<compile_context>
chip_gen: v7x
topology: tpu7x:2x2x1
jax: 0.10.0
libtpu: 0.0.40
codegen_flags: <defaults>
</compile_context>

<pallas_src>
import functools

import jax
import jax.numpy as jnp
from jax.experimental import pallas as pl
from jax.experimental.pallas import tpu as pltpu

MXU_DTYPE = jnp.bfloat16   # MXU operand / HBM weight dtype (f32 accumulation)
LN_EPS = 1e-5


# ----------------------------- in-kernel helpers -----------------------------

def _ln(x, g, b, eps=LN_EPS):
    """LayerNorm over the last dim, f32 math."""
    mean = jnp.mean(x, axis=-1, keepdims=True)
    var = jnp.mean(jnp.square(x - mean), axis=-1, keepdims=True)
    return (x - mean) * jax.lax.rsqrt(var + eps) * g + b


# ----------------------------- Pallas kernels -----------------------------

def _patch_embed_kernel(x_ref, w_ref, b_ref, pos_ref, o_ref):
    # Single block: (B*N, P) @ (P, E) + bias + positional embedding, fused.
    x = x_ref[...]                                        # (B, N, P) f32
    B, N, P = x.shape
    y = jnp.dot(x.reshape(B * N, P).astype(MXU_DTYPE), w_ref[...],
                preferred_element_type=jnp.float32)       # (B*N, E) f32
    E = y.shape[-1]
    o_ref[...] = y.reshape(B, N, E) + b_ref[...] + pos_ref[...]


def patch_embed_pallas(skel, w, b, pos):
    B, N, P = skel.shape
    E = w.shape[1]
    return pl.pallas_call(
        _patch_embed_kernel,
        out_shape=jax.ShapeDtypeStruct((B, N, E), jnp.float32),
        grid=(1,),
        in_specs=[
            pl.BlockSpec((B, N, P), lambda i: (0, 0, 0)),
            pl.BlockSpec((P, E), lambda i: (0, 0)),
            pl.BlockSpec((1, E), lambda i: (0, 0)),
            pl.BlockSpec((1, N, E), lambda i: (0, 0, 0)),
        ],
        out_specs=pl.BlockSpec((B, N, E), lambda i: (0, 0, 0)),
    )(skel, w, b.reshape(1, E), pos)


def _transformer_kernel(x_ref,
                        ln1g_ref, ln1b_ref, wq_ref, wk_ref, wv_ref, wo_ref, bout_ref,
                        ln2g_ref, ln2b_ref, wff1_ref, bff1_ref, wff2_ref, bff2_ref,
                        lnfg_ref, lnfb_ref,
                        o_ref, *, batch, seq, heads, dim_head):
    """One full pre-norm transformer layer per grid step.

    Activation (B*T, D) lives resident in o_ref across the depth axis; every
    per-layer weight stack is streamed exactly once (block index = depth only).
    """
    d = pl.program_id(0)
    nlayers = pl.num_programs(0)

    @pl.when(d == 0)
    def _():
        o_ref[...] = x_ref[...]

    x = o_ref[...].astype(jnp.float32)                    # (B*T, D), resident
    scale = dim_head ** -0.5

    # ---- attention block: LN1 + per-head QKV + softmax + PV + out-proj + residual
    h = _ln(x, ln1g_ref[0], ln1b_ref[0]).astype(MXU_DTYPE)
    attn = jnp.zeros_like(x)
    for hd in range(heads):                               # static unroll; heads is small
        # per-head projections: static leading-axis weight index (no lane slicing)
        q = jnp.dot(h, wq_ref[0, hd], preferred_element_type=jnp.float32)
        k = jnp.dot(h, wk_ref[0, hd], preferred_element_type=jnp.float32)
        v = jnp.dot(h, wv_ref[0, hd], preferred_element_type=jnp.float32)
        # aligned sublane split (seq is a multiple of 8 in this script)
        q = q.reshape(batch, seq, dim_head).astype(MXU_DTYPE)
        k = k.reshape(batch, seq, dim_head).astype(MXU_DTYPE)
        v = v.reshape(batch, seq, dim_head).astype(MXU_DTYPE)
        s = jnp.einsum("bqd,bkd->bqk", q, k,
                       preferred_element_type=jnp.float32) * scale
        s = s - jnp.max(s, axis=-1, keepdims=True)
        p = jnp.exp(s)
        p = p * pl.reciprocal(jnp.sum(p, axis=-1, keepdims=True), approx=True)
        o_h = jnp.einsum("bqk,bkd->bqd", p.astype(MXU_DTYPE), v,
                         preferred_element_type=jnp.float32)
        o_flat = o_h.reshape(batch * seq, dim_head).astype(MXU_DTYPE)
        # fold the per-head slice of the output projection (no lane-dim concat)
        attn = attn + jnp.dot(o_flat, wo_ref[0, hd],
                              preferred_element_type=jnp.float32)
    x = x + attn + bout_ref[0]

    # ---- feed-forward block: LN2 + FF1 + GELU + FF2 + residual, fully fused
    h = _ln(x, ln2g_ref[0], ln2b_ref[0]).astype(MXU_DTYPE)
    h1 = jnp.dot(h, wff1_ref[0], preferred_element_type=jnp.float32) + bff1_ref[0]
    # TODO(synk): PyTorch nn.GELU defaults to exact erf; tanh approximation used here.
    g = jax.nn.gelu(h1, approximate=True).astype(MXU_DTYPE)
    x = x + jnp.dot(g, wff2_ref[0], preferred_element_type=jnp.float32) + bff2_ref[0]

    # Final LayerNorm applied in registers on the last step; exactly one store.
    @pl.when(d < nlayers - 1)
    def _():
        o_ref[...] = x.astype(o_ref.dtype)

    @pl.when(d == nlayers - 1)
    def _():
        o_ref[...] = _ln(x, lnfg_ref[...], lnfb_ref[...]).astype(o_ref.dtype)


def transformer_pallas(x2d, params, batch, seq, heads, dim_head):
    """Whole pre-norm ViT-style transformer (all layers + final LN) in ONE pallas_call.

    x2d: (batch*seq, dim) activations, batch folded into the block.
    """
    BT, D = x2d.shape
    assert BT == batch * seq
    depth = params["ln1_g"].shape[0]
    mlp = params["w_ff1"].shape[-1]
    dh = dim_head

    xmap = lambda d_: (0, 0)            # activation: constant block (resident)
    wmap3 = lambda d_: (d_, 0, 0)       # stacked per-layer params (3-D)
    wmap4 = lambda d_: (d_, 0, 0, 0)    # stacked per-layer per-head weights (4-D)
    cmap = lambda d_: (0, 0)            # final-LN params: constant

    kernel = functools.partial(_transformer_kernel, batch=batch, seq=seq,
                               heads=heads, dim_head=dim_head)
    return pl.pallas_call(
        kernel,
        out_shape=jax.ShapeDtypeStruct((BT, D), jnp.float32),
        grid=(depth,),
        in_specs=[
            pl.BlockSpec((BT, D), xmap),               # x
            pl.BlockSpec((1, 1, D), wmap3),            # ln1_g
            pl.BlockSpec((1, 1, D), wmap3),            # ln1_b
            pl.BlockSpec((1, heads, D, dh), wmap4),    # w_q (bf16, per head)
            pl.BlockSpec((1, heads, D, dh), wmap4),    # w_k
            pl.BlockSpec((1, heads, D, dh), wmap4),    # w_v
            pl.BlockSpec((1, heads, dh, D), wmap4),    # w_o
            pl.BlockSpec((1, 1, D), wmap3),            # b_out
            pl.BlockSpec((1, 1, D), wmap3),            # ln2_g
            pl.BlockSpec((1, 1, D), wmap3),            # ln2_b
            pl.BlockSpec((1, D, mlp), wmap3),          # w_ff1 (bf16)
            pl.BlockSpec((1, 1, mlp), wmap3),          # b_ff1
            pl.BlockSpec((1, mlp, D), wmap3),          # w_ff2 (bf16)
            pl.BlockSpec((1, 1, D), wmap3),            # b_ff2
            pl.BlockSpec((1, D), cmap),                # lnf_g
            pl.BlockSpec((1, D), cmap),                # lnf_b
        ],
        out_specs=pl.BlockSpec((BT, D), xmap),
        compiler_params=pltpu.CompilerParams(
            dimension_semantics=("arbitrary",),
            vmem_limit_bytes=64 * 1024 * 1024),
    )(x2d,
      params["ln1_g"], params["ln1_b"],
      params["w_q"], params["w_k"], params["w_v"], params["w_o"], params["b_out"],
      params["ln2_g"], params["ln2_b"],
      params["w_ff1"], params["b_ff1"], params["w_ff2"], params["b_ff2"],
      params["lnf_g"], params["lnf_b"])


def _dec_tokens_kernel(enc_ref, w_ref, b_ref, mask_tok_ref, pos_m_ref, pos_u_ref,
                       o_ref, *, batch, seq_unmasked):
    # enc_to_dec projection on flattened rows, then assemble the full (B, N, Dd)
    # token block in registers and do ONE full store (no partial/masked stores).
    proj = jnp.dot(enc_ref[...].astype(MXU_DTYPE), w_ref[...],
                   preferred_element_type=jnp.float32) + b_ref[...]
    Dd = proj.shape[-1]
    unmasked = proj.reshape(batch, seq_unmasked, Dd) + pos_u_ref[...]
    masked = mask_tok_ref[...] + pos_m_ref[...]           # broadcast mask token
    o_ref[...] = jnp.concatenate([masked, unmasked], axis=1)


def build_decoder_tokens_pallas(encoded2d, w, b, mask_token, pos_m, pos_u, batch):
    """Fused enc_to_dec linear + positional adds + mask-token/unmasked concat."""
    BTu, E = encoded2d.shape
    Tu = BTu // batch
    B, Tm, Dd = pos_m.shape
    N = Tm + Tu
    kernel = functools.partial(_dec_tokens_kernel, batch=batch, seq_unmasked=Tu)
    return pl.pallas_call(
        kernel,
        out_shape=jax.ShapeDtypeStruct((B, N, Dd), jnp.float32),
        grid=(1,),
        in_specs=[
            pl.BlockSpec((BTu, E), lambda i: (0, 0)),
            pl.BlockSpec((E, Dd), lambda i: (0, 0)),
            pl.BlockSpec((1, Dd), lambda i: (0, 0)),
            pl.BlockSpec((1, Dd), lambda i: (0, 0)),
            pl.BlockSpec((B, Tm, Dd), lambda i: (0, 0, 0)),
            pl.BlockSpec((B, Tu, Dd), lambda i: (0, 0, 0)),
        ],
        out_specs=pl.BlockSpec((B, N, Dd), lambda i: (0, 0, 0)),
    )(encoded2d, w, b.reshape(1, Dd), mask_token.reshape(1, Dd), pos_m, pos_u)


def _head_kernel(x_ref, w_ref, b_ref, t_ref, pred_ref, loss_ref):
    pred = jnp.dot(x_ref[...].astype(MXU_DTYPE), w_ref[...],
                   preferred_element_type=jnp.float32) + b_ref[...]
    pred_ref[...] = pred
    diff = pred - t_ref[...]
    m, p = diff.shape
    loss_ref[0, 0] = jnp.sum(diff * diff) / jnp.float32(m * p)


def pred_and_loss_pallas(x2d, w, b, target2d):
    """Fused to_prediction linear + MSE(mean) loss (scalar loss goes out via SMEM)."""
    M, Dd = x2d.shape
    P = w.shape[1]
    pred, loss = pl.pallas_call(
        _head_kernel,
        out_shape=(jax.ShapeDtypeStruct((M, P), jnp.float32),
                   jax.ShapeDtypeStruct((1, 1), jnp.float32)),
        grid=(1,),
        in_specs=[
            pl.BlockSpec((M, Dd), lambda i: (0, 0)),
            pl.BlockSpec((Dd, P), lambda i: (0, 0)),
            pl.BlockSpec((1, P), lambda i: (0, 0)),
            pl.BlockSpec((M, P), lambda i: (0, 0)),
        ],
        out_specs=(pl.BlockSpec((M, P), lambda i: (0, 0)),
                   pl.BlockSpec(memory_space=pltpu.MemorySpace.SMEM)),
    )(x2d, w, b.reshape(1, P), target2d)
    return pred, loss[0, 0]


# ----------------------------- parameters -----------------------------

def _dense(key, shape, scale=0.02):
    return scale * jax.random.normal(key, shape, dtype=jnp.float32)


def init_transformer(key, dim, depth, heads, dim_head, mlp_dim):
    """Per-layer weights stacked on a leading depth axis; q/k/v/out pre-split per
    head at init so the kernel never lane-slices at dim_head granularity.
    Matmul weights are stored in bf16 (HBM/DMA/VMEM savings); LN/bias stay f32."""
    keys = jax.random.split(key, 6 * depth)
    bf = lambda k_, shape: _dense(k_, shape).astype(MXU_DTYPE)
    return dict(
        ln1_g=jnp.ones((depth, 1, dim), jnp.float32),
        ln1_b=jnp.zeros((depth, 1, dim), jnp.float32),
        # vit-pytorch to_qkv has no bias -> no b_qkv at all.
        w_q=jnp.stack([bf(keys[6 * i + 0], (heads, dim, dim_head)) for i in range(depth)]),
        w_k=jnp.stack([bf(keys[6 * i + 1], (heads, dim, dim_head)) for i in range(depth)]),
        w_v=jnp.stack([bf(keys[6 * i + 2], (heads, dim, dim_head)) for i in range(depth)]),
        w_o=jnp.stack([bf(keys[6 * i + 3], (heads, dim_head, dim)) for i in range(depth)]),
        b_out=jnp.zeros((depth, 1, dim), jnp.float32),
        ln2_g=jnp.ones((depth, 1, dim), jnp.float32),
        ln2_b=jnp.zeros((depth, 1, dim), jnp.float32),
        w_ff1=jnp.stack([bf(keys[6 * i + 4], (dim, mlp_dim)) for i in range(depth)]),
        b_ff1=jnp.zeros((depth, 1, mlp_dim), jnp.float32),
        w_ff2=jnp.stack([bf(keys[6 * i + 5], (mlp_dim, dim)) for i in range(depth)]),
        b_ff2=jnp.zeros((depth, 1, dim), jnp.float32),
        lnf_g=jnp.ones((1, dim), jnp.float32),
        lnf_b=jnp.zeros((1, dim), jnp.float32),
    )


def init_dmae_params(key, *, num_patches, patch_dim, encoder_dim, decoder_dim, cfg):
    keys = jax.random.split(key, 10)
    encoder = dict(
        pos_embedding=_dense(keys[0], (1, num_patches, encoder_dim), scale=1.0),
        patch_w=_dense(keys[1], (patch_dim, encoder_dim)).astype(MXU_DTYPE),
        patch_b=jnp.zeros((encoder_dim,), jnp.float32),
        transformer=init_transformer(keys[2], encoder_dim, cfg["enc_depth"],
                                     cfg["enc_heads"], cfg["enc_dim_head"],
                                     cfg["enc_mlp"]),
    )
    return dict(
        encoder=encoder,
        enc_to_dec_w=_dense(keys[3], (encoder_dim, decoder_dim)).astype(MXU_DTYPE),
        enc_to_dec_b=jnp.zeros((decoder_dim,), jnp.float32),
        mask_token=_dense(keys[4], (decoder_dim,), scale=1.0),
        decoder=init_transformer(keys[5], decoder_dim, cfg["dec_depth"],
                                 cfg["dec_heads"], cfg["dec_dim_head"],
                                 cfg["dec_mlp"]),
        decoder_pos_emb=_dense(keys[6], (210, decoder_dim), scale=1.0),  # unused in fwd
        decoder_pos_emb_ft=_dense(keys[7], (num_patches, decoder_dim), scale=1.0),
        to_pred_w=_dense(keys[8], (decoder_dim, patch_dim)).astype(MXU_DTYPE),
        to_pred_b=jnp.zeros((patch_dim,), jnp.float32),
    )


# ----------------------------- forward pass -----------------------------

def dmae_v5_ft_forward(params, cfg, skel_data, mask_key,
                       masking_ratio=0.75, force_rand_idx=None):
    B, N, P = skel_data.shape
    enc = params["encoder"]

    # patch embedding (+ absorbed permute) fused with positional-embedding add
    tokens = patch_embed_pallas(skel_data, enc["patch_w"], enc["patch_b"],
                                enc["pos_embedding"])                     # (B, N, E)
    E = tokens.shape[-1]

    # random masking
    if force_rand_idx is not None:
        masked_indices, unmasked_indices = force_rand_idx
        num_masked = masked_indices.shape[1]
    else:
        num_masked = int(masking_ratio * N)
        rand = jax.random.uniform(mask_key, (B, N))
        rand_indices = jnp.argsort(rand, axis=-1)
        masked_indices = rand_indices[:, :num_masked]
        unmasked_indices = rand_indices[:, num_masked:]
    num_unmasked = N - num_masked

    # TODO(synk): gathers stay in XLA glue; could fold into the kernels via
    # PrefetchScalarGridSpec + pl.Element row maps (gather during DMA) at scale.
    unmasked_tokens = jnp.take_along_axis(tokens, unmasked_indices[..., None], axis=1)
    skel_masked = jnp.take_along_axis(skel_data, masked_indices[..., None], axis=1)

    # encoder transformer on unmasked tokens (single fused pallas_call, batch folded)
    encoded2d = transformer_pallas(unmasked_tokens.reshape(B * num_unmasked, E),
                                   enc["transformer"], B, num_unmasked,
                                   cfg["enc_heads"], cfg["enc_dim_head"])  # (B*Tu, E)

    # enc_to_dec projection + decoder positional embeddings + mask-token concat (fused)
    pos_u = jnp.take(params["decoder_pos_emb_ft"], unmasked_indices, axis=0)
    pos_m = jnp.take(params["decoder_pos_emb_ft"], masked_indices, axis=0)
    decoder_tokens = build_decoder_tokens_pallas(
        encoded2d, params["enc_to_dec_w"], params["enc_to_dec_b"],
        params["mask_token"], pos_m, pos_u, batch=B)                      # (B, N, Ddec)
    Dd = decoder_tokens.shape[-1]

    # decoder transformer (single fused pallas_call, batch folded)
    decoded2d = transformer_pallas(decoder_tokens.reshape(B * N, Dd),
                                   params["decoder"], B, N,
                                   cfg["dec_heads"], cfg["dec_dim_head"])  # (B*N, Ddec)
    decoded = decoded2d.reshape(B, N, Dd)

    # prediction head + MSE loss (fused, loss via SMEM scalar)
    mask_out = decoded[:, :num_masked]
    pred2d, recon_loss = pred_and_loss_pallas(
        mask_out.reshape(B * num_masked, Dd),
        params["to_pred_w"], params["to_pred_b"],
        skel_masked.reshape(B * num_masked, P))
    skel_masked_pred = pred2d.reshape(B, num_masked, P)

    return skel_masked_pred, skel_masked, masked_indices, recon_loss


# ----------------------------- main -----------------------------

if __name__ == "__main__":
    # N chosen so both the unmasked (8) and full (32) token counts are multiples
    # of 8: all in-kernel batch-fold reshapes stay sublane-tile aligned.
    B, N, P = 2, 32, 24          # batch, num_patches, patch_dim
    E, Ddec = 48, 32             # encoder_dim != decoder_dim -> enc_to_dec is a Linear
    masking_ratio = 0.75         # -> 24 masked, 8 unmasked

    cfg = dict(
        enc_depth=2, enc_heads=4, enc_dim_head=8, enc_mlp=2 * E,
        dec_depth=1, dec_heads=4, dec_dim_head=16, dec_mlp=4 * Ddec,
    )

    root = jax.random.PRNGKey(0)
    k_param, k_data, k_mask = jax.random.split(root, 3)

    params = init_dmae_params(k_param, num_patches=N, patch_dim=P,
                              encoder_dim=E, decoder_dim=Ddec, cfg=cfg)
    skel_data = jax.random.normal(k_data, (B, N, P), dtype=jnp.float32)

    @jax.jit
    def run(params, skel_data, mask_key):
        return dmae_v5_ft_forward(params, cfg, skel_data, mask_key,
                                  masking_ratio=masking_ratio)

    pred, skel_masked, masked_idx, loss = run(params, skel_data, k_mask)
    jax.block_until_ready((pred, skel_masked, masked_idx, loss))

    num_masked = int(masking_ratio * N)
    assert pred.shape == (B, num_masked, P)
    assert skel_masked.shape == (B, num_masked, P)
    assert masked_idx.shape == (B, num_masked)
    assert loss.shape == ()
    print("KERNEL_OK")
</pallas_src>

<mosaic_0001>
module attributes {stable_mosaic.version = 11 : i64} {
  func.func @_patch_embed_kernel(%arg0: i32, %arg1: memref<2x32x24xf32, #tpu.memory_space<vmem>>, %arg2: memref<24x48xbf16, #tpu.memory_space<vmem>>, %arg3: memref<1x48xf32, #tpu.memory_space<vmem>>, %arg4: memref<1x32x48xf32, #tpu.memory_space<vmem>>, %arg5: memref<2x32x48xf32, #tpu.memory_space<vmem>>) attributes {dimension_semantics = [#tpu.dimension_semantics<arbitrary>], iteration_bounds = array<i64: 1>, scalar_prefetch = 0 : i64, scratch_operands = 0 : i64, tpu.core_type = #tpu.core_type<tc>, window_params = [{pipeline_mode = #tpu.pipeline_mode<synchronous>, transform_indices = @transform_0, window_bounds = array<i64: 2, 32, 24>}, {pipeline_mode = #tpu.pipeline_mode<synchronous>, transform_indices = @transform_1, window_bounds = array<i64: 24, 48>}, {pipeline_mode = #tpu.pipeline_mode<synchronous>, transform_indices = @transform_2, window_bounds = array<i64: 1, 48>}, {pipeline_mode = #tpu.pipeline_mode<synchronous>, transform_indices = @transform_3, window_bounds = array<i64: 1, 32, 48>}, {pipeline_mode = #tpu.pipeline_mode<synchronous>, transform_indices = @transform_4, window_bounds = array<i64: 2, 32, 48>}]} {
    %c0 = arith.constant 0 : index
    %c0_0 = arith.constant 0 : index
    %c0_1 = arith.constant 0 : index
    %0 = vector.load %arg1[%c0, %c0_0, %c0_1] : memref<2x32x24xf32, #tpu.memory_space<vmem>>, vector<2x32x24xf32>
    %1 = vector.shape_cast %0 : vector<2x32x24xf32> to vector<64x24xf32>
    %2 = arith.truncf %1 : vector<64x24xf32> to vector<64x24xbf16>
    %c0_2 = arith.constant 0 : index
    %c0_3 = arith.constant 0 : index
    %3 = vector.load %arg2[%c0_2, %c0_3] : memref<24x48xbf16, #tpu.memory_space<vmem>>, vector<24x48xbf16>
    %cst = arith.constant dense<0.000000e+00> : vector<64x48xf32>
    %4 = tpu.matmul %2, %3, %cst {dimension_numbers = #tpu.dot_dimension_numbers<[1], [0], [0], [1], [0, 0, 1, 1], [], []>} : vector<64x24xbf16>, vector<24x48xbf16>, vector<64x48xf32> -> vector<64x48xf32>
    %5 = vector.shape_cast %4 : vector<64x48xf32> to vector<2x32x48xf32>
    %c0_4 = arith.constant 0 : index
    %c0_5 = arith.constant 0 : index
    %6 = vector.load %arg3[%c0_4, %c0_5] : memref<1x48xf32, #tpu.memory_space<vmem>>, vector<1x48xf32>
    %7 = vector.shape_cast %6 : vector<1x48xf32> to vector<1x1x48xf32>
    %8 = vector.broadcast %7 : vector<1x1x48xf32> to vector<2x32x48xf32>
    %9 = arith.addf %5, %8 : vector<2x32x48xf32>
    %c0_6 = arith.constant 0 : index
    %c0_7 = arith.constant 0 : index
    %c0_8 = arith.constant 0 : index
    %10 = vector.load %arg4[%c0_6, %c0_7, %c0_8] : memref<1x32x48xf32, #tpu.memory_space<vmem>>, vector<1x32x48xf32>
    %11 = vector.broadcast %10 : vector<1x32x48xf32> to vector<2x32x48xf32>
    %12 = arith.addf %9, %11 : vector<2x32x48xf32>
    %c0_9 = arith.constant 0 : index
    %c0_10 = arith.constant 0 : index
    %c0_11 = arith.constant 0 : index
    %13 = vector.load %arg5[%c0_9, %c0_10, %c0_11] : memref<2x32x48xf32, #tpu.memory_space<vmem>>, vector<2x32x48xf32>
    tpu.vector_store %arg5[%c0_9, %c0_10, %c0_11], %12 {strides = array<i32>} : memref<2x32x48xf32, #tpu.memory_space<vmem>>, vector<2x32x48xf32>,
    return
  }
  func.func @transform_0(%arg0: i32) -> (i32, i32, i32) {
    %c0_i32 = arith.constant 0 : i32
    %c0_i32_0 = arith.constant 0 : i32
    %c0_i32_1 = arith.constant 0 : i32
    %c0_i32_2 = arith.constant 0 : i32
    return %c0_i32, %c0_i32_0, %c0_i32_1 : i32, i32, i32
  }
  func.func @transform_1(%arg0: i32) -> (i32, i32) {
    %c0_i32 = arith.constant 0 : i32
    %c0_i32_0 = arith.constant 0 : i32
    %c0_i32_1 = arith.constant 0 : i32
    return %c0_i32, %c0_i32_0 : i32, i32
  }
  func.func @transform_2(%arg0: i32) -> (i32, i32) {
    %c0_i32 = arith.constant 0 : i32
    %c0_i32_0 = arith.constant 0 : i32
    %c0_i32_1 = arith.constant 0 : i32
    return %c0_i32, %c0_i32_0 : i32, i32
  }
  func.func @transform_3(%arg0: i32) -> (i32, i32, i32) {
    %c0_i32 = arith.constant 0 : i32
    %c0_i32_0 = arith.constant 0 : i32
    %c0_i32_1 = arith.constant 0 : i32
    %c0_i32_2 = arith.constant 0 : i32
    return %c0_i32, %c0_i32_0, %c0_i32_1 : i32, i32, i32
  }
  func.func @transform_4(%arg0: i32) -> (i32, i32, i32) {
    %c0_i32 = arith.constant 0 : i32
    %c0_i32_0 = arith.constant 0 : i32
    %c0_i32_1 = arith.constant 0 : i32
    %c0_i32_2 = arith.constant 0 : i32
    return %c0_i32, %c0_i32_0, %c0_i32_1 : i32, i32, i32
  }
}

module attributes {stable_mosaic.version = 11 : i64} {
  func.func @_transformer_kernel(%arg0: i32, %arg1: memref<16x48xf32, #tpu.memory_space<vmem>>, %arg2: memref<1x1x48xf32, #tpu.memory_space<vmem>>, %arg3: memref<1x1x48xf32, #tpu.memory_space<vmem>>, %arg4: memref<1x4x48x8xbf16, #tpu.memory_space<vmem>>, %arg5: memref<1x4x48x8xbf16, #tpu.memory_space<vmem>>, %arg6: memref<1x4x48x8xbf16, #tpu.memory_space<vmem>>, %arg7: memref<1x4x8x48xbf16, #tpu.memory_space<vmem>>, %arg8: memref<1x1x48xf32, #tpu.memory_space<vmem>>, %arg9: memref<1x1x48xf32, #tpu.memory_space<vmem>>, %arg10: memref<1x1x48xf32, #tpu.memory_space<vmem>>, %arg11: memref<1x48x96xbf16, #tpu.memory_space<vmem>>, %arg12: memref<1x1x96xf32, #tpu.memory_space<vmem>>, %arg13: memref<1x96x48xbf16, #tpu.memory_space<vmem>>, %arg14: memref<1x1x48xf32, #tpu.memory_space<vmem>>, %arg15: memref<1x48xf32, #tpu.memory_space<vmem>>, %arg16: memref<1x48xf32, #tpu.memory_space<vmem>>, %arg17: memref<16x48xf32, #tpu.memory_space<vmem>>) attributes {dimension_semantics = [#tpu.dimension_semantics<arbitrary>], iteration_bounds = array<i64: 2>, scalar_prefetch = 0 : i64, scratch_operands = 0 : i64, tpu.core_type = #tpu.core_type<tc>, window_params = [{pipeline_mode = #tpu.pipeline_mode<synchronous>, transform_indices = @transform_0, window_bounds = array<i64: 16, 48>}, {transform_indices = @transform_1, window_bounds = array<i64: 1, 1, 48>}, {transform_indices = @transform_2, window_bounds = array<i64: 1, 1, 48>}, {transform_indices = @transform_3, window_bounds = array<i64: 1, 4, 48, 8>}, {transform_indices = @transform_4, window_bounds = array<i64: 1, 4, 48, 8>}, {transform_indices = @transform_5, window_bounds = array<i64: 1, 4, 48, 8>}, {transform_indices = @transform_6, window_bounds = array<i64: 1, 4, 8, 48>}, {transform_indices = @transform_7, window_bounds = array<i64: 1, 1, 48>}, {transform_indices = @transform_8, window_bounds = array<i64: 1, 1, 48>}, {transform_indices = @transform_9, window_bounds = array<i64: 1, 1, 48>}, {transform_indices = @transform_10, window_bounds = array<i64: 1, 48, 96>}, {transform_indices = @transform_11, window_bounds = array<i64: 1, 1, 96>}, {transform_indices = @transform_12, window_bounds = array<i64: 1, 96, 48>}, {transform_indices = @transform_13, window_bounds = array<i64: 1, 1, 48>}, {pipeline_mode = #tpu.pipeline_mode<synchronous>, transform_indices = @transform_14, window_bounds = array<i64: 1, 48>}, {pipeline_mode = #tpu.pipeline_mode<synchronous>, transform_indices = @transform_15, window_bounds = array<i64: 1, 48>}, {pipeline_mode = #tpu.pipeline_mode<synchronous>, transform_indices = @transform_16, window_bounds = array<i64: 16, 48>}]} {
    %c0_i32 = arith.constant 0 : i32
    %0 = arith.cmpi eq, %arg0, %c0_i32 : i32
    %1 = arith.extui %0 : i1 to i32
    %c0_i32_0 = arith.constant 0 : i32
    %2 = arith.cmpi ne, %1, %c0_i32_0 : i32
    scf.if %2 {
      %c0_145 = arith.constant 0 : index
      %c0_146 = arith.constant 0 : index
      %243 = vector.load %arg1[%c0_145, %c0_146] : memref<16x48xf32, #tpu.memory_space<vmem>>, vector<16x48xf32>
      %c0_147 = arith.constant 0 : index
      %c0_148 = arith.constant 0 : index
      %244 = vector.load %arg17[%c0_147, %c0_148] : memref<16x48xf32, #tpu.memory_space<vmem>>, vector<16x48xf32>
      tpu.vector_store %arg17[%c0_147, %c0_148], %243 {strides = array<i32>} : memref<16x48xf32, #tpu.memory_space<vmem>>, vector<16x48xf32>,
    } else {
    }
    %c0 = arith.constant 0 : index
    %c0_1 = arith.constant 0 : index
    %3 = vector.load %arg17[%c0, %c0_1] : memref<16x48xf32, #tpu.memory_space<vmem>>, vector<16x48xf32>
    %c0_2 = arith.constant 0 : index
    %c0_3 = arith.constant 0 : index
    %c0_4 = arith.constant 0 : index
    %4 = vector.load %arg2[%c0_2, %c0_3, %c0_4] : memref<1x1x48xf32, #tpu.memory_space<vmem>>, vector<1x1x48xf32>
    %5 = vector.shape_cast %4 : vector<1x1x48xf32> to vector<1x48xf32>
    %c0_5 = arith.constant 0 : index
    %c0_6 = arith.constant 0 : index
    %c0_7 = arith.constant 0 : index
    %6 = vector.load %arg3[%c0_5, %c0_6, %c0_7] : memref<1x1x48xf32, #tpu.memory_space<vmem>>, vector<1x1x48xf32>
    %7 = vector.shape_cast %6 : vector<1x1x48xf32> to vector<1x48xf32>
    %cst = arith.constant dense<0.000000e+00> : vector<16xf32>
    %8 = vector.multi_reduction <add>, %3, %cst [1] : vector<16x48xf32> to vector<16xf32>
    %9 = vector.shape_cast %8 : vector<16xf32> to vector<16x1xf32>
    %cst_8 = arith.constant 4.800000e+01 : f32
    %10 = vector.broadcast %cst_8 : f32 to vector<16x1xf32>
    %11 = arith.divf %9, %10 : vector<16x1xf32>
    %12 = vector.broadcast %11 : vector<16x1xf32> to vector<16x48xf32>
    %13 = arith.subf %3, %12 : vector<16x48xf32>
    %14 = arith.mulf %13, %13 : vector<16x48xf32>
    %cst_9 = arith.constant dense<0.000000e+00> : vector<16xf32>
    %15 = vector.multi_reduction <add>, %14, %cst_9 [1] : vector<16x48xf32> to vector<16xf32>
    %16 = vector.shape_cast %15 : vector<16xf32> to vector<16x1xf32>
    %cst_10 = arith.constant 4.800000e+01 : f32
    %17 = vector.broadcast %cst_10 : f32 to vector<16x1xf32>
    %18 = arith.divf %16, %17 : vector<16x1xf32>
    %19 = vector.broadcast %11 : vector<16x1xf32> to vector<16x48xf32>
    %20 = arith.subf %3, %19 : vector<16x48xf32>
    %cst_11 = arith.constant 9.99999974E-6 : f32
    %21 = vector.broadcast %cst_11 : f32 to vector<16x1xf32>
    %22 = arith.addf %18, %21 : vector<16x1xf32>
    %23 = math.rsqrt %22 : vector<16x1xf32>
    %24 = vector.broadcast %23 : vector<16x1xf32> to vector<16x48xf32>
    %25 = arith.mulf %20, %24 : vector<16x48xf32>
    %26 = vector.broadcast %5 : vector<1x48xf32> to vector<16x48xf32>
    %27 = arith.mulf %25, %26 : vector<16x48xf32>
    %28 = vector.broadcast %7 : vector<1x48xf32> to vector<16x48xf32>
    %29 = arith.addf %27, %28 : vector<16x48xf32>
    %30 = arith.truncf %29 : vector<16x48xf32> to vector<16x48xbf16>
    %cst_12 = arith.constant 0.000000e+00 : f32
    %31 = vector.broadcast %cst_12 : f32 to vector<16x48xf32>
    %c0_13 = arith.constant 0 : index
    %c0_14 = arith.constant 0 : index
    %c0_15 = arith.constant 0 : index
    %c0_16 = arith.constant 0 : index
    %32 = vector.load %arg4[%c0_13, %c0_14, %c0_15, %c0_16] : memref<1x4x48x8xbf16, #tpu.memory_space<vmem>>, vector<1x1x48x8xbf16>
    %33 = vector.shape_cast %32 : vector<1x1x48x8xbf16> to vector<48x8xbf16>
    %cst_17 = arith.constant dense<0.000000e+00> : vector<16x8xf32>
    %34 = tpu.matmul %30, %33, %cst_17 {dimension_numbers = #tpu.dot_dimension_numbers<[1], [0], [0], [1], [0, 0, 1, 1], [], []>} : vector<16x48xbf16>, vector<48x8xbf16>, vector<16x8xf32> -> vector<16x8xf32>
    %c0_18 = arith.constant 0 : index
    %c0_19 = arith.constant 0 : index
    %c0_20 = arith.constant 0 : index
    %c0_21 = arith.constant 0 : index
    %35 = vector.load %arg5[%c0_18, %c0_19, %c0_20, %c0_21] : memref<1x4x48x8xbf16, #tpu.memory_space<vmem>>, vector<1x1x48x8xbf16>
    %36 = vector.shape_cast %35 : vector<1x1x48x8xbf16> to vector<48x8xbf16>
    %cst_22 = arith.constant dense<0.000000e+00> : vector<16x8xf32>
    %37 = tpu.matmul %30, %36, %cst_22 {dimension_numbers = #tpu.dot_dimension_numbers<[1], [0], [0], [1], [0, 0, 1, 1], [], []>} : vector<16x48xbf16>, vector<48x8xbf16>, vector<16x8xf32> -> vector<16x8xf32>
    %c0_23 = arith.constant 0 : index
    %c0_24 = arith.constant 0 : index
    %c0_25 = arith.constant 0 : index
    %c0_26 = arith.constant 0 : index
    %38 = vector.load %arg6[%c0_23, %c0_24, %c0_25, %c0_26] : memref<1x4x48x8xbf16, #tpu.memory_space<vmem>>, vector<1x1x48x8xbf16>
    %39 = vector.shape_cast %38 : vector<1x1x48x8xbf16> to vector<48x8xbf16>
    %cst_27 = arith.constant dense<0.000000e+00> : vector<16x8xf32>
    %40 = tpu.matmul %30, %39, %cst_27 {dimension_numbers = #tpu.dot_dimension_numbers<[1], [0], [0], [1], [0, 0, 1, 1], [], []>} : vector<16x48xbf16>, vector<48x8xbf16>, vector<16x8xf32> -> vector<16x8xf32>
    %41 = vector.shape_cast %34 : vector<16x8xf32> to vector<2x8x8xf32>
    %42 = arith.truncf %41 : vector<2x8x8xf32> to vector<2x8x8xbf16>
    %43 = vector.shape_cast %37 : vector<16x8xf32> to vector<2x8x8xf32>
    %44 = arith.truncf %43 : vector<2x8x8xf32> to vector<2x8x8xbf16>
    %45 = vector.shape_cast %40 : vector<16x8xf32> to vector<2x8x8xf32>
    %46 = arith.truncf %45 : vector<2x8x8xf32> to vector<2x8x8xbf16>
    "tpu.trace_start"() <{level = 10 : i32, message = "bqd,bkd->bqk"}> : () -> ()
    %cst_28 = arith.constant dense<0.000000e+00> : vector<2x8x8xf32>
    %47 = tpu.matmul %42, %44, %cst_28 {dimension_numbers = #tpu.dot_dimension_numbers<[2], [2], [1], [1], [0, 0, 0, 1, 1, 1], [0], [0]>} : vector<2x8x8xbf16>, vector<2x8x8xbf16>, vector<2x8x8xf32> -> vector<2x8x8xf32>
    "tpu.trace_stop"() : () -> ()
    %cst_29 = arith.constant 0.353553385 : f32
    %48 = vector.broadcast %cst_29 : f32 to vector<2x8x8xf32>
    %49 = arith.mulf %47, %48 : vector<2x8x8xf32>
    %cst_30 = arith.constant dense<0xFF800000> : vector<2x8xf32>
    %50 = vector.multi_reduction <maximumf>, %49, %cst_30 [2] : vector<2x8x8xf32> to vector<2x8xf32>
    %51 = vector.shape_cast %50 : vector<2x8xf32> to vector<2x8x1xf32>
    %52 = vector.broadcast %51 : vector<2x8x1xf32> to vector<2x8x8xf32>
    %53 = arith.subf %49, %52 : vector<2x8x8xf32>
    %54 = math.exp %53 : vector<2x8x8xf32>
    %cst_31 = arith.constant dense<0.000000e+00> : vector<2x8xf32>
    %55 = vector.multi_reduction <add>, %54, %cst_31 [2] : vector<2x8x8xf32> to vector<2x8xf32>
    %56 = vector.shape_cast %55 : vector<2x8xf32> to vector<2x8x1xf32>
    %57 = tpu.reciprocal %56 {approx = true} : vector<2x8x1xf32> -> vector<2x8x1xf32>
    %58 = vector.broadcast %57 : vector<2x8x1xf32> to vector<2x8x8xf32>
    %59 = arith.mulf %54, %58 : vector<2x8x8xf32>
    %60 = arith.truncf %59 : vector<2x8x8xf32> to vector<2x8x8xbf16>
    "tpu.trace_start"() <{level = 10 : i32, message = "bqk,bkd->bqd"}> : () -> ()
    %cst_32 = arith.constant dense<0.000000e+00> : vector<2x8x8xf32>
    %61 = tpu.matmul %60, %46, %cst_32 {dimension_numbers = #tpu.dot_dimension_numbers<[2], [1], [1], [2], [0, 0, 0, 1, 1, 2], [0], [0]>} : vector<2x8x8xbf16>, vector<2x8x8xbf16>, vector<2x8x8xf32> -> vector<2x8x8xf32>
    "tpu.trace_stop"() : () -> ()
    %62 = vector.shape_cast %61 : vector<2x8x8xf32> to vector<16x8xf32>
    %63 = arith.truncf %62 : vector<16x8xf32> to vector<16x8xbf16>
    %c0_33 = arith.constant 0 : index
    %c0_34 = arith.constant 0 : index
    %c0_35 = arith.constant 0 : index
    %c0_36 = arith.constant 0 : index
    %64 = vector.load %arg7[%c0_33, %c0_34, %c0_35, %c0_36] : memref<1x4x8x48xbf16, #tpu.memory_space<vmem>>, vector<1x1x8x48xbf16>
    %65 = vector.shape_cast %64 : vector<1x1x8x48xbf16> to vector<8x48xbf16>
    %cst_37 = arith.constant dense<0.000000e+00> : vector<16x48xf32>
    %66 = tpu.matmul %63, %65, %cst_37 {dimension_numbers = #tpu.dot_dimension_numbers<[1], [0], [0], [1], [0, 0, 1, 1], [], []>} : vector<16x8xbf16>, vector<8x48xbf16>, vector<16x48xf32> -> vector<16x48xf32>
    %67 = arith.addf %31, %66 : vector<16x48xf32>
    %c0_38 = arith.constant 0 : index
    %c1 = arith.constant 1 : index
    %c0_39 = arith.constant 0 : index
    %c0_40 = arith.constant 0 : index
    %68 = vector.load %arg4[%c0_38, %c1, %c0_39, %c0_40] : memref<1x4x48x8xbf16, #tpu.memory_space<vmem>>, vector<1x1x48x8xbf16>
    %69 = vector.shape_cast %68 : vector<1x1x48x8xbf16> to vector<48x8xbf16>
    %cst_41 = arith.constant dense<0.000000e+00> : vector<16x8xf32>
    %70 = tpu.matmul %30, %69, %cst_41 {dimension_numbers = #tpu.dot_dimension_numbers<[1], [0], [0], [1], [0, 0, 1, 1], [], []>} : vector<16x48xbf16>, vector<48x8xbf16>, vector<16x8xf32> -> vector<16x8xf32>
    %c0_42 = arith.constant 0 : index
    %c1_43 = arith.constant 1 : index
    %c0_44 = arith.constant 0 : index
    %c0_45 = arith.constant 0 : index
    %71 = vector.load %arg5[%c0_42, %c1_43, %c0_44, %c0_45] : memref<1x4x48x8xbf16, #tpu.memory_space<vmem>>, vector<1x1x48x8xbf16>
    %72 = vector.shape_cast %71 : vector<1x1x48x8xbf16> to vector<48x8xbf16>
    %cst_46 = arith.constant dense<0.000000e+00> : vector<16x8xf32>
    %73 = tpu.matmul %30, %72, %cst_46 {dimension_numbers = #tpu.dot_dimension_numbers<[1], [0], [0], [1], [0, 0, 1, 1], [], []>} : vector<16x48xbf16>, vector<48x8xbf16>, vector<16x8xf32> -> vector<16x8xf32>
    %c0_47 = arith.constant 0 : index
    %c1_48 = arith.constant 1 : index
    %c0_49 = arith.constant 0 : index
    %c0_50 = arith.constant 0 : index
    %74 = vector.load %arg6[%c0_47, %c1_48, %c0_49, %c0_50] : memref<1x4x48x8xbf16, #tpu.memory_space<vmem>>, vector<1x1x48x8xbf16>
    %75 = vector.shape_cast %74 : vector<1x1x48x8xbf16> to vector<48x8xbf16>
    %cst_51 = arith.constant dense<0.000000e+00> : vector<16x8xf32>
    %76 = tpu.matmul %30, %75, %cst_51 {dimension_numbers = #tpu.dot_dimension_numbers<[1], [0], [0], [1], [0, 0, 1, 1], [], []>} : vector<16x48xbf16>, vector<48x8xbf16>, vector<16x8xf32> -> vector<16x8xf32>
    %77 = vector.shape_cast %70 : vector<16x8xf32> to vector<2x8x8xf32>
    %78 = arith.truncf %77 : vector<2x8x8xf32> to vector<2x8x8xbf16>
    %79 = vector.shape_cast %73 : vector<16x8xf32> to vector<2x8x8xf32>
    %80 = arith.truncf %79 : vector<2x8x8xf32> to vector<2x8x8xbf16>
    %81 = vector.shape_cast %76 : vector<16x8xf32> to vector<2x8x8xf32>
    %82 = arith.truncf %81 : vector<2x8x8xf32> to vector<2x8x8xbf16>
    "tpu.trace_start"() <{level = 10 : i32, message = "bqd,bkd->bqk"}> : () -> ()
    %cst_52 = arith.constant dense<0.000000e+00> : vector<2x8x8xf32>
    %83 = tpu.matmul %78, %80, %cst_52 {dimension_numbers = #tpu.dot_dimension_numbers<[2], [2], [1], [1], [0, 0, 0, 1, 1, 1], [0], [0]>} : vector<2x8x8xbf16>, vector<2x8x8xbf16>, vector<2x8x8xf32> -> vector<2x8x8xf32>
    "tpu.trace_stop"() : () -> ()
    %cst_53 = arith.constant 0.353553385 : f32
    %84 = vector.broadcast %cst_53 : f32 to vector<2x8x8xf32>
    %85 = arith.mulf %83, %84 : vector<2x8x8xf32>
    %cst_54 = arith.constant dense<0xFF800000> : vector<2x8xf32>
    %86 = vector.multi_reduction <maximumf>, %85, %cst_54 [2] : vector<2x8x8xf32> to vector<2x8xf32>
    %87 = vector.shape_cast %86 : vector<2x8xf32> to vector<2x8x1xf32>
    %88 = vector.broadcast %87 : vector<2x8x1xf32> to vector<2x8x8xf32>
    %89 = arith.subf %85, %88 : vector<2x8x8xf32>
    %90 = math.exp %89 : vector<2x8x8xf32>
    %cst_55 = arith.constant dense<0.000000e+00> : vector<2x8xf32>
    %91 = vector.multi_reduction <add>, %90, %cst_55 [2] : vector<2x8x8xf32> to vector<2x8xf32>
    %92 = vector.shape_cast %91 : vector<2x8xf32> to vector<2x8x1xf32>
    %93 = tpu.reciprocal %92 {approx = true} : vector<2x8x1xf32> -> vector<2x8x1xf32>
    %94 = vector.broadcast %93 : vector<2x8x1xf32> to vector<2x8x8xf32>
    %95 = arith.mulf %90, %94 : vector<2x8x8xf32>
    %96 = arith.truncf %95 : vector<2x8x8xf32> to vector<2x8x8xbf16>
    "tpu.trace_start"() <{level = 10 : i32, message = "bqk,bkd->bqd"}> : () -> ()
    %cst_56 = arith.constant dense<0.000000e+00> : vector<2x8x8xf32>
    %97 = tpu.matmul %96, %82, %cst_56 {dimension_numbers = #tpu.dot_dimension_numbers<[2], [1], [1], [2], [0, 0, 0, 1, 1, 2], [0], [0]>} : vector<2x8x8xbf16>, vector<2x8x8xbf16>, vector<2x8x8xf32> -> vector<2x8x8xf32>
    "tpu.trace_stop"() : () -> ()
    %98 = vector.shape_cast %97 : vector<2x8x8xf32> to vector<16x8xf32>
    %99 = arith.truncf %98 : vector<16x8xf32> to vector<16x8xbf16>
    %c0_57 = arith.constant 0 : index
    %c1_58 = arith.constant 1 : index
    %c0_59 = arith.constant 0 : index
    %c0_60 = arith.constant 0 : index
    %100 = vector.load %arg7[%c0_57, %c1_58, %c0_59, %c0_60] : memref<1x4x8x48xbf16, #tpu.memory_space<vmem>>, vector<1x1x8x48xbf16>
    %101 = vector.shape_cast %100 : vector<1x1x8x48xbf16> to vector<8x48xbf16>
    %cst_61 = arith.constant dense<0.000000e+00> : vector<16x48xf32>
    %102 = tpu.matmul %99, %101, %cst_61 {dimension_numbers = #tpu.dot_dimension_numbers<[1], [0], [0], [1], [0, 0, 1, 1], [], []>} : vector<16x8xbf16>, vector<8x48xbf16>, vector<16x48xf32> -> vector<16x48xf32>
    %103 = arith.addf %67, %102 : vector<16x48xf32>
    %c0_62 = arith.constant 0 : index
    %c2 = arith.constant 2 : index
    %c0_63 = arith.constant 0 : index
    %c0_64 = arith.constant 0 : index
    %104 = vector.load %arg4[%c0_62, %c2, %c0_63, %c0_64] : memref<1x4x48x8xbf16, #tpu.memory_space<vmem>>, vector<1x1x48x8xbf16>
    %105 = vector.shape_cast %104 : vector<1x1x48x8xbf16> to vector<48x8xbf16>
    %cst_65 = arith.constant dense<0.000000e+00> : vector<16x8xf32>
    %106 = tpu.matmul %30, %105, %cst_65 {dimension_numbers = #tpu.dot_dimension_numbers<[1], [0], [0], [1], [0, 0, 1, 1], [], []>} : vector<16x48xbf16>, vector<48x8xbf16>, vector<16x8xf32> -> vector<16x8xf32>
    %c0_66 = arith.constant 0 : index
    %c2_67 = arith.constant 2 : index
    %c0_68 = arith.constant 0 : index
    %c0_69 = arith.constant 0 : index
    %107 = vector.load %arg5[%c0_66, %c2_67, %c0_68, %c0_69] : memref<1x4x48x8xbf16, #tpu.memory_space<vmem>>, vector<1x1x48x8xbf16>
    %108 = vector.shape_cast %107 : vector<1x1x48x8xbf16> to vector<48x8xbf16>
    %cst_70 = arith.constant dense<0.000000e+00> : vector<16x8xf32>
    %109 = tpu.matmul %30, %108, %cst_70 {dimension_numbers = #tpu.dot_dimension_numbers<[1], [0], [0], [1], [0, 0, 1, 1], [], []>} : vector<16x48xbf16>, vector<48x8xbf16>, vector<16x8xf32> -> vector<16x8xf32>
    %c0_71 = arith.constant 0 : index
    %c2_72 = arith.constant 2 : index
    %c0_73 = arith.constant 0 : index
    %c0_74 = arith.constant 0 : index
    %110 = vector.load %arg6[%c0_71, %c2_72, %c0_73, %c0_74] : memref<1x4x48x8xbf16, #tpu.memory_space<vmem>>, vector<1x1x48x8xbf16>
    %111 = vector.shape_cast %110 : vector<1x1x48x8xbf16> to vector<48x8xbf16>
    %cst_75 = arith.constant dense<0.000000e+00> : vector<16x8xf32>
    %112 = tpu.matmul %30, %111, %cst_75 {dimension_numbers = #tpu.dot_dimension_numbers<[1], [0], [0], [1], [0, 0, 1, 1], [], []>} : vector<16x48xbf16>, vector<48x8xbf16>, vector<16x8xf32> -> vector<16x8xf32>
    %113 = vector.shape_cast %106 : vector<16x8xf32> to vector<2x8x8xf32>
    %114 = arith.truncf %113 : vector<2x8x8xf32> to vector<2x8x8xbf16>
    %115 = vector.shape_cast %109 : vector<16x8xf32> to vector<2x8x8xf32>
    %116 = arith.truncf %115 : vector<2x8x8xf32> to vector<2x8x8xbf16>
    %117 = vector.shape_cast %112 : vector<16x8xf32> to vector<2x8x8xf32>
    %118 = arith.truncf %117 : vector<2x8x8xf32> to vector<2x8x8xbf16>
    "tpu.trace_start"() <{level = 10 : i32, message = "bqd,bkd->bqk"}> : () -> ()
    %cst_76 = arith.constant dense<0.000000e+00> : vector<2x8x8xf32>
    %119 = tpu.matmul %114, %116, %cst_76 {dimension_numbers = #tpu.dot_dimension_numbers<[2], [2], [1], [1], [0, 0, 0, 1, 1, 1], [0], [0]>} : vector<2x8x8xbf16>, vector<2x8x8xbf16>, vector<2x8x8xf32> -> vector<2x8x8xf32>
    "tpu.trace_stop"() : () -> ()
    %cst_77 = arith.constant 0.353553385 : f32
    %120 = vector.broadcast %cst_77 : f32 to vector<2x8x8xf32>
    %121 = arith.mulf %119, %120 : vector<2x8x8xf32>
    %cst_78 = arith.constant dense<0xFF800000> : vector<2x8xf32>
    %122 = vector.multi_reduction <maximumf>, %121, %cst_78 [2] : vector<2x8x8xf32> to vector<2x8xf32>
    %123 = vector.shape_cast %122 : vector<2x8xf32> to vector<2x8x1xf32>
    %124 = vector.broadcast %123 : vector<2x8x1xf32> to vector<2x8x8xf32>
    %125 = arith.subf %121, %124 : vector<2x8x8xf32>
    %126 = math.exp %125 : vector<2x8x8xf32>
    %cst_79 = arith.constant dense<0.000000e+00> : vector<2x8xf32>
    %127 = vector.multi_reduction <add>, %126, %cst_79 [2] : vector<2x8x8xf32> to vector<2x8xf32>
    %128 = vector.shape_cast %127 : vector<2x8xf32> to vector<2x8x1xf32>
    %129 = tpu.reciprocal %128 {approx = true} : vector<2x8x1xf32> -> vector<2x8x1xf32>
    %130 = vector.broadcast %129 : vector<2x8x1xf32> to vector<2x8x8xf32>
    %131 = arith.mulf %126, %130 : vector<2x8x8xf32>
    %132 = arith.truncf %131 : vector<2x8x8xf32> to vector<2x8x8xbf16>
    "tpu.trace_start"() <{level = 10 : i32, message = "bqk,bkd->bqd"}> : () -> ()
    %cst_80 = arith.constant dense<0.000000e+00> : vector<2x8x8xf32>
    %133 = tpu.matmul %132, %118, %cst_80 {dimension_numbers = #tpu.dot_dimension_numbers<[2], [1], [1], [2], [0, 0, 0, 1, 1, 2], [0], [0]>} : vector<2x8x8xbf16>, vector<2x8x8xbf16>, vector<2x8x8xf32> -> vector<2x8x8xf32>
    "tpu.trace_stop"() : () -> ()
    %134 = vector.shape_cast %133 : vector<2x8x8xf32> to vector<16x8xf32>
    %135 = arith.truncf %134 : vector<16x8xf32> to vector<16x8xbf16>
    %c0_81 = arith.constant 0 : index
    %c2_82 = arith.constant 2 : index
    %c0_83 = arith.constant 0 : index
    %c0_84 = arith.constant 0 : index
    %136 = vector.load %arg7[%c0_81, %c2_82, %c0_83, %c0_84] : memref<1x4x8x48xbf16, #tpu.memory_space<vmem>>, vector<1x1x8x48xbf16>
    %137 = vector.shape_cast %136 : vector<1x1x8x48xbf16> to vector<8x48xbf16>
    %cst_85 = arith.constant dense<0.000000e+00> : vector<16x48xf32>
    %138 = tpu.matmul %135, %137, %cst_85 {dimension_numbers = #tpu.dot_dimension_numbers<[1], [0], [0], [1], [0, 0, 1, 1], [], []>} : vector<16x8xbf16>, vector<8x48xbf16>, vector<16x48xf32> -> vector<16x48xf32>
    %139 = arith.addf %103, %138 : vector<16x48xf32>
    %c0_86 = arith.constant 0 : index
    %c3 = arith.constant 3 : index
    %c0_87 = arith.constant 0 : index
    %c0_88 = arith.constant 0 : index
    %140 = vector.load %arg4[%c0_86, %c3, %c0_87, %c0_88] : memref<1x4x48x8xbf16, #tpu.memory_space<vmem>>, vector<1x1x48x8xbf16>
    %141 = vector.shape_cast %140 : vector<1x1x48x8xbf16> to vector<48x8xbf16>
    %cst_89 = arith.constant dense<0.000000e+00> : vector<16x8xf32>
    %142 = tpu.matmul %30, %141, %cst_89 {dimension_numbers = #tpu.dot_dimension_numbers<[1], [0], [0], [1], [0, 0, 1, 1], [], []>} : vector<16x48xbf16>, vector<48x8xbf16>, vector<16x8xf32> -> vector<16x8xf32>
    %c0_90 = arith.constant 0 : index
    %c3_91 = arith.constant 3 : index
    %c0_92 = arith.constant 0 : index
    %c0_93 = arith.constant 0 : index
    %143 = vector.load %arg5[%c0_90, %c3_91, %c0_92, %c0_93] : memref<1x4x48x8xbf16, #tpu.memory_space<vmem>>, vector<1x1x48x8xbf16>
    %144 = vector.shape_cast %143 : vector<1x1x48x8xbf16> to vector<48x8xbf16>
    %cst_94 = arith.constant dense<0.000000e+00> : vector<16x8xf32>
    %145 = tpu.matmul %30, %144, %cst_94 {dimension_numbers = #tpu.dot_dimension_numbers<[1], [0], [0], [1], [0, 0, 1, 1], [], []>} : vector<16x48xbf16>, vector<48x8xbf16>, vector<16x8xf32> -> vector<16x8xf32>
    %c0_95 = arith.constant 0 : index
    %c3_96 = arith.constant 3 : index
    %c0_97 = arith.constant 0 : index
    %c0_98 = arith.constant 0 : index
    %146 = vector.load %arg6[%c0_95, %c3_96, %c0_97, %c0_98] : memref<1x4x48x8xbf16, #tpu.memory_space<vmem>>, vector<1x1x48x8xbf16>
    %147 = vector.shape_cast %146 : vector<1x1x48x8xbf16> to vector<48x8xbf16>
    %cst_99 = arith.constant dense<0.000000e+00> : vector<16x8xf32>
    %148 = tpu.matmul %30, %147, %cst_99 {dimension_numbers = #tpu.dot_dimension_numbers<[1], [0], [0], [1], [0, 0, 1, 1], [], []>} : vector<16x48xbf16>, vector<48x8xbf16>, vector<16x8xf32> -> vector<16x8xf32>
    %149 = vector.shape_cast %142 : vector<16x8xf32> to vector<2x8x8xf32>
    %150 = arith.truncf %149 : vector<2x8x8xf32> to vector<2x8x8xbf16>
    %151 = vector.shape_cast %145 : vector<16x8xf32> to vector<2x8x8xf32>
    %152 = arith.truncf %151 : vector<2x8x8xf32> to vector<2x8x8xbf16>
    %153 = vector.shape_cast %148 : vector<16x8xf32> to vector<2x8x8xf32>
    %154 = arith.truncf %153 : vector<2x8x8xf32> to vector<2x8x8xbf16>
    "tpu.trace_start"() <{level = 10 : i32, message = "bqd,bkd->bqk"}> : () -> ()
    %cst_100 = arith.constant dense<0.000000e+00> : vector<2x8x8xf32>
    %155 = tpu.matmul %150, %152, %cst_100 {dimension_numbers = #tpu.dot_dimension_numbers<[2], [2], [1], [1], [0, 0, 0, 1, 1, 1], [0], [0]>} : vector<2x8x8xbf16>, vector<2x8x8xbf16>, vector<2x8x8xf32> -> vector<2x8x8xf32>
    "tpu.trace_stop"() : () -> ()
    %cst_101 = arith.constant 0.353553385 : f32
    %156 = vector.broadcast %cst_101 : f32 to vector<2x8x8xf32>
    %157 = arith.mulf %155, %156 : vector<2x8x8xf32>
    %cst_102 = arith.constant dense<0xFF800000> : vector<2x8xf32>
    %158 = vector.multi_reduction <maximumf>, %157, %cst_102 [2] : vector<2x8x8xf32> to vector<2x8xf32>
    %159 = vector.shape_cast %158 : vector<2x8xf32> to vector<2x8x1xf32>
    %160 = vector.broadcast %159 : vector<2x8x1xf32> to vector<2x8x8xf32>
    %161 = arith.subf %157, %160 : vector<2x8x8xf32>
    %162 = math.exp %161 : vector<2x8x8xf32>
    %cst_103 = arith.constant dense<0.000000e+00> : vector<2x8xf32>
    %163 = vector.multi_reduction <add>, %162, %cst_103 [2] : vector<2x8x8xf32> to vector<2x8xf32>
    %164 = vector.shape_cast %163 : vector<2x8xf32> to vector<2x8x1xf32>
    %165 = tpu.reciprocal %164 {approx = true} : vector<2x8x1xf32> -> vector<2x8x1xf32>
    %166 = vector.broadcast %165 : vector<2x8x1xf32> to vector<2x8x8xf32>
    %167 = arith.mulf %162, %166 : vector<2x8x8xf32>
    %168 = arith.truncf %167 : vector<2x8x8xf32> to vector<2x8x8xbf16>
    "tpu.trace_start"() <{level = 10 : i32, message = "bqk,bkd->bqd"}> : () -> ()
    %cst_104 = arith.constant dense<0.000000e+00> : vector<2x8x8xf32>
    %169 = tpu.matmul %168, %154, %cst_104 {dimension_numbers = #tpu.dot_dimension_numbers<[2], [1], [1], [2], [0, 0, 0, 1, 1, 2], [0], [0]>} : vector<2x8x8xbf16>, vector<2x8x8xbf16>, vector<2x8x8xf32> -> vector<2x8x8xf32>
    "tpu.trace_stop"() : () -> ()
    %170 = vector.shape_cast %169 : vector<2x8x8xf32> to vector<16x8xf32>
    %171 = arith.truncf %170 : vector<16x8xf32> to vector<16x8xbf16>
    %c0_105 = arith.constant 0 : index
    %c3_106 = arith.constant 3 : index
    %c0_107 = arith.constant 0 : index
    %c0_108 = arith.constant 0 : index
    %172 = vector.load %arg7[%c0_105, %c3_106, %c0_107, %c0_108] : memref<1x4x8x48xbf16, #tpu.memory_space<vmem>>, vector<1x1x8x48xbf16>
    %173 = vector.shape_cast %172 : vector<1x1x8x48xbf16> to vector<8x48xbf16>
    %cst_109 = arith.constant dense<0.000000e+00> : vector<16x48xf32>
    %174 = tpu.matmul %171, %173, %cst_109 {dimension_numbers = #tpu.dot_dimension_numbers<[1], [0], [0], [1], [0, 0, 1, 1], [], []>} : vector<16x8xbf16>, vector<8x48xbf16>, vector<16x48xf32> -> vector<16x48xf32>
    %175 = arith.addf %139, %174 : vector<16x48xf32>
    %176 = arith.addf %3, %175 : vector<16x48xf32>
    %c0_110 = arith.constant 0 : index
    %c0_111 = arith.constant 0 : index
    %c0_112 = arith.constant 0 : index
    %177 = vector.load %arg8[%c0_110, %c0_111, %c0_112] : memref<1x1x48xf32, #tpu.memory_space<vmem>>, vector<1x1x48xf32>
    %178 = vector.shape_cast %177 : vector<1x1x48xf32> to vector<1x48xf32>
    %179 = vector.broadcast %178 : vector<1x48xf32> to vector<16x48xf32>
    %180 = arith.addf %176, %179 : vector<16x48xf32>
    %c0_113 = arith.constant 0 : index
    %c0_114 = arith.constant 0 : index
    %c0_115 = arith.constant 0 : index
    %181 = vector.load %arg9[%c0_113, %c0_114, %c0_115] : memref<1x1x48xf32, #tpu.memory_space<vmem>>, vector<1x1x48xf32>
    %182 = vector.shape_cast %181 : vector<1x1x48xf32> to vector<1x48xf32>
    %c0_116 = arith.constant 0 : index
    %c0_117 = arith.constant 0 : index
    %c0_118 = arith.constant 0 : index
    %183 = vector.load %arg10[%c0_116, %c0_117, %c0_118] : memref<1x1x48xf32, #tpu.memory_space<vmem>>, vector<1x1x48xf32>
    %184 = vector.shape_cast %183 : vector<1x1x48xf32> to vector<1x48xf32>
    %cst_119 = arith.constant dense<0.000000e+00> : vector<16xf32>
    %185 = vector.multi_reduction <add>, %180, %cst_119 [1] : vector<16x48xf32> to vector<16xf32>
    %186 = vector.shape_cast %185 : vector<16xf32> to vector<16x1xf32>
    %cst_120 = arith.constant 4.800000e+01 : f32
    %187 = vector.broadcast %cst_120 : f32 to vector<16x1xf32>
    %188 = arith.divf %186, %187 : vector<16x1xf32>
    %189 = vector.broadcast %188 : vector<16x1xf32> to vector<16x48xf32>
    %190 = arith.subf %180, %189 : vector<16x48xf32>
    %191 = arith.mulf %190, %190 : vector<16x48xf32>
    %cst_121 = arith.constant dense<0.000000e+00> : vector<16xf32>
    %192 = vector.multi_reduction <add>, %191, %cst_121 [1] : vector<16x48xf32> to vector<16xf32>
    %193 = vector.shape_cast %192 : vector<16xf32> to vector<16x1xf32>
    %cst_122 = arith.constant 4.800000e+01 : f32
    %194 = vector.broadcast %cst_122 : f32 to vector<16x1xf32>
    %195 = arith.divf %193, %194 : vector<16x1xf32>
    %196 = vector.broadcast %188 : vector<16x1xf32> to vector<16x48xf32>
    %197 = arith.subf %180, %196 : vector<16x48xf32>
    %cst_123 = arith.constant 9.99999974E-6 : f32
    %198 = vector.broadcast %cst_123 : f32 to vector<16x1xf32>
    %199 = arith.addf %195, %198 : vector<16x1xf32>
    %200 = math.rsqrt %199 : vector<16x1xf32>
    %201 = vector.broadcast %200 : vector<16x1xf32> to vector<16x48xf32>
    %202 = arith.mulf %197, %201 : vector<16x48xf32>
    %203 = vector.broadcast %182 : vector<1x48xf32> to vector<16x48xf32>
    %204 = arith.mulf %202, %203 : vector<16x48xf32>
    %205 = vector.broadcast %184 : vector<1x48xf32> to vector<16x48xf32>
    %206 = arith.addf %204, %205 : vector<16x48xf32>
    %207 = arith.truncf %206 : vector<16x48xf32> to vector<16x48xbf16>
    %c0_124 = arith.constant 0 : index
    %c0_125 = arith.constant 0 : index
    %c0_126 = arith.constant 0 : index
    %208 = vector.load %arg11[%c0_124, %c0_125, %c0_126] : memref<1x48x96xbf16, #tpu.memory_space<vmem>>, vector<1x48x96xbf16>
    %209 = vector.shape_cast %208 : vector<1x48x96xbf16> to vector<48x96xbf16>
    %cst_127 = arith.constant dense<0.000000e+00> : vector<16x96xf32>
    %210 = tpu.matmul %207, %209, %cst_127 {dimension_numbers = #tpu.dot_dimension_numbers<[1], [0], [0], [1], [0, 0, 1, 1], [], []>} : vector<16x48xbf16>, vector<48x96xbf16>, vector<16x96xf32> -> vector<16x96xf32>
    %c0_128 = arith.constant 0 : index
    %c0_129 = arith.constant 0 : index
    %c0_130 = arith.constant 0 : index
    %211 = vector.load %arg12[%c0_128, %c0_129, %c0_130] : memref<1x1x96xf32, #tpu.memory_space<vmem>>, vector<1x1x96xf32>
    %212 = vector.shape_cast %211 : vector<1x1x96xf32> to vector<1x96xf32>
    %213 = vector.broadcast %212 : vector<1x96xf32> to vector<16x96xf32>
    %214 = arith.addf %210, %213 : vector<16x96xf32>
    %215 = arith.mulf %214, %214 : vector<16x96xf32>
    %216 = arith.mulf %214, %215 : vector<16x96xf32>
    %cst_131 = arith.constant 4.471500e-02 : f32
    %217 = vector.broadcast %cst_131 : f32 to vector<16x96xf32>
    %218 = arith.mulf %217, %216 : vector<16x96xf32>
    %219 = arith.addf %214, %218 : vector<16x96xf32>
    %cst_132 = arith.constant 0.797884583 : f32
    %220 = vector.broadcast %cst_132 : f32 to vector<16x96xf32>
    %221 = arith.mulf %220, %219 : vector<16x96xf32>
    %222 = math.tanh %221 : vector<16x96xf32>
    %cst_133 = arith.constant 1.000000e+00 : f32
    %223 = vector.broadcast %cst_133 : f32 to vector<16x96xf32>
    %224 = arith.addf %223, %222 : vector<16x96xf32>
    %cst_134 = arith.constant 5.000000e-01 : f32
    %225 = vector.broadcast %cst_134 : f32 to vector<16x96xf32>
    %226 = arith.mulf %225, %224 : vector<16x96xf32>
    %227 = arith.mulf %214, %226 : vector<16x96xf32>
    %228 = arith.truncf %227 : vector<16x96xf32> to vector<16x96xbf16>
    %c0_135 = arith.constant 0 : index
    %c0_136 = arith.constant 0 : index
    %c0_137 = arith.constant 0 : index
    %229 = vector.load %arg13[%c0_135, %c0_136, %c0_137] : memref<1x96x48xbf16, #tpu.memory_space<vmem>>, vector<1x96x48xbf16>
    %230 = vector.shape_cast %229 : vector<1x96x48xbf16> to vector<96x48xbf16>
    %cst_138 = arith.constant dense<0.000000e+00> : vector<16x48xf32>
    %231 = tpu.matmul %228, %230, %cst_138 {dimension_numbers = #tpu.dot_dimension_numbers<[1], [0], [0], [1], [0, 0, 1, 1], [], []>} : vector<16x96xbf16>, vector<96x48xbf16>, vector<16x48xf32> -> vector<16x48xf32>
    %232 = arith.addf %180, %231 : vector<16x48xf32>
    %c0_139 = arith.constant 0 : index
    %c0_140 = arith.constant 0 : index
    %c0_141 = arith.constant 0 : index
    %233 = vector.load %arg14[%c0_139, %c0_140, %c0_141] : memref<1x1x48xf32, #tpu.memory_space<vmem>>, vector<1x1x48xf32>
    %234 = vector.shape_cast %233 : vector<1x1x48xf32> to vector<1x48xf32>
    %235 = vector.broadcast %234 : vector<1x48xf32> to vector<16x48xf32>
    %236 = arith.addf %232, %235 : vector<16x48xf32>
    %c1_i32 = arith.constant 1 : i32
    %237 = arith.cmpi slt, %arg0, %c1_i32 : i32
    %238 = arith.extui %237 : i1 to i32
    %c0_i32_142 = arith.constant 0 : i32
    %239 = arith.cmpi ne, %238, %c0_i32_142 : i32
    scf.if %239 {
      %c0_145 = arith.constant 0 : index
      %c0_146 = arith.constant 0 : index
      %243 = vector.load %arg17[%c0_145, %c0_146] : memref<16x48xf32, #tpu.memory_space<vmem>>, vector<16x48xf32>
      tpu.vector_store %arg17[%c0_145, %c0_146], %236 {strides = array<i32>} : memref<16x48xf32, #tpu.memory_space<vmem>>, vector<16x48xf32>,
    } else {
    }
    %c1_i32_143 = arith.constant 1 : i32
    %240 = arith.cmpi eq, %arg0, %c1_i32_143 : i32
    %241 = arith.extui %240 : i1 to i32
    %c0_i32_144 = arith.constant 0 : i32
    %242 = arith.cmpi ne, %241, %c0_i32_144 : i32
    scf.if %242 {
      %c0_145 = arith.constant 0 : index
      %c0_146 = arith.constant 0 : index
      %243 = vector.load %arg15[%c0_145, %c0_146] : memref<1x48xf32, #tpu.memory_space<vmem>>, vector<1x48xf32>
      %c0_147 = arith.constant 0 : index
      %c0_148 = arith.constant 0 : index
      %244 = vector.load %arg16[%c0_147, %c0_148] : memref<1x48xf32, #tpu.memory_space<vmem>>, vector<1x48xf32>
      %cst_149 = arith.constant dense<0.000000e+00> : vector<16xf32>
      %245 = vector.multi_reduction <add>, %236, %cst_149 [1] : vector<16x48xf32> to vector<16xf32>
      %246 = vector.shape_cast %245 : vector<16xf32> to vector<16x1xf32>
      %cst_150 = arith.constant 4.800000e+01 : f32
      %247 = vector.broadcast %cst_150 : f32 to vector<16x1xf32>
      %248 = arith.divf %246, %247 : vector<16x1xf32>
      %249 = vector.broadcast %248 : vector<16x1xf32> to vector<16x48xf32>
      %250 = arith.subf %236, %249 : vector<16x48xf32>
      %251 = arith.mulf %250, %250 : vector<16x48xf32>
      %cst_151 = arith.constant dense<0.000000e+00> : vector<16xf32>
      %252 = vector.multi_reduction <add>, %251, %cst_151 [1] : vector<16x48xf32> to vector<16xf32>
      %253 = vector.shape_cast %252 : vector<16xf32> to vector<16x1xf32>
      %cst_152 = arith.constant 4.800000e+01 : f32
      %254 = vector.broadcast %cst_152 : f32 to vector<16x1xf32>
      %255 = arith.divf %253, %254 : vector<16x1xf32>
      %256 = vector.broadcast %248 : vector<16x1xf32> to vector<16x48xf32>
      %257 = arith.subf %236, %256 : vector<16x48xf32>
      %cst_153 = arith.constant 9.99999974E-6 : f32
      %258 = vector.broadcast %cst_153 : f32 to vector<16x1xf32>
      %259 = arith.addf %255, %258 : vector<16x1xf32>
      %260 = math.rsqrt %259 : vector<16x1xf32>
      %261 = vector.broadcast %260 : vector<16x1xf32> to vector<16x48xf32>
      %262 = arith.mulf %257, %261 : vector<16x48xf32>
      %263 = vector.broadcast %243 : vector<1x48xf32> to vector<16x48xf32>
      %264 = arith.mulf %262, %263 : vector<16x48xf32>
      %265 = vector.broadcast %244 : vector<1x48xf32> to vector<16x48xf32>
      %266 = arith.addf %264, %265 : vector<16x48xf32>
      %c0_154 = arith.constant 0 : index
      %c0_155 = arith.constant 0 : index
      %267 = vector.load %arg17[%c0_154, %c0_155] : memref<16x48xf32, #tpu.memory_space<vmem>>, vector<16x48xf32>
      tpu.vector_store %arg17[%c0_154, %c0_155], %266 {strides = array<i32>} : memref<16x48xf32, #tpu.memory_space<vmem>>, vector<16x48xf32>,
    } else {
    }
    return
  }
  func.func @transform_0(%arg0: i32) -> (i32, i32) {
    %c0_i32 = arith.constant 0 : i32
    %c0_i32_0 = arith.constant 0 : i32
    %c0_i32_1 = arith.constant 0 : i32
    return %c0_i32, %c0_i32_0 : i32, i32
  }
  func.func @transform_1(%arg0: i32) -> (i32, i32, i32) {
    %c0_i32 = arith.constant 0 : i32
    %c0_i32_0 = arith.constant 0 : i32
    %c0_i32_1 = arith.constant 0 : i32
    return %arg0, %c0_i32, %c0_i32_0 : i32, i32, i32
  }
  func.func @transform_2(%arg0: i32) -> (i32, i32, i32) {
    %c0_i32 = arith.constant 0 : i32
    %c0_i32_0 = arith.constant 0 : i32
    %c0_i32_1 = arith.constant 0 : i32
    return %arg0, %c0_i32, %c0_i32_0 : i32, i32, i32
  }
  func.func @transform_3(%arg0: i32) -> (i32, i32, i32, i32) {
    %c0_i32 = arith.constant 0 : i32
    %c0_i32_0 = arith.constant 0 : i32
    %c0_i32_1 = arith.constant 0 : i32
    %c0_i32_2 = arith.constant 0 : i32
    return %arg0, %c0_i32, %c0_i32_0, %c0_i32_1 : i32, i32, i32, i32
  }
  func.func @transform_4(%arg0: i32) -> (i32, i32, i32, i32) {
    %c0_i32 = arith.constant 0 : i32
    %c0_i32_0 = arith.constant 0 : i32
    %c0_i32_1 = arith.constant 0 : i32
    %c0_i32_2 = arith.constant 0 : i32
    return %arg0, %c0_i32, %c0_i32_0, %c0_i32_1 : i32, i32, i32, i32
  }
  func.func @transform_5(%arg0: i32) -> (i32, i32, i32, i32) {
    %c0_i32 = arith.constant 0 : i32
    %c0_i32_0 = arith.constant 0 : i32
    %c0_i32_1 = arith.constant 0 : i32
    %c0_i32_2 = arith.constant 0 : i32
    return %arg0, %c0_i32, %c0_i32_0, %c0_i32_1 : i32, i32, i32, i32
  }
  func.func @transform_6(%arg0: i32) -> (i32, i32, i32, i32) {
    %c0_i32 = arith.constant 0 : i32
    %c0_i32_0 = arith.constant 0 : i32
    %c0_i32_1 = arith.constant 0 : i32
    %c0_i32_2 = arith.constant 0 : i32
    return %arg0, %c0_i32, %c0_i32_0, %c0_i32_1 : i32, i32, i32, i32
  }
  func.func @transform_7(%arg0: i32) -> (i32, i32, i32) {
    %c0_i32 = arith.constant 0 : i32
    %c0_i32_0 = arith.constant 0 : i32
    %c0_i32_1 = arith.constant 0 : i32
    return %arg0, %c0_i32, %c0_i32_0 : i32, i32, i32
  }
  func.func @transform_8(%arg0: i32) -> (i32, i32, i32) {
    %c0_i32 = arith.constant 0 : i32
    %c0_i32_0 = arith.constant 0 : i32
    %c0_i32_1 = arith.constant 0 : i32
    return %arg0, %c0_i32, %c0_i32_0 : i32, i32, i32
  }
  func.func @transform_9(%arg0: i32) -> (i32, i32, i32) {
    %c0_i32 = arith.constant 0 : i32
    %c0_i32_0 = arith.constant 0 : i32
    %c0_i32_1 = arith.constant 0 : i32
    return %arg0, %c0_i32, %c0_i32_0 : i32, i32, i32
  }
  func.func @transform_10(%arg0: i32) -> (i32, i32, i32) {
    %c0_i32 = arith.constant 0 : i32
    %c0_i32_0 = arith.constant 0 : i32
    %c0_i32_1 = arith.constant 0 : i32
    return %arg0, %c0_i32, %c0_i32_0 : i32, i32, i32
  }
  func.func @transform_11(%arg0: i32) -> (i32, i32, i32) {
    %c0_i32 = arith.constant 0 : i32
    %c0_i32_0 = arith.constant 0 : i32
    %c0_i32_1 = arith.constant 0 : i32
    return %arg0, %c0_i32, %c0_i32_0 : i32, i32, i32
  }
  func.func @transform_12(%arg0: i32) -> (i32, i32, i32) {
    %c0_i32 = arith.constant 0 : i32
    %c0_i32_0 = arith.constant 0 : i32
    %c0_i32_1 = arith.constant 0 : i32
    return %arg0, %c0_i32, %c0_i32_0 : i32, i32, i32
  }
  func.func @transform_13(%arg0: i32) -> (i32, i32, i32) {
    %c0_i32 = arith.constant 0 : i32
    %c0_i32_0 = arith.constant 0 : i32
    %c0_i32_1 = arith.constant 0 : i32
    return %arg0, %c0_i32, %c0_i32_0 : i32, i32, i32
  }
  func.func @transform_14(%arg0: i32) -> (i32, i32) {
    %c0_i32 = arith.constant 0 : i32
    %c0_i32_0 = arith.constant 0 : i32
    %c0_i32_1 = arith.constant 0 : i32
    return %c0_i32, %c0_i32_0 : i32, i32
  }
  func.func @transform_15(%arg0: i32) -> (i32, i32) {
    %c0_i32 = arith.constant 0 : i32
    %c0_i32_0 = arith.constant 0 : i32
    %c0_i32_1 = arith.constant 0 : i32
    return %c0_i32, %c0_i32_0 : i32, i32
  }
  func.func @transform_16(%arg0: i32) -> (i32, i32) {
    %c0_i32 = arith.constant 0 : i32
    %c0_i32_0 = arith.constant 0 : i32
    %c0_i32_1 = arith.constant 0 : i32
    return %c0_i32, %c0_i32_0 : i32, i32
  }
}

module attributes {stable_mosaic.version = 11 : i64} {
  func.func @_dec_tokens_kernel(%arg0: i32, %arg1: memref<16x48xf32, #tpu.memory_space<vmem>>, %arg2: memref<48x32xbf16, #tpu.memory_space<vmem>>, %arg3: memref<1x32xf32, #tpu.memory_space<vmem>>, %arg4: memref<1x32xf32, #tpu.memory_space<vmem>>, %arg5: memref<2x24x32xf32, #tpu.memory_space<vmem>>, %arg6: memref<2x8x32xf32, #tpu.memory_space<vmem>>, %arg7: memref<2x32x32xf32, #tpu.memory_space<vmem>>) attributes {dimension_semantics = [#tpu.dimension_semantics<arbitrary>], iteration_bounds = array<i64: 1>, scalar_prefetch = 0 : i64, scratch_operands = 0 : i64, tpu.core_type = #tpu.core_type<tc>, window_params = [{pipeline_mode = #tpu.pipeline_mode<synchronous>, transform_indices = @transform_0, window_bounds = array<i64: 16, 48>}, {pipeline_mode = #tpu.pipeline_mode<synchronous>, transform_indices = @transform_1, window_bounds = array<i64: 48, 32>}, {pipeline_mode = #tpu.pipeline_mode<synchronous>, transform_indices = @transform_2, window_bounds = array<i64: 1, 32>}, {pipeline_mode = #tpu.pipeline_mode<synchronous>, transform_indices = @transform_3, window_bounds = array<i64: 1, 32>}, {pipeline_mode = #tpu.pipeline_mode<synchronous>, transform_indices = @transform_4, window_bounds = array<i64: 2, 24, 32>}, {pipeline_mode = #tpu.pipeline_mode<synchronous>, transform_indices = @transform_5, window_bounds = array<i64: 2, 8, 32>}, {pipeline_mode = #tpu.pipeline_mode<synchronous>, transform_indices = @transform_6, window_bounds = array<i64: 2, 32, 32>}]} {
    %c0 = arith.constant 0 : index
    %c0_0 = arith.constant 0 : index
    %0 = vector.load %arg1[%c0, %c0_0] : memref<16x48xf32, #tpu.memory_space<vmem>>, vector<16x48xf32>
    %1 = arith.truncf %0 : vector<16x48xf32> to vector<16x48xbf16>
    %c0_1 = arith.constant 0 : index
    %c0_2 = arith.constant 0 : index
    %2 = vector.load %arg2[%c0_1, %c0_2] : memref<48x32xbf16, #tpu.memory_space<vmem>>, vector<48x32xbf16>
    %cst = arith.constant dense<0.000000e+00> : vector<16x32xf32>
    %3 = tpu.matmul %1, %2, %cst {dimension_numbers = #tpu.dot_dimension_numbers<[1], [0], [0], [1], [0, 0, 1, 1], [], []>} : vector<16x48xbf16>, vector<48x32xbf16>, vector<16x32xf32> -> vector<16x32xf32>
    %c0_3 = arith.constant 0 : index
    %c0_4 = arith.constant 0 : index
    %4 = vector.load %arg3[%c0_3, %c0_4] : memref<1x32xf32, #tpu.memory_space<vmem>>, vector<1x32xf32>
    %5 = vector.broadcast %4 : vector<1x32xf32> to vector<16x32xf32>
    %6 = arith.addf %3, %5 : vector<16x32xf32>
    %7 = vector.shape_cast %6 : vector<16x32xf32> to vector<2x8x32xf32>
    %c0_5 = arith.constant 0 : index
    %c0_6 = arith.constant 0 : index
    %c0_7 = arith.constant 0 : index
    %8 = vector.load %arg6[%c0_5, %c0_6, %c0_7] : memref<2x8x32xf32, #tpu.memory_space<vmem>>, vector<2x8x32xf32>
    %9 = arith.addf %7, %8 : vector<2x8x32xf32>
    %c0_8 = arith.constant 0 : index
    %c0_9 = arith.constant 0 : index
    %10 = vector.load %arg4[%c0_8, %c0_9] : memref<1x32xf32, #tpu.memory_space<vmem>>, vector<1x32xf32>
    %c0_10 = arith.constant 0 : index
    %c0_11 = arith.constant 0 : index
    %c0_12 = arith.constant 0 : index
    %11 = vector.load %arg5[%c0_10, %c0_11, %c0_12] : memref<2x24x32xf32, #tpu.memory_space<vmem>>, vector<2x24x32xf32>
    %12 = vector.shape_cast %10 : vector<1x32xf32> to vector<1x1x32xf32>
    %13 = vector.broadcast %12 : vector<1x1x32xf32> to vector<2x24x32xf32>
    %14 = arith.addf %13, %11 : vector<2x24x32xf32>
    %15 = tpu.concatenate %14, %9 in 1 : vector<2x24x32xf32>, vector<2x8x32xf32> -> vector<2x32x32xf32>
    %c0_13 = arith.constant 0 : index
    %c0_14 = arith.constant 0 : index
    %c0_15 = arith.constant 0 : index
    %16 = vector.load %arg7[%c0_13, %c0_14, %c0_15] : memref<2x32x32xf32, #tpu.memory_space<vmem>>, vector<2x32x32xf32>
    tpu.vector_store %arg7[%c0_13, %c0_14, %c0_15], %15 {strides = array<i32>} : memref<2x32x32xf32, #tpu.memory_space<vmem>>, vector<2x32x32xf32>,
    return
  }
  func.func @transform_0(%arg0: i32) -> (i32, i32) {
    %c0_i32 = arith.constant 0 : i32
    %c0_i32_0 = arith.constant 0 : i32
    %c0_i32_1 = arith.constant 0 : i32
    return %c0_i32, %c0_i32_0 : i32, i32
  }
  func.func @transform_1(%arg0: i32) -> (i32, i32) {
    %c0_i32 = arith.constant 0 : i32
    %c0_i32_0 = arith.constant 0 : i32
    %c0_i32_1 = arith.constant 0 : i32
    return %c0_i32, %c0_i32_0 : i32, i32
  }
  func.func @transform_2(%arg0: i32) -> (i32, i32) {
    %c0_i32 = arith.constant 0 : i32
    %c0_i32_0 = arith.constant 0 : i32
    %c0_i32_1 = arith.constant 0 : i32
    return %c0_i32, %c0_i32_0 : i32, i32
  }
  func.func @transform_3(%arg0: i32) -> (i32, i32) {
    %c0_i32 = arith.constant 0 : i32
    %c0_i32_0 = arith.constant 0 : i32
    %c0_i32_1 = arith.constant 0 : i32
    return %c0_i32, %c0_i32_0 : i32, i32
  }
  func.func @transform_4(%arg0: i32) -> (i32, i32, i32) {
    %c0_i32 = arith.constant 0 : i32
    %c0_i32_0 = arith.constant 0 : i32
    %c0_i32_1 = arith.constant 0 : i32
    %c0_i32_2 = arith.constant 0 : i32
    return %c0_i32, %c0_i32_0, %c0_i32_1 : i32, i32, i32
  }
  func.func @transform_5(%arg0: i32) -> (i32, i32, i32) {
    %c0_i32 = arith.constant 0 : i32
    %c0_i32_0 = arith.constant 0 : i32
    %c0_i32_1 = arith.constant 0 : i32
    %c0_i32_2 = arith.constant 0 : i32
    return %c0_i32, %c0_i32_0, %c0_i32_1 : i32, i32, i32
  }
  func.func @transform_6(%arg0: i32) -> (i32, i32, i32) {
    %c0_i32 = arith.constant 0 : i32
    %c0_i32_0 = arith.constant 0 : i32
    %c0_i32_1 = arith.constant 0 : i32
    %c0_i32_2 = arith.constant 0 : i32
    return %c0_i32, %c0_i32_0, %c0_i32_1 : i32, i32, i32
  }
}

module attributes {stable_mosaic.version = 11 : i64} {
  func.func @_transformer_kernel(%arg0: i32, %arg1: memref<64x32xf32, #tpu.memory_space<vmem>>, %arg2: memref<1x1x32xf32, #tpu.memory_space<vmem>>, %arg3: memref<1x1x32xf32, #tpu.memory_space<vmem>>, %arg4: memref<1x4x32x16xbf16, #tpu.memory_space<vmem>>, %arg5: memref<1x4x32x16xbf16, #tpu.memory_space<vmem>>, %arg6: memref<1x4x32x16xbf16, #tpu.memory_space<vmem>>, %arg7: memref<1x4x16x32xbf16, #tpu.memory_space<vmem>>, %arg8: memref<1x1x32xf32, #tpu.memory_space<vmem>>, %arg9: memref<1x1x32xf32, #tpu.memory_space<vmem>>, %arg10: memref<1x1x32xf32, #tpu.memory_space<vmem>>, %arg11: memref<1x32x128xbf16, #tpu.memory_space<vmem>>, %arg12: memref<1x1x128xf32, #tpu.memory_space<vmem>>, %arg13: memref<1x128x32xbf16, #tpu.memory_space<vmem>>, %arg14: memref<1x1x32xf32, #tpu.memory_space<vmem>>, %arg15: memref<1x32xf32, #tpu.memory_space<vmem>>, %arg16: memref<1x32xf32, #tpu.memory_space<vmem>>, %arg17: memref<64x32xf32, #tpu.memory_space<vmem>>) attributes {dimension_semantics = [#tpu.dimension_semantics<arbitrary>], iteration_bounds = array<i64: 1>, scalar_prefetch = 0 : i64, scratch_operands = 0 : i64, tpu.core_type = #tpu.core_type<tc>, window_params = [{pipeline_mode = #tpu.pipeline_mode<synchronous>, transform_indices = @transform_0, window_bounds = array<i64: 64, 32>}, {transform_indices = @transform_1, window_bounds = array<i64: 1, 1, 32>}, {transform_indices = @transform_2, window_bounds = array<i64: 1, 1, 32>}, {transform_indices = @transform_3, window_bounds = array<i64: 1, 4, 32, 16>}, {transform_indices = @transform_4, window_bounds = array<i64: 1, 4, 32, 16>}, {transform_indices = @transform_5, window_bounds = array<i64: 1, 4, 32, 16>}, {transform_indices = @transform_6, window_bounds = array<i64: 1, 4, 16, 32>}, {transform_indices = @transform_7, window_bounds = array<i64: 1, 1, 32>}, {transform_indices = @transform_8, window_bounds = array<i64: 1, 1, 32>}, {transform_indices = @transform_9, window_bounds = array<i64: 1, 1, 32>}, {transform_indices = @transform_10, window_bounds = array<i64: 1, 32, 128>}, {transform_indices = @transform_11, window_bounds = array<i64: 1, 1, 128>}, {transform_indices = @transform_12, window_bounds = array<i64: 1, 128, 32>}, {transform_indices = @transform_13, window_bounds = array<i64: 1, 1, 32>}, {pipeline_mode = #tpu.pipeline_mode<synchronous>, transform_indices = @transform_14, window_bounds = array<i64: 1, 32>}, {pipeline_mode = #tpu.pipeline_mode<synchronous>, transform_indices = @transform_15, window_bounds = array<i64: 1, 32>}, {pipeline_mode = #tpu.pipeline_mode<synchronous>, transform_indices = @transform_16, window_bounds = array<i64: 64, 32>}]} {
    %c0_i32 = arith.constant 0 : i32
    %0 = arith.cmpi eq, %arg0, %c0_i32 : i32
    %1 = arith.extui %0 : i1 to i32
    %c0_i32_0 = arith.constant 0 : i32
    %2 = arith.cmpi ne, %1, %c0_i32_0 : i32
    scf.if %2 {
      %c0_146 = arith.constant 0 : index
      %c0_147 = arith.constant 0 : index
      %243 = vector.load %arg1[%c0_146, %c0_147] : memref<64x32xf32, #tpu.memory_space<vmem>>, vector<64x32xf32>
      %c0_148 = arith.constant 0 : index
      %c0_149 = arith.constant 0 : index
      %244 = vector.load %arg17[%c0_148, %c0_149] : memref<64x32xf32, #tpu.memory_space<vmem>>, vector<64x32xf32>
      tpu.vector_store %arg17[%c0_148, %c0_149], %243 {strides = array<i32>} : memref<64x32xf32, #tpu.memory_space<vmem>>, vector<64x32xf32>,
    } else {
    }
    %c0 = arith.constant 0 : index
    %c0_1 = arith.constant 0 : index
    %3 = vector.load %arg17[%c0, %c0_1] : memref<64x32xf32, #tpu.memory_space<vmem>>, vector<64x32xf32>
    %c0_2 = arith.constant 0 : index
    %c0_3 = arith.constant 0 : index
    %c0_4 = arith.constant 0 : index
    %4 = vector.load %arg2[%c0_2, %c0_3, %c0_4] : memref<1x1x32xf32, #tpu.memory_space<vmem>>, vector<1x1x32xf32>
    %5 = vector.shape_cast %4 : vector<1x1x32xf32> to vector<1x32xf32>
    %c0_5 = arith.constant 0 : index
    %c0_6 = arith.constant 0 : index
    %c0_7 = arith.constant 0 : index
    %6 = vector.load %arg3[%c0_5, %c0_6, %c0_7] : memref<1x1x32xf32, #tpu.memory_space<vmem>>, vector<1x1x32xf32>
    %7 = vector.shape_cast %6 : vector<1x1x32xf32> to vector<1x32xf32>
    %cst = arith.constant dense<0.000000e+00> : vector<64xf32>
    %8 = vector.multi_reduction <add>, %3, %cst [1] : vector<64x32xf32> to vector<64xf32>
    %9 = vector.shape_cast %8 : vector<64xf32> to vector<64x1xf32>
    %cst_8 = arith.constant 3.200000e+01 : f32
    %10 = vector.broadcast %cst_8 : f32 to vector<64x1xf32>
    %11 = arith.divf %9, %10 : vector<64x1xf32>
    %12 = vector.broadcast %11 : vector<64x1xf32> to vector<64x32xf32>
    %13 = arith.subf %3, %12 : vector<64x32xf32>
    %14 = arith.mulf %13, %13 : vector<64x32xf32>
    %cst_9 = arith.constant dense<0.000000e+00> : vector<64xf32>
    %15 = vector.multi_reduction <add>, %14, %cst_9 [1] : vector<64x32xf32> to vector<64xf32>
    %16 = vector.shape_cast %15 : vector<64xf32> to vector<64x1xf32>
    %cst_10 = arith.constant 3.200000e+01 : f32
    %17 = vector.broadcast %cst_10 : f32 to vector<64x1xf32>
    %18 = arith.divf %16, %17 : vector<64x1xf32>
    %19 = vector.broadcast %11 : vector<64x1xf32> to vector<64x32xf32>
    %20 = arith.subf %3, %19 : vector<64x32xf32>
    %cst_11 = arith.constant 9.99999974E-6 : f32
    %21 = vector.broadcast %cst_11 : f32 to vector<64x1xf32>
    %22 = arith.addf %18, %21 : vector<64x1xf32>
    %23 = math.rsqrt %22 : vector<64x1xf32>
    %24 = vector.broadcast %23 : vector<64x1xf32> to vector<64x32xf32>
    %25 = arith.mulf %20, %24 : vector<64x32xf32>
    %26 = vector.broadcast %5 : vector<1x32xf32> to vector<64x32xf32>
    %27 = arith.mulf %25, %26 : vector<64x32xf32>
    %28 = vector.broadcast %7 : vector<1x32xf32> to vector<64x32xf32>
    %29 = arith.addf %27, %28 : vector<64x32xf32>
    %30 = arith.truncf %29 : vector<64x32xf32> to vector<64x32xbf16>
    %cst_12 = arith.constant 0.000000e+00 : f32
    %31 = vector.broadcast %cst_12 : f32 to vector<64x32xf32>
    %c0_13 = arith.constant 0 : index
    %c0_14 = arith.constant 0 : index
    %c0_15 = arith.constant 0 : index
    %c0_16 = arith.constant 0 : index
    %32 = vector.load %arg4[%c0_13, %c0_14, %c0_15, %c0_16] : memref<1x4x32x16xbf16, #tpu.memory_space<vmem>>, vector<1x1x32x16xbf16>
    %33 = vector.shape_cast %32 : vector<1x1x32x16xbf16> to vector<32x16xbf16>
    %cst_17 = arith.constant dense<0.000000e+00> : vector<64x16xf32>
    %34 = tpu.matmul %30, %33, %cst_17 {dimension_numbers = #tpu.dot_dimension_numbers<[1], [0], [0], [1], [0, 0, 1, 1], [], []>} : vector<64x32xbf16>, vector<32x16xbf16>, vector<64x16xf32> -> vector<64x16xf32>
    %c0_18 = arith.constant 0 : index
    %c0_19 = arith.constant 0 : index
    %c0_20 = arith.constant 0 : index
    %c0_21 = arith.constant 0 : index
    %35 = vector.load %arg5[%c0_18, %c0_19, %c0_20, %c0_21] : memref<1x4x32x16xbf16, #tpu.memory_space<vmem>>, vector<1x1x32x16xbf16>
    %36 = vector.shape_cast %35 : vector<1x1x32x16xbf16> to vector<32x16xbf16>
    %cst_22 = arith.constant dense<0.000000e+00> : vector<64x16xf32>
    %37 = tpu.matmul %30, %36, %cst_22 {dimension_numbers = #tpu.dot_dimension_numbers<[1], [0], [0], [1], [0, 0, 1, 1], [], []>} : vector<64x32xbf16>, vector<32x16xbf16>, vector<64x16xf32> -> vector<64x16xf32>
    %c0_23 = arith.constant 0 : index
    %c0_24 = arith.constant 0 : index
    %c0_25 = arith.constant 0 : index
    %c0_26 = arith.constant 0 : index
    %38 = vector.load %arg6[%c0_23, %c0_24, %c0_25, %c0_26] : memref<1x4x32x16xbf16, #tpu.memory_space<vmem>>, vector<1x1x32x16xbf16>
    %39 = vector.shape_cast %38 : vector<1x1x32x16xbf16> to vector<32x16xbf16>
    %cst_27 = arith.constant dense<0.000000e+00> : vector<64x16xf32>
    %40 = tpu.matmul %30, %39, %cst_27 {dimension_numbers = #tpu.dot_dimension_numbers<[1], [0], [0], [1], [0, 0, 1, 1], [], []>} : vector<64x32xbf16>, vector<32x16xbf16>, vector<64x16xf32> -> vector<64x16xf32>
    %41 = vector.shape_cast %34 : vector<64x16xf32> to vector<2x32x16xf32>
    %42 = arith.truncf %41 : vector<2x32x16xf32> to vector<2x32x16xbf16>
    %43 = vector.shape_cast %37 : vector<64x16xf32> to vector<2x32x16xf32>
    %44 = arith.truncf %43 : vector<2x32x16xf32> to vector<2x32x16xbf16>
    %45 = vector.shape_cast %40 : vector<64x16xf32> to vector<2x32x16xf32>
    %46 = arith.truncf %45 : vector<2x32x16xf32> to vector<2x32x16xbf16>
    "tpu.trace_start"() <{level = 10 : i32, message = "bqd,bkd->bqk"}> : () -> ()
    %cst_28 = arith.constant dense<0.000000e+00> : vector<2x32x32xf32>
    %47 = tpu.matmul %42, %44, %cst_28 {dimension_numbers = #tpu.dot_dimension_numbers<[2], [2], [1], [1], [0, 0, 0, 1, 1, 1], [0], [0]>} : vector<2x32x16xbf16>, vector<2x32x16xbf16>, vector<2x32x32xf32> -> vector<2x32x32xf32>
    "tpu.trace_stop"() : () -> ()
    %cst_29 = arith.constant 2.500000e-01 : f32
    %48 = vector.broadcast %cst_29 : f32 to vector<2x32x32xf32>
    %49 = arith.mulf %47, %48 : vector<2x32x32xf32>
    %cst_30 = arith.constant dense<0xFF800000> : vector<2x32xf32>
    %50 = vector.multi_reduction <maximumf>, %49, %cst_30 [2] : vector<2x32x32xf32> to vector<2x32xf32>
    %51 = vector.shape_cast %50 : vector<2x32xf32> to vector<2x32x1xf32>
    %52 = vector.broadcast %51 : vector<2x32x1xf32> to vector<2x32x32xf32>
    %53 = arith.subf %49, %52 : vector<2x32x32xf32>
    %54 = math.exp %53 : vector<2x32x32xf32>
    %cst_31 = arith.constant dense<0.000000e+00> : vector<2x32xf32>
    %55 = vector.multi_reduction <add>, %54, %cst_31 [2] : vector<2x32x32xf32> to vector<2x32xf32>
    %56 = vector.shape_cast %55 : vector<2x32xf32> to vector<2x32x1xf32>
    %57 = tpu.reciprocal %56 {approx = true} : vector<2x32x1xf32> -> vector<2x32x1xf32>
    %58 = vector.broadcast %57 : vector<2x32x1xf32> to vector<2x32x32xf32>
    %59 = arith.mulf %54, %58 : vector<2x32x32xf32>
    %60 = arith.truncf %59 : vector<2x32x32xf32> to vector<2x32x32xbf16>
    "tpu.trace_start"() <{level = 10 : i32, message = "bqk,bkd->bqd"}> : () -> ()
    %cst_32 = arith.constant dense<0.000000e+00> : vector<2x32x16xf32>
    %61 = tpu.matmul %60, %46, %cst_32 {dimension_numbers = #tpu.dot_dimension_numbers<[2], [1], [1], [2], [0, 0, 0, 1, 1, 2], [0], [0]>} : vector<2x32x32xbf16>, vector<2x32x16xbf16>, vector<2x32x16xf32> -> vector<2x32x16xf32>
    "tpu.trace_stop"() : () -> ()
    %62 = vector.shape_cast %61 : vector<2x32x16xf32> to vector<64x16xf32>
    %63 = arith.truncf %62 : vector<64x16xf32> to vector<64x16xbf16>
    %c0_33 = arith.constant 0 : index
    %c0_34 = arith.constant 0 : index
    %c0_35 = arith.constant 0 : index
    %c0_36 = arith.constant 0 : index
    %64 = vector.load %arg7[%c0_33, %c0_34, %c0_35, %c0_36] : memref<1x4x16x32xbf16, #tpu.memory_space<vmem>>, vector<1x1x16x32xbf16>
    %65 = vector.shape_cast %64 : vector<1x1x16x32xbf16> to vector<16x32xbf16>
    %cst_37 = arith.constant dense<0.000000e+00> : vector<64x32xf32>
    %66 = tpu.matmul %63, %65, %cst_37 {dimension_numbers = #tpu.dot_dimension_numbers<[1], [0], [0], [1], [0, 0, 1, 1], [], []>} : vector<64x16xbf16>, vector<16x32xbf16>, vector<64x32xf32> -> vector<64x32xf32>
    %67 = arith.addf %31, %66 : vector<64x32xf32>
    %c0_38 = arith.constant 0 : index
    %c1 = arith.constant 1 : index
    %c0_39 = arith.constant 0 : index
    %c0_40 = arith.constant 0 : index
    %68 = vector.load %arg4[%c0_38, %c1, %c0_39, %c0_40] : memref<1x4x32x16xbf16, #tpu.memory_space<vmem>>, vector<1x1x32x16xbf16>
    %69 = vector.shape_cast %68 : vector<1x1x32x16xbf16> to vector<32x16xbf16>
    %cst_41 = arith.constant dense<0.000000e+00> : vector<64x16xf32>
    %70 = tpu.matmul %30, %69, %cst_41 {dimension_numbers = #tpu.dot_dimension_numbers<[1], [0], [0], [1], [0, 0, 1, 1], [], []>} : vector<64x32xbf16>, vector<32x16xbf16>, vector<64x16xf32> -> vector<64x16xf32>
    %c0_42 = arith.constant 0 : index
    %c1_43 = arith.constant 1 : index
    %c0_44 = arith.constant 0 : index
    %c0_45 = arith.constant 0 : index
    %71 = vector.load %arg5[%c0_42, %c1_43, %c0_44, %c0_45] : memref<1x4x32x16xbf16, #tpu.memory_space<vmem>>, vector<1x1x32x16xbf16>
    %72 = vector.shape_cast %71 : vector<1x1x32x16xbf16> to vector<32x16xbf16>
    %cst_46 = arith.constant dense<0.000000e+00> : vector<64x16xf32>
    %73 = tpu.matmul %30, %72, %cst_46 {dimension_numbers = #tpu.dot_dimension_numbers<[1], [0], [0], [1], [0, 0, 1, 1], [], []>} : vector<64x32xbf16>, vector<32x16xbf16>, vector<64x16xf32> -> vector<64x16xf32>
    %c0_47 = arith.constant 0 : index
    %c1_48 = arith.constant 1 : index
    %c0_49 = arith.constant 0 : index
    %c0_50 = arith.constant 0 : index
    %74 = vector.load %arg6[%c0_47, %c1_48, %c0_49, %c0_50] : memref<1x4x32x16xbf16, #tpu.memory_space<vmem>>, vector<1x1x32x16xbf16>
    %75 = vector.shape_cast %74 : vector<1x1x32x16xbf16> to vector<32x16xbf16>
    %cst_51 = arith.constant dense<0.000000e+00> : vector<64x16xf32>
    %76 = tpu.matmul %30, %75, %cst_51 {dimension_numbers = #tpu.dot_dimension_numbers<[1], [0], [0], [1], [0, 0, 1, 1], [], []>} : vector<64x32xbf16>, vector<32x16xbf16>, vector<64x16xf32> -> vector<64x16xf32>
    %77 = vector.shape_cast %70 : vector<64x16xf32> to vector<2x32x16xf32>
    %78 = arith.truncf %77 : vector<2x32x16xf32> to vector<2x32x16xbf16>
    %79 = vector.shape_cast %73 : vector<64x16xf32> to vector<2x32x16xf32>
    %80 = arith.truncf %79 : vector<2x32x16xf32> to vector<2x32x16xbf16>
    %81 = vector.shape_cast %76 : vector<64x16xf32> to vector<2x32x16xf32>
    %82 = arith.truncf %81 : vector<2x32x16xf32> to vector<2x32x16xbf16>
    "tpu.trace_start"() <{level = 10 : i32, message = "bqd,bkd->bqk"}> : () -> ()
    %cst_52 = arith.constant dense<0.000000e+00> : vector<2x32x32xf32>
    %83 = tpu.matmul %78, %80, %cst_52 {dimension_numbers = #tpu.dot_dimension_numbers<[2], [2], [1], [1], [0, 0, 0, 1, 1, 1], [0], [0]>} : vector<2x32x16xbf16>, vector<2x32x16xbf16>, vector<2x32x32xf32> -> vector<2x32x32xf32>
    "tpu.trace_stop"() : () -> ()
    %cst_53 = arith.constant 2.500000e-01 : f32
    %84 = vector.broadcast %cst_53 : f32 to vector<2x32x32xf32>
    %85 = arith.mulf %83, %84 : vector<2x32x32xf32>
    %cst_54 = arith.constant dense<0xFF800000> : vector<2x32xf32>
    %86 = vector.multi_reduction <maximumf>, %85, %cst_54 [2] : vector<2x32x32xf32> to vector<2x32xf32>
    %87 = vector.shape_cast %86 : vector<2x32xf32> to vector<2x32x1xf32>
    %88 = vector.broadcast %87 : vector<2x32x1xf32> to vector<2x32x32xf32>
    %89 = arith.subf %85, %88 : vector<2x32x32xf32>
    %90 = math.exp %89 : vector<2x32x32xf32>
    %cst_55 = arith.constant dense<0.000000e+00> : vector<2x32xf32>
    %91 = vector.multi_reduction <add>, %90, %cst_55 [2] : vector<2x32x32xf32> to vector<2x32xf32>
    %92 = vector.shape_cast %91 : vector<2x32xf32> to vector<2x32x1xf32>
    %93 = tpu.reciprocal %92 {approx = true} : vector<2x32x1xf32> -> vector<2x32x1xf32>
    %94 = vector.broadcast %93 : vector<2x32x1xf32> to vector<2x32x32xf32>
    %95 = arith.mulf %90, %94 : vector<2x32x32xf32>
    %96 = arith.truncf %95 : vector<2x32x32xf32> to vector<2x32x32xbf16>
    "tpu.trace_start"() <{level = 10 : i32, message = "bqk,bkd->bqd"}> : () -> ()
    %cst_56 = arith.constant dense<0.000000e+00> : vector<2x32x16xf32>
    %97 = tpu.matmul %96, %82, %cst_56 {dimension_numbers = #tpu.dot_dimension_numbers<[2], [1], [1], [2], [0, 0, 0, 1, 1, 2], [0], [0]>} : vector<2x32x32xbf16>, vector<2x32x16xbf16>, vector<2x32x16xf32> -> vector<2x32x16xf32>
    "tpu.trace_stop"() : () -> ()
    %98 = vector.shape_cast %97 : vector<2x32x16xf32> to vector<64x16xf32>
    %99 = arith.truncf %98 : vector<64x16xf32> to vector<64x16xbf16>
    %c0_57 = arith.constant 0 : index
    %c1_58 = arith.constant 1 : index
    %c0_59 = arith.constant 0 : index
    %c0_60 = arith.constant 0 : index
    %100 = vector.load %arg7[%c0_57, %c1_58, %c0_59, %c0_60] : memref<1x4x16x32xbf16, #tpu.memory_space<vmem>>, vector<1x1x16x32xbf16>
    %101 = vector.shape_cast %100 : vector<1x1x16x32xbf16> to vector<16x32xbf16>
    %cst_61 = arith.constant dense<0.000000e+00> : vector<64x32xf32>
    %102 = tpu.matmul %99, %101, %cst_61 {dimension_numbers = #tpu.dot_dimension_numbers<[1], [0], [0], [1], [0, 0, 1, 1], [], []>} : vector<64x16xbf16>, vector<16x32xbf16>, vector<64x32xf32> -> vector<64x32xf32>
    %103 = arith.addf %67, %102 : vector<64x32xf32>
    %c0_62 = arith.constant 0 : index
    %c2 = arith.constant 2 : index
    %c0_63 = arith.constant 0 : index
    %c0_64 = arith.constant 0 : index
    %104 = vector.load %arg4[%c0_62, %c2, %c0_63, %c0_64] : memref<1x4x32x16xbf16, #tpu.memory_space<vmem>>, vector<1x1x32x16xbf16>
    %105 = vector.shape_cast %104 : vector<1x1x32x16xbf16> to vector<32x16xbf16>
    %cst_65 = arith.constant dense<0.000000e+00> : vector<64x16xf32>
    %106 = tpu.matmul %30, %105, %cst_65 {dimension_numbers = #tpu.dot_dimension_numbers<[1], [0], [0], [1], [0, 0, 1, 1], [], []>} : vector<64x32xbf16>, vector<32x16xbf16>, vector<64x16xf32> -> vector<64x16xf32>
    %c0_66 = arith.constant 0 : index
    %c2_67 = arith.constant 2 : index
    %c0_68 = arith.constant 0 : index
    %c0_69 = arith.constant 0 : index
    %107 = vector.load %arg5[%c0_66, %c2_67, %c0_68, %c0_69] : memref<1x4x32x16xbf16, #tpu.memory_space<vmem>>, vector<1x1x32x16xbf16>
    %108 = vector.shape_cast %107 : vector<1x1x32x16xbf16> to vector<32x16xbf16>
    %cst_70 = arith.constant dense<0.000000e+00> : vector<64x16xf32>
    %109 = tpu.matmul %30, %108, %cst_70 {dimension_numbers = #tpu.dot_dimension_numbers<[1], [0], [0], [1], [0, 0, 1, 1], [], []>} : vector<64x32xbf16>, vector<32x16xbf16>, vector<64x16xf32> -> vector<64x16xf32>
    %c0_71 = arith.constant 0 : index
    %c2_72 = arith.constant 2 : index
    %c0_73 = arith.constant 0 : index
    %c0_74 = arith.constant 0 : index
    %110 = vector.load %arg6[%c0_71, %c2_72, %c0_73, %c0_74] : memref<1x4x32x16xbf16, #tpu.memory_space<vmem>>, vector<1x1x32x16xbf16>
    %111 = vector.shape_cast %110 : vector<1x1x32x16xbf16> to vector<32x16xbf16>
    %cst_75 = arith.constant dense<0.000000e+00> : vector<64x16xf32>
    %112 = tpu.matmul %30, %111, %cst_75 {dimension_numbers = #tpu.dot_dimension_numbers<[1], [0], [0], [1], [0, 0, 1, 1], [], []>} : vector<64x32xbf16>, vector<32x16xbf16>, vector<64x16xf32> -> vector<64x16xf32>
    %113 = vector.shape_cast %106 : vector<64x16xf32> to vector<2x32x16xf32>
    %114 = arith.truncf %113 : vector<2x32x16xf32> to vector<2x32x16xbf16>
    %115 = vector.shape_cast %109 : vector<64x16xf32> to vector<2x32x16xf32>
    %116 = arith.truncf %115 : vector<2x32x16xf32> to vector<2x32x16xbf16>
    %117 = vector.shape_cast %112 : vector<64x16xf32> to vector<2x32x16xf32>
    %118 = arith.truncf %117 : vector<2x32x16xf32> to vector<2x32x16xbf16>
    "tpu.trace_start"() <{level = 10 : i32, message = "bqd,bkd->bqk"}> : () -> ()
    %cst_76 = arith.constant dense<0.000000e+00> : vector<2x32x32xf32>
    %119 = tpu.matmul %114, %116, %cst_76 {dimension_numbers = #tpu.dot_dimension_numbers<[2], [2], [1], [1], [0, 0, 0, 1, 1, 1], [0], [0]>} : vector<2x32x16xbf16>, vector<2x32x16xbf16>, vector<2x32x32xf32> -> vector<2x32x32xf32>
    "tpu.trace_stop"() : () -> ()
    %cst_77 = arith.constant 2.500000e-01 : f32
    %120 = vector.broadcast %cst_77 : f32 to vector<2x32x32xf32>
    %121 = arith.mulf %119, %120 : vector<2x32x32xf32>
    %cst_78 = arith.constant dense<0xFF800000> : vector<2x32xf32>
    %122 = vector.multi_reduction <maximumf>, %121, %cst_78 [2] : vector<2x32x32xf32> to vector<2x32xf32>
    %123 = vector.shape_cast %122 : vector<2x32xf32> to vector<2x32x1xf32>
    %124 = vector.broadcast %123 : vector<2x32x1xf32> to vector<2x32x32xf32>
    %125 = arith.subf %121, %124 : vector<2x32x32xf32>
    %126 = math.exp %125 : vector<2x32x32xf32>
    %cst_79 = arith.constant dense<0.000000e+00> : vector<2x32xf32>
    %127 = vector.multi_reduction <add>, %126, %cst_79 [2] : vector<2x32x32xf32> to vector<2x32xf32>
    %128 = vector.shape_cast %127 : vector<2x32xf32> to vector<2x32x1xf32>
    %129 = tpu.reciprocal %128 {approx = true} : vector<2x32x1xf32> -> vector<2x32x1xf32>
    %130 = vector.broadcast %129 : vector<2x32x1xf32> to vector<2x32x32xf32>
    %131 = arith.mulf %126, %130 : vector<2x32x32xf32>
    %132 = arith.truncf %131 : vector<2x32x32xf32> to vector<2x32x32xbf16>
    "tpu.trace_start"() <{level = 10 : i32, message = "bqk,bkd->bqd"}> : () -> ()
    %cst_80 = arith.constant dense<0.000000e+00> : vector<2x32x16xf32>
    %133 = tpu.matmul %132, %118, %cst_80 {dimension_numbers = #tpu.dot_dimension_numbers<[2], [1], [1], [2], [0, 0, 0, 1, 1, 2], [0], [0]>} : vector<2x32x32xbf16>, vector<2x32x16xbf16>, vector<2x32x16xf32> -> vector<2x32x16xf32>
    "tpu.trace_stop"() : () -> ()
    %134 = vector.shape_cast %133 : vector<2x32x16xf32> to vector<64x16xf32>
    %135 = arith.truncf %134 : vector<64x16xf32> to vector<64x16xbf16>
    %c0_81 = arith.constant 0 : index
    %c2_82 = arith.constant 2 : index
    %c0_83 = arith.constant 0 : index
    %c0_84 = arith.constant 0 : index
    %136 = vector.load %arg7[%c0_81, %c2_82, %c0_83, %c0_84] : memref<1x4x16x32xbf16, #tpu.memory_space<vmem>>, vector<1x1x16x32xbf16>
    %137 = vector.shape_cast %136 : vector<1x1x16x32xbf16> to vector<16x32xbf16>
    %cst_85 = arith.constant dense<0.000000e+00> : vector<64x32xf32>
    %138 = tpu.matmul %135, %137, %cst_85 {dimension_numbers = #tpu.dot_dimension_numbers<[1], [0], [0], [1], [0, 0, 1, 1], [], []>} : vector<64x16xbf16>, vector<16x32xbf16>, vector<64x32xf32> -> vector<64x32xf32>
    %139 = arith.addf %103, %138 : vector<64x32xf32>
    %c0_86 = arith.constant 0 : index
    %c3 = arith.constant 3 : index
    %c0_87 = arith.constant 0 : index
    %c0_88 = arith.constant 0 : index
    %140 = vector.load %arg4[%c0_86, %c3, %c0_87, %c0_88] : memref<1x4x32x16xbf16, #tpu.memory_space<vmem>>, vector<1x1x32x16xbf16>
    %141 = vector.shape_cast %140 : vector<1x1x32x16xbf16> to vector<32x16xbf16>
    %cst_89 = arith.constant dense<0.000000e+00> : vector<64x16xf32>
    %142 = tpu.matmul %30, %141, %cst_89 {dimension_numbers = #tpu.dot_dimension_numbers<[1], [0], [0], [1], [0, 0, 1, 1], [], []>} : vector<64x32xbf16>, vector<32x16xbf16>, vector<64x16xf32> -> vector<64x16xf32>
    %c0_90 = arith.constant 0 : index
    %c3_91 = arith.constant 3 : index
    %c0_92 = arith.constant 0 : index
    %c0_93 = arith.constant 0 : index
    %143 = vector.load %arg5[%c0_90, %c3_91, %c0_92, %c0_93] : memref<1x4x32x16xbf16, #tpu.memory_space<vmem>>, vector<1x1x32x16xbf16>
    %144 = vector.shape_cast %143 : vector<1x1x32x16xbf16> to vector<32x16xbf16>
    %cst_94 = arith.constant dense<0.000000e+00> : vector<64x16xf32>
    %145 = tpu.matmul %30, %144, %cst_94 {dimension_numbers = #tpu.dot_dimension_numbers<[1], [0], [0], [1], [0, 0, 1, 1], [], []>} : vector<64x32xbf16>, vector<32x16xbf16>, vector<64x16xf32> -> vector<64x16xf32>
    %c0_95 = arith.constant 0 : index
    %c3_96 = arith.constant 3 : index
    %c0_97 = arith.constant 0 : index
    %c0_98 = arith.constant 0 : index
    %146 = vector.load %arg6[%c0_95, %c3_96, %c0_97, %c0_98] : memref<1x4x32x16xbf16, #tpu.memory_space<vmem>>, vector<1x1x32x16xbf16>
    %147 = vector.shape_cast %146 : vector<1x1x32x16xbf16> to vector<32x16xbf16>
    %cst_99 = arith.constant dense<0.000000e+00> : vector<64x16xf32>
    %148 = tpu.matmul %30, %147, %cst_99 {dimension_numbers = #tpu.dot_dimension_numbers<[1], [0], [0], [1], [0, 0, 1, 1], [], []>} : vector<64x32xbf16>, vector<32x16xbf16>, vector<64x16xf32> -> vector<64x16xf32>
    %149 = vector.shape_cast %142 : vector<64x16xf32> to vector<2x32x16xf32>
    %150 = arith.truncf %149 : vector<2x32x16xf32> to vector<2x32x16xbf16>
    %151 = vector.shape_cast %145 : vector<64x16xf32> to vector<2x32x16xf32>
    %152 = arith.truncf %151 : vector<2x32x16xf32> to vector<2x32x16xbf16>
    %153 = vector.shape_cast %148 : vector<64x16xf32> to vector<2x32x16xf32>
    %154 = arith.truncf %153 : vector<2x32x16xf32> to vector<2x32x16xbf16>
    "tpu.trace_start"() <{level = 10 : i32, message = "bqd,bkd->bqk"}> : () -> ()
    %cst_100 = arith.constant dense<0.000000e+00> : vector<2x32x32xf32>
    %155 = tpu.matmul %150, %152, %cst_100 {dimension_numbers = #tpu.dot_dimension_numbers<[2], [2], [1], [1], [0, 0, 0, 1, 1, 1], [0], [0]>} : vector<2x32x16xbf16>, vector<2x32x16xbf16>, vector<2x32x32xf32> -> vector<2x32x32xf32>
    "tpu.trace_stop"() : () -> ()
    %cst_101 = arith.constant 2.500000e-01 : f32
    %156 = vector.broadcast %cst_101 : f32 to vector<2x32x32xf32>
    %157 = arith.mulf %155, %156 : vector<2x32x32xf32>
    %cst_102 = arith.constant dense<0xFF800000> : vector<2x32xf32>
    %158 = vector.multi_reduction <maximumf>, %157, %cst_102 [2] : vector<2x32x32xf32> to vector<2x32xf32>
    %159 = vector.shape_cast %158 : vector<2x32xf32> to vector<2x32x1xf32>
    %160 = vector.broadcast %159 : vector<2x32x1xf32> to vector<2x32x32xf32>
    %161 = arith.subf %157, %160 : vector<2x32x32xf32>
    %162 = math.exp %161 : vector<2x32x32xf32>
    %cst_103 = arith.constant dense<0.000000e+00> : vector<2x32xf32>
    %163 = vector.multi_reduction <add>, %162, %cst_103 [2] : vector<2x32x32xf32> to vector<2x32xf32>
    %164 = vector.shape_cast %163 : vector<2x32xf32> to vector<2x32x1xf32>
    %165 = tpu.reciprocal %164 {approx = true} : vector<2x32x1xf32> -> vector<2x32x1xf32>
    %166 = vector.broadcast %165 : vector<2x32x1xf32> to vector<2x32x32xf32>
    %167 = arith.mulf %162, %166 : vector<2x32x32xf32>
    %168 = arith.truncf %167 : vector<2x32x32xf32> to vector<2x32x32xbf16>
    "tpu.trace_start"() <{level = 10 : i32, message = "bqk,bkd->bqd"}> : () -> ()
    %cst_104 = arith.constant dense<0.000000e+00> : vector<2x32x16xf32>
    %169 = tpu.matmul %168, %154, %cst_104 {dimension_numbers = #tpu.dot_dimension_numbers<[2], [1], [1], [2], [0, 0, 0, 1, 1, 2], [0], [0]>} : vector<2x32x32xbf16>, vector<2x32x16xbf16>, vector<2x32x16xf32> -> vector<2x32x16xf32>
    "tpu.trace_stop"() : () -> ()
    %170 = vector.shape_cast %169 : vector<2x32x16xf32> to vector<64x16xf32>
    %171 = arith.truncf %170 : vector<64x16xf32> to vector<64x16xbf16>
    %c0_105 = arith.constant 0 : index
    %c3_106 = arith.constant 3 : index
    %c0_107 = arith.constant 0 : index
    %c0_108 = arith.constant 0 : index
    %172 = vector.load %arg7[%c0_105, %c3_106, %c0_107, %c0_108] : memref<1x4x16x32xbf16, #tpu.memory_space<vmem>>, vector<1x1x16x32xbf16>
    %173 = vector.shape_cast %172 : vector<1x1x16x32xbf16> to vector<16x32xbf16>
    %cst_109 = arith.constant dense<0.000000e+00> : vector<64x32xf32>
    %174 = tpu.matmul %171, %173, %cst_109 {dimension_numbers = #tpu.dot_dimension_numbers<[1], [0], [0], [1], [0, 0, 1, 1], [], []>} : vector<64x16xbf16>, vector<16x32xbf16>, vector<64x32xf32> -> vector<64x32xf32>
    %175 = arith.addf %139, %174 : vector<64x32xf32>
    %176 = arith.addf %3, %175 : vector<64x32xf32>
    %c0_110 = arith.constant 0 : index
    %c0_111 = arith.constant 0 : index
    %c0_112 = arith.constant 0 : index
    %177 = vector.load %arg8[%c0_110, %c0_111, %c0_112] : memref<1x1x32xf32, #tpu.memory_space<vmem>>, vector<1x1x32xf32>
    %178 = vector.shape_cast %177 : vector<1x1x32xf32> to vector<1x32xf32>
    %179 = vector.broadcast %178 : vector<1x32xf32> to vector<64x32xf32>
    %180 = arith.addf %176, %179 : vector<64x32xf32>
    %c0_113 = arith.constant 0 : index
    %c0_114 = arith.constant 0 : index
    %c0_115 = arith.constant 0 : index
    %181 = vector.load %arg9[%c0_113, %c0_114, %c0_115] : memref<1x1x32xf32, #tpu.memory_space<vmem>>, vector<1x1x32xf32>
    %182 = vector.shape_cast %181 : vector<1x1x32xf32> to vector<1x32xf32>
    %c0_116 = arith.constant 0 : index
    %c0_117 = arith.constant 0 : index
    %c0_118 = arith.constant 0 : index
    %183 = vector.load %arg10[%c0_116, %c0_117, %c0_118] : memref<1x1x32xf32, #tpu.memory_space<vmem>>, vector<1x1x32xf32>
    %184 = vector.shape_cast %183 : vector<1x1x32xf32> to vector<1x32xf32>
    %cst_119 = arith.constant dense<0.000000e+00> : vector<64xf32>
    %185 = vector.multi_reduction <add>, %180, %cst_119 [1] : vector<64x32xf32> to vector<64xf32>
    %186 = vector.shape_cast %185 : vector<64xf32> to vector<64x1xf32>
    %cst_120 = arith.constant 3.200000e+01 : f32
    %187 = vector.broadcast %cst_120 : f32 to vector<64x1xf32>
    %188 = arith.divf %186, %187 : vector<64x1xf32>
    %189 = vector.broadcast %188 : vector<64x1xf32> to vector<64x32xf32>
    %190 = arith.subf %180, %189 : vector<64x32xf32>
    %191 = arith.mulf %190, %190 : vector<64x32xf32>
    %cst_121 = arith.constant dense<0.000000e+00> : vector<64xf32>
    %192 = vector.multi_reduction <add>, %191, %cst_121 [1] : vector<64x32xf32> to vector<64xf32>
    %193 = vector.shape_cast %192 : vector<64xf32> to vector<64x1xf32>
    %cst_122 = arith.constant 3.200000e+01 : f32
    %194 = vector.broadcast %cst_122 : f32 to vector<64x1xf32>
    %195 = arith.divf %193, %194 : vector<64x1xf32>
    %196 = vector.broadcast %188 : vector<64x1xf32> to vector<64x32xf32>
    %197 = arith.subf %180, %196 : vector<64x32xf32>
    %cst_123 = arith.constant 9.99999974E-6 : f32
    %198 = vector.broadcast %cst_123 : f32 to vector<64x1xf32>
    %199 = arith.addf %195, %198 : vector<64x1xf32>
    %200 = math.rsqrt %199 : vector<64x1xf32>
    %201 = vector.broadcast %200 : vector<64x1xf32> to vector<64x32xf32>
    %202 = arith.mulf %197, %201 : vector<64x32xf32>
    %203 = vector.broadcast %182 : vector<1x32xf32> to vector<64x32xf32>
    %204 = arith.mulf %202, %203 : vector<64x32xf32>
    %205 = vector.broadcast %184 : vector<1x32xf32> to vector<64x32xf32>
    %206 = arith.addf %204, %205 : vector<64x32xf32>
    %207 = arith.truncf %206 : vector<64x32xf32> to vector<64x32xbf16>
    %c0_124 = arith.constant 0 : index
    %c0_125 = arith.constant 0 : index
    %c0_126 = arith.constant 0 : index
    %208 = vector.load %arg11[%c0_124, %c0_125, %c0_126] : memref<1x32x128xbf16, #tpu.memory_space<vmem>>, vector<1x32x128xbf16>
    %209 = vector.shape_cast %208 : vector<1x32x128xbf16> to vector<32x128xbf16>
    %cst_127 = arith.constant dense<0.000000e+00> : vector<64x128xf32>
    %210 = tpu.matmul %207, %209, %cst_127 {dimension_numbers = #tpu.dot_dimension_numbers<[1], [0], [0], [1], [0, 0, 1, 1], [], []>} : vector<64x32xbf16>, vector<32x128xbf16>, vector<64x128xf32> -> vector<64x128xf32>
    %c0_128 = arith.constant 0 : index
    %c0_129 = arith.constant 0 : index
    %c0_130 = arith.constant 0 : index
    %211 = vector.load %arg12[%c0_128, %c0_129, %c0_130] : memref<1x1x128xf32, #tpu.memory_space<vmem>>, vector<1x1x128xf32>
    %212 = vector.shape_cast %211 : vector<1x1x128xf32> to vector<1x128xf32>
    %213 = vector.broadcast %212 : vector<1x128xf32> to vector<64x128xf32>
    %214 = arith.addf %210, %213 : vector<64x128xf32>
    %215 = arith.mulf %214, %214 : vector<64x128xf32>
    %216 = arith.mulf %214, %215 : vector<64x128xf32>
    %cst_131 = arith.constant 4.471500e-02 : f32
    %217 = vector.broadcast %cst_131 : f32 to vector<64x128xf32>
    %218 = arith.mulf %217, %216 : vector<64x128xf32>
    %219 = arith.addf %214, %218 : vector<64x128xf32>
    %cst_132 = arith.constant 0.797884583 : f32
    %220 = vector.broadcast %cst_132 : f32 to vector<64x128xf32>
    %221 = arith.mulf %220, %219 : vector<64x128xf32>
    %222 = math.tanh %221 : vector<64x128xf32>
    %cst_133 = arith.constant 1.000000e+00 : f32
    %223 = vector.broadcast %cst_133 : f32 to vector<64x128xf32>
    %224 = arith.addf %223, %222 : vector<64x128xf32>
    %cst_134 = arith.constant 5.000000e-01 : f32
    %225 = vector.broadcast %cst_134 : f32 to vector<64x128xf32>
    %226 = arith.mulf %225, %224 : vector<64x128xf32>
    %227 = arith.mulf %214, %226 : vector<64x128xf32>
    %228 = arith.truncf %227 : vector<64x128xf32> to vector<64x128xbf16>
    %c0_135 = arith.constant 0 : index
    %c0_136 = arith.constant 0 : index
    %c0_137 = arith.constant 0 : index
    %229 = vector.load %arg13[%c0_135, %c0_136, %c0_137] : memref<1x128x32xbf16, #tpu.memory_space<vmem>>, vector<1x128x32xbf16>
    %230 = vector.shape_cast %229 : vector<1x128x32xbf16> to vector<128x32xbf16>
    %cst_138 = arith.constant dense<0.000000e+00> : vector<64x32xf32>
    %231 = tpu.matmul %228, %230, %cst_138 {dimension_numbers = #tpu.dot_dimension_numbers<[1], [0], [0], [1], [0, 0, 1, 1], [], []>} : vector<64x128xbf16>, vector<128x32xbf16>, vector<64x32xf32> -> vector<64x32xf32>
    %232 = arith.addf %180, %231 : vector<64x32xf32>
    %c0_139 = arith.constant 0 : index
    %c0_140 = arith.constant 0 : index
    %c0_141 = arith.constant 0 : index
    %233 = vector.load %arg14[%c0_139, %c0_140, %c0_141] : memref<1x1x32xf32, #tpu.memory_space<vmem>>, vector<1x1x32xf32>
    %234 = vector.shape_cast %233 : vector<1x1x32xf32> to vector<1x32xf32>
    %235 = vector.broadcast %234 : vector<1x32xf32> to vector<64x32xf32>
    %236 = arith.addf %232, %235 : vector<64x32xf32>
    %c0_i32_142 = arith.constant 0 : i32
    %237 = arith.cmpi slt, %arg0, %c0_i32_142 : i32
    %238 = arith.extui %237 : i1 to i32
    %c0_i32_143 = arith.constant 0 : i32
    %239 = arith.cmpi ne, %238, %c0_i32_143 : i32
    scf.if %239 {
      %c0_146 = arith.constant 0 : index
      %c0_147 = arith.constant 0 : index
      %243 = vector.load %arg17[%c0_146, %c0_147] : memref<64x32xf32, #tpu.memory_space<vmem>>, vector<64x32xf32>
      tpu.vector_store %arg17[%c0_146, %c0_147], %236 {strides = array<i32>} : memref<64x32xf32, #tpu.memory_space<vmem>>, vector<64x32xf32>,
    } else {
    }
    %c0_i32_144 = arith.constant 0 : i32
    %240 = arith.cmpi eq, %arg0, %c0_i32_144 : i32
    %241 = arith.extui %240 : i1 to i32
    %c0_i32_145 = arith.constant 0 : i32
    %242 = arith.cmpi ne, %241, %c0_i32_145 : i32
    scf.if %242 {
      %c0_146 = arith.constant 0 : index
      %c0_147 = arith.constant 0 : index
      %243 = vector.load %arg15[%c0_146, %c0_147] : memref<1x32xf32, #tpu.memory_space<vmem>>, vector<1x32xf32>
      %c0_148 = arith.constant 0 : index
      %c0_149 = arith.constant 0 : index
      %244 = vector.load %arg16[%c0_148, %c0_149] : memref<1x32xf32, #tpu.memory_space<vmem>>, vector<1x32xf32>
      %cst_150 = arith.constant dense<0.000000e+00> : vector<64xf32>
      %245 = vector.multi_reduction <add>, %236, %cst_150 [1] : vector<64x32xf32> to vector<64xf32>
      %246 = vector.shape_cast %245 : vector<64xf32> to vector<64x1xf32>
      %cst_151 = arith.constant 3.200000e+01 : f32
      %247 = vector.broadcast %cst_151 : f32 to vector<64x1xf32>
      %248 = arith.divf %246, %247 : vector<64x1xf32>
      %249 = vector.broadcast %248 : vector<64x1xf32> to vector<64x32xf32>
      %250 = arith.subf %236, %249 : vector<64x32xf32>
      %251 = arith.mulf %250, %250 : vector<64x32xf32>
      %cst_152 = arith.constant dense<0.000000e+00> : vector<64xf32>
      %252 = vector.multi_reduction <add>, %251, %cst_152 [1] : vector<64x32xf32> to vector<64xf32>
      %253 = vector.shape_cast %252 : vector<64xf32> to vector<64x1xf32>
      %cst_153 = arith.constant 3.200000e+01 : f32
      %254 = vector.broadcast %cst_153 : f32 to vector<64x1xf32>
      %255 = arith.divf %253, %254 : vector<64x1xf32>
      %256 = vector.broadcast %248 : vector<64x1xf32> to vector<64x32xf32>
      %257 = arith.subf %236, %256 : vector<64x32xf32>
      %cst_154 = arith.constant 9.99999974E-6 : f32
      %258 = vector.broadcast %cst_154 : f32 to vector<64x1xf32>
      %259 = arith.addf %255, %258 : vector<64x1xf32>
      %260 = math.rsqrt %259 : vector<64x1xf32>
      %261 = vector.broadcast %260 : vector<64x1xf32> to vector<64x32xf32>
      %262 = arith.mulf %257, %261 : vector<64x32xf32>
      %263 = vector.broadcast %243 : vector<1x32xf32> to vector<64x32xf32>
      %264 = arith.mulf %262, %263 : vector<64x32xf32>
      %265 = vector.broadcast %244 : vector<1x32xf32> to vector<64x32xf32>
      %266 = arith.addf %264, %265 : vector<64x32xf32>
      %c0_155 = arith.constant 0 : index
      %c0_156 = arith.constant 0 : index
      %267 = vector.load %arg17[%c0_155, %c0_156] : memref<64x32xf32, #tpu.memory_space<vmem>>, vector<64x32xf32>
      tpu.vector_store %arg17[%c0_155, %c0_156], %266 {strides = array<i32>} : memref<64x32xf32, #tpu.memory_space<vmem>>, vector<64x32xf32>,
    } else {
    }
    return
  }
  func.func @transform_0(%arg0: i32) -> (i32, i32) {
    %c0_i32 = arith.constant 0 : i32
    %c0_i32_0 = arith.constant 0 : i32
    %c0_i32_1 = arith.constant 0 : i32
    return %c0_i32, %c0_i32_0 : i32, i32
  }
  func.func @transform_1(%arg0: i32) -> (i32, i32, i32) {
    %c0_i32 = arith.constant 0 : i32
    %c0_i32_0 = arith.constant 0 : i32
    %c0_i32_1 = arith.constant 0 : i32
    return %arg0, %c0_i32, %c0_i32_0 : i32, i32, i32
  }
  func.func @transform_2(%arg0: i32) -> (i32, i32, i32) {
    %c0_i32 = arith.constant 0 : i32
    %c0_i32_0 = arith.constant 0 : i32
    %c0_i32_1 = arith.constant 0 : i32
    return %arg0, %c0_i32, %c0_i32_0 : i32, i32, i32
  }
  func.func @transform_3(%arg0: i32) -> (i32, i32, i32, i32) {
    %c0_i32 = arith.constant 0 : i32
    %c0_i32_0 = arith.constant 0 : i32
    %c0_i32_1 = arith.constant 0 : i32
    %c0_i32_2 = arith.constant 0 : i32
    return %arg0, %c0_i32, %c0_i32_0, %c0_i32_1 : i32, i32, i32, i32
  }
  func.func @transform_4(%arg0: i32) -> (i32, i32, i32, i32) {
    %c0_i32 = arith.constant 0 : i32
    %c0_i32_0 = arith.constant 0 : i32
    %c0_i32_1 = arith.constant 0 : i32
    %c0_i32_2 = arith.constant 0 : i32
    return %arg0, %c0_i32, %c0_i32_0, %c0_i32_1 : i32, i32, i32, i32
  }
  func.func @transform_5(%arg0: i32) -> (i32, i32, i32, i32) {
    %c0_i32 = arith.constant 0 : i32
    %c0_i32_0 = arith.constant 0 : i32
    %c0_i32_1 = arith.constant 0 : i32
    %c0_i32_2 = arith.constant 0 : i32
    return %arg0, %c0_i32, %c0_i32_0, %c0_i32_1 : i32, i32, i32, i32
  }
  func.func @transform_6(%arg0: i32) -> (i32, i32, i32, i32) {
    %c0_i32 = arith.constant 0 : i32
    %c0_i32_0 = arith.constant 0 : i32
    %c0_i32_1 = arith.constant 0 : i32
    %c0_i32_2 = arith.constant 0 : i32
    return %arg0, %c0_i32, %c0_i32_0, %c0_i32_1 : i32, i32, i32, i32
  }
  func.func @transform_7(%arg0: i32) -> (i32, i32, i32) {
    %c0_i32 = arith.constant 0 : i32
    %c0_i32_0 = arith.constant 0 : i32
    %c0_i32_1 = arith.constant 0 : i32
    return %arg0, %c0_i32, %c0_i32_0 : i32, i32, i32
  }
  func.func @transform_8(%arg0: i32) -> (i32, i32, i32) {
    %c0_i32 = arith.constant 0 : i32
    %c0_i32_0 = arith.constant 0 : i32
    %c0_i32_1 = arith.constant 0 : i32
    return %arg0, %c0_i32, %c0_i32_0 : i32, i32, i32
  }
  func.func @transform_9(%arg0: i32) -> (i32, i32, i32) {
    %c0_i32 = arith.constant 0 : i32
    %c0_i32_0 = arith.constant 0 : i32
    %c0_i32_1 = arith.constant 0 : i32
    return %arg0, %c0_i32, %c0_i32_0 : i32, i32, i32
  }
  func.func @transform_10(%arg0: i32) -> (i32, i32, i32) {
    %c0_i32 = arith.constant 0 : i32
    %c0_i32_0 = arith.constant 0 : i32
    %c0_i32_1 = arith.constant 0 : i32
    return %arg0, %c0_i32, %c0_i32_0 : i32, i32, i32
  }
  func.func @transform_11(%arg0: i32) -> (i32, i32, i32) {
    %c0_i32 = arith.constant 0 : i32
    %c0_i32_0 = arith.constant 0 : i32
    %c0_i32_1 = arith.constant 0 : i32
    return %arg0, %c0_i32, %c0_i32_0 : i32, i32, i32
  }
  func.func @transform_12(%arg0: i32) -> (i32, i32, i32) {
    %c0_i32 = arith.constant 0 : i32
    %c0_i32_0 = arith.constant 0 : i32
    %c0_i32_1 = arith.constant 0 : i32
    return %arg0, %c0_i32, %c0_i32_0 : i32, i32, i32
  }
  func.func @transform_13(%arg0: i32) -> (i32, i32, i32) {
    %c0_i32 = arith.constant 0 : i32
    %c0_i32_0 = arith.constant 0 : i32
    %c0_i32_1 = arith.constant 0 : i32
    return %arg0, %c0_i32, %c0_i32_0 : i32, i32, i32
  }
  func.func @transform_14(%arg0: i32) -> (i32, i32) {
    %c0_i32 = arith.constant 0 : i32
    %c0_i32_0 = arith.constant 0 : i32
    %c0_i32_1 = arith.constant 0 : i32
    return %c0_i32, %c0_i32_0 : i32, i32
  }
  func.func @transform_15(%arg0: i32) -> (i32, i32) {
    %c0_i32 = arith.constant 0 : i32
    %c0_i32_0 = arith.constant 0 : i32
    %c0_i32_1 = arith.constant 0 : i32
    return %c0_i32, %c0_i32_0 : i32, i32
  }
  func.func @transform_16(%arg0: i32) -> (i32, i32) {
    %c0_i32 = arith.constant 0 : i32
    %c0_i32_0 = arith.constant 0 : i32
    %c0_i32_1 = arith.constant 0 : i32
    return %c0_i32, %c0_i32_0 : i32, i32
  }
}

module attributes {stable_mosaic.version = 11 : i64} {
  func.func @_head_kernel(%arg0: i32, %arg1: memref<48x32xf32, #tpu.memory_space<vmem>>, %arg2: memref<32x24xbf16, #tpu.memory_space<vmem>>, %arg3: memref<1x24xf32, #tpu.memory_space<vmem>>, %arg4: memref<48x24xf32, #tpu.memory_space<vmem>>, %arg5: memref<48x24xf32, #tpu.memory_space<vmem>>, %arg6: memref<1x1xf32, #tpu.memory_space<smem>>) attributes {dimension_semantics = [#tpu.dimension_semantics<arbitrary>], iteration_bounds = array<i64: 1>, scalar_prefetch = 0 : i64, scratch_operands = 0 : i64, tpu.core_type = #tpu.core_type<tc>, window_params = [{pipeline_mode = #tpu.pipeline_mode<synchronous>, transform_indices = @transform_0, window_bounds = array<i64: 48, 32>}, {pipeline_mode = #tpu.pipeline_mode<synchronous>, transform_indices = @transform_1, window_bounds = array<i64: 32, 24>}, {pipeline_mode = #tpu.pipeline_mode<synchronous>, transform_indices = @transform_2, window_bounds = array<i64: 1, 24>}, {pipeline_mode = #tpu.pipeline_mode<synchronous>, transform_indices = @transform_3, window_bounds = array<i64: 48, 24>}, {pipeline_mode = #tpu.pipeline_mode<synchronous>, transform_indices = @transform_4, window_bounds = array<i64: 48, 24>}, {transform_indices = @transform_5, window_bounds = array<i64: 1, 1>}]} {
    %c0 = arith.constant 0 : index
    %c0_0 = arith.constant 0 : index
    %0 = vector.load %arg1[%c0, %c0_0] : memref<48x32xf32, #tpu.memory_space<vmem>>, vector<48x32xf32>
    %1 = arith.truncf %0 : vector<48x32xf32> to vector<48x32xbf16>
    %c0_1 = arith.constant 0 : index
    %c0_2 = arith.constant 0 : index
    %2 = vector.load %arg2[%c0_1, %c0_2] : memref<32x24xbf16, #tpu.memory_space<vmem>>, vector<32x24xbf16>
    %cst = arith.constant dense<0.000000e+00> : vector<48x24xf32>
    %3 = tpu.matmul %1, %2, %cst {dimension_numbers = #tpu.dot_dimension_numbers<[1], [0], [0], [1], [0, 0, 1, 1], [], []>} : vector<48x32xbf16>, vector<32x24xbf16>, vector<48x24xf32> -> vector<48x24xf32>
    %c0_3 = arith.constant 0 : index
    %c0_4 = arith.constant 0 : index
    %4 = vector.load %arg3[%c0_3, %c0_4] : memref<1x24xf32, #tpu.memory_space<vmem>>, vector<1x24xf32>
    %5 = vector.broadcast %4 : vector<1x24xf32> to vector<48x24xf32>
    %6 = arith.addf %3, %5 : vector<48x24xf32>
    %c0_5 = arith.constant 0 : index
    %c0_6 = arith.constant 0 : index
    %7 = vector.load %arg5[%c0_5, %c0_6] : memref<48x24xf32, #tpu.memory_space<vmem>>, vector<48x24xf32>
    tpu.vector_store %arg5[%c0_5, %c0_6], %6 {strides = array<i32>} : memref<48x24xf32, #tpu.memory_space<vmem>>, vector<48x24xf32>,
    %c0_7 = arith.constant 0 : index
    %c0_8 = arith.constant 0 : index
    %8 = vector.load %arg4[%c0_7, %c0_8] : memref<48x24xf32, #tpu.memory_space<vmem>>, vector<48x24xf32>
    %9 = arith.subf %6, %8 : vector<48x24xf32>
    %10 = arith.mulf %9, %9 : vector<48x24xf32>
    %11 = vector.shape_cast %10 : vector<48x24xf32> to vector<1x48x24xf32>
    %cst_9 = arith.constant dense<0.000000e+00> : vector<1xf32>
    %12 = vector.multi_reduction <add>, %11, %cst_9 [1, 2] : vector<1x48x24xf32> to vector<1xf32>
    %13 = vector.shape_cast %12 : vector<1xf32> to vector<1x1x1xf32>
    %14 = vector.extract %13[0, 0, 0] : f32 from vector<1x1x1xf32>
    %cst_10 = arith.constant 1.152000e+03 : f32
    %15 = arith.divf %14, %cst_10 : f32
    %c0_11 = arith.constant 0 : index
    %c0_12 = arith.constant 0 : index
    %16 = memref.load %arg6[%c0_11, %c0_12] : memref<1x1xf32, #tpu.memory_space<smem>>
    memref.store %15, %arg6[%c0_11, %c0_12] : memref<1x1xf32, #tpu.memory_space<smem>>
    return
  }
  func.func @transform_0(%arg0: i32) -> (i32, i32) {
    %c0_i32 = arith.constant 0 : i32
    %c0_i32_0 = arith.constant 0 : i32
    %c0_i32_1 = arith.constant 0 : i32
    return %c0_i32, %c0_i32_0 : i32, i32
  }
  func.func @transform_1(%arg0: i32) -> (i32, i32) {
    %c0_i32 = arith.constant 0 : i32
    %c0_i32_0 = arith.constant 0 : i32
    %c0_i32_1 = arith.constant 0 : i32
    return %c0_i32, %c0_i32_0 : i32, i32
  }
  func.func @transform_2(%arg0: i32) -> (i32, i32) {
    %c0_i32 = arith.constant 0 : i32
    %c0_i32_0 = arith.constant 0 : i32
    %c0_i32_1 = arith.constant 0 : i32
    return %c0_i32, %c0_i32_0 : i32, i32
  }
  func.func @transform_3(%arg0: i32) -> (i32, i32) {
    %c0_i32 = arith.constant 0 : i32
    %c0_i32_0 = arith.constant 0 : i32
    %c0_i32_1 = arith.constant 0 : i32
    return %c0_i32, %c0_i32_0 : i32, i32
  }
  func.func @transform_4(%arg0: i32) -> (i32, i32) {
    %c0_i32 = arith.constant 0 : i32
    %c0_i32_0 = arith.constant 0 : i32
    %c0_i32_1 = arith.constant 0 : i32
    return %c0_i32, %c0_i32_0 : i32, i32
  }
  func.func @transform_5(%arg0: i32) -> (i32, i32) {
    %c0_i32 = arith.constant 0 : i32
    %c0_i32_0 = arith.constant 0 : i32
    %c0_i32_1 = arith.constant 0 : i32
    return %c0_i32, %c0_i32_0 : i32, i32
  }
}

</mosaic_0001>

<bundles_post_ra>
// kernel: run.5
= control target key start
LH: loop header
LB: loop body
LE: loop exit
PB: predicated region body
PF: predicated region fallthrough
CT: control target
= control target key end

     0   :  { %vm55_vm0 = vcmask 1043456   ;;  %vm42_vm1 = vcmask 195584   ;;  %vm151_vm2 = vcmask 392192   ;;  %s306_s1 = inlined_call_operand.vmem [shape: bf16[24,48], index: 1, kind: input, shape index: {}]   ;;  %s307_s0 = inlined_call_operand.vmem [shape: f32[2,32,24], index: 0, kind: input, shape index: {}]   ;;  %s308_s2 = inlined_call_operand.vmem [shape: f32[1,48], index: 2, kind: input, shape index: {}]   ;;  %s309_s3 = inlined_call_operand.vmem [shape: f32[1,32,48], index: 3, kind: input, shape index: {}]   ;;  %s310_s4 = inlined_call_operand.vmem [shape: f32[2,32,48], index: 4, kind: output, shape index: {}]  }
   0x1   :  { %v195_v0 = vld [vmem:[%s306_s1] sm:$0xff]   ;;  %v196_v1 = vld [vmem:[%s306_s1 + $0x8] ss:$0 sps:$4 sm:$0xff]   ;;  %v20_v8 = vld [vmem:[%s307_s0 + $0x10] sm:$0xff] }
   0x2   :  { %v18_v2 = vld [vmem:[%s307_s0] sm:$0xff]  ;;  %177 = vmatprep.subr.bf16.mxu0 %v195_v0  ;;  %189 = vmatprep.subr.bf16.mxu1 %v195_v0  ;;  %v19_v3 = vld [vmem:[%s307_s0 + $0x8] sm:$0xff]  ;;  %v21_v9 = vld [vmem:[%s307_s0 + $0x18] sm:$0xff]  ;;  %v57_v11 = vsel %vm55_vm0, %v196_v1, 0 }
   0x3   :  { %v22_v4 = vld [vmem:[%s307_s0 + $0x20] sm:$0xff]  ;;  %v23_v5 = vld [vmem:[%s307_s0 + $0x28] sm:$0xff]  ;;  %178 = vmatpush3.bf16.msra.mxu0 %v195_v0  ;;  %191 = vmatpush3.bf16.msra.mxu1 %v195_v0  ;;  %v26_v6 = vpack.c.bf16 %v19_v3, %v18_v2  ;;  %v24_v10 = vld [vmem:[%s307_s0 + $0x30] sm:$0xff]  ;;  %v27_v13 = vpack.c.bf16 %v21_v9, %v20_v8 }
   0x4   :  { %v28_v7 = vpack.c.bf16 %v23_v5, %v22_v4  ;;  %193 = vmatprep.subr.msk.bf16.mxu0 %vm55_vm0, %v196_v1  ;;  %194 = vmatprep.subr.msk.bf16.mxu1 %vm55_vm0, %v196_v1  ;;  %v25_v12 = vld [vmem:[%s307_s0 + $0x38] sm:$0xff]  ;;  %v170_v15 = vld [vmem:[%s308_s2] ss:$0 sm:$0xff]  ;;  %v141_v17 = vld [vmem:[%s309_s3 + $0x10] sm:$0xff] }
   0x5   :  { %181 = vmatprep.mubr.msk.bf16.mxu0 %vm42_vm1, %v26_v6  ;;  %v29_v14 = vpack.c.bf16 %v25_v12, %v24_v10  ;;  %v139_v22 = vld [vmem:[%s309_s3] sm:$0xff]  ;;  %v142_v27 = vld [vmem:[%s309_s3 + $0x18] sm:$0xff]  ;;  %v140_v34 = vld [vmem:[%s309_s3 + $0x8] sm:$0xff] }
   0x6   :  { %185 = vmatprep.mubr.msk.bf16.mxu1 %vm42_vm1, %v28_v7 }
   0x7   :  { %180 = vmatpush3.bf16.msra.mxu0 %v57_v11  ;;  %192 = vmatpush3.bf16.msra.mxu1 %v57_v11 }
   0xa   :  { %182 = vmatmul.mubr.msk.bf16.vlgmr.msra.gmra.mrb[0].mxu0 %vm42_vm1, %v27_v13  ;;  %186 = vmatmul.mubr.msk.bf16.vlgmr.msra.gmra.mrb[0].mxu1 %vm42_vm1, %v29_v14 }
  0xdd   :  { %v183_v16 = vpop.f32.mrb[0].mxu0  ;;  %v187_v18 = vpop.f32.mrb[0].mxu1 }
  0xde   :  { %v133_v19 = vadd.f32 %v183_v16, %v170_v15  ;;  %v137_v20 = vadd.f32 %v187_v18, %v170_v15  ;;  %v93_v21 = vpop.f32.mrb[1].mxu0  ;;  %v109_v23 = vpop.f32.mrb[1].mxu1 }
  0xdf   :  { %v131_v24 = vadd.f32 %v170_v15, %v93_v21  ;;  %v135_v25 = vadd.f32 %v170_v15, %v109_v23  ;;  %v184_v26 = vpop.f32.mrb[2].mxu0  ;;  %v188_v28 = vpop.f32.mrb[2].mxu1 }
  0xe0   :  { %v145_v29 = vadd.f32 %v141_v17, %v133_v19  ;;  %v149_v30 = vadd.f32 %v141_v17, %v137_v20  ;;  %v134_v31 = vadd.f32 %v184_v26, %v170_v15  ;;  %v138_v32 = vadd.f32 %v188_v28, %v170_v15  ;;  %v96_v33 = vpop.f32.mrb[3].mxu0  ;;  %v112_v35 = vpop.f32.mrb[3].mxu1 }
  0xe1   :  { %v143_v36 = vadd.f32 %v139_v22, %v131_v24  ;;  %v147_v37 = vadd.f32 %v139_v22, %v135_v25  ;;  %v132_v38 = vadd.f32 %v170_v15, %v96_v33  ;;  %v136_v39 = vadd.f32 %v170_v15, %v112_v35 }
  0xe2   :  { %154 = vst.msk [vmem:[%s310_s4 + $0x10] sm:$0xff] %vm151_vm2, %v145_v29  ;;  %158 = vst.msk [vmem:[%s310_s4 + $0x30] sm:$0xff] %vm151_vm2, %v149_v30  ;;  %v146_v40 = vadd.f32 %v142_v27, %v134_v31  ;;  %v150_v41 = vadd.f32 %v142_v27, %v138_v32 }
  0xe3   :  { %152 = vst.msk [vmem:[%s310_s4] sm:$0xff] %vm151_vm2, %v143_v36  ;;  %156 = vst.msk [vmem:[%s310_s4 + $0x20] sm:$0xff] %vm151_vm2, %v147_v37  ;;  %v144_v42 = vadd.f32 %v140_v34, %v132_v38  ;;  %v148_v43 = vadd.f32 %v140_v34, %v136_v39 }
  0xe4   :  { %155 = vst.msk [vmem:[%s310_s4 + $0x18] sm:$0xff] %vm151_vm2, %v146_v40  ;;  %159 = vst.msk [vmem:[%s310_s4 + $0x38] sm:$0xff] %vm151_vm2, %v150_v41 }
  0xe5   :  { %153 = vst.msk [vmem:[%s310_s4 + $0x8] sm:$0xff] %vm151_vm2, %v144_v42  ;;  %157 = vst.msk [vmem:[%s310_s4 + $0x28] sm:$0xff] %vm151_vm2, %v148_v43 }

// kernel: run.7
= control target key start
LH: loop header
LB: loop body
LE: loop exit
PB: predicated region body
PF: predicated region fallthrough
CT: control target
= control target key end

     0   :  { %v204_v1 = vmov 0.0   ;;  %vm205_vm0 = vmmov 0   ;;  %s309_s0 = inlined_call_operand.vmem [shape: f32[16,48], index: 0, kind: input, shape index: {}]   ;;  %s310_s1 = inlined_call_operand.vmem [shape: bf16[48,32], index: 1, kind: input, shape index: {}]   ;;  %s311_s2 = inlined_call_operand.vmem [shape: f32[1,32], index: 2, kind: input, shape index: {}]   ;;  %s312_s3 = inlined_call_operand.vmem [shape: f32[1,32], index: 3, kind: input, shape index: {}]   ;;  %s313_s4 = inlined_call_operand.vmem [shape: f32[2,24,32], index: 4, kind: input, shape index: {}]   ;;  %s314_s5 = inlined_call_operand.vmem [shape: f32[2,8,32], index: 5, kind: input, shape index: {}]   ;;  %s315_s6 = inlined_call_operand.hbm [shape: f32[2,32,32], index: 6, kind: output, shape index: {}]  }
   0x1   :  { %v177_v0 = vld [vmem:[%s310_s1] sm:$0xff]   ;;  %162 = vmatprep.subr.bf16.mxu0 %v204_v1  ;;  %v178_v2 = vld [vmem:[%s310_s1 + $0x8] sm:$0xff]   ;;  %168 = vmatprep.mubr.msk.bf16.mxu0 %vm205_vm0, %v204_v1 }
   0x2   :  { %163 = vmatpush3.bf16.msra.mxu0 %v177_v0 }
   0x3   :  { %164 = vmatprep.subr.bf16.mxu0 %v204_v1 }
   0x4   :  { %11 = vsyncpa [#allocation3], 0  ;;  %v179_v3 = vld [vmem:[%s310_s1 + $0x10] sm:$0xff]   ;;  %v25_v4 = vld [vmem:[%s309_s0] sm:$0xff]  ;;  %vm59_vm1 = vcmask 392192   ;;  %vm127_vm2 = vcmask 261120  }
   0x5   :  { %v26_v5 = vld [vmem:[%s309_s0 + $0x8] sm:$0xff]  ;;  %v157_v7 = vld [vmem:[%s312_s3] ss:$0 sm:$0xff]  ;;  %v111_v10 = vld [vmem:[%s313_s4 + $0x10] sm:$0xff]  ;;  %s206_s21 = smov [#allocation2]  }
   0x6   :  { %165 = vmatpush3.bf16.msra.mxu0 %v178_v2  ;;  %v27_v6 = vpack.c.bf16 %v26_v5, %v25_v4  ;;  %v109_v8 = vld [vmem:[%s313_s4] sm:$0xff]  ;;  %v110_v9 = vld [vmem:[%s313_s4 + $0x8] sm:$0xff]  ;;  %v112_v11 = vld [vmem:[%s313_s4 + $0x18] sm:$0xff]  ;;  %v123_v16 = vadd.f32 %v157_v7, %v111_v10  ;;  %s141_s22 = sshll.u32 %s206_s21, 4  ;;  %s142_s22 = int_to_ptr.vmem [resolvable:$true] %s141_s22 }
   0x7   :  { %166 = vmatprep.subr.bf16.mxu0 %v204_v1  ;;  %v121_v12 = vadd.f32 %v157_v7, %v109_v8  ;;  %v113_v13 = vld [vmem:[%s313_s4 + $0x20] sm:$0xff]  ;;  %v114_v14 = vld [vmem:[%s313_s4 + $0x28] sm:$0xff]  ;;  %v122_v15 = vadd.f32 %v157_v7, %v110_v9  ;;  %v124_v17 = vadd.f32 %v157_v7, %v112_v11  ;;  %p185_p1 = scmp.lt.s32.totalorder %s142_s22, %s142_s22 }
   0x8   :  { %v125_v18 = vadd.f32 %v157_v7, %v113_v13  ;;  %v126_v19 = vadd.f32 %v157_v7, %v114_v14  ;;  %130 = vst.msk [vmem:[#allocation2 + $0x10] sm:$0xff] %vm127_vm2, %v123_v16  ;;  %v152_v20 = vld [vmem:[%s311_s2] ss:$0 sm:$0xff]  ;;  %v105_v26 = vld [vmem:[%s314_s5 + $0x8] sm:$0xff]  ;;  %s180_s2 = scalar_lea.vmem %s142_s22, 1024 }
   0x9   :  { %128 = vst.msk [vmem:[#allocation2] sm:$0xff] %vm127_vm2, %v121_v12  ;;  %129 = vst.msk [vmem:[#allocation2 + $0x8] sm:$0xff] %vm127_vm2, %v122_v15  ;;  %v104_v22 = vld [vmem:[%s314_s5] sm:$0xff]  ;;  %p181_p0 = scmp.ne.s32.totalorder %s142_s22, %s180_s2  ;;  %p186_p2 = scmp.lt.s32.totalorder %s180_s2, %s180_s2 }
   0xa   :  { %167 = vmatpush3.bf16.msra.mxu0 %v179_v3  ;;  %132 = vst.msk [vmem:[#allocation2 + $0x20] sm:$0xff] %vm127_vm2, %v124_v17  ;;  %133 = vst.msk [vmem:[#allocation2 + $0x28] sm:$0xff] %vm127_vm2, %v125_v18 }
   0xb   :  { %134 = vst.msk [vmem:[#allocation2 + $0x30] sm:$0xff] %vm127_vm2, %v126_v19  ;;  %p187_p3 = por %p186_p2, %p185_p1 }
   0xd   :  { %169 = vmatmul.mubr.msk.bf16.vlgmr.msra.gmra.mrb[0].mxu0 %vm59_vm1, %v27_v6  ;;  %p188_p4 = pnand %p187_p3, %p181_p0 }
  0xe0   :  { %v97_v21 = vpop.f32.mrb[0].mxu0 }
  0xe1   :  { %v98_v23 = vadd.f32 %v152_v20, %v97_v21  ;;  %v170_v24 = vpop.f32.mrb[1].mxu0 }
  0xe2   :  { %v100_v25 = vpop.f32.mrb[2].mxu0 }
  0xe3   :  { %v106_v27 = vadd.f32 %v104_v22, %v98_v23  ;;  %v101_v28 = vadd.f32 %v152_v20, %v100_v25  ;;  %v171_v29 = vpop.f32.mrb[3].mxu0 }
  0xe5   :  { %131 = vst.msk [vmem:[#allocation2 + $0x18] sm:$0xff] %vm127_vm2, %v106_v27  ;;  %v107_v30 = vadd.f32 %v105_v26, %v101_v28 }
  0xe7   :  { %135 = vst.msk [vmem:[#allocation2 + $0x38] sm:$0xff] %vm127_vm2, %v107_v30 }
  0xe8   :  { %191 = shalt.err (!%p188_p4)
}
  0xe9   :  { %s192_s5 = scalar_lea.hbm %s315_s6, 1024 }
  0xea   :  { %p193_p5 = scmp.ne.s32.totalorder %s315_s6, %s192_s5  ;;  %p196_p6 = scmp.lt.u32.totalorder %s192_s5, %s315_s6 }
  0xec   :  { %p198_p7 = pnand %p196_p6, %p193_p5 }
  0xee   :  { %201 = shalt.err (!%p198_p7)
}
  0xef   :  { %s207_s7 = smov 128   ;;  %s208_s8 = smov 8  }
  0xf0   :  { %147 = dma.vmem_to_hbm [thread:$0]  %s142_s22, 1024, %s315_s6, [#allocation3], %s207_s7, %s207_s7, %s208_s8  }
  0xf1   :  { %202 = dma.done.wait [#allocation3], 1024  }
  0xf2   :  { %203 = vsyncadd [#allocation3], 4294966272 }
  0xf3   :  { %151 = vsyncpa [#allocation3], 1 }

// kernel: run.9
= control target key start
LH: loop header
LB: loop body
LE: loop exit
PB: predicated region body
PF: predicated region fallthrough
CT: control target
= control target key end

     0   :  { %11 = vsyncpa [#allocation3], 0  ;;  %v277_v1 = vmov 0.0   ;;  %vm278_vm0 = vmmov 0   ;;  %s394_s0 = inlined_call_operand.vmem [shape: f32[48,32], index: 0, kind: input, shape index: {}]   ;;  %s395_s1 = inlined_call_operand.vmem [shape: bf16[32,24], index: 1, kind: input, shape index: {}]   ;;  %s396_s2 = inlined_call_operand.vmem [shape: f32[1,24], index: 2, kind: input, shape index: {}]   ;;  %s397_s3 = inlined_call_operand.vmem [shape: f32[48,24], index: 3, kind: input, shape index: {}]   ;;  %s398_s4 = inlined_call_operand.hbm [shape: f32[48,24], index: 4, kind: output, shape index: {0}]   ;;  %s399_s5 = inlined_call_operand.hbm [shape: f32[1,1], index: 5, kind: output, shape index: {1}]  }
   0x1   :  { %v239_v0 = vld [vmem:[%s395_s1] sm:$0xff]   ;;  %211 = vmatprep.subr.bf16.mxu0 %v277_v1  ;;  %227 = vmatprep.subr.bf16.mxu1 %v277_v1  ;;  %v240_v2 = vld [vmem:[%s395_s1 + $0x8] sm:$0xff]   ;;  %v24_v5 = vld [vmem:[%s394_s0 + $0x10] sm:$0xff] }
   0x2   :  { %212 = vmatpush3.bf16.msra.mxu0 %v239_v0  ;;  %229 = vmatpush3.bf16.msra.mxu1 %v239_v0  ;;  %v22_v3 = vld [vmem:[%s394_s0] sm:$0xff]  ;;  %v23_v4 = vld [vmem:[%s394_s0 + $0x8] sm:$0xff]  ;;  %v25_v6 = vld [vmem:[%s394_s0 + $0x18] sm:$0xff] }
   0x3   :  { %213 = vmatprep.subr.bf16.mxu0 %v277_v1  ;;  %228 = vmatprep.subr.bf16.mxu1 %v277_v1 }
   0x4   :  { %215 = vmatprep.mubr.msk.bf16.mxu0 %vm278_vm0, %v277_v1  ;;  %219 = vmatprep.mubr.msk.bf16.mxu1 %vm278_vm0, %v277_v1 }
   0x5   :  { %12 = vsyncpa [#allocation4], 0  ;;  %v28_v7 = vpack.c.bf16 %v23_v4, %v22_v3  ;;  %v29_v8 = vpack.c.bf16 %v25_v6, %v24_v5  ;;  %vm54_vm1 = vcmask 261120   ;;  %v26_v9 = vld [vmem:[%s394_s0 + $0x20] sm:$0xff]  ;;  %v27_v10 = vld [vmem:[%s394_s0 + $0x28] sm:$0xff]  ;;  %vm121_vm2 = vcmask 195584  }
   0x6   :  { %214 = vmatpush3.bf16.msra.mxu0 %v240_v2  ;;  %230 = vmatpush3.bf16.msra.mxu1 %v240_v2  ;;  %v30_v11 = vpack.c.bf16 %v27_v10, %v26_v9  ;;  %v200_v12 = vld [vmem:[%s396_s2] ss:$0 sm:$0xff]  ;;  %v130_v16 = vld [vmem:[%s397_s3 + $0x10] sm:$0xff]  ;;  %v129_v22 = vld [vmem:[%s397_s3 + $0x8] sm:$0xff] }
   0x7   :  { %v128_v14 = vld [vmem:[%s397_s3] sm:$0xff]  ;;  %v131_v24 = vld [vmem:[%s397_s3 + $0x18] sm:$0xff]  ;;  %v133_v45 = vld [vmem:[%s397_s3 + $0x28] sm:$0xff] }
   0x8   :  { %v132_v37 = vld [vmem:[%s397_s3 + $0x20] sm:$0xff]  ;;  %s279_s3 = smov [#allocation2]  }
   0x9   :  { %216 = vmatmul.mubr.msk.bf16.vlgmr.msra.gmra.mrb[0].mxu0 %vm54_vm1, %v28_v7  ;;  %220 = vmatmul.mubr.msk.bf16.vlgmr.msra.gmra.mrb[0].mxu1 %vm54_vm1, %v29_v8  ;;  %s176_s20 = sshll.u32 %s279_s3, 4  ;;  %s177_s20 = int_to_ptr.vmem [resolvable:$true] %s176_s20 }
   0xa   :  { %223 = vmatprep.mubr.msk.bf16.mxu1 %vm278_vm0, %v277_v1  ;;  %s241_s21 = scalar_lea.vmem %s177_s20, 768  ;;  %p246_p1 = scmp.lt.s32.totalorder %s177_s20, %s177_s20 }
   0xb   :  { %p242_p0 = scmp.ne.s32.totalorder %s177_s20, %s241_s21  ;;  %p247_p2 = scmp.lt.s32.totalorder %s241_s21, %s241_s21 }
   0xd   :  { %p248_p3 = por %p247_p2, %p246_p1 }
   0xf   :  { %p249_p4 = pnand %p248_p3, %p242_p0 }
  0x11   :  { %224 = vmatmul.mubr.msk.bf16.gmra.mrb[4].mxu1 %vm54_vm1, %v30_v11 }
  0xdc   :  { %v98_v13 = vpop.f32.mrb[0].mxu0  ;;  %v106_v15 = vpop.f32.mrb[0].mxu1 }
  0xdd   :  { %v99_v17 = vadd.f32 %v200_v12, %v98_v13  ;;  %v107_v18 = vadd.f32 %v200_v12, %v106_v15  ;;  %v217_v19 = vpop.f32.mrb[1].mxu0  ;;  %v221_v20 = vpop.f32.mrb[1].mxu1 }
  0xde   :  { %v101_v21 = vpop.f32.mrb[2].mxu0  ;;  %v109_v23 = vpop.f32.mrb[2].mxu1 }
  0xdf   :  { %122 = vst.msk [vmem:[#allocation2] sm:$0xff] %vm121_vm2, %v99_v17  ;;  %v134_v25 = vsub.f32 %v99_v17, %v128_v14  ;;  %124 = vst.msk [vmem:[#allocation2 + $0x10] sm:$0xff] %vm121_vm2, %v107_v18  ;;  %v136_v26 = vsub.f32 %v107_v18, %v130_v16  ;;  %v102_v27 = vadd.f32 %v200_v12, %v101_v21  ;;  %v218_v29 = vpop.f32.mrb[3].mxu0  ;;  %v222_v30 = vpop.f32.mrb[3].mxu1 }
  0xe0   :  { %v110_v28 = vadd.f32 %v200_v12, %v109_v23 }
  0xe1   :  { %v140_v31 = vmul.f32 %v134_v25, %v134_v25  ;;  %123 = vst.msk [vmem:[#allocation2 + $0x8] sm:$0xff] %vm121_vm2, %v102_v27  ;;  %v135_v32 = vsub.f32 %v102_v27, %v129_v22  ;;  %v142_v34 = vmul.f32 %v136_v26, %v136_v26 }
  0xe2   :  { %125 = vst.msk [vmem:[#allocation2 + $0x18] sm:$0xff] %vm121_vm2, %v110_v28  ;;  %v137_v33 = vsub.f32 %v110_v28, %v131_v24 }
  0xe3   :  { %v141_v35 = vmul.f32 %v135_v32, %v135_v32  ;;  %v146_v38 = vsel %vm121_vm2, %v140_v31, 0.0  ;;  %v149_v46 = vsel %vm121_vm2, %v142_v34, 0.0 }
  0xe4   :  { %v114_v36 = vpop.f32.mrb[4].mxu1  ;;  %v143_v40 = vmul.f32 %v137_v33, %v137_v33 }
  0xe5   :  { %v147_v39 = vsel %vm121_vm2, %v141_v35, 0.0  ;;  %v115_v41 = vadd.f32 %v200_v12, %v114_v36  ;;  %v225_v42 = vpop.f32.mrb[5].mxu1 }
  0xe6   :  { %v148_v43 = vadd.f32 %v147_v39, %v146_v38  ;;  %v117_v44 = vpop.f32.mrb[6].mxu1  ;;  %v151_v53 = vsel %vm121_vm2, %v143_v40, 0.0 }
  0xe7   :  { %126 = vst.msk [vmem:[#allocation2 + $0x20] sm:$0xff] %vm121_vm2, %v115_v41  ;;  %v138_v47 = vsub.f32 %v115_v41, %v132_v37  ;;  %v118_v48 = vadd.f32 %v200_v12, %v117_v44  ;;  %v226_v49 = vpop.f32.mrb[7].mxu1 }
  0xe8   :  { %v150_v50 = vadd.f32 %v149_v46, %v148_v43 }
  0xe9   :  { %v144_v51 = vmul.f32 %v138_v47, %v138_v47  ;;  %127 = vst.msk [vmem:[#allocation2 + $0x28] sm:$0xff] %vm121_vm2, %v118_v48  ;;  %v139_v52 = vsub.f32 %v118_v48, %v133_v45 }
  0xea   :  { %v152_v54 = vadd.f32 %v151_v53, %v150_v50 }
  0xeb   :  { %v145_v55 = vmul.f32 %v139_v52, %v139_v52  ;;  %v153_v56 = vsel %vm121_vm2, %v144_v51, 0.0 }
  0xec   :  { %v154_v57 = vadd.f32 %v153_v56, %v152_v54 }
  0xed   :  { %v155_v58 = vsel %vm121_vm2, %v145_v55, 0.0 }
  0xee   :  { %v156_v59 = vadd.f32 %v155_v58, %v154_v57 }
  0xf0   :  { %157 = vadd.xlane.f32.xlu0 %v156_v59 }
  0xf1   :  { %252 = shalt.err (!%p249_p4)
}
  0xf2   :  { %s253_s24 = scalar_lea.hbm %s398_s4, 768 }
  0xf3   :  { %p254_p5 = scmp.ne.s32.totalorder %s398_s4, %s253_s24  ;;  %p257_p6 = scmp.lt.u32.totalorder %s253_s24, %s398_s4 }
  0xf5   :  { %p259_p7 = pnand %p257_p6, %p254_p5 }
  0xf7   :  { %262 = shalt.err (!%p259_p7)
}
  0xf8   :  { %s280_s29 = smov 128   ;;  %s281_s1 = smov 8  }
  0xf9   :  { %182 = dma.vmem_to_hbm [thread:$0]  %s177_s20, 768, %s398_s4, [#allocation3], %s280_s29, %s280_s29, %s281_s1  }
  0xfa   :  { %s263_s11 = scalar_lea.hbm %s399_s5, 16 }
  0xfb   :  { %p264_p8 = scmp.ne.s32.totalorder %s399_s5, %s263_s11  ;;  %p267_p9 = scmp.lt.u32.totalorder %s263_s11, %s399_s5 }
  0xfd   :  { %p269_p10 = pnand %p267_p9, %p264_p8 }
 0x17d   :  { %v158_v60 = vpop.xlane.xlu0 %157 }
 0x17e   :  { %v159_v61 = vrot.slane %v158_v60, 4 }
 0x180   :  { %v160_v62 = vadd.f32 %v159_v61, %v158_v60 }
 0x182   :  { %v161_v63 = vrot.slane %v160_v62, 2 }
 0x184   :  { %v162_v0 = vadd.f32 %v161_v63, %v160_v62 }
 0x186   :  { %v163_v1 = vrot.slane %v162_v0, 1 }
 0x188   :  { %v164_v2 = vadd.f32 %v163_v1, %v162_v0 }
 0x18a   :  { %231 = vpush %v164_v2 }
 0x1bb   :  { %s232_s7 = spop %231 }
 0x1bc   :  { %s168_s8 = smul.f32 0.00086805556, %s232_s7 }
 0x1be   :  { %170 = sst [smem:[#allocation5]] %s168_s8 }
 0x1bf   :  { %272 = shalt.err (!%p269_p10)
}
 0x1c0   :  { %s282_s14 = smov [#allocation5]  }
 0x1c1   :  { %190 = dma.smem_to_hbm %s282_s14, 16, %s399_s5, [#allocation4]  }
 0x1c2   :  { %273 = dma.done.wait [#allocation3], 768  }
 0x1c3   :  { %274 = vsyncadd [#allocation3], 4294966528 }
 0x1c4   :  { %275 = dma.done.wait [#allocation4], 16  }
 0x1c5   :  { %276 = vsyncadd [#allocation4], 4294967280 }
 0x1c6   :  { %197 = sfence }
 0x1c7   :  { %198 = vsyncpa [#allocation3], 1 }
 0x1c8   :  { %199 = vsyncpa [#allocation4], 1 }

// kernel: run.6
= control target key start
LH: loop header
LB: loop body
LE: loop exit
PB: predicated region body
PF: predicated region fallthrough
CT: control target
= control target key end

     0   :  { %s6040_s0 = inlined_call_operand.hbm [shape: f32[16,48], index: 0, kind: input, shape index: {}]   ;;  %s6041_s1 = inlined_call_operand.hbm [shape: f32[2,1,48], index: 1, kind: input, shape index: {}]   ;;  %s6042_s2 = inlined_call_operand.hbm [shape: f32[2,1,48], index: 2, kind: input, shape index: {}]   ;;  %s6043_s3 = inlined_call_operand.hbm [shape: bf16[2,4,48,8], index: 3, kind: input, shape index: {}]   ;;  %s6044_s4 = inlined_call_operand.hbm [shape: bf16[2,4,48,8], index: 4, kind: input, shape index: {}]   ;;  %s6045_s5 = inlined_call_operand.hbm [shape: bf16[2,4,48,8], index: 5, kind: input, shape index: {}]   ;;  %s6046_s6 = inlined_call_operand.hbm [shape: bf16[2,4,8,48], index: 6, kind: input, shape index: {}]   ;;  %s6047_s7 = inlined_call_operand.hbm [shape: f32[2,1,48], index: 7, kind: input, shape index: {}]   ;;  %s6048_s8 = inlined_call_operand.hbm [shape: f32[2,1,48], index: 8, kind: input, shape index: {}]   ;;  %s6049_s9 = inlined_call_operand.hbm [shape: f32[2,1,48], index: 9, kind: input, shape index: {}]   ;;  %s6050_s10 = inlined_call_operand.hbm [shape: bf16[2,48,96], index: 10, kind: input, shape index: {}]   ;;  %s6051_s11 = inlined_call_operand.hbm [shape: f32[2,1,96], index: 11, kind: input, shape index: {}]   ;;  %s6052_s12 = inlined_call_operand.hbm [shape: bf16[2,96,48], index: 12, kind: input, shape index: {}]   ;;  %s6053_s13 = inlined_call_operand.hbm [shape: f32[2,1,48], index: 13, kind: input, shape index: {}]   ;;  %s6054_s14 = inlined_call_operand.hbm [shape: f32[1,48], index: 14, kind: input, shape index: {}]   ;;  %s6055_s15 = inlined_call_operand.hbm [shape: f32[1,48], index: 15, kind: input, shape index: {}]   ;;  %s6056_s16 = inlined_call_operand.hbm [shape: f32[16,48], index: 16, kind: output, shape index: {}]  }
   0x1   :  { %6095 = sst [smem:[#allocation47_spill]] %s6040_s0 }
   0x2   :  { %6096 = sst [smem:[#allocation48_spill]] %s6041_s1 }
   0x3   :  { %6097 = sst [smem:[#allocation49_spill]] %s6043_s3 }
   0x4   :  { %6098 = sst [smem:[#allocation50_spill]] %s6045_s5 }
   0x5   :  { %6099 = sst [smem:[#allocation51_spill]] %s6047_s7 }
   0x6   :  { %6100 = sst [smem:[#allocation52_spill]] %s6049_s9 }
   0x7   :  { %6101 = sst [smem:[#allocation53_spill]] %s6050_s10 }
   0x8   :  { %6102 = sst [smem:[#allocation54_spill]] %s6051_s11 }
   0x9   :  { %6103 = sst [smem:[#allocation55_spill]] %s6052_s12 }
   0xa   :  { %6104 = sst [smem:[#allocation56_spill]] %s6053_s13 }
   0xb   :  { %6105 = sst [smem:[#allocation57_spill]] %s6054_s14 }
   0xc   :  { %6106 = sst [smem:[#allocation58_spill]] %s6056_s16 }
   0xd   :  { %21 = vsyncpa [#allocation3], 0 }
   0xe   :  { %22 = vsyncpa [#allocation6], 0 }
   0xf   :  { %24 = vsyncpa [#allocation6 + $0x1], 0 }
  0x10   :  { %25 = vsyncpa [#allocation9], 0 }
  0x11   :  { %27 = vsyncpa [#allocation9 + $0x1], 0 }
  0x12   :  { %28 = vsyncpa [#allocation12], 0 }
  0x13   :  { %30 = vsyncpa [#allocation12 + $0x1], 0 }
  0x14   :  { %31 = vsyncpa [#allocation15], 0 }
  0x15   :  { %33 = vsyncpa [#allocation15 + $0x1], 0 }
  0x16   :  { %34 = vsyncpa [#allocation18], 0 }
  0x17   :  { %36 = vsyncpa [#allocation18 + $0x1], 0 }
  0x18   :  { %37 = vsyncpa [#allocation21], 0 }
  0x19   :  { %39 = vsyncpa [#allocation21 + $0x1], 0 }
  0x1a   :  { %40 = vsyncpa [#allocation24], 0 }
  0x1b   :  { %42 = vsyncpa [#allocation24 + $0x1], 0 }
  0x1c   :  { %43 = vsyncpa [#allocation27], 0 }
  0x1d   :  { %44 = vsyncpa [#allocation4], 0  ;;  %s5028_s21 = smov 0   ;;  %s5030_s22 = smov 0  }
  0x1e   :  { %s5032_s23 = smov 0   ;;  %s5034_s24 = smov 0  }
  0x1f LB: > { %6107 = sst [smem:[#allocation40_spill]] %s4908_s22  ;;  %s5047_s25 = sadd.s32 4294967295, %s4916_s24   ;;  %s4916_s24 = sphi %s5034_s24, %s6167_s24   ;;  %s4912_s23 = sphi %s5032_s23, %s6170_s23   ;;  %s4908_s22 = sphi %s5030_s22, %s6169_s22   ;;  %s4904_s21 = sphi %s5028_s21, %s6168_s21  }
  0x20   : > { %6108 = sst [smem:[#allocation41_spill]] %s4912_s23  ;;  %s5050_s26 = sadd.s32 1, %s4916_s24  }
  0x21   : > { %6109 = sst [smem:[#allocation42_spill]] %s5047_s25  ;;  %s75_s27 = ssub.s32 %s4916_s24, %s5050_s26 }
  0x22   : > { %6110 = sst [smem:[#allocation43_spill]] %s5050_s26  ;;  %s78_s28 = sadd.s32 1, %s4912_s23 }
  0x23   : > { %p76_p0 = scmp.eq.s32.totalorder %s75_s27, 0  ;;  %p85_p1 = scmp.ne.s32.totalorder %s4912_s23, %s4908_s22 }
  0x24   : > { %p86_p2 = scmp.eq.s32.totalorder %s4916_s24, 0  ;;  %p91_p3 = scmp.ne.s32.totalorder %s4908_s22, %s4904_s21 }
  0x25   : > { %s5060_s29 = scalar_select %p76_p0, %s4912_s23, %s78_s28  }
  0x26   : > { %p5062_p4 = por %p86_p2, %p85_p1  ;;  %p6065_p5 = scmp.eq.s32.totalorder %s5047_s25, 0 }
  0x27   : > { %6111 = sst [smem:[#allocation44_spill]] %s5060_s29  ;;  %p3546_p6 = scmp.ge.s32.totalorder %s4916_s24, 1 }
  0x28   : > { %p477_p7 = scmp.lt.s32.totalorder %s4916_s24, 3  ;;  %p5071_p8 = por %p6065_p5, %p91_p3 }
  0x29   : > { %s4918_s18 = smov [#allocation25]   ;;  %p4197_p12 = scmp.lt.s32.totalorder %s4916_s24, 2 }
  0x2a   : > { %s6113_s0 = scalar_select %p5071_p8, 1, 0 }
  0x2b   : > { %p5076_p10 = pnand %p3546_p6, %p477_p7  ;;  %s503_s19 = sshll.u32 %s4918_s18, 4  ;;  %s504_s19 = int_to_ptr.vmem [resolvable:$true] %s503_s19 }
  0x2c   : > { %6114 = sst [smem:[#allocation45_spill]] %s6113_s0  ;;  %s5084_s20 = sand.u32 1, %s4912_s23  }
  0x2d   : > { %s6115_s17 = scalar_select %p5076_p10, 1, 0 }
  0x2e   : > { %p4144_p11 = pneg %p5076_p10  ;;  %s5093_s27 = sand.u32 1, %s4916_s24  }
  0x2f   : > { %6116 = sst [smem:[#allocation46_spill]] %s6115_s17  ;;  %p5097_p0 = pnand %p4197_p12, %p5062_p4 }
  0x30   : > { %p5088_p13 = pnand %p4144_p11, %p6065_p5  ;;  %s6119_s14 = sld [smem:[#allocation57_spill]] }
  0x31   : > { %s6118_s28 = scalar_select %p5097_p0, 1, 0 }
  0x32   : > { %s6117_s21 = scalar_select %p5088_p13, 1, 0 }
  0x33   : > { %p5109_p2 = pneg %p5088_p13 }
  0x35   : > { %s6120_s0 = scalar_select %p5109_p2, 1, 0 }
  0x36   : > { %s4342_s26 = scalar_lea.hbm %s6119_s14, 16 }
  0x37   : > { %p4343_p1 = scmp.ne.s32.totalorder %s6119_s14, %s4342_s26  ;;  %p4349_p6 = scmp.lt.u32.totalorder %s4342_s26, %s6119_s14 }
  0x39   : > { %p4345_p3 = pnand %p5109_p2, %p4343_p1 }
  0x3b   : > { %p4346_p4 = pneg %p4345_p3 }
  0x3d   : > { %p4351_p7 = pnand %p4349_p6, %p4346_p4 }
  0x3f   : > { %4354 = shalt.err (!%p4351_p7)
}
  0x40   : > { %s4355_s29 = scalar_lea.vmem %s504_s19, 16  ;;  %s4362_s16 = scalar_lea.vmem %s504_s19, 32 }
  0x41   : > { %p4356_p11 = scmp.ne.s32.totalorder %s504_s19, %s4355_s29  ;;  %p4363_p5 = scmp.lt.s32.totalorder %s504_s19, %s504_s19 }
  0x42   : > { %p4364_p8 = scmp.lt.s32.totalorder %s4362_s16, %s4355_s29 }
  0x43   : > { %p4358_p12 = pnand %p4356_p11, %p5109_p2 }
  0x44   : > { %p4365_p10 = por %p4364_p8, %p4363_p5 }
  0x45   : > { %p4359_p9 = pneg %p4358_p12 }
  0x47   : > { %p4366_p0 = pnand %p4365_p10, %p4359_p9 }
  0x49   : > { %4369 = shalt.err (!%p4366_p0)
}
  0x4a   : > { %4150 = dma.hbm_to_vmem [thread:$0]  (!%p5088_p13), %s6119_s14, 16, %s504_s19, [#allocation24]  }
  0x4b   : > { %s5126_s22 = sshll.u32 %s4916_s24, 4  ;;  %s6121_s1 = sld [smem:[#allocation48_spill]] }
  0x4c   : > { %s528_s16 = scalar_lea.vmem [#allocation5], %s5084_s20  ;;  %p6122_p8 = scmp.ne.s32.totalorder %s6118_s28, 0 }
  0x4d   : > { %s535_s25 = sshll.u32 %s528_s16, 4  ;;  %s5135_s25 = int_to_ptr.vmem [resolvable:$true] %s535_s25 }
  0x4e   : > { %p5142_p9 = pneg %p6122_p8 }
  0x50   : > { %s6123_s19 = scalar_select %p5142_p9, 1, 0 }
  0x51   : > { %s5132_s29 = scalar_lea.hbm %s6121_s1, %s5126_s22  ;;  %s4375_s14 = scalar_lea.hbm %s6121_s1, 32 }
  0x52   : > { %s4370_s18 = scalar_lea.hbm %s5132_s29, 16  ;;  %p4376_p1 = scmp.lt.u32.totalorder %s5132_s29, %s6121_s1 }
  0x53   : > { %p4371_p5 = scmp.ne.s32.totalorder %s5132_s29, %s4370_s18  ;;  %p4377_p3 = scmp.lt.u32.totalorder %s4375_s14, %s4370_s18 }
  0x54   : > { %p4379_p6 = scmp.lt.u32.totalorder %s4370_s18, %s5132_s29 }
  0x55   : > { %p4373_p10 = pnand %p5142_p9, %p4371_p5  ;;  %p4378_p4 = por %p4377_p3, %p4376_p1 }
  0x57   : > { %p4374_p0 = pneg %p4373_p10  ;;  %p4380_p7 = por %p4379_p6, %p4378_p4 }
  0x59   : > { %p4381_p11 = pnand %p4380_p7, %p4374_p0 }
  0x5b   : > { %4384 = shalt.err (!%p4381_p11)
}
  0x5c   : > { %s4385_s23 = scalar_lea.vmem %s5135_s25, 16  ;;  %s4919_s26 = smov [#allocation5]  }
  0x5d   : > { %p4386_p12 = scmp.ne.s32.totalorder %s5135_s25, %s4385_s23  ;;  %s4390_s30 = sshll.u32 %s4919_s26, 4  ;;  %s4391_s30 = int_to_ptr.vmem [resolvable:$false] %s4390_s30 }
  0x5e   : > { %s4392_s17 = scalar_lea.vmem %s4391_s30, 32  ;;  %p4393_p13 = scmp.lt.s32.totalorder %s5135_s25, %s4391_s30 }
  0x5f   : > { %p4388_p5 = pnand %p4386_p12, %p5142_p9  ;;  %p4394_p2 = scmp.lt.s32.totalorder %s4392_s17, %s4385_s23 }
  0x61   : > { %p4389_p10 = pneg %p4388_p5  ;;  %p4395_p1 = por %p4394_p2, %p4393_p13 }
  0x63   : > { %p4396_p3 = pnand %p4395_p1, %p4389_p10 }
  0x65   : > { %4399 = shalt.err (!%p4396_p3)
}
  0x66   : > { %s6124_s14 = scalar_lea.sflag [#allocation6], %s5093_s27  ;;  %s5168_s18 = smul.u32 96, %s5084_s20 }
  0x67   : > { %4157 = dma.hbm_to_vmem [thread:$0]  (!%p6122_p8), %s5132_s29, 16, %s5135_s25, %s6124_s14  }
  0x68   : > { %s5171_s16 = smul.u32 1536, %s4916_s24  ;;  %s6125_s3 = sld [smem:[#allocation49_spill]] }
  0x69   : > { %s563_s17 = scalar_lea.vmem [#allocation8], %s5168_s18  ;;  %s6080_s25 = scalar_lea.sflag [#allocation9], %s5093_s27 }
  0x6a   : > { %s570_s1 = sshll.u32 %s563_s17, 4  ;;  %s5180_s1 = int_to_ptr.vmem [resolvable:$true] %s570_s1 }
  0x6e   : > { %s5177_s30 = scalar_lea.hbm %s6125_s3, %s5171_s16  ;;  %s4405_s23 = scalar_lea.hbm %s6125_s3, 3072 }
  0x6f   : > { %s4400_s29 = scalar_lea.hbm %s5177_s30, 1536  ;;  %p4406_p4 = scmp.lt.u32.totalorder %s5177_s30, %s6125_s3 }
  0x70   : > { %p4401_p13 = scmp.ne.s32.totalorder %s5177_s30, %s4400_s29  ;;  %p4407_p6 = scmp.lt.u32.totalorder %s4405_s23, %s4400_s29 }
  0x71   : > { %p4409_p11 = scmp.lt.u32.totalorder %s4400_s29, %s5177_s30 }
  0x72   : > { %p4403_p2 = pnand %p4401_p13, %p5142_p9  ;;  %p4408_p7 = por %p4407_p6, %p4406_p4 }
  0x74   : > { %p4404_p0 = pneg %p4403_p2  ;;  %p4410_p12 = por %p4409_p11, %p4408_p7 }
  0x76   : > { %p4411_p5 = pnand %p4410_p12, %p4404_p0 }
  0x78   : > { %4414 = shalt.err (!%p4411_p5)
}
  0x79   : > { %s4415_s17 = scalar_lea.vmem %s5180_s1, 1536  ;;  %s4920_s13 = smov [#allocation8]  }
  0x7a   : > { %p4416_p10 = scmp.ne.s32.totalorder %s5180_s1, %s4415_s17  ;;  %s4420_s14 = sshll.u32 %s4920_s13, 4  ;;  %s4421_s14 = int_to_ptr.vmem [resolvable:$false] %s4420_s14 }
  0x7b   : > { %s4422_s12 = scalar_lea.vmem %s4421_s14, 3072  ;;  %p4423_p13 = scmp.lt.s32.totalorder %s5180_s1, %s4421_s14 }
  0x7c   : > { %p4418_p1 = pnand %p4416_p10, %p5142_p9  ;;  %p4424_p2 = scmp.lt.s32.totalorder %s4422_s12, %s4415_s17 }
  0x7e   : > { %p4419_p3 = pneg %p4418_p1  ;;  %p4425_p4 = por %p4424_p2, %p4423_p13 }
  0x80   : > { %p4426_p6 = pnand %p4425_p4, %p4419_p3 }
  0x82   : > { %4429 = shalt.err (!%p4426_p6)
}
  0x83   : > { %s6082_s29 = smov 64   ;;  %s6087_s23 = smov 4  }
  0x84   : > { %4163 = dma.hbm_to_vmem [thread:$0]  (!%p6122_p8), %s5177_s30, 1536, %s5180_s1, %s6080_s25, %s6082_s29, %s6082_s29, %s6087_s23  }
  0x85   : > { %s6126_s5 = sld [smem:[#allocation50_spill]]  ;;  %s605_s14 = scalar_lea.vmem [#allocation11], %s5168_s18 }
  0x86   : > { %s612_s12 = sshll.u32 %s605_s14, 4  ;;  %s6081_s3 = scalar_lea.sflag [#allocation12], %s5093_s27  ;;  %s5216_s12 = int_to_ptr.vmem [resolvable:$true] %s612_s12 }
  0x8b   : > { %s5213_s13 = scalar_lea.hbm %s6126_s5, %s5171_s16  ;;  %s4435_s26 = scalar_lea.hbm %s6126_s5, 3072 }
  0x8c   : > { %s4430_s10 = scalar_lea.hbm %s5213_s13, 1536  ;;  %p4436_p12 = scmp.lt.u32.totalorder %s5213_s13, %s6126_s5 }
  0x8d   : > { %p4431_p0 = scmp.ne.s32.totalorder %s5213_s13, %s4430_s10  ;;  %p4437_p5 = scmp.lt.u32.totalorder %s4435_s26, %s4430_s10 }
  0x8e   : > { %p4439_p1 = scmp.lt.u32.totalorder %s4430_s10, %s5213_s13 }
  0x8f   : > { %p4433_p7 = pnand %p4431_p0, %p5142_p9  ;;  %p4438_p10 = por %p4437_p5, %p4436_p12 }
  0x91   : > { %p4434_p11 = pneg %p4433_p7  ;;  %p4440_p3 = por %p4439_p1, %p4438_p10 }
  0x93   : > { %p4441_p13 = pnand %p4440_p3, %p4434_p11 }
  0x95   : > { %4444 = shalt.err (!%p4441_p13)
}
  0x96   : > { %s4445_s14 = scalar_lea.vmem %s5216_s12, 1536  ;;  %s4923_s1 = smov [#allocation11]  }
  0x97   : > { %p4446_p2 = scmp.ne.s32.totalorder %s5216_s12, %s4445_s14  ;;  %s4450_s30 = sshll.u32 %s4923_s1, 4  ;;  %s4451_s30 = int_to_ptr.vmem [resolvable:$false] %s4450_s30 }
  0x98   : > { %s4452_s25 = scalar_lea.vmem %s4451_s30, 3072  ;;  %p4453_p0 = scmp.lt.s32.totalorder %s5216_s12, %s4451_s30 }
  0x99   : > { %p4448_p4 = pnand %p4446_p2, %p5142_p9  ;;  %p4454_p7 = scmp.lt.s32.totalorder %s4452_s25, %s4445_s14 }
  0x9b   : > { %p4449_p6 = pneg %p4448_p4  ;;  %p4455_p12 = por %p4454_p7, %p4453_p0 }
  0x9d   : > { %p4456_p5 = pnand %p4455_p12, %p4449_p6 }
  0x9f   : > { %4459 = shalt.err (!%p4456_p5)
}
  0xa0   : > { %4169 = dma.hbm_to_vmem [thread:$0]  (!%p6122_p8), %s5213_s13, 1536, %s5216_s12, %s6081_s3, %s6082_s29, %s6082_s29, %s6087_s23  }
  0xa1   : > { %s6127_s7 = sld [smem:[#allocation51_spill]]  ;;  %s646_s14 = scalar_lea.vmem [#allocation14], %s5084_s20 }
  0xa2   : > { %s653_s1 = sshll.u32 %s646_s14, 4  ;;  %s6085_s30 = scalar_lea.sflag [#allocation15], %s5093_s27  ;;  %s654_s1 = int_to_ptr.vmem [resolvable:$true] %s653_s1 }
  0xa7   : > { %s5249_s17 = scalar_lea.hbm %s6127_s7, %s5126_s22  ;;  %s4465_s12 = scalar_lea.hbm %s6127_s7, 32 }
  0xa8   : > { %s4460_s25 = scalar_lea.hbm %s5249_s17, 16  ;;  %p4466_p3 = scmp.lt.u32.totalorder %s5249_s17, %s6127_s7 }
  0xa9   : > { %p4461_p11 = scmp.ne.s32.totalorder %s5249_s17, %s4460_s25  ;;  %p4467_p13 = scmp.lt.u32.totalorder %s4465_s12, %s4460_s25 }
  0xaa   : > { %p4469_p4 = scmp.lt.u32.totalorder %s4460_s25, %s5249_s17 }
  0xab   : > { %p4463_p10 = pnand %p4461_p11, %p5142_p9  ;;  %p4468_p2 = por %p4467_p13, %p4466_p3 }
  0xad   : > { %p4464_p1 = pneg %p4463_p10  ;;  %p4470_p6 = por %p4469_p4, %p4468_p2 }
  0xaf   : > { %p4471_p0 = pnand %p4470_p6, %p4464_p1 }
  0xb1   : > { %4474 = shalt.err (!%p4471_p0)
}
  0xb2   : > { %s4475_s14 = scalar_lea.vmem %s654_s1, 16  ;;  %s4924_s3 = smov [#allocation14]  }
  0xb3   : > { %p4476_p7 = scmp.ne.s32.totalorder %s654_s1, %s4475_s14  ;;  %s4480_s29 = sshll.u32 %s4924_s3, 4  ;;  %s4481_s29 = int_to_ptr.vmem [resolvable:$false] %s4480_s29 }
  0xb4   : > { %s4482_s5 = scalar_lea.vmem %s4481_s29, 32  ;;  %p4483_p11 = scmp.lt.s32.totalorder %s654_s1, %s4481_s29 }
  0xb5   : > { %p4478_p12 = pnand %p4476_p7, %p5142_p9  ;;  %p4484_p10 = scmp.lt.s32.totalorder %s4482_s5, %s4475_s14 }
  0xb7   : > { %p4479_p5 = pneg %p4478_p12  ;;  %p4485_p8 = por %p4484_p10, %p4483_p11 }
  0xb9   : > { %p4486_p3 = pnand %p4485_p8, %p4479_p5 }
  0xbb   : > { %4489 = shalt.err (!%p4486_p3)
}
  0xbc   : > { %p6128_p13 = scmp.ne.s32.totalorder %s6118_s28, 0  ;;  %s6129_s9 = sld [smem:[#allocation52_spill]] }
  0xbd   : > { %s680_s29 = scalar_lea.vmem [#allocation17], %s5084_s20  ;;  %s6086_s10 = scalar_lea.sflag [#allocation18], %s5093_s27 }
  0xbe   : > { %4175 = dma.hbm_to_vmem [thread:$0]  (!%p6128_p13), %s5249_s17, 16, %s654_s1, %s6085_s30  }
  0xbf   : > { %s687_s12 = sshll.u32 %s680_s29, 4  ;;  %s688_s12 = int_to_ptr.vmem [resolvable:$true] %s687_s12 }
  0xc2   : > { %s5276_s3 = scalar_lea.hbm %s6129_s9, %s5126_s22  ;;  %s4495_s1 = scalar_lea.hbm %s6129_s9, 32 }
  0xc3   : > { %s4490_s26 = scalar_lea.hbm %s5276_s3, 16  ;;  %p4496_p4 = scmp.lt.u32.totalorder %s5276_s3, %s6129_s9 }
  0xc4   : > { %p4491_p8 = scmp.ne.s32.totalorder %s5276_s3, %s4490_s26  ;;  %p4497_p6 = scmp.lt.u32.totalorder %s4495_s1, %s4490_s26 }
  0xc5   : > { %p4499_p7 = scmp.lt.u32.totalorder %s4490_s26, %s5276_s3 }
  0xc6   : > { %p4493_p1 = pnand %p4491_p8, %p5142_p9  ;;  %p4498_p0 = por %p4497_p6, %p4496_p4 }
  0xc8   : > { %p4494_p2 = pneg %p4493_p1  ;;  %p4500_p12 = por %p4499_p7, %p4498_p0 }
  0xca   : > { %p4501_p5 = pnand %p4500_p12, %p4494_p2 }
  0xcc   : > { %4504 = shalt.err (!%p4501_p5)
}
  0xcd   : > { %s4505_s13 = scalar_lea.vmem %s688_s12, 16  ;;  %s4925_s29 = smov [#allocation17]  }
  0xce   : > { %p4506_p11 = scmp.ne.s32.totalorder %s688_s12, %s4505_s13  ;;  %s4510_s30 = sshll.u32 %s4925_s29, 4  ;;  %s4511_s30 = int_to_ptr.vmem [resolvable:$false] %s4510_s30 }
  0xcf   : > { %s4512_s14 = scalar_lea.vmem %s4511_s30, 32  ;;  %p4513_p8 = scmp.lt.s32.totalorder %s688_s12, %s4511_s30 }
  0xd0   : > { %p4508_p10 = pnand %p4506_p11, %p5142_p9  ;;  %p4514_p1 = scmp.lt.s32.totalorder %s4512_s14, %s4505_s13 }
  0xd2   : > { %p4509_p3 = pneg %p4508_p10  ;;  %p4515_p13 = por %p4514_p1, %p4513_p8 }
  0xd4   : > { %p4516_p4 = pnand %p4515_p13, %p4509_p3 }
  0xd6   : > { %4519 = shalt.err (!%p4516_p4)
}
  0xd7   : > { %p6130_p6 = scmp.ne.s32.totalorder %s6118_s28, 0  ;;  %s6131_s11 = sld [smem:[#allocation54_spill]] }
  0xd8   : > { %s718_s30 = scalar_lea.vmem [#allocation20], %s5084_s20  ;;  %s4926_s25 = smov [#allocation2]  }
  0xd9   : > { %4181 = dma.hbm_to_vmem [thread:$0]  (!%p6130_p6), %s5276_s3, 16, %s688_s12, %s6086_s10  }
  0xda   : > { %s725_s5 = sshll.u32 %s718_s30, 4  ;;  %s5308_s13 = sshll.u32 %s4926_s25, 4  ;;  %s5306_s5 = int_to_ptr.vmem [resolvable:$true] %s725_s5  ;;  %s490_s13 = int_to_ptr.vmem [resolvable:$true] %s5308_s13 }
  0xdb   : > { %s6090_s29 = scalar_lea.sflag [#allocation21], %s5093_s27 }
  0xdd   : > { %s5303_s1 = scalar_lea.hbm %s6131_s11, %s5126_s22  ;;  %s4525_s26 = scalar_lea.hbm %s6131_s11, 32 }
  0xde   : > { %s4520_s14 = scalar_lea.hbm %s5303_s1, 16  ;;  %p4526_p7 = scmp.lt.u32.totalorder %s5303_s1, %s6131_s11 }
  0xdf   : > { %p4521_p13 = scmp.ne.s32.totalorder %s5303_s1, %s4520_s14  ;;  %p4527_p12 = scmp.lt.u32.totalorder %s4525_s26, %s4520_s14 }
  0xe0   : > { %p4529_p11 = scmp.lt.u32.totalorder %s4520_s14, %s5303_s1 }
  0xe1   : > { %p4523_p2 = pnand %p4521_p13, %p5142_p9  ;;  %p4528_p5 = por %p4527_p12, %p4526_p7 }
  0xe3   : > { %p4524_p0 = pneg %p4523_p2  ;;  %p4530_p10 = por %p4529_p11, %p4528_p5 }
  0xe5   : > { %p4531_p3 = pnand %p4530_p10, %p4524_p0 }
  0xe7   : > { %4534 = shalt.err (!%p4531_p3)
}
  0xe8   : > { %s4535_s30 = scalar_lea.vmem %s5306_s5, 16  ;;  %s4927_s25 = smov [#allocation20]  }
  0xe9   : > { %p4536_p8 = scmp.ne.s32.totalorder %s5306_s5, %s4535_s30  ;;  %s4540_s3 = sshll.u32 %s4927_s25, 4  ;;  %s4541_s3 = int_to_ptr.vmem [resolvable:$false] %s4540_s3 }
  0xea   : > { %s4542_s10 = scalar_lea.vmem %s4541_s3, 32  ;;  %p4543_p13 = scmp.lt.s32.totalorder %s5306_s5, %s4541_s3 }
  0xeb   : > { %p4538_p1 = pnand %p4536_p8, %p5142_p9  ;;  %p4544_p2 = scmp.lt.s32.totalorder %s4542_s10, %s4535_s30 }
  0xed   : > { %p4539_p4 = pneg %p4538_p1  ;;  %p4545_p7 = por %p4544_p2, %p4543_p13 }
  0xef   : > { %p4546_p12 = pnand %p4545_p7, %p4539_p4 }
  0xf1   : > { %4549 = shalt.err (!%p4546_p12)
}
  0xf2   : > { %4187 = dma.hbm_to_vmem [thread:$0]  (!%p6130_p6), %s5303_s1, 16, %s5306_s5, %s6090_s29  }
  0xf3   : > { %s6132_s26 = sld [smem:[#allocation47_spill]]  ;;  %p6133_p5 = scmp.ne.s32.totalorder %s6120_s0, 0 }
  0xf9   : > { %s4550_s17 = scalar_lea.hbm %s6132_s26, 256 }
  0xfa   : > { %p4551_p0 = scmp.ne.s32.totalorder %s6132_s26, %s4550_s17  ;;  %p4557_p3 = scmp.lt.u32.totalorder %s4550_s17, %s6132_s26 }
  0xfc   : > { %p4553_p11 = pnand %p4551_p0, %p6133_p5 }
  0xfe   : > { %p4554_p10 = pneg %p4553_p11 }
 0x100   : > { %p4559_p8 = pnand %p4557_p3, %p4554_p10 }
 0x102   : > { %4562 = shalt.err (!%p4559_p8)
}
 0x103   : > { %s4563_s23 = scalar_lea.vmem %s490_s13, 256  ;;  %p4571_p2 = scmp.lt.s32.totalorder %s490_s13, %s490_s13 }
 0x104   : > { %p4564_p1 = scmp.ne.s32.totalorder %s490_s13, %s4563_s23  ;;  %p4572_p7 = scmp.lt.s32.totalorder %s4563_s23, %s4563_s23 }
 0x106   : > { %p4566_p4 = pnand %p4564_p1, %p6133_p5  ;;  %p4573_p12 = por %p4572_p7, %p4571_p2 }
 0x108   : > { %p4567_p13 = pneg %p4566_p4 }
 0x10a   : > { %p4574_p6 = pnand %p4573_p12, %p4567_p13 }
 0x10c   : > { %4577 = shalt.err (!%p4574_p6)
}
 0x10d   : > { %s4928_s1 = smov 128   ;;  %s4929_s5 = smov 8  }
 0x10e   : > { %p6134_p0 = scmp.ne.s32.totalorder %s6117_s21, 0  ;;  %s4930_s17 = smov [#allocation26]  }
 0x10f   : > { %s514_s25 = sshll.u32 %s4930_s17, 4  ;;  %s5357_s23 = scalar_lea.hbm %s6042_s2, %s5126_s22  ;;  %s515_s25 = int_to_ptr.vmem [resolvable:$true] %s514_s25 }
 0x110   : > { %4147 = dma.hbm_to_vmem [thread:$0]  (!%p6134_p0), %s6132_s26, 256, %s490_s13, [#allocation3], %s4928_s1, %s4928_s1, %s4929_s5  }
 0x111   : > { %s4578_s7 = scalar_lea.hbm %s6055_s15, 16 }
 0x112   : > { %p4579_p6 = scmp.ne.s32.totalorder %s6055_s15, %s4578_s7  ;;  %p4585_p3 = scmp.lt.u32.totalorder %s4578_s7, %s6055_s15 }
 0x114   : > { %p4581_p11 = pnand %p4579_p6, %p6133_p5 }
 0x116   : > { %p4582_p10 = pneg %p4581_p11 }
 0x118   : > { %p4587_p8 = pnand %p4585_p3, %p4582_p10 }
 0x11a   : > { %4590 = shalt.err (!%p4587_p8)
}
 0x11b   : > { %s4591_s5 = scalar_lea.vmem %s515_s25, 16  ;;  %s4598_s29 = scalar_lea.vmem %s515_s25, 32 }
 0x11c   : > { %p4592_p1 = scmp.ne.s32.totalorder %s515_s25, %s4591_s5  ;;  %p4599_p2 = scmp.lt.s32.totalorder %s515_s25, %s515_s25 }
 0x11d   : > { %p4600_p7 = scmp.lt.s32.totalorder %s4598_s29, %s4591_s5 }
 0x11e   : > { %p4594_p4 = pnand %p4592_p1, %p6133_p5 }
 0x11f   : > { %p4601_p12 = por %p4600_p7, %p4599_p2 }
 0x120   : > { %p4595_p13 = pneg %p4594_p4 }
 0x122   : > { %p4602_p9 = pnand %p4601_p12, %p4595_p13 }
 0x124   : > { %4605 = shalt.err (!%p4602_p9)
}
 0x125   : > { %4153 = dma.hbm_to_vmem [thread:$0]  (!%p6134_p0), %s6055_s15, 16, %s515_s25, [#allocation27]  }
 0x126   : > { %s545_s7 = scalar_lea.vmem [#allocation7], %s5084_s20  ;;  %s5382_s17 = scalar_lea.hbm %s6044_s4, %s5171_s16 }
 0x127   : > { %s552_s0 = sshll.u32 %s545_s7, 4  ;;  %s4606_s21 = scalar_lea.hbm %s5357_s23, 16  ;;  %s553_s0 = int_to_ptr.vmem [resolvable:$true] %s552_s0 }
 0x128   : > { %p4607_p9 = scmp.ne.s32.totalorder %s5357_s23, %s4606_s21  ;;  %p6135_p5 = scmp.ne.s32.totalorder %s6123_s19, 0 }
 0x129   : > { %s4611_s10 = scalar_lea.hbm %s6042_s2, 32  ;;  %p4612_p0 = scmp.lt.u32.totalorder %s5357_s23, %s6042_s2 }
 0x12a   : > { %p4609_p6 = pnand %p4607_p9, %p6135_p5  ;;  %p4613_p10 = scmp.lt.u32.totalorder %s4611_s10, %s4606_s21 }
 0x12b   : > { %p4615_p8 = scmp.lt.u32.totalorder %s4606_s21, %s5357_s23 }
 0x12c   : > { %p4610_p11 = pneg %p4609_p6  ;;  %p4614_p3 = por %p4613_p10, %p4612_p0 }
 0x12e   : > { %p4616_p1 = por %p4615_p8, %p4614_p3 }
 0x130   : > { %p4617_p4 = pnand %p4616_p1, %p4610_p11 }
 0x132   : > { %4620 = shalt.err (!%p4617_p4)
}
 0x133   : > { %s4621_s16 = scalar_lea.vmem %s553_s0, 16  ;;  %s4931_s25 = smov [#allocation7]  }
 0x134   : > { %p4622_p13 = scmp.ne.s32.totalorder %s553_s0, %s4621_s16  ;;  %s4626_s5 = sshll.u32 %s4931_s25, 4  ;;  %s4627_s5 = int_to_ptr.vmem [resolvable:$false] %s4626_s5 }
 0x135   : > { %s4628_s29 = scalar_lea.vmem %s4627_s5, 32  ;;  %p4629_p12 = scmp.lt.s32.totalorder %s553_s0, %s4627_s5 }
 0x136   : > { %p4624_p2 = pnand %p4622_p13, %p6135_p5  ;;  %p4630_p9 = scmp.lt.s32.totalorder %s4628_s29, %s4621_s16 }
 0x138   : > { %p4625_p7 = pneg %p4624_p2  ;;  %p4631_p6 = por %p4630_p9, %p4629_p12 }
 0x13a   : > { %p4632_p0 = pnand %p4631_p6, %p4625_p7 }
 0x13c   : > { %4635 = shalt.err (!%p4632_p0)
}
 0x13d   : > { %p6136_p10 = scmp.ne.s32.totalorder %s6118_s28, 0  ;;  %s6137_s9 = scalar_lea.sflag [#allocation6], %s5093_s27 }
 0x13e   : > { %s584_s11 = scalar_lea.vmem [#allocation10], %s5168_s18  ;;  %s3556_s14 = sshll.u32 %s5084_s20, 4 }
 0x13f   : > { %4160 = dma.hbm_to_vmem [thread:$0]  (!%p6136_p10), %s5357_s23, 16, %s553_s0, %s6137_s9  }
 0x140   : > { %s591_s7 = sshll.u32 %s584_s11, 4  ;;  %s4636_s12 = scalar_lea.hbm %s5382_s17, 1536  ;;  %s5405_s7 = int_to_ptr.vmem [resolvable:$true] %s591_s7 }
 0x141   : > { %p4637_p11 = scmp.ne.s32.totalorder %s5382_s17, %s4636_s12  ;;  %s4641_s30 = scalar_lea.hbm %s6044_s4, 3072 }
 0x142   : > { %p4642_p1 = scmp.lt.u32.totalorder %s5382_s17, %s6044_s4  ;;  %p4643_p4 = scmp.lt.u32.totalorder %s4641_s30, %s4636_s12 }
 0x143   : > { %p4639_p3 = pnand %p4637_p11, %p6135_p5  ;;  %p4645_p2 = scmp.lt.u32.totalorder %s4636_s12, %s5382_s17 }
 0x144   : > { %p4644_p13 = por %p4643_p4, %p4642_p1 }
 0x145   : > { %p4640_p8 = pneg %p4639_p3 }
 0x146   : > { %p4646_p7 = por %p4645_p2, %p4644_p13 }
 0x148   : > { %p4647_p12 = pnand %p4646_p7, %p4640_p8 }
 0x14a   : > { %4650 = shalt.err (!%p4647_p12)
}
 0x14b   : > { %s4651_s18 = scalar_lea.vmem %s5405_s7, 1536  ;;  %s4932_s23 = smov [#allocation10]  }
 0x14c   : > { %p4652_p9 = scmp.ne.s32.totalorder %s5405_s7, %s4651_s18  ;;  %s4656_s0 = sshll.u32 %s4932_s23, 4  ;;  %s4657_s0 = int_to_ptr.vmem [resolvable:$false] %s4656_s0 }
 0x14d   : > { %s4658_s1 = scalar_lea.vmem %s4657_s0, 3072  ;;  %p4659_p11 = scmp.lt.s32.totalorder %s5405_s7, %s4657_s0 }
 0x14e   : > { %p4654_p6 = pnand %p4652_p9, %p6135_p5  ;;  %p4660_p3 = scmp.lt.s32.totalorder %s4658_s1, %s4651_s18 }
 0x150   : > { %p4655_p0 = pneg %p4654_p6  ;;  %p4661_p1 = por %p4660_p3, %p4659_p11 }
 0x152   : > { %p4662_p4 = pnand %p4661_p1, %p4655_p0 }
 0x154   : > { %4665 = shalt.err (!%p4662_p4)
}
 0x155   : > { %s6138_s16 = smov 4   ;;  %s6139_s25 = smov 64  }
 0x156   : > { %s6140_s5 = scalar_lea.sflag [#allocation9], %s5093_s27  ;;  %s3723_s29 = sshll.u32 %s4916_s24, 8 }
 0x157   : > { %4166 = dma.hbm_to_vmem [thread:$0]  (!%p6136_p10), %s5382_s17, 1536, %s5405_s7, %s6140_s5, %s6139_s25, %s6139_s25, %s6138_s16  }
 0x158   : > { %s626_s9 = scalar_lea.vmem [#allocation13], %s3556_s14  ;;  %s5439_s3 = scalar_lea.hbm %s6046_s6, %s3723_s29 }
 0x159   : > { %s633_s11 = sshll.u32 %s626_s9, 4  ;;  %s4666_s30 = scalar_lea.hbm %s5439_s3, 256  ;;  %s5441_s11 = int_to_ptr.vmem [resolvable:$true] %s633_s11 }
 0x15a   : > { %p4667_p8 = scmp.ne.s32.totalorder %s5439_s3, %s4666_s30  ;;  %s4671_s14 = scalar_lea.hbm %s6046_s6, 512 }
 0x15b   : > { %p4672_p7 = scmp.lt.u32.totalorder %s5439_s3, %s6046_s6  ;;  %p4673_p12 = scmp.lt.u32.totalorder %s4671_s14, %s4666_s30 }
 0x15c   : > { %p4669_p13 = pnand %p4667_p8, %p6135_p5  ;;  %p4675_p6 = scmp.lt.u32.totalorder %s4666_s30, %s5439_s3 }
 0x15d   : > { %p4674_p9 = por %p4673_p12, %p4672_p7 }
 0x15e   : > { %p4670_p2 = pneg %p4669_p13 }
 0x15f   : > { %p4676_p0 = por %p4675_p6, %p4674_p9 }
 0x161   : > { %p4677_p11 = pnand %p4676_p0, %p4670_p2 }
 0x163   : > { %4680 = shalt.err (!%p4677_p11)
}
 0x164   : > { %s4681_s18 = scalar_lea.vmem %s5441_s11, 256  ;;  %s4933_s23 = smov [#allocation13]  }
 0x165   : > { %p4682_p3 = scmp.ne.s32.totalorder %s5441_s11, %s4681_s18  ;;  %s4686_s0 = sshll.u32 %s4933_s23, 4  ;;  %s4687_s0 = int_to_ptr.vmem [resolvable:$false] %s4686_s0 }
 0x166   : > { %s4688_s1 = scalar_lea.vmem %s4687_s0, 512  ;;  %p4689_p8 = scmp.lt.s32.totalorder %s5441_s11, %s4687_s0 }
 0x167   : > { %p4684_p1 = pnand %p4682_p3, %p6135_p5  ;;  %p4690_p13 = scmp.lt.s32.totalorder %s4688_s1, %s4681_s18 }
 0x169   : > { %p4685_p4 = pneg %p4684_p1  ;;  %p4691_p7 = por %p4690_p13, %p4689_p8 }
 0x16b   : > { %p4692_p12 = pnand %p4691_p7, %p4685_p4 }
 0x16d   : > { %4695 = shalt.err (!%p4692_p12)
}
 0x16e   : > { %s6141_s5 = scalar_lea.sflag [#allocation12], %s5093_s27  ;;  %s5473_s12 = scalar_lea.hbm %s6048_s8, %s5126_s22 }
 0x16f   : > { %4172 = dma.hbm_to_vmem [thread:$0]  (!%p6136_p10), %s5439_s3, 256, %s5441_s11, %s6141_s5, %s6139_s25, %s6139_s25, %s6138_s16  }
 0x170   : > { %s663_s21 = scalar_lea.vmem [#allocation16], %s5084_s20  ;;  %s4095_s17 = smul.u32 24, %s5084_s20 }
 0x171   : > { %s670_s30 = sshll.u32 %s663_s21, 4  ;;  %s4096_s7 = smul.u32 384, %s4916_s24  ;;  %s671_s30 = int_to_ptr.vmem [resolvable:$true] %s670_s30 }
 0x172   : > { %s4696_s14 = scalar_lea.hbm %s5473_s12, 16  ;;  %s4701_s10 = scalar_lea.hbm %s6048_s8, 32 }
 0x173   : > { %p4697_p2 = scmp.ne.s32.totalorder %s5473_s12, %s4696_s14  ;;  %p4702_p0 = scmp.lt.u32.totalorder %s5473_s12, %s6048_s8 }
 0x174   : > { %p4703_p11 = scmp.lt.u32.totalorder %s4701_s10, %s4696_s14  ;;  %p4705_p1 = scmp.lt.u32.totalorder %s4696_s14, %s5473_s12 }
 0x175   : > { %p4699_p9 = pnand %p4697_p2, %p6135_p5 }
 0x176   : > { %p4704_p3 = por %p4703_p11, %p4702_p0 }
 0x177   : > { %p4700_p6 = pneg %p4699_p9 }
 0x178   : > { %p4706_p4 = por %p4705_p1, %p4704_p3 }
 0x17a   : > { %p4707_p8 = pnand %p4706_p4, %p4700_p6 }
 0x17c   : > { %4710 = shalt.err (!%p4707_p8)
}
 0x17d   : > { %s4711_s23 = scalar_lea.vmem %s671_s30, 16  ;;  %s4934_s0 = smov [#allocation16]  }
 0x17e   : > { %p4712_p13 = scmp.ne.s32.totalorder %s671_s30, %s4711_s23  ;;  %s4716_s1 = sshll.u32 %s4934_s0, 4  ;;  %s4717_s1 = int_to_ptr.vmem [resolvable:$false] %s4716_s1 }
 0x17f   : > { %s4718_s5 = scalar_lea.vmem %s4717_s1, 32  ;;  %p4719_p2 = scmp.lt.s32.totalorder %s671_s30, %s4717_s1 }
 0x180   : > { %p4714_p7 = pnand %p4712_p13, %p6135_p5  ;;  %p4720_p9 = scmp.lt.s32.totalorder %s4718_s5, %s4711_s23 }
 0x182   : > { %p4715_p12 = pneg %p4714_p7  ;;  %p4721_p10 = por %p4720_p9, %p4719_p2 }
 0x184   : > { %p4722_p0 = pnand %p4721_p10, %p4715_p12 }
 0x186   : > { %4725 = shalt.err (!%p4722_p0)
}
 0x187   : > { %p6142_p11 = scmp.ne.s32.totalorder %s6118_s28, 0  ;;  %s6143_s29 = scalar_lea.sflag [#allocation15], %s5093_s27 }
 0x188   : > { %s6144_s14 = sld [smem:[#allocation53_spill]]  ;;  %s698_s3 = scalar_lea.vmem [#allocation19], %s4095_s17 }
 0x189   : > { %4178 = dma.hbm_to_vmem [thread:$0]  (!%p6142_p11), %s5473_s12, 16, %s671_s30, %s6143_s29  }
 0x18a   : > { %s705_s10 = sshll.u32 %s698_s3, 4  ;;  %s4097_s13 = smul.u32 48, %s5084_s20  ;;  %s5505_s10 = int_to_ptr.vmem [resolvable:$true] %s705_s10 }
 0x18b   : > { %s4098_s18 = smul.u32 768, %s4916_s24 }
 0x18e   : > { %s5500_s11 = scalar_lea.hbm %s6144_s14, %s4096_s7  ;;  %s4731_s7 = scalar_lea.hbm %s6144_s14, 768 }
 0x18f   : > { %s4726_s23 = scalar_lea.hbm %s5500_s11, 384  ;;  %p4732_p1 = scmp.lt.u32.totalorder %s5500_s11, %s6144_s14 }
 0x190   : > { %p4727_p10 = scmp.ne.s32.totalorder %s5500_s11, %s4726_s23  ;;  %p4733_p4 = scmp.lt.u32.totalorder %s4731_s7, %s4726_s23 }
 0x191   : > { %p4735_p13 = scmp.lt.u32.totalorder %s4726_s23, %s5500_s11 }
 0x192   : > { %p4729_p6 = pnand %p4727_p10, %p6135_p5  ;;  %p4734_p8 = por %p4733_p4, %p4732_p1 }
 0x194   : > { %p4730_p3 = pneg %p4729_p6  ;;  %p4736_p7 = por %p4735_p13, %p4734_p8 }
 0x196   : > { %p4737_p12 = pnand %p4736_p7, %p4730_p3 }
 0x198   : > { %4740 = shalt.err (!%p4737_p12)
}
 0x199   : > { %s4741_s17 = scalar_lea.vmem %s5505_s10, 384  ;;  %s4935_s5 = smov [#allocation19]  }
 0x19a   : > { %p4742_p2 = scmp.ne.s32.totalorder %s5505_s10, %s4741_s17  ;;  %s4746_s29 = sshll.u32 %s4935_s5, 4  ;;  %s4747_s29 = int_to_ptr.vmem [resolvable:$false] %s4746_s29 }
 0x19b   : > { %s4748_s9 = scalar_lea.vmem %s4747_s29, 768  ;;  %p4749_p10 = scmp.lt.s32.totalorder %s5505_s10, %s4747_s29 }
 0x19c   : > { %p4744_p9 = pnand %p4742_p2, %p6135_p5  ;;  %p4750_p6 = scmp.lt.s32.totalorder %s4748_s9, %s4741_s17 }
 0x19e   : > { %p4745_p0 = pneg %p4744_p9  ;;  %p4751_p1 = por %p4750_p6, %p4749_p10 }
 0x1a0   : > { %p4752_p4 = pnand %p4751_p1, %p4745_p0 }
 0x1a2   : > { %4755 = shalt.err (!%p4752_p4)
}
 0x1a3   : > { %s6145_s21 = scalar_lea.sflag [#allocation18], %s5093_s27  ;;  %s6146_s12 = sld [smem:[#allocation55_spill]] }
 0x1a4   : > { %4184 = dma.hbm_to_vmem [thread:$0]  (!%p6142_p11), %s5500_s11, 384, %s5505_s10, %s6145_s21, %s6139_s25, %s6139_s25, %s6138_s16  }
 0x1a5   : > { %s736_s7 = scalar_lea.vmem [#allocation22], %s4097_s13 }
 0x1a6   : > { %s743_s0 = sshll.u32 %s736_s7, 4  ;;  %s5543_s0 = int_to_ptr.vmem [resolvable:$true] %s743_s0 }
 0x1a9   : > { %s5539_s30 = scalar_lea.hbm %s6146_s12, %s4098_s18  ;;  %s4761_s10 = scalar_lea.hbm %s6146_s12, 1536 }
 0x1aa   : > { %s4756_s1 = scalar_lea.hbm %s5539_s30, 768  ;;  %p4762_p7 = scmp.lt.u32.totalorder %s5539_s30, %s6146_s12 }
 0x1ab   : > { %p4757_p3 = scmp.ne.s32.totalorder %s5539_s30, %s4756_s1  ;;  %p4763_p12 = scmp.lt.u32.totalorder %s4761_s10, %s4756_s1 }
 0x1ac   : > { %p4765_p9 = scmp.lt.u32.totalorder %s4756_s1, %s5539_s30 }
 0x1ad   : > { %p4759_p8 = pnand %p4757_p3, %p6135_p5  ;;  %p4764_p2 = por %p4763_p12, %p4762_p7 }
 0x1af   : > { %p4760_p13 = pneg %p4759_p8  ;;  %p4766_p0 = por %p4765_p9, %p4764_p2 }
 0x1b1   : > { %p4767_p10 = pnand %p4766_p0, %p4760_p13 }
 0x1b3   : > { %4770 = shalt.err (!%p4767_p10)
}
 0x1b4   : > { %s4771_s13 = scalar_lea.vmem %s5543_s0, 768  ;;  %s4936_s5 = smov [#allocation22]  }
 0x1b5   : > { %p4772_p6 = scmp.ne.s32.totalorder %s5543_s0, %s4771_s13  ;;  %s4776_s29 = sshll.u32 %s4936_s5, 4  ;;  %s4777_s29 = int_to_ptr.vmem [resolvable:$false] %s4776_s29 }
 0x1b6   : > { %s4778_s9 = scalar_lea.vmem %s4777_s29, 1536  ;;  %p4779_p3 = scmp.lt.s32.totalorder %s5543_s0, %s4777_s29 }
 0x1b7   : > { %p4774_p1 = pnand %p4772_p6, %p6135_p5  ;;  %p4780_p8 = scmp.lt.s32.totalorder %s4778_s9, %s4771_s13 }
 0x1b9   : > { %p4775_p4 = pneg %p4774_p1  ;;  %p4781_p7 = por %p4780_p8, %p4779_p3 }
 0x1bb   : > { %p4782_p12 = pnand %p4781_p7, %p4775_p4 }
 0x1bd   : > { %4785 = shalt.err (!%p4782_p12)
}
 0x1be   : > { %s6147_s21 = scalar_lea.sflag [#allocation21], %s5093_s27  ;;  %s6148_s7 = sld [smem:[#allocation56_spill]] }
 0x1bf   : > { %4190 = dma.hbm_to_vmem [thread:$0]  (!%p6142_p11), %s5539_s30, 768, %s5543_s0, %s6147_s21, %s6139_s25, %s6139_s25, %s6138_s16  }
 0x1c0   : > { %s756_s24 = scalar_lea.vmem [#allocation23], %s5084_s20  ;;  %s754_s10 = scalar_lea.sflag [#allocation24], %s5093_s27 }
 0x1c1   : > { %s763_s11 = sshll.u32 %s756_s24, 4  ;;  %s764_s11 = int_to_ptr.vmem [resolvable:$true] %s763_s11 }
 0x1c4   : > { %s5575_s1 = scalar_lea.hbm %s6148_s7, %s5126_s22  ;;  %s4791_s25 = scalar_lea.hbm %s6148_s7, 32 }
 0x1c5   : > { %s4786_s18 = scalar_lea.hbm %s5575_s1, 16  ;;  %p4792_p0 = scmp.lt.u32.totalorder %s5575_s1, %s6148_s7 }
 0x1c6   : > { %p4787_p13 = scmp.ne.s32.totalorder %s5575_s1, %s4786_s18  ;;  %p4793_p10 = scmp.lt.u32.totalorder %s4791_s25, %s4786_s18 }
 0x1c7   : > { %p4795_p1 = scmp.lt.u32.totalorder %s4786_s18, %s5575_s1 }
 0x1c8   : > { %p4789_p2 = pnand %p4787_p13, %p6135_p5  ;;  %p4794_p6 = por %p4793_p10, %p4792_p0 }
 0x1ca   : > { %p4790_p9 = pneg %p4789_p2  ;;  %p4796_p4 = por %p4795_p1, %p4794_p6 }
 0x1cc   : > { %p4797_p3 = pnand %p4796_p4, %p4790_p9 }
 0x1ce   : > { %4800 = shalt.err (!%p4797_p3)
}
 0x1cf   : > { %s4801_s20 = scalar_lea.vmem %s764_s11, 16  ;;  %s4937_s27 = smov [#allocation23]  }
 0x1d0   : > { %p4802_p8 = scmp.ne.s32.totalorder %s764_s11, %s4801_s20  ;;  %s4806_s0 = sshll.u32 %s4937_s27, 4  ;;  %s4807_s0 = int_to_ptr.vmem [resolvable:$false] %s4806_s0 }
 0x1d1   : > { %s4808_s13 = scalar_lea.vmem %s4807_s0, 32  ;;  %p4809_p13 = scmp.lt.s32.totalorder %s764_s11, %s4807_s0 }
 0x1d2   : > { %p4804_p7 = pnand %p4802_p8, %p6135_p5  ;;  %p4810_p2 = scmp.lt.s32.totalorder %s4808_s13, %s4801_s20 }
 0x1d4   : > { %p4805_p12 = pneg %p4804_p7  ;;  %p4811_p11 = por %p4810_p2, %p4809_p13 }
 0x1d6   : > { %p4812_p0 = pnand %p4811_p11, %p4805_p12 }
 0x1d8   : > { %4815 = shalt.err (!%p4812_p0)
}
 0x1d9   : > { %p6149_p10 = scmp.ne.s32.totalorder %s6118_s28, 0  ;;  %s6150_s5 = sld [smem:[#allocation46_spill]] }
 0x1db   : > { %4193 = dma.hbm_to_vmem [thread:$0]  (!%p6149_p10), %s5575_s1, 16, %s764_s11, %s754_s10  }
 0x1df   : > { %p6151_p9 = scmp.ne.s32.totalorder %s6150_s5, 0 }
 0x1e0   : > { %s6152_s29 = sld [smem:[#allocation42_spill]] (!%p6151_p9) }
 0x1e1   : > { %772 = sbr.rel (%p6151_p9) target bundleno = 5905 (0x1711), region = 84 }
 0x1e6   : > { %p6153_p6 = scmp.eq.s32.totalorder (!%p6151_p9), %s6152_s29, 0 }
 0x1e8   : > { %4859 = dma.done.wait (%p6153_p6), [#allocation3], 256   ;;  %p6154_p5 = pmov %p6153_p6 }
 0x1e9   : > { %s6155_s19 = sld [smem:[#allocation40_spill]]  ;;  %s6156_s9 = sld [smem:[#allocation45_spill]] }
 0x1ea   : > { %4861 = vsyncadd (%p6154_p5), [#allocation3], 4294967040  ;;  %s5603_s21 = sand.u32 1, %s6152_s29  }
 0x1eb   : > { %s779_s28 = scalar_lea.sflag [#allocation6], %s5603_s21 }
 0x1ef   : > { %s5606_s3 = sand.u32 1, %s6155_s19   ;;  %p6157_p11 = scmp.ne.s32.totalorder %s6156_s9, 0 }
 0x1f0   : > { %s781_s23 = scalar_lea.vmem [#allocation5], %s5606_s3 }
 0x1f1   : > { %4863 = dma.done.wait (%p6157_p11), %s779_s28, 32  }
 0x1f2   : > { %4865 = vsyncadd (%p6157_p11), %s779_s28, 4294967264  ;;  %s4099_s1 = smul.u32 96, %s5606_s3  ;;  %s789_s24 = scalar_lea.vmem [#allocation7], %s5606_s3 }
 0x1f3   : > { %s795_s11 = scalar_lea.sflag [#allocation9], %s5603_s21 }
 0x1f4   : > { %s5617_s10 = scalar_lea.vmem [#allocation8], %s4099_s1 }
 0x1f5   : > { %4867 = dma.done.wait (%p6157_p11), %s795_s11, 3072  }
 0x1f6   : > { %4869 = vsyncadd (%p6157_p11), %s795_s11, 4294964224  ;;  %s5623_s18 = scalar_lea.vmem [#allocation10], %s4099_s1  ;;  %s813_s17 = scalar_lea.sflag [#allocation12], %s5603_s21 }
 0x1f7   : > { %s5626_s16 = scalar_lea.vmem [#allocation11], %s4099_s1 }
 0x1f8   : > { %4871 = dma.done.wait (%p6157_p11), %s813_s17, 1792  }
 0x1f9   : > { %4873 = vsyncadd (%p6157_p11), %s813_s17, 4294965504  ;;  %s3568_s25 = sshll.u32 %s5606_s3, 4  ;;  %s831_s22 = scalar_lea.sflag [#allocation15], %s5603_s21 }
 0x1fa   : > { %s5633_s30 = scalar_lea.vmem [#allocation13], %s3568_s25  ;;  %s833_s20 = scalar_lea.vmem [#allocation14], %s5606_s3 }
 0x1fb   : > { %4875 = dma.done.wait (%p6157_p11), %s831_s22, 32  }
 0x1fc   : > { %4877 = vsyncadd (%p6157_p11), %s831_s22, 4294967264  ;;  %s841_s27 = scalar_lea.vmem [#allocation16], %s5606_s3  ;;  %s847_s0 = scalar_lea.sflag [#allocation18], %s5603_s21 }
 0x1fd   : > { %s849_s13 = scalar_lea.vmem [#allocation17], %s5606_s3 }
 0x1fe   : > { %4879 = dma.done.wait (%p6157_p11), %s847_s0, 400  }
 0x1ff   : > { %4881 = vsyncadd (%p6157_p11), %s847_s0, 4294966896  ;;  %s4100_s5 = smul.u32 24, %s5606_s3  ;;  %s864_s28 = scalar_lea.sflag [#allocation21], %s5603_s21 }
 0x200   : > { %s866_s1 = scalar_lea.vmem [#allocation20], %s5606_s3 }
 0x201   : > { %s5649_s19 = scalar_lea.vmem [#allocation19], %s4100_s5 }
 0x202   : > { %4883 = dma.done.wait (%p6157_p11), %s864_s28, 784  }
 0x203   : > { %4885 = vsyncadd (%p6157_p11), %s864_s28, 4294966512  ;;  %s4101_s11 = smul.u32 48, %s5606_s3  ;;  %s881_s25 = scalar_lea.sflag [#allocation24], %s5603_s21 }
 0x204   : > { %s883_s22 = scalar_lea.vmem [#allocation23], %s5606_s3 }
 0x205   : > { %s5658_s17 = scalar_lea.vmem [#allocation22], %s4101_s11 }
 0x206   : > { %4887 = dma.done.wait (%p6157_p11), %s881_s25, 16  }
 0x207   : > { %4889 = vsyncadd (%p6157_p11), %s881_s25, 4294967280  ;;  %p6158_p1 = pmov %p6154_p5 }
 0x209   : > { %4891 = dma.done.wait (%p6158_p1), [#allocation24], 16   ;;  %p6159_p4 = pmov %p6158_p1 }
 0x20a   : > { %p6160_p3 = pmov %p6158_p1 }
 0x20b   : > { %4893 = vsyncadd (%p6159_p4), [#allocation24], 4294967280 }
 0x20c   : > { %4895 = dma.done.wait (%p6160_p3), [#allocation27], 16   ;;  %p6161_p8 = pmov %p6158_p1 }
 0x20d   : > { %p6162_p7 = scmp.ne.s32.totalorder %s6152_s29, 0 }
 0x20e   : > { %4897 = vsyncadd (%p6161_p8), [#allocation27], 4294967280  ;;  %v993_v0 = vld [vmem:[#allocation2] sm:$0xff] (!%p6162_p7)  ;;  %vm995_vm0 = vcmask (!%p6162_p7), 392192   ;;  %v994_v1 = vld [vmem:[#allocation2 + $0x8] sm:$0xff] (!%p6162_p7) }
 0x20f   : > { %992 = sbr.rel (%p6162_p7) target bundleno = 534 (0x216), region = 152  ;;  %996 = vst.msk [vmem:[#allocation28] sm:$0xff] (!%p6162_p7), %vm995_vm0, %v993_v0  ;;  %997 = vst.msk [vmem:[#allocation28 + $0x8] sm:$0xff] (!%p6162_p7), %vm995_vm0, %v994_v1 }
 0x216 PF: > { %v998_v2 = vld [vmem:[#allocation28] sm:$0xff]  ;;  %vm1002_vm1 = vcmask 392192   ;;  %v999_v3 = vld [vmem:[#allocation28 + $0x8] sm:$0xff]  ;;  %v4938_v17 = vmov 0.0   ;;  %v4251_v21 = vld [vmem:[%s5617_s10 + $0x10] sm:$0xff]   ;;  %vm4939_vm2 = vmmov 0  }
 0x217   : > { %v1003_v4 = vsel %vm1002_vm1, %v998_v2, 0.0  ;;  %v1006_v5 = vsel %vm1002_vm1, %v999_v3, 0.0  ;;  %v4247_v16 = vld [vmem:[%s5617_s10] sm:$0xff]   ;;  %3823 = vmatprep.subr.bf16.mxu0 %v4938_v17  ;;  %3833 = vmatprep.subr.bf16.mxu1 %v4938_v17  ;;  %v4249_v19 = vld [vmem:[%s5617_s10 + $0x8] sm:$0xff]   ;;  %v4252_v22 = vld [vmem:[%s5623_s18 + $0x10] sm:$0xff]   ;;  %vm1251_vm3 = vcmask 64512  }
 0x218   : > { %1004 = vadd.xlane.f32.xlu0 %v1003_v4  ;;  %v4248_v18 = vld [vmem:[%s5623_s18] sm:$0xff]   ;;  %3824 = vmatpush3.bf16.msra.mxu0 %v4247_v16  ;;  %v4250_v20 = vld [vmem:[%s5623_s18 + $0x8] sm:$0xff]   ;;  %v4255_v42 = vld [vmem:[%s5626_s16 + $0x10] sm:$0xff]   ;;  %vm1373_vm4 = vcmask 1043456   ;;  %vm3106_vm5 = vcmask 785408   ;;  %s6163_s29 = sld [smem:[#allocation42_spill]] }
 0x219   : > { %3834 = vmatpush3.bf16.msra.mxu1 %v4248_v18  ;;  %3825 = vmatprep.subr.bf16.mxu0 %v4938_v17  ;;  %v3572_v31 = vld [vmem:[%s781_s23] ss:$0 sm:$0xff]  ;;  %v4253_v39 = vld [vmem:[%s5626_s16] sm:$0xff]  }
 0x21a   : > { %3835 = vmatprep.subr.bf16.mxu1 %v4938_v17  ;;  %3829 = vmatprep.mubr.msk.bf16.mxu0 %vm4939_vm2, %v4938_v17  ;;  %v3573_v35 = vld [vmem:[%s789_s24] ss:$0 sm:$0xff] }
 0x21b   : > { %3839 = vmatprep.mubr.msk.bf16.mxu1 %vm4939_vm2, %v4938_v17  ;;  %v4254_v41 = vld [vmem:[%s5626_s16 + $0x8] sm:$0xff]  }
 0x21c   : > { %1007 = vadd.xlane.f32.xlu0 %v1006_v5  ;;  %3826 = vmatpush3.bf16.msra.mxu0 %v4249_v19 }
 0x21d   : > { %3836 = vmatpush3.bf16.msra.mxu1 %v4250_v20  ;;  %3827 = vmatprep.subr.bf16.mxu0 %v4938_v17 }
 0x21e   : > { %3837 = vmatprep.subr.bf16.mxu1 %v4938_v17  ;;  %p3715_p12 = scmp.ge.s32.totalorder %s6163_s29, 1 }
 0x220   : > { %3828 = vmatpush3.bf16.msra.mxu0 %v4251_v21 }
 0x221   : > { %3838 = vmatpush3.bf16.msra.mxu1 %v4252_v22  ;;  %3843 = vmatprep.subr.bf16.mxu0 %v4938_v17 }
 0x222   : > { %3859 = vmatprep.subr.bf16.mxu1 %v4938_v17 }
 0x2a5   : > { %v1005_v6 = vpop.xlane.xlu0 %1004 }
 0x2a6   : > { %v1010_v7 = vmul.f32 0.020833334, %v1005_v6 }
 0x2a8   : > { %v1012_v8 = vsub.f32 %v998_v2, %v1010_v7 }
 0x2a9   : > { %v1008_v9 = vpop.xlane.xlu0 %1007 }
 0x2aa   : > { %v1011_v10 = vmul.f32 0.020833334, %v1008_v9  ;;  %v1014_v11 = vmul.f32 %v1012_v8, %v1012_v8 }
 0x2ac   : > { %v1013_v12 = vsub.f32 %v999_v3, %v1011_v10  ;;  %v1016_v13 = vsel %vm1002_vm1, %v1014_v11, 0.0 }
 0x2ad   : > { %1017 = vadd.xlane.f32.xlu1 %v1016_v13 }
 0x2ae   : > { %v1015_v14 = vmul.f32 %v1013_v12, %v1013_v12 }
 0x2b0   : > { %v1019_v15 = vsel %vm1002_vm1, %v1015_v14, 0.0 }
 0x2b1   : > { %1020 = vadd.xlane.f32.xlu1 %v1019_v15 }
 0x33a   : > { %v1018_v23 = vpop.xlane.xlu1 %1017 }
 0x33b   : > { %v1022_v24 = vmul.f32 0.020833334, %v1018_v23 }
 0x33d   : > { %v1024_v25 = vadd.f32 1e-05, %v1022_v24 }
 0x33e   : > { %v1021_v26 = vpop.xlane.xlu1 %1020 }
 0x33f   : > { %4292 = vrsqrt.f32 %v1024_v25  ;;  %v1023_v27 = vmul.f32 0.020833334, %v1021_v26 }
 0x341   : > { %v1025_v28 = vadd.f32 1e-05, %v1023_v27 }
 0x343   : > { %4294 = vrsqrt.f32 %v1025_v28 }
 0x349   : > { %v4293_v29 = vpop.eup %4292 }
 0x34a   : > { %v1028_v30 = vmul.f32 %v4293_v29, %v1012_v8  ;;  %v4256_v29 = vld [vmem:[%s5617_s10 + $0x18] sm:$0xff]  }
 0x34c   : > { %v1036_v33 = vmul.f32 %v3572_v31, %v1028_v30 }
 0x34d   : > { %v4295_v32 = vpop.eup %4294 }
 0x34e   : > { %v1029_v34 = vmul.f32 %v4295_v32, %v1013_v12  ;;  %v1044_v37 = vadd.f32 %v3573_v35, %v1036_v33  ;;  %v4257_v32 = vld [vmem:[%s5623_s18 + $0x18] sm:$0xff]  }
 0x350   : > { %v1037_v36 = vmul.f32 %v3572_v31, %v1029_v34  ;;  %v4258_v34 = vld [vmem:[%s5617_s10 + $0x20] sm:$0xff]  }
 0x352   : > { %v1045_v38 = vadd.f32 %v3573_v35, %v1037_v36  ;;  %v4259_v35 = vld [vmem:[%s5623_s18 + $0x20] sm:$0xff]   ;;  %v4260_v36 = vld [vmem:[%s5617_s10 + $0x28] sm:$0xff]  }
 0x354   : > { %v5703_v40 = vpack.c.bf16 %v1045_v38, %v1044_v37  ;;  %v4261_v37 = vld [vmem:[%s5623_s18 + $0x28] sm:$0xff]   ;;  %v4262_v38 = vld [vmem:[%s5626_s16 + $0x18] sm:$0xff]  }
 0x356   : > { %3830 = vmatmul.mubr.msk.bf16.vlgmr.msra.gmra.mrb[0].mxu0 %vm1002_vm1, %v5703_v40  ;;  %3840 = vmatmul.mubr.msk.bf16.vlgmr.msra.gmra.mrb[0].mxu1 %vm1002_vm1, %v5703_v40 }
 0x357   : > { %3844 = vmatpush3.bf16.msra.mxu0 %v4253_v39  ;;  %3849 = vmatprep.mubr.msk.bf16.mxu0 %vm4939_vm2, %v4938_v17  ;;  %v4263_v39 = vld [vmem:[%s5626_s16 + $0x20] sm:$0xff]  }
 0x358   : > { %3845 = vmatprep.subr.bf16.mxu0 %v4938_v17  ;;  %3861 = vmatprep.mubr.msk.bf16.mxu1 %vm4939_vm2, %v4938_v17 }
 0x35b   : > { %3846 = vmatpush3.bf16.msra.mxu0 %v4254_v41  ;;  %v4264_v41 = vld [vmem:[%s5626_s16 + $0x28] sm:$0xff]  }
 0x35c   : > { %3847 = vmatprep.subr.bf16.mxu0 %v4938_v17 }
 0x35f   : > { %3848 = vmatpush3.bf16.msra.mxu0 %v4255_v42 }
 0x360   : > { %3853 = vmatprep.subr.bf16.mxu0 %v4938_v17 }
 0x362   : > { %3850 = vmatmul.mubr.msk.bf16.vlgmr.msra.gmra.mrb[4].mxu0 %vm1002_vm1, %v5703_v40 }
 0x363   : > { %3855 = vmatprep.mubr.msk.bf16.mxu0 %vm4939_vm2, %v4938_v17 }
 0x429   : > { %v1108_v43 = vpop.f32.mrb[0].mxu0  ;;  %v1173_v44 = vpop.f32.mrb[0].mxu1 }
 0x42a   : > { %v1247_v45 = vpack.c.bf16 %v1173_v44, %v1173_v44  ;;  %v3831_v46 = vpop.f32.mrb[1].mxu0  ;;  %v3841_v47 = vpop.f32.mrb[1].mxu1  ;;  %v1245_v55 = vpack.c.bf16 %v1108_v43, %v1108_v43 }
 0x42b   : > { %v1111_v48 = vpop.f32.mrb[2].mxu0  ;;  %v1176_v49 = vpop.f32.mrb[2].mxu1 }
 0x42c   : > { %v1256_v50 = vsel %vm1251_vm3, %v1247_v45, 0  ;;  %v1248_v51 = vpack.c.bf16 %v1176_v49, %v1176_v49  ;;  %v3832_v52 = vpop.f32.mrb[3].mxu0  ;;  %v3842_v53 = vpop.f32.mrb[3].mxu1  ;;  %v1246_v56 = vpack.c.bf16 %v1111_v48, %v1111_v48 }
 0x42d   : > { %3854 = vmatpush3.bf16.xpose.msra.mxu0 %v1256_v50 }
 0x42e   : > { %v1302_v54 = vsel %vm1251_vm3, %v1248_v51, 0  ;;  %3865 = vmatprep.subr.bf16.mxu0 %v4938_v17 }
 0x42f   : > { %3860 = vmatpush3.bf16.xpose.msra.mxu1 %v1302_v54 }
 0x430   : > { %3871 = vmatprep.subr.bf16.mxu1 %v4938_v17 }
 0x434   : > { %3856 = vmatmul.mubr.msk.bf16.vlgmr.msra.gmra.mrb[8].mxu0 %vm1251_vm3, %v1245_v55 }
 0x435   : > { %v1238_v57 = vpop.f32.mrb[4].mxu0  ;;  %3867 = vmatprep.mubr.msk.bf16.mxu0 %vm4939_vm2, %v4938_v17 }
 0x436   : > { %v1249_v58 = vpack.c.bf16 %v1238_v57, %v1238_v57  ;;  %v3851_v59 = vpop.f32.mrb[5].mxu0  ;;  %3862 = vmatmul.mubr.msk.bf16.vlgmr.msra.gmra.mrb[4].mxu1 %vm1251_vm3, %v1246_v56 }
 0x437   : > { %v1241_v60 = vpop.f32.mrb[6].mxu0  ;;  %3873 = vmatprep.mubr.msk.bf16.mxu1 %vm4939_vm2, %v4938_v17 }
 0x438   : > { %v1375_v61 = vsel %vm1373_vm4, %v1249_v58, 0  ;;  %v1250_v62 = vpack.c.bf16 %v1241_v60, %v1241_v60  ;;  %v3852_v63 = vpop.f32.mrb[7].mxu0 }
 0x439   : > { %3866 = vmatpush3.bf16.msra.mxu0 %v1375_v61 }
 0x43a   : > { %v1421_v0 = vsel %vm1373_vm4, %v1250_v62, 0  ;;  %3877 = vmatprep.subr.bf16.mxu0 %v4938_v17 }
 0x43b   : > { %3872 = vmatpush3.bf16.msra.mxu1 %v1421_v0 }
 0x43c   : > { %3887 = vmatprep.subr.bf16.mxu1 %v4938_v17 }
 0x507   : > { %v1292_v1 = vpop.f32.mrb[8].mxu0 }
 0x508   : > { %v1344_v2 = vmul.f32 0.35355338, %v1292_v1  ;;  %v3857_v3 = vpop.f32.mrb[9].mxu0 }
 0x509   : > { %v1295_v4 = vpop.f32.mrb[10].mxu0  ;;  %v1338_v5 = vpop.f32.mrb[4].mxu1 }
 0x50a   : > { %v1345_v6 = vmul.f32 0.35355338, %v1338_v5  ;;  %v3858_v7 = vpop.f32.mrb[11].mxu0  ;;  %v3863_v8 = vpop.f32.mrb[5].mxu1  ;;  %v1346_v9 = vsel %vm1251_vm3, %v1344_v2, -inf }
 0x50b   : > { %v1341_v10 = vpop.f32.mrb[6].mxu1  ;;  %1347 = vmax.xlane.f32.xlu1 %v1346_v9 }
 0x50c   : > { %v3864_v11 = vpop.f32.mrb[7].mxu1  ;;  %v1349_v12 = vsel %vm1251_vm3, %v1345_v6, -inf }
 0x50d   : > { %1350 = vmax.xlane.f32.xlu0 %v1349_v12 }
 0x598   : > { %v1348_v13 = vpop.xlane.xlu1 %1347 }
 0x599   : > { %v1352_v14 = vsub.f32 %v1344_v2, %v1348_v13 }
 0x59a   : > { %v1351_v15 = vpop.xlane.xlu0 %1350 }
 0x59b   : > { %v1354_v16 = vmul.f32 1.442695, %v1352_v14  ;;  %v1353_v18 = vsub.f32 %v1345_v6, %v1351_v15 }
 0x59d   : > { %4296 = vpow2.f32 %v1354_v16  ;;  %v1356_v19 = vmul.f32 1.442695, %v1353_v18 }
 0x59f   : > { %4298 = vpow2.f32 %v1356_v19 }
 0x5a7   : > { %v4297_v20 = vpop.eup %4296 }
 0x5a8   : > { %v1358_v21 = vsel %vm1251_vm3, %v4297_v20, 0.0 }
 0x5a9   : > { %v4299_v22 = vpop.eup %4298  ;;  %1359 = vadd.xlane.f32.xlu1 %v1358_v21 }
 0x5aa   : > { %v1361_v23 = vsel %vm1251_vm3, %v4299_v22, 0.0 }
 0x5ab   : > { %1362 = vadd.xlane.f32.xlu0 %v1361_v23 }
 0x636   : > { %v1360_v24 = vpop.xlane.xlu1 %1359 }
 0x637   : > { %4300 = vrcp.f32 %v1360_v24 }
 0x638   : > { %v1363_v25 = vpop.xlane.xlu0 %1362 }
 0x639   : > { %4302 = vrcp.f32 %v1363_v25 }
 0x641   : > { %v4301_v26 = vpop.eup %4300 }
 0x642   : > { %v1366_v27 = vmul.f32 %v4301_v26, %v4297_v20 }
 0x643   : > { %v4303_v28 = vpop.eup %4302 }
 0x644   : > { %v1367_v30 = vmul.f32 %v4303_v28, %v4299_v22  ;;  %v1368_v31 = vpack.c.bf16 %v1366_v27, %v1366_v27 }
 0x646   : > { %3868 = vmatmul.mubr.msk.bf16.vlgmr.msra.gmra.mrb[12].mxu0 %vm1251_vm3, %v1368_v31  ;;  %v1369_v33 = vpack.c.bf16 %v1367_v30, %v1367_v30 }
 0x647   : > { %3878 = vmatpush3.bf16.msra.mxu0 %v4256_v29  ;;  %3883 = vmatprep.mubr.msk.bf16.mxu0 %vm4939_vm2, %v4938_v17 }
 0x648   : > { %3874 = vmatmul.mubr.msk.bf16.vlgmr.msra.gmra.mrb[8].mxu1 %vm1251_vm3, %v1369_v33  ;;  %3879 = vmatprep.subr.bf16.mxu0 %v4938_v17 }
 0x649   : > { %3888 = vmatpush3.bf16.msra.mxu1 %v4257_v32  ;;  %3893 = vmatprep.mubr.msk.bf16.mxu1 %vm4939_vm2, %v4938_v17 }
 0x64a   : > { %3889 = vmatprep.subr.bf16.mxu1 %v4938_v17 }
 0x64b   : > { %3880 = vmatpush3.bf16.msra.mxu0 %v4258_v34 }
 0x64c   : > { %3881 = vmatprep.subr.bf16.mxu0 %v4938_v17 }
 0x64d   : > { %3890 = vmatpush3.bf16.msra.mxu1 %v4259_v35  ;;  %v3624_v35 = vld [vmem:[%s5633_s30 + $0x4] sm:$0xf] }
 0x64e   : > { %3891 = vmatprep.subr.bf16.mxu1 %v4938_v17 }
 0x64f   : > { %3882 = vmatpush3.bf16.msra.mxu0 %v4260_v36 }
 0x650   : > { %3897 = vmatprep.subr.bf16.mxu0 %v4938_v17 }
 0x651   : > { %3892 = vmatpush3.bf16.msra.mxu1 %v4261_v37 }
 0x652   : > { %3884 = vmatmul.mubr.msk.bf16.vlgmr.msra.gmra.mrb[16].mxu0 %vm1002_vm1, %v5703_v40  ;;  %3907 = vmatprep.subr.bf16.mxu1 %v4938_v17 }
 0x653   : > { %3898 = vmatpush3.bf16.msra.mxu0 %v4262_v38  ;;  %3903 = vmatprep.mubr.msk.bf16.mxu0 %vm4939_vm2, %v4938_v17  ;;  %v1464_v38 = vld [vmem:[%s5633_s30] sm:$0xf] }
 0x654   : > { %3894 = vmatmul.mubr.msk.bf16.vlgmr.msra.gmra.mrb[12].mxu1 %vm1002_vm1, %v5703_v40  ;;  %3899 = vmatprep.subr.bf16.mxu0 %v4938_v17 }
 0x655   : > { %3909 = vmatprep.mubr.msk.bf16.mxu1 %vm4939_vm2, %v4938_v17 }
 0x657   : > { %3900 = vmatpush3.bf16.msra.mxu0 %v4263_v39 }
 0x658   : > { %3901 = vmatprep.subr.bf16.mxu0 %v4938_v17 }
 0x65b   : > { %3902 = vmatpush3.bf16.msra.mxu0 %v4264_v41 }
 0x65c   : > { %3913 = vmatprep.subr.bf16.mxu0 %v4938_v17 }
 0x65e   : > { %3904 = vmatmul.mubr.msk.bf16.vlgmr.msra.gmra.mrb[20].mxu0 %vm1002_vm1, %v5703_v40 }
 0x65f   : > { %3915 = vmatprep.mubr.msk.bf16.mxu0 %vm4939_vm2, %v4938_v17 }
 0x719   : > { %v5776_v42 = vpop.f32.mrb[12].mxu0 }
 0x71a   : > { %v3869_v43 = vpop.f32.mrb[13].mxu0 }
 0x71b   : > { %v1414_v44 = vpop.f32.mrb[14].mxu0  ;;  %v5778_v45 = vpop.f32.mrb[8].mxu1  ;;  %v1886_v43 = vsel %vm1373_vm4, %v3624_v35, 0 }
 0x71c   : > { %v1463_v46 = vpack.c.bf16 %v5778_v45, %v5776_v42  ;;  %v3870_v47 = vpop.f32.mrb[15].mxu0  ;;  %v3875_v48 = vpop.f32.mrb[9].mxu1 }
 0x71d   : > { %v1460_v49 = vpop.f32.mrb[10].mxu1  ;;  %v1933_v47 = vsel %vm1373_vm4, %v1464_v38, 0  ;;  %v4265_v48 = vld [vmem:[%s5623_s18 + $0x30] sm:$0xff]  }
 0x71e   : > { %v3876_v50 = vpop.f32.mrb[11].mxu1  ;;  %v4266_v49 = vld [vmem:[%s5623_s18 + $0x38] sm:$0xff]  }
 0x71f   : > { %v4267_v50 = vld [vmem:[%s5623_s18 + $0x40] sm:$0xff]  }
 0x725   : > { %v1524_v51 = vpop.f32.mrb[16].mxu0 }
 0x726   : > { %v3885_v52 = vpop.f32.mrb[17].mxu0  ;;  %v1663_v63 = vpack.c.bf16 %v1524_v51, %v1524_v51 }
 0x727   : > { %v1527_v53 = vpop.f32.mrb[18].mxu0  ;;  %v1590_v54 = vpop.f32.mrb[12].mxu1  ;;  %v4268_v52 = vld [vmem:[%s5617_s10 + $0x30] sm:$0xff]  }
 0x728   : > { %v1665_v55 = vpack.c.bf16 %v1590_v54, %v1590_v54  ;;  %v3886_v56 = vpop.f32.mrb[19].mxu0  ;;  %v3895_v57 = vpop.f32.mrb[13].mxu1  ;;  %v1664_v1 = vpack.c.bf16 %v1527_v53, %v1527_v53 }
 0x729   : > { %v1593_v58 = vpop.f32.mrb[14].mxu1 }
 0x72a   : > { %v1673_v59 = vsel %vm1251_vm3, %v1665_v55, 0  ;;  %v1666_v60 = vpack.c.bf16 %v1593_v58, %v1593_v58  ;;  %v3896_v61 = vpop.f32.mrb[15].mxu1  ;;  %v4269_v58 = vld [vmem:[%s5617_s10 + $0x38] sm:$0xff]  }
 0x72b   : > { %3908 = vmatpush3.bf16.xpose.msra.mxu1 %v1673_v59 }
 0x72c   : > { %v1719_v62 = vsel %vm1251_vm3, %v1666_v60, 0  ;;  %3919 = vmatprep.subr.bf16.mxu1 %v4938_v17  ;;  %v4270_v60 = vld [vmem:[%s5617_s10 + $0x40] sm:$0xff]  }
 0x72d   : > { %3914 = vmatpush3.bf16.xpose.msra.mxu0 %v1719_v62 }
 0x72e   : > { %3925 = vmatprep.subr.bf16.mxu0 %v4938_v17 }
 0x731   : > { %v1656_v0 = vpop.f32.mrb[20].mxu0 }
 0x732   : > { %v1667_v2 = vpack.c.bf16 %v1656_v0, %v1656_v0  ;;  %v3905_v3 = vpop.f32.mrb[21].mxu0  ;;  %3910 = vmatmul.mubr.msk.bf16.vlgmr.msra.gmra.mrb[16].mxu1 %vm1251_vm3, %v1663_v63  ;;  %v4271_v0 = vld [vmem:[%s5626_s16 + $0x30] sm:$0xff]  }
 0x733   : > { %v1659_v4 = vpop.f32.mrb[22].mxu0  ;;  %3921 = vmatprep.mubr.msk.bf16.mxu1 %vm4939_vm2, %v4938_v17  ;;  %v4273_v3 = vld [vmem:[%s5626_s16 + $0x40] sm:$0xff]  }
 0x734   : > { %v1791_v5 = vsel %vm1373_vm4, %v1667_v2, 0  ;;  %v1668_v6 = vpack.c.bf16 %v1659_v4, %v1659_v4  ;;  %v3906_v7 = vpop.f32.mrb[23].mxu0  ;;  %3916 = vmatmul.mubr.msk.bf16.vlgmr.msra.gmra.mrb[24].mxu0 %vm1251_vm3, %v1664_v1  ;;  %v4272_v1 = vld [vmem:[%s5626_s16 + $0x38] sm:$0xff]  }
 0x735   : > { %3920 = vmatpush3.bf16.msra.mxu1 %v1791_v5  ;;  %3927 = vmatprep.mubr.msk.bf16.mxu0 %vm4939_vm2, %v4938_v17 }
 0x736   : > { %v1837_v8 = vsel %vm1373_vm4, %v1668_v6, 0  ;;  %3931 = vmatprep.subr.bf16.mxu1 %v4938_v17 }
 0x737   : > { %3926 = vmatpush3.bf16.msra.mxu0 %v1837_v8 }
 0x738   : > { %3937 = vmatprep.subr.bf16.mxu0 %v4938_v17 }
 0x805   : > { %v1709_v9 = vpop.f32.mrb[16].mxu1 }
 0x806   : > { %v1761_v10 = vmul.f32 0.35355338, %v1709_v9  ;;  %v3911_v11 = vpop.f32.mrb[17].mxu1 }
 0x807   : > { %v1712_v12 = vpop.f32.mrb[18].mxu1  ;;  %v1755_v13 = vpop.f32.mrb[24].mxu0 }
 0x808   : > { %v1762_v14 = vmul.f32 0.35355338, %v1755_v13  ;;  %v3912_v15 = vpop.f32.mrb[19].mxu1  ;;  %v3917_v16 = vpop.f32.mrb[25].mxu0  ;;  %v1763_v18 = vsel %vm1251_vm3, %v1761_v10, -inf }
 0x809   : > { %1764 = vmax.xlane.f32.xlu0 %v1763_v18  ;;  %v1758_v19 = vpop.f32.mrb[26].mxu0 }
 0x80a   : > { %v3918_v20 = vpop.f32.mrb[27].mxu0  ;;  %v1766_v21 = vsel %vm1251_vm3, %v1762_v14, -inf }
 0x80b   : > { %1767 = vmax.xlane.f32.xlu1 %v1766_v21 }
 0x896   : > { %v1765_v22 = vpop.xlane.xlu0 %1764 }
 0x897   : > { %v1769_v23 = vsub.f32 %v1761_v10, %v1765_v22 }
 0x898   : > { %v1768_v24 = vpop.xlane.xlu1 %1767 }
 0x899   : > { %v1771_v25 = vmul.f32 1.442695, %v1769_v23  ;;  %v1770_v26 = vsub.f32 %v1762_v14, %v1768_v24 }
 0x89b   : > { %4304 = vpow2.f32 %v1771_v25  ;;  %v1773_v27 = vmul.f32 1.442695, %v1770_v26 }
 0x89d   : > { %4306 = vpow2.f32 %v1773_v27 }
 0x8a5   : > { %v4305_v28 = vpop.eup %4304 }
 0x8a6   : > { %v1775_v29 = vsel %vm1251_vm3, %v4305_v28, 0.0 }
 0x8a7   : > { %v4307_v30 = vpop.eup %4306  ;;  %1776 = vadd.xlane.f32.xlu0 %v1775_v29 }
 0x8a8   : > { %v1778_v31 = vsel %vm1251_vm3, %v4307_v30, 0.0 }
 0x8a9   : > { %1779 = vadd.xlane.f32.xlu1 %v1778_v31 }
 0x934   : > { %v1777_v32 = vpop.xlane.xlu0 %1776 }
 0x935   : > { %4308 = vrcp.f32 %v1777_v32 }
 0x936   : > { %v1780_v33 = vpop.xlane.xlu1 %1779 }
 0x937   : > { %4310 = vrcp.f32 %v1780_v33 }
 0x93f   : > { %v4309_v34 = vpop.eup %4308 }
 0x940   : > { %v1783_v36 = vmul.f32 %v4309_v34, %v4305_v28 }
 0x941   : > { %v4311_v37 = vpop.eup %4310 }
 0x942   : > { %v1784_v39 = vmul.f32 %v4311_v37, %v4307_v30  ;;  %v1785_v41 = vpack.c.bf16 %v1783_v36, %v1783_v36 }
 0x944   : > { %3922 = vmatmul.mubr.msk.bf16.vlgmr.msra.gmra.mrb[20].mxu1 %vm1251_vm3, %v1785_v41  ;;  %v1786_v44 = vpack.c.bf16 %v1784_v39, %v1784_v39 }
 0x945   : > { %3932 = vmatpush3.bf16.msra.mxu1 %v1886_v43  ;;  %3933 = vmatprep.mubr.msk.bf16.mxu1 %vm4939_vm2, %v4938_v17 }
 0x946   : > { %3928 = vmatmul.mubr.msk.bf16.vlgmr.msra.gmra.mrb[28].mxu0 %vm1251_vm3, %v1786_v44  ;;  %3943 = vmatprep.subr.bf16.mxu1 %v4938_v17 }
 0x947   : > { %3938 = vmatpush3.bf16.msra.mxu0 %v1933_v47  ;;  %3939 = vmatprep.mubr.msk.bf16.mxu0 %vm4939_vm2, %v4938_v17 }
 0x948   : > { %3953 = vmatprep.subr.bf16.mxu0 %v4938_v17 }
 0x94e   : > { %3940 = vmatmul.mubr.msk.bf16.vlgmr.msra.gmra.mrb[32].mxu0 %vm1251_vm3, %v1463_v46 }
 0x94f   : > { %3954 = vmatpush3.bf16.msra.mxu0 %v4265_v48  ;;  %3959 = vmatprep.mubr.msk.bf16.mxu0 %vm4939_vm2, %v4938_v17 }
 0x950   : > { %3955 = vmatprep.subr.bf16.mxu0 %v4938_v17 }
 0x953   : > { %3956 = vmatpush3.bf16.msra.mxu0 %v4266_v49 }
 0x954   : > { %3957 = vmatprep.subr.bf16.mxu0 %v4938_v17 }
 0x957   : > { %3958 = vmatpush3.bf16.msra.mxu0 %v4267_v50 }
 0x958   : > { %3973 = vmatprep.subr.bf16.mxu0 %v4938_v17 }
 0x95a   : > { %3960 = vmatmul.mubr.msk.bf16.vlgmr.msra.gmra.mrb[36].mxu0 %vm1002_vm1, %v5703_v40 }
 0x95b   : > { %3975 = vmatprep.mubr.msk.bf16.mxu0 %vm4939_vm2, %v4938_v17 }
 0xa17   : > { %v1827_v42 = vpop.f32.mrb[20].mxu1 }
 0xa18   : > { %v3923_v45 = vpop.f32.mrb[21].mxu1 }
 0xa19   : > { %v1830_v46 = vpop.f32.mrb[22].mxu1  ;;  %v1873_v51 = vpop.f32.mrb[28].mxu0 }
 0xa1a   : > { %v1879_v53 = vpack.c.bf16 %v1873_v51, %v1827_v42  ;;  %v3924_v54 = vpop.f32.mrb[23].mxu1  ;;  %v3929_v55 = vpop.f32.mrb[29].mxu0 }
 0xa1b   : > { %v1876_v56 = vpop.f32.mrb[30].mxu0 }
 0xa1c   : > { %v3930_v57 = vpop.f32.mrb[31].mxu0  ;;  %3934 = vmatmul.mubr.msk.bf16.vlgmr.msra.gmra.mrb[24].mxu1 %vm1251_vm3, %v1879_v53 }
 0xa1d   : > { %3944 = vmatpush3.bf16.msra.mxu1 %v4268_v52  ;;  %3949 = vmatprep.mubr.msk.bf16.mxu1 %vm4939_vm2, %v4938_v17 }
 0xa1e   : > { %3945 = vmatprep.subr.bf16.mxu1 %v4938_v17 }
 0xa21   : > { %3946 = vmatpush3.bf16.msra.mxu1 %v4269_v58  ;;  %v1969_v59 = vpop.f32.mrb[32].mxu0  ;;  %v3661_v58 = vld [vmem:[%s5633_s30 + $0x8] sm:$0xf] }
 0xa22   : > { %v3941_v61 = vpop.f32.mrb[33].mxu0  ;;  %3947 = vmatprep.subr.bf16.mxu1 %v4938_v17 }
 0xa23   : > { %v1972_v62 = vpop.f32.mrb[34].mxu0 }
 0xa24   : > { %v3942_v63 = vpop.f32.mrb[35].mxu0 }
 0xa25   : > { %3948 = vmatpush3.bf16.msra.mxu1 %v4270_v60  ;;  %v2397_v63 = vsel %vm1373_vm4, %v3661_v58, 0 }
 0xa26   : > { %3963 = vmatprep.subr.bf16.mxu1 %v4938_v17 }
 0xa28   : > { %3950 = vmatmul.mubr.msk.bf16.vlgmr.msra.gmra.mrb[28].mxu1 %vm1002_vm1, %v5703_v40 }
 0xa29   : > { %3964 = vmatpush3.bf16.msra.mxu1 %v4271_v0  ;;  %3969 = vmatprep.mubr.msk.bf16.mxu1 %vm4939_vm2, %v4938_v17  ;;  %v4274_v0 = vld [vmem:[%s5617_s10 + $0x48] sm:$0xff]  }
 0xa2a   : > { %3965 = vmatprep.subr.bf16.mxu1 %v4938_v17 }
 0xa2d   : > { %v2101_v2 = vpop.f32.mrb[36].mxu0  ;;  %3966 = vmatpush3.bf16.msra.mxu1 %v4272_v1 }
 0xa2e   : > { %v2176_v4 = vpack.c.bf16 %v2101_v2, %v2101_v2  ;;  %v3961_v5 = vpop.f32.mrb[37].mxu0  ;;  %3967 = vmatprep.subr.bf16.mxu1 %v4938_v17  ;;  %v4275_v2 = vld [vmem:[%s5617_s10 + $0x50] sm:$0xff]  }
 0xa2f   : > { %v2104_v6 = vpop.f32.mrb[38].mxu0  ;;  %v4278_v5 = vld [vmem:[%s5626_s16 + $0x50] sm:$0xff]  }
 0xa30   : > { %v2184_v7 = vsel %vm1251_vm3, %v2176_v4, 0  ;;  %v3962_v8 = vpop.f32.mrb[39].mxu0  ;;  %v2177_v9 = vpack.c.bf16 %v2104_v6, %v2104_v6  ;;  %v4277_v4 = vld [vmem:[%s5626_s16 + $0x48] sm:$0xff]   ;;  %v4279_v6 = vld [vmem:[%s5626_s16 + $0x58] sm:$0xff]  }
 0xa31   : > { %3968 = vmatpush3.bf16.msra.mxu1 %v4273_v3  ;;  %3974 = vmatpush3.bf16.xpose.msra.mxu0 %v2184_v7  ;;  %v4276_v3 = vld [vmem:[%s5617_s10 + $0x58] sm:$0xff]  }
 0xa32   : > { %3979 = vmatprep.subr.bf16.mxu1 %v4938_v17  ;;  %3985 = vmatprep.subr.bf16.mxu0 %v4938_v17  ;;  %v2230_v10 = vsel %vm1251_vm3, %v2177_v9, 0 }
 0xa34   : > { %3970 = vmatmul.mubr.msk.bf16.vlgmr.msra.gmra.mrb[32].mxu1 %vm1002_vm1, %v5703_v40 }
 0xa35   : > { %3981 = vmatprep.mubr.msk.bf16.mxu1 %vm4939_vm2, %v4938_v17 }
 0xa3a   : > { %3980 = vmatpush3.bf16.xpose.msra.mxu1 %v2230_v10 }
 0xa3b   : > { %3991 = vmatprep.subr.bf16.mxu1 %v4938_v17 }
 0xaef   : > { %v1922_v11 = vpop.f32.mrb[24].mxu1 }
 0xaf0   : > { %v5855_v12 = vadd.f32 %v1969_v59, %v1922_v11  ;;  %v3935_v13 = vpop.f32.mrb[25].mxu1  ;;  %v4280_v11 = vld [vmem:[%s5623_s18 + $0x48] sm:$0xff]  }
 0xaf1   : > { %v1925_v14 = vpop.f32.mrb[26].mxu1 }
 0xaf2   : > { %v5857_v15 = vadd.f32 %v1972_v62, %v1925_v14  ;;  %v3936_v16 = vpop.f32.mrb[27].mxu1 }
 0xafb   : > { %v2035_v18 = vpop.f32.mrb[28].mxu1 }
 0xafc   : > { %v2174_v19 = vpack.c.bf16 %v2035_v18, %v2035_v18  ;;  %v3951_v20 = vpop.f32.mrb[29].mxu1 }
 0xafd   : > { %v2038_v21 = vpop.f32.mrb[30].mxu1  ;;  %v4281_v20 = vld [vmem:[%s5623_s18 + $0x50] sm:$0xff]  }
 0xafe   : > { %v2175_v22 = vpack.c.bf16 %v2038_v21, %v2038_v21  ;;  %v3952_v23 = vpop.f32.mrb[31].mxu1  ;;  %3976 = vmatmul.mubr.msk.bf16.vlgmr.msra.gmra.mrb[40].mxu0 %vm1251_vm3, %v2174_v19  ;;  %v4282_v21 = vld [vmem:[%s5623_s18 + $0x58] sm:$0xff]  }
 0xaff   : > { %3987 = vmatprep.mubr.msk.bf16.mxu0 %vm4939_vm2, %v4938_v17 }
 0xb00   : > { %3982 = vmatmul.mubr.msk.bf16.vlgmr.msra.gmra.mrb[36].mxu1 %vm1251_vm3, %v2175_v22 }
 0xb01   : > { %3993 = vmatprep.mubr.msk.bf16.mxu1 %vm4939_vm2, %v4938_v17 }
 0xb07   : > { %v2167_v24 = vpop.f32.mrb[32].mxu1 }
 0xb08   : > { %v2178_v25 = vpack.c.bf16 %v2167_v24, %v2167_v24  ;;  %v3971_v26 = vpop.f32.mrb[33].mxu1 }
 0xb09   : > { %v2170_v27 = vpop.f32.mrb[34].mxu1 }
 0xb0a   : > { %v2302_v28 = vsel %vm1373_vm4, %v2178_v25, 0  ;;  %v2179_v29 = vpack.c.bf16 %v2170_v27, %v2170_v27  ;;  %v3972_v30 = vpop.f32.mrb[35].mxu1 }
 0xb0b   : > { %3986 = vmatpush3.bf16.msra.mxu0 %v2302_v28 }
 0xb0c   : > { %v2348_v31 = vsel %vm1373_vm4, %v2179_v29, 0  ;;  %3997 = vmatprep.subr.bf16.mxu0 %v4938_v17 }
 0xb0d   : > { %3992 = vmatpush3.bf16.msra.mxu1 %v2348_v31 }
 0xb0e   : > { %4003 = vmatprep.subr.bf16.mxu1 %v4938_v17 }
 0xbd1   : > { %v2220_v32 = vpop.f32.mrb[40].mxu0 }
 0xbd2   : > { %v2272_v33 = vmul.f32 0.35355338, %v2220_v32  ;;  %v3977_v34 = vpop.f32.mrb[41].mxu0 }
 0xbd3   : > { %v2223_v35 = vpop.f32.mrb[42].mxu0  ;;  %v2266_v36 = vpop.f32.mrb[36].mxu1 }
 0xbd4   : > { %v2273_v37 = vmul.f32 0.35355338, %v2266_v36  ;;  %v3978_v38 = vpop.f32.mrb[43].mxu0  ;;  %v3983_v39 = vpop.f32.mrb[37].mxu1  ;;  %v2274_v41 = vsel %vm1251_vm3, %v2272_v33, -inf }
 0xbd5   : > { %v2269_v43 = vpop.f32.mrb[38].mxu1  ;;  %2275 = vmax.xlane.f32.xlu0 %v2274_v41 }
 0xbd6   : > { %v3984_v44 = vpop.f32.mrb[39].mxu1  ;;  %v2277_v47 = vsel %vm1251_vm3, %v2273_v37, -inf }
 0xbd7   : > { %2278 = vmax.xlane.f32.xlu1 %v2277_v47 }
 0xc62   : > { %v2276_v48 = vpop.xlane.xlu0 %2275 }
 0xc63   : > { %v2280_v49 = vsub.f32 %v2272_v33, %v2276_v48 }
 0xc64   : > { %v2279_v50 = vpop.xlane.xlu1 %2278 }
 0xc65   : > { %v2282_v42 = vmul.f32 1.442695, %v2280_v49  ;;  %v2281_v45 = vsub.f32 %v2273_v37, %v2279_v50 }
 0xc67   : > { %4312 = vpow2.f32 %v2282_v42  ;;  %v2284_v46 = vmul.f32 1.442695, %v2281_v45 }
 0xc69   : > { %4314 = vpow2.f32 %v2284_v46 }
 0xc71   : > { %v4313_v51 = vpop.eup %4312 }
 0xc72   : > { %v2286_v52 = vsel %vm1251_vm3, %v4313_v51, 0.0 }
 0xc73   : > { %v4315_v53 = vpop.eup %4314  ;;  %2287 = vadd.xlane.f32.xlu0 %v2286_v52 }
 0xc74   : > { %v2289_v54 = vsel %vm1251_vm3, %v4315_v53, 0.0 }
 0xc75   : > { %2290 = vadd.xlane.f32.xlu1 %v2289_v54 }
 0xd00   : > { %v2288_v55 = vpop.xlane.xlu0 %2287 }
 0xd01   : > { %4316 = vrcp.f32 %v2288_v55 }
 0xd02   : > { %v2291_v56 = vpop.xlane.xlu1 %2290 }
 0xd03   : > { %4318 = vrcp.f32 %v2291_v56 }
 0xd0b   : > { %v4317_v57 = vpop.eup %4316 }
 0xd0c   : > { %v2294_v59 = vmul.f32 %v4317_v57, %v4313_v51 }
 0xd0d   : > { %v4319_v60 = vpop.eup %4318 }
 0xd0e   : > { %v2295_v61 = vmul.f32 %v4319_v60, %v4315_v53  ;;  %v2296_v62 = vpack.c.bf16 %v2294_v59, %v2294_v59 }
 0xd10   : > { %3988 = vmatmul.mubr.msk.bf16.vlgmr.msra.gmra.mrb[44].mxu0 %vm1251_vm3, %v2296_v62  ;;  %v2297_v1 = vpack.c.bf16 %v2295_v61, %v2295_v61 }
 0xd11   : > { %3998 = vmatpush3.bf16.msra.mxu0 %v2397_v63  ;;  %3999 = vmatprep.mubr.msk.bf16.mxu0 %vm4939_vm2, %v4938_v17 }
 0xd12   : > { %3994 = vmatmul.mubr.msk.bf16.vlgmr.msra.gmra.mrb[40].mxu1 %vm1251_vm3, %v2297_v1  ;;  %4013 = vmatprep.subr.bf16.mxu0 %v4938_v17 }
 0xd13   : > { %4004 = vmatpush3.bf16.msra.mxu1 %v4274_v0  ;;  %4009 = vmatprep.mubr.msk.bf16.mxu1 %vm4939_vm2, %v4938_v17 }
 0xd14   : > { %4005 = vmatprep.subr.bf16.mxu1 %v4938_v17 }
 0xd17   : > { %4006 = vmatpush3.bf16.msra.mxu1 %v4275_v2 }
 0xd18   : > { %4007 = vmatprep.subr.bf16.mxu1 %v4938_v17 }
 0xd1b   : > { %4008 = vmatpush3.bf16.msra.mxu1 %v4276_v3 }
 0xd1c   : > { %4023 = vmatprep.subr.bf16.mxu1 %v4938_v17 }
 0xd1e   : > { %4010 = vmatmul.mubr.msk.bf16.vlgmr.msra.gmra.mrb[44].mxu1 %vm1002_vm1, %v5703_v40 }
 0xd1f   : > { %4024 = vmatpush3.bf16.msra.mxu1 %v4277_v4  ;;  %4029 = vmatprep.mubr.msk.bf16.mxu1 %vm4939_vm2, %v4938_v17 }
 0xd20   : > { %4025 = vmatprep.subr.bf16.mxu1 %v4938_v17 }
 0xd23   : > { %4026 = vmatpush3.bf16.msra.mxu1 %v4278_v5 }
 0xd24   : > { %4027 = vmatprep.subr.bf16.mxu1 %v4938_v17 }
 0xd27   : > { %4028 = vmatpush3.bf16.msra.mxu1 %v4279_v6 }
 0xd28   : > { %4045 = vmatprep.subr.bf16.mxu1 %v4938_v17 }
 0xd2a   : > { %4030 = vmatmul.mubr.msk.bf16.vlgmr.msra.gmra.mrb[48].mxu1 %vm1002_vm1, %v5703_v40 }
 0xd2b   : > { %4047 = vmatprep.mubr.msk.bf16.mxu1 %vm4939_vm2, %v4938_v17 }
 0xde3   : > { %v2338_v7 = vpop.f32.mrb[44].mxu0 }
 0xde4   : > { %v3989_v8 = vpop.f32.mrb[45].mxu0 }
 0xde5   : > { %v2341_v9 = vpop.f32.mrb[46].mxu0  ;;  %v2384_v10 = vpop.f32.mrb[40].mxu1 }
 0xde6   : > { %v2390_v13 = vpack.c.bf16 %v2384_v10, %v2338_v7  ;;  %v3990_v14 = vpop.f32.mrb[47].mxu0  ;;  %v3995_v16 = vpop.f32.mrb[41].mxu1 }
 0xde7   : > { %v2387_v18 = vpop.f32.mrb[42].mxu1  ;;  %v3697_v16 = vld [vmem:[%s5633_s30 + $0xc] sm:$0xf] }
 0xde8   : > { %v3996_v19 = vpop.f32.mrb[43].mxu1  ;;  %4000 = vmatmul.mubr.msk.bf16.vlgmr.msra.gmra.mrb[48].mxu0 %vm1251_vm3, %v2390_v13  ;;  %v2863_v18 = vsel %vm1373_vm4, %v3697_v16, 0 }
 0xde9   : > { %4014 = vmatpush3.bf16.msra.mxu0 %v4280_v11  ;;  %4019 = vmatprep.mubr.msk.bf16.mxu0 %vm4939_vm2, %v4938_v17 }
 0xdea   : > { %4015 = vmatprep.subr.bf16.mxu0 %v4938_v17 }
 0xded   : > { %4016 = vmatpush3.bf16.msra.mxu0 %v4281_v20 }
 0xdee   : > { %4017 = vmatprep.subr.bf16.mxu0 %v4938_v17 }
 0xdf1   : > { %v2501_v22 = vpop.f32.mrb[44].mxu1  ;;  %4018 = vmatpush3.bf16.msra.mxu0 %v4282_v21 }
 0xdf2   : > { %v4011_v23 = vpop.f32.mrb[45].mxu1  ;;  %4033 = vmatprep.subr.bf16.mxu0 %v4938_v17  ;;  %v2640_v48 = vpack.c.bf16 %v2501_v22, %v2501_v22 }
 0xdf3   : > { %v2504_v24 = vpop.f32.mrb[46].mxu1 }
 0xdf4   : > { %v4012_v25 = vpop.f32.mrb[47].mxu1  ;;  %4020 = vmatmul.mubr.msk.bf16.vlgmr.msra.gmra.mrb[52].mxu0 %vm1002_vm1, %v5703_v40  ;;  %v2641_v49 = vpack.c.bf16 %v2504_v24, %v2504_v24 }
 0xdf5   : > { %4035 = vmatprep.mubr.msk.bf16.mxu0 %vm4939_vm2, %v4938_v17 }
 0xdfd   : > { %v2633_v26 = vpop.f32.mrb[48].mxu1 }
 0xdfe   : > { %v2644_v27 = vpack.c.bf16 %v2633_v26, %v2633_v26  ;;  %v4031_v28 = vpop.f32.mrb[49].mxu1 }
 0xdff   : > { %v2636_v29 = vpop.f32.mrb[50].mxu1 }
 0xe00   : > { %v2768_v30 = vsel %vm1373_vm4, %v2644_v27, 0  ;;  %v4032_v31 = vpop.f32.mrb[51].mxu1 }
 0xe01   : > { %4046 = vmatpush3.bf16.msra.mxu1 %v2768_v30  ;;  %v3699_v31 = vld [vmem:[%s833_s20] ss:$0 sm:$0xff] }
 0xe02   : > { %4057 = vmatprep.subr.bf16.mxu1 %v4938_v17 }
 0xebb   : > { %v2433_v32 = vpop.f32.mrb[48].mxu0 }
 0xebc   : > { %v5918_v33 = vadd.f32 %v2433_v32, %v5855_v12  ;;  %v4001_v34 = vpop.f32.mrb[49].mxu0 }
 0xebd   : > { %v2436_v35 = vpop.f32.mrb[50].mxu0  ;;  %v4336_v34 = vld [vmem:[#allocation28] sm:$0xff] }
 0xebe   : > { %v5921_v40 = vadd.f32 %v2436_v35, %v5857_v15  ;;  %v4002_v36 = vpop.f32.mrb[51].mxu0  ;;  %v2645_v15 = vpack.c.bf16 %v2636_v29, %v2636_v29 }
 0xec0   : > { %v2814_v50 = vsel %vm1373_vm4, %v2645_v15, 0 }
 0xec7   : > { %v2567_v37 = vpop.f32.mrb[52].mxu0 }
 0xec8   : > { %v2642_v38 = vpack.c.bf16 %v2567_v37, %v2567_v37  ;;  %v4021_v39 = vpop.f32.mrb[53].mxu0 }
 0xec9   : > { %v2570_v41 = vpop.f32.mrb[54].mxu0  ;;  %v4337_v39 = vld [vmem:[#allocation28 + $0x8] sm:$0xff] }
 0xeca   : > { %v2650_v43 = vsel %vm1251_vm3, %v2642_v38, 0  ;;  %v4022_v44 = vpop.f32.mrb[55].mxu0  ;;  %v2643_v47 = vpack.c.bf16 %v2570_v41, %v2570_v41 }
 0xecb   : > { %4034 = vmatpush3.bf16.xpose.msra.mxu0 %v2650_v43 }
 0xecc   : > { %4039 = vmatprep.subr.bf16.mxu0 %v4938_v17  ;;  %v2696_v12 = vsel %vm1251_vm3, %v2643_v47, 0 }
 0xed2   : > { %4036 = vmatmul.mubr.msk.bf16.vlgmr.msra.gmra.mrb[56].mxu0 %vm1251_vm3, %v2640_v48 }
 0xed3   : > { %4040 = vmatpush3.bf16.xpose.msra.mxu0 %v2696_v12  ;;  %4041 = vmatprep.mubr.msk.bf16.mxu0 %vm4939_vm2, %v4938_v17 }
 0xed4   : > { %4051 = vmatprep.subr.bf16.mxu0 %v4938_v17 }
 0xeda   : > { %4042 = vmatmul.mubr.msk.bf16.vlgmr.msra.gmra.mrb[60].mxu0 %vm1251_vm3, %v2641_v49 }
 0xedb   : > { %4052 = vmatpush3.bf16.msra.mxu0 %v2814_v50  ;;  %4053 = vmatprep.mubr.msk.bf16.mxu0 %vm4939_vm2, %v4938_v17 }
 0xedc   : > { %4063 = vmatprep.subr.bf16.mxu0 %v4938_v17 }
 0xfa5   : > { %v2686_v42 = vpop.f32.mrb[56].mxu0 }
 0xfa6   : > { %v2738_v45 = vmul.f32 0.35355338, %v2686_v42  ;;  %v4037_v46 = vpop.f32.mrb[57].mxu0 }
 0xfa7   : > { %v2689_v51 = vpop.f32.mrb[58].mxu0 }
 0xfa8   : > { %v4038_v52 = vpop.f32.mrb[59].mxu0  ;;  %v2740_v53 = vsel %vm1251_vm3, %v2738_v45, -inf  ;;  %v4283_v51 = vld [vmem:[%s5649_s19] sm:$0xff]  }
 0xfa9   : > { %2741 = vmax.xlane.f32.xlu0 %v2740_v53  ;;  %v4284_v52 = vld [vmem:[%s5649_s19 + $0x8] sm:$0xff]   ;;  %v4285_v53 = vld [vmem:[%s5649_s19 + $0x10] sm:$0xff]  }
 0xfad   : > { %v2732_v54 = vpop.f32.mrb[60].mxu0 }
 0xfae   : > { %v2739_v55 = vmul.f32 0.35355338, %v2732_v54  ;;  %v4043_v56 = vpop.f32.mrb[61].mxu0 }
 0xfaf   : > { %v2735_v57 = vpop.f32.mrb[62].mxu0 }
 0xfb0   : > { %v4044_v58 = vpop.f32.mrb[63].mxu0  ;;  %v2743_v59 = vsel %vm1251_vm3, %v2739_v55, -inf }
 0xfb1   : > { %2744 = vmax.xlane.f32.xlu1 %v2743_v59 }
0x1036   : > { %v2742_v60 = vpop.xlane.xlu0 %2741 }
0x1037   : > { %v2746_v61 = vsub.f32 %v2738_v45, %v2742_v60 }
0x1039   : > { %v2748_v62 = vmul.f32 1.442695, %v2746_v61  ;;  %v3700_v61 = vld [vmem:[%s841_s27] ss:$0 sm:$0xff] }
0x103b   : > { %4320 = vpow2.f32 %v2748_v62 }
0x103e   : > { %v2745_v63 = vpop.xlane.xlu1 %2744 }
0x103f   : > { %v2747_v0 = vsub.f32 %v2739_v55, %v2745_v63 }
0x1041   : > { %v2750_v1 = vmul.f32 1.442695, %v2747_v0 }
0x1043   : > { %4322 = vpow2.f32 %v2750_v1 }
0x1045   : > { %v4321_v2 = vpop.eup %4320 }
0x1046   : > { %v2752_v3 = vsel %vm1251_vm3, %v4321_v2, 0.0 }
0x1047   : > { %2753 = vadd.xlane.f32.xlu0 %v2752_v3 }
0x104d   : > { %v4323_v4 = vpop.eup %4322 }
0x104e   : > { %v2755_v5 = vsel %vm1251_vm3, %v4323_v4, 0.0 }
0x104f   : > { %2756 = vadd.xlane.f32.xlu1 %v2755_v5 }
0x10d4   : > { %v2754_v6 = vpop.xlane.xlu0 %2753 }
0x10d5   : > { %4324 = vrcp.f32 %v2754_v6 }
0x10dc   : > { %v2757_v7 = vpop.xlane.xlu1 %2756 }
0x10dd   : > { %4326 = vrcp.f32 %v2757_v7  ;;  %v4286_v7 = vld [vmem:[%s5658_s17] sm:$0xff]  }
0x10df   : > { %v4325_v8 = vpop.eup %4324 }
0x10e0   : > { %v2760_v9 = vmul.f32 %v4325_v8, %v4321_v2  ;;  %v3701_v2 = vld [vmem:[%s849_s13] ss:$0 sm:$0xff]  ;;  %v4287_v8 = vld [vmem:[%s5658_s17 + $0x8] sm:$0xff]  }
0x10e2   : > { %v2762_v10 = vpack.c.bf16 %v2760_v9, %v2760_v9  ;;  %v4288_v9 = vld [vmem:[%s5658_s17 + $0x10] sm:$0xff]  }
0x10e4   : > { %4048 = vmatmul.mubr.msk.bf16.vlgmr.msra.gmra.mrb[52].mxu1 %vm1251_vm3, %v2762_v10  ;;  %v4289_v10 = vld [vmem:[%s5658_s17 + $0x18] sm:$0xff]  }
0x10e5   : > { %4059 = vmatprep.mubr.msk.bf16.mxu1 %vm4939_vm2, %v4938_v17  ;;  %4058 = vmatpush3.bf16.msra.mxu1 %v2863_v18 }
0x10e6   : > { %4073 = vmatprep.subr.bf16.mxu1 %v4938_v17 }
0x10e7   : > { %v4327_v11 = vpop.eup %4326 }
0x10e8   : > { %v2761_v13 = vmul.f32 %v4327_v11, %v4323_v4  ;;  %v4290_v11 = vld [vmem:[%s5658_s17 + $0x20] sm:$0xff]  }
0x10ea   : > { %v2763_v14 = vpack.c.bf16 %v2761_v13, %v2761_v13  ;;  %v4291_v13 = vld [vmem:[%s5658_s17 + $0x28] sm:$0xff]  }
0x10ec   : > { %4054 = vmatmul.mubr.msk.bf16.vlgmr.msra.gmra.mrb[64].mxu0 %vm1251_vm3, %v2763_v14  ;;  %v3702_v14 = vld [vmem:[%s866_s1] ss:$0 sm:$0xff] }
0x10ed   : > { %4069 = vmatprep.mubr.msk.bf16.mxu0 %vm4939_vm2, %v4938_v17  ;;  %4064 = vmatpush3.bf16.msra.mxu0 %v4283_v51 }
0x10ee   : > { %4065 = vmatprep.subr.bf16.mxu0 %v4938_v17 }
0x10f1   : > { %4066 = vmatpush3.bf16.msra.mxu0 %v4284_v52 }
0x10f2   : > { %4067 = vmatprep.subr.bf16.mxu0 %v4938_v17 }
0x10f5   : > { %4068 = vmatpush3.bf16.msra.mxu0 %v4285_v53 }
0x11b7   : > { %v2804_v19 = vpop.f32.mrb[52].mxu1 }
0x11b8   : > { %v4049_v20 = vpop.f32.mrb[53].mxu1 }
0x11b9   : > { %v2807_v21 = vpop.f32.mrb[54].mxu1 }
0x11ba   : > { %v4050_v22 = vpop.f32.mrb[55].mxu1 }
0x11bf   : > { %v2850_v23 = vpop.f32.mrb[64].mxu0 }
0x11c0   : > { %v2856_v24 = vpack.c.bf16 %v2850_v23, %v2804_v19  ;;  %v4055_v25 = vpop.f32.mrb[65].mxu0 }
0x11c1   : > { %v2853_v26 = vpop.f32.mrb[66].mxu0 }
0x11c2   : > { %v4056_v27 = vpop.f32.mrb[67].mxu0  ;;  %4060 = vmatmul.mubr.msk.bf16.vlgmr.msra.gmra.mrb[56].mxu1 %vm1251_vm3, %v2856_v24 }
0x11c3   : > { %4085 = vmatprep.mubr.msk.bf16.mxu1 %vm4939_vm2, %v4938_v17  ;;  %4074 = vmatpush3.bf16.msra.mxu1 %v4286_v7 }
0x11c4   : > { %4075 = vmatprep.subr.bf16.mxu1 %v4938_v17 }
0x11c7   : > { %4076 = vmatpush3.bf16.msra.mxu1 %v4287_v8 }
0x11c8   : > { %4077 = vmatprep.subr.bf16.mxu1 %v4938_v17 }
0x11cb   : > { %4078 = vmatpush3.bf16.msra.mxu1 %v4288_v9 }
0x11cc   : > { %4079 = vmatprep.subr.bf16.mxu1 %v4938_v17 }
0x11cf   : > { %4080 = vmatpush3.bf16.msra.mxu1 %v4289_v10 }
0x11d0   : > { %4081 = vmatprep.subr.bf16.mxu1 %v4938_v17 }
0x11d3   : > { %4082 = vmatpush3.bf16.msra.mxu1 %v4290_v11 }
0x11d4   : > { %4083 = vmatprep.subr.bf16.mxu1 %v4938_v17 }
0x11d7   : > { %4084 = vmatpush3.bf16.msra.mxu1 %v4291_v13 }
0x1295   : > { %v2899_v28 = vpop.f32.mrb[56].mxu1 }
0x1296   : > { %v2906_v29 = vadd.f32 %v2899_v28, %v5918_v33  ;;  %v4061_v30 = vpop.f32.mrb[57].mxu1 }
0x1297   : > { %v2902_v32 = vpop.f32.mrb[58].mxu1 }
0x1298   : > { %v2908_v35 = vadd.f32 %v4336_v34, %v2906_v29  ;;  %v2907_v36 = vadd.f32 %v2902_v32, %v5921_v40  ;;  %v4062_v37 = vpop.f32.mrb[59].mxu1 }
0x129a   : > { %v5955_v38 = vadd.f32 %v3699_v31, %v2908_v35  ;;  %v2909_v41 = vadd.f32 %v4337_v39, %v2907_v36 }
0x129c   : > { %v5957_v43 = vadd.f32 %v3699_v31, %v2909_v41  ;;  %v2921_v44 = vsel %vm1002_vm1, %v5955_v38, 0.0 }
0x129d   : > { %2922 = vadd.xlane.f32.xlu0 %v2921_v44 }
0x129e   : > { %v2924_v33 = vsel %vm1002_vm1, %v5957_v43, 0.0 }
0x129f   : > { %2925 = vadd.xlane.f32.xlu1 %v2924_v33 }
0x132a   : > { %v2923_v47 = vpop.xlane.xlu0 %2922 }
0x132b   : > { %v2927_v48 = vmul.f32 0.020833334, %v2923_v47 }
0x132c   : > { %v2926_v40 = vpop.xlane.xlu1 %2925 }
0x132d   : > { %v2929_v12 = vsub.f32 %v5955_v38, %v2927_v48  ;;  %v2928_v15 = vmul.f32 0.020833334, %v2926_v40  ;;  %v3714_v48 = vld [vmem:[%s883_s22] ss:$0 sm:$0xff] }
0x132f   : > { %v2930_v49 = vsub.f32 %v5957_v43, %v2928_v15  ;;  %v2931_v50 = vmul.f32 %v2929_v12, %v2929_v12 }
0x1331   : > { %v2933_v42 = vsel %vm1002_vm1, %v2931_v50, 0.0  ;;  %v2932_v45 = vmul.f32 %v2930_v49, %v2930_v49 }
0x1332   : > { %2934 = vadd.xlane.f32.xlu0 %v2933_v42 }
0x1333   : > { %v2936_v46 = vsel %vm1002_vm1, %v2932_v45, 0.0 }
0x1334   : > { %2937 = vadd.xlane.f32.xlu1 %v2936_v46 }
0x13bf   : > { %v2935_v54 = vpop.xlane.xlu0 %2934 }
0x13c0   : > { %v2939_v55 = vmul.f32 0.020833334, %v2935_v54 }
0x13c1   : > { %v2938_v56 = vpop.xlane.xlu1 %2937 }
0x13c2   : > { %v2941_v57 = vadd.f32 1e-05, %v2939_v55  ;;  %v2940_v58 = vmul.f32 0.020833334, %v2938_v56 }
0x13c4   : > { %4328 = vrsqrt.f32 %v2941_v57  ;;  %v2942_v59 = vadd.f32 1e-05, %v2940_v58 }
0x13c6   : > { %4330 = vrsqrt.f32 %v2942_v59 }
0x13ce   : > { %v4329_v60 = vpop.eup %4328 }
0x13cf   : > { %v2945_v62 = vmul.f32 %v4329_v60, %v2929_v12 }
0x13d0   : > { %v4331_v63 = vpop.eup %4330 }
0x13d1   : > { %v2953_v0 = vmul.f32 %v3700_v61, %v2945_v62  ;;  %v2946_v1 = vmul.f32 %v4331_v63, %v2930_v49 }
0x13d3   : > { %v2954_v3 = vmul.f32 %v3700_v61, %v2946_v1  ;;  %v2961_v4 = vadd.f32 %v3701_v2, %v2953_v0 }
0x13d5   : > { %v2962_v5 = vadd.f32 %v3701_v2, %v2954_v3 }
0x13d7   : > { %v2963_v6 = vpack.c.bf16 %v2962_v5, %v2961_v4 }
0x13d9   : > { %4070 = vmatmul.mubr.msk.bf16.vlgmr.msra.gmra.mrb[68].mxu0 %vm1002_vm1, %v2963_v6 }
0x14ac   : > { %v3032_v16 = vpop.f32.mrb[68].mxu0 }
0x14ad   : > { %v3033_v18 = vadd.f32 %v3702_v14, %v3032_v16  ;;  %v4071_v19 = vpop.f32.mrb[69].mxu0 }
0x14ae   : > { %v3035_v20 = vpop.f32.mrb[70].mxu0 }
0x14af   : > { %v3039_v21 = vmul.f32 %v3033_v18, %v3033_v18  ;;  %v3036_v22 = vadd.f32 %v3702_v14, %v3035_v20  ;;  %v4072_v23 = vpop.f32.mrb[71].mxu0 }
0x14b1   : > { %v3041_v24 = vmul.f32 %v3039_v21, %v3033_v18  ;;  %v3040_v25 = vmul.f32 %v3036_v22, %v3036_v22 }
0x14b3   : > { %v3043_v26 = vmul.f32 0.044715, %v3041_v24  ;;  %v3042_v27 = vmul.f32 %v3040_v25, %v3036_v22 }
0x14b5   : > { %v3045_v28 = vadd.f32 %v3043_v26, %v3033_v18  ;;  %v3044_v29 = vmul.f32 0.044715, %v3042_v27 }
0x14b7   : > { %v3047_v30 = vmul.f32 0.7978846, %v3045_v28  ;;  %v3046_v31 = vadd.f32 %v3044_v29, %v3036_v22 }
0x14b9   : > { %4332 = vtanh.f32 %v3047_v30  ;;  %v3048_v17 = vmul.f32 0.7978846, %v3046_v31 }
0x14bb   : > { %4334 = vtanh.f32 %v3048_v17 }
0x14c3   : > { %v4333_v32 = vpop.eup %4332 }
0x14c4   : > { %v3051_v34 = vadd.f32 1.0, %v4333_v32 }
0x14c5   : > { %v4335_v35 = vpop.eup %4334 }
0x14c6   : > { %v3053_v36 = vmul.f32 0.5, %v3051_v34  ;;  %v3052_v37 = vadd.f32 1.0, %v4335_v35 }
0x14c8   : > { %v3054_v39 = vmul.f32 0.5, %v3052_v37  ;;  %v3055_v41 = vmul.f32 %v3053_v36, %v3033_v18 }
0x14ca   : > { %v3056_v44 = vmul.f32 %v3054_v39, %v3036_v22 }
0x14cc   : > { %v3057_v33 = vpack.c.bf16 %v3056_v44, %v3055_v41 }
0x14ce   : > { %4086 = vmatmul.mubr.msk.bf16.vlgmr.msra.gmra.mrb[60].mxu1 %vm3106_vm5, %v3057_v33 }
0x15a0   : > { %3165 = sbr.rel (%p3715_p12) target bundleno = 5545 (0x15a9), region = 156 }
0x15a1   : > { %v3144_v47 = vpop.f32.mrb[60].mxu1 }
0x15a2   : > { %v3151_v40 = vadd.f32 %v3144_v47, %v5955_v38  ;;  %v4087_v12 = vpop.f32.mrb[61].mxu1 }
0x15a3   : > { %v3147_v15 = vpop.f32.mrb[62].mxu1 }
0x15a4   : > { %v3160_v49 = vadd.f32 %v3714_v48, %v3151_v40  ;;  %v3152_v50 = vadd.f32 %v3147_v15, %v5957_v43  ;;  %v4088_v42 = vpop.f32.mrb[63].mxu1 }
0x15a6   : > { %v3161_v45 = vadd.f32 %v3714_v48, %v3152_v50  ;;  %3166 = vst.msk [vmem:[#allocation28] sm:$0xff] (!%p3715_p12), %vm1002_vm1, %v3160_v49 }
0x15a8   : > { %3167 = vst.msk [vmem:[#allocation28 + $0x8] sm:$0xff] %vm1002_vm1, %v3161_v45 }
0x15a9 PF: > { %s6164_s9 = sld [smem:[#allocation42_spill]] }
0x15af   : > { %p3716_p13 = scmp.ne.s32.totalorder %s6164_s9, 1 }
0x15b0   : > { %v3174_v38 = vsel (!%p3716_p13), %vm1002_vm1, %v3160_v49, 0.0  ;;  %v3177_v46 = vsel (!%p3716_p13), %vm1002_vm1, %v3161_v45, 0.0  ;;  %v3717_v3 = vld [vmem:[#allocation25] ss:$0 sm:$0xff] (!%p3716_p13)  ;;  %v3718_v5 = vld [vmem:[#allocation26] ss:$0 sm:$0xff] (!%p3716_p13) }
0x15b1   : > { %3171 = sbr.rel (%p3716_p13) target bundleno = 5870 (0x16ee), region = 160  ;;  %3175 = vadd.xlane.f32.xlu0 (!%p3716_p13), %v3174_v38 }
0x15b5   : > { %3178 = vadd.xlane.f32.xlu0 (!%p3716_p13), %v3177_v46 }
0x163e   : > { %v3176_v43 = vpop.xlane.xlu0 %3175 }
0x163f   : > { %v3180_v51 = vmul.f32 0.020833334, %v3176_v43 }
0x1641   : > { %v3182_v52 = vsub.f32 %v3160_v49, %v3180_v51 }
0x1642   : > { %v3179_v53 = vpop.xlane.xlu0 %3178 }
0x1643   : > { %v3181_v54 = vmul.f32 0.020833334, %v3179_v53  ;;  %v3184_v55 = vmul.f32 %v3182_v52, %v3182_v52 }
0x1645   : > { %v3183_v56 = vsub.f32 %v3161_v45, %v3181_v54  ;;  %v3186_v57 = vsel %vm1002_vm1, %v3184_v55, 0.0 }
0x1646   : > { %3187 = vadd.xlane.f32.xlu1 %v3186_v57 }
0x1647   : > { %v3185_v58 = vmul.f32 %v3183_v56, %v3183_v56 }
0x1649   : > { %v3189_v59 = vsel %vm1002_vm1, %v3185_v58, 0.0 }
0x164a   : > { %3190 = vadd.xlane.f32.xlu1 %v3189_v59 }
0x16d3   : > { %v3188_v60 = vpop.xlane.xlu1 %3187 }
0x16d4   : > { %v3192_v61 = vmul.f32 0.020833334, %v3188_v60 }
0x16d6   : > { %v3194_v62 = vadd.f32 1e-05, %v3192_v61 }
0x16d7   : > { %v3191_v63 = vpop.xlane.xlu1 %3190 }
0x16d8   : > { %4338 = vrsqrt.f32 %v3194_v62  ;;  %v3193_v0 = vmul.f32 0.020833334, %v3191_v63 }
0x16da   : > { %v3195_v1 = vadd.f32 1e-05, %v3193_v0 }
0x16dc   : > { %4340 = vrsqrt.f32 %v3195_v1 }
0x16e2   : > { %v4339_v2 = vpop.eup %4338 }
0x16e3   : > { %v3198_v4 = vmul.f32 %v4339_v2, %v3182_v52 }
0x16e5   : > { %v3206_v6 = vmul.f32 %v3717_v3, %v3198_v4 }
0x16e6   : > { %v4341_v7 = vpop.eup %4340 }
0x16e7   : > { %v3214_v8 = vadd.f32 %v3718_v5, %v3206_v6  ;;  %v3199_v9 = vmul.f32 %v4341_v7, %v3183_v56 }
0x16e9   : > { %3216 = vst.msk [vmem:[#allocation28] sm:$0xff] %vm1002_vm1, %v3214_v8  ;;  %v3207_v10 = vmul.f32 %v3717_v3, %v3199_v9 }
0x16eb   : > { %v3215_v11 = vadd.f32 %v3718_v5, %v3207_v10 }
0x16ed   : > { %3217 = vst.msk [vmem:[#allocation28 + $0x8] sm:$0xff] %vm1002_vm1, %v3215_v11 }
0x16ee PF: > { %s6165_s21 = sld [smem:[#allocation42_spill]]  ;;  %s4940_s3 = smov [#allocation28]  }
0x16ef   : > { %s3224_s23 = sshll.u32 %s4940_s3, 4  ;;  %s3225_s23 = int_to_ptr.vmem [resolvable:$true] %s3224_s23 }
0x16f0   : > { %s4816_s24 = scalar_lea.vmem %s3225_s23, 256  ;;  %p4823_p6 = scmp.lt.s32.totalorder %s3225_s23, %s3225_s23 }
0x16f1   : > { %p4817_p0 = scmp.ne.s32.totalorder %s3225_s23, %s4816_s24  ;;  %p4824_p5 = scmp.lt.s32.totalorder %s4816_s24, %s4816_s24 }
0x16f3   : > { %p4825_p11 = por %p4824_p5, %p4823_p6 }
0x16f4   : > { %p4201_p2 = scmp.eq.s32.totalorder %s6165_s21, 1 }
0x16f6   : > { %p4818_p10 = pnand %p4817_p0, %p4201_p2 }
0x16f8   : > { %p4819_p9 = pneg %p4818_p10 }
0x16fa   : > { %p4826_p1 = pnand %p4825_p11, %p4819_p9 }
0x16fc   : > { %4829 = shalt.err (!%p4826_p1)
}
0x16fd   : > { %s6166_s16 = sld [smem:[#allocation58_spill]] }
0x1703   : > { %s4830_s30 = scalar_lea.hbm %s6166_s16, 256 }
0x1704   : > { %p4831_p4 = scmp.ne.s32.totalorder %s6166_s16, %s4830_s30  ;;  %p4836_p7 = scmp.lt.u32.totalorder %s4830_s30, %s6166_s16 }
0x1706   : > { %p4832_p3 = pnand %p4831_p4, %p4201_p2 }
0x1708   : > { %p4833_p8 = pneg %p4832_p3 }
0x170a   : > { %p4838_p12 = pnand %p4836_p7, %p4833_p8 }
0x170c   : > { %4841 = shalt.err (!%p4838_p12)
}
0x170d   : > { %s4941_s5 = smov 128   ;;  %s4942_s19 = smov 8  }
0x170e   : > { %4141 = dma.vmem_to_hbm [thread:$0]  (%p4201_p2), %s3225_s23, 256, %s6166_s16, [#allocation4], %s4941_s5, %s4941_s5, %s4942_s19  }
0x170f   : > { %4899 = dma.done.wait (%p4201_p2), [#allocation4], 256  }
0x1710   : > { %4901 = vsyncadd (%p4201_p2), [#allocation4], 4294967040 }
0x1711 PF: > { %s6167_s24 = sld [smem:[#allocation43_spill]]  ;;  %s6168_s21 = sld [smem:[#allocation40_spill]] }
0x1712   : > { %s6169_s22 = sld [smem:[#allocation41_spill]]  ;;  %s6170_s23 = sld [smem:[#allocation44_spill]] }
0x1717   : > { %p47_p13 = scmp.ge.s32.totalorder %s6167_s24, 4  }
0x1719   :  { %49 = sbr.rel (!%p47_p13) target bundleno = 31 (0x1f), region = 302 }
0x1720   :  { %3240 = vsyncpa [#allocation3], 1 }
0x1721   :  { %3242 = vsyncpa [#allocation3 + $0x1], 1 }
0x1722   :  { %3243 = vsyncpa [#allocation6], 1 }
0x1723   :  { %3245 = vsyncpa [#allocation6 + $0x1], 1 }
0x1724   :  { %3246 = vsyncpa [#allocation9], 1 }
0x1725   :  { %3248 = vsyncpa [#allocation9 + $0x1], 1 }
0x1726   :  { %3249 = vsyncpa [#allocation12], 1 }
0x1727   :  { %3251 = vsyncpa [#allocation12 + $0x1], 1 }
0x1728   :  { %3252 = vsyncpa [#allocation15], 1 }
0x1729   :  { %3254 = vsyncpa [#allocation15 + $0x1], 1 }
0x172a   :  { %3255 = vsyncpa [#allocation18], 1 }
0x172b   :  { %3257 = vsyncpa [#allocation18 + $0x1], 1 }
0x172c   :  { %3258 = vsyncpa [#allocation21], 1 }
0x172d   :  { %3260 = vsyncpa [#allocation21 + $0x1], 1 }
0x172e   :  { %3261 = vsyncpa [#allocation24], 1 }
0x172f   :  { %3263 = vsyncpa [#allocation24 + $0x1], 1 }
0x1730   :  { %3264 = vsyncpa [#allocation27], 1 }
0x1731   :  { %3265 = vsyncpa [#allocation4], 1 }
0x1732   :  { %3267 = vsyncpa [#allocation4 + $0x1], 1 }

// kernel: run.8
= control target key start
LH: loop header
LB: loop body
LE: loop exit
PB: predicated region body
PF: predicated region fallthrough
CT: control target
= control target key end

     0   :  { %s6210_s0 = inlined_call_operand.hbm [shape: f32[64,32], index: 0, kind: input, shape index: {}]   ;;  %s6211_s1 = inlined_call_operand.hbm [shape: f32[1,1,32], index: 1, kind: input, shape index: {}]   ;;  %s6212_s2 = inlined_call_operand.hbm [shape: f32[1,1,32], index: 2, kind: input, shape index: {}]   ;;  %s6213_s3 = inlined_call_operand.hbm [shape: bf16[1,4,32,16], index: 3, kind: input, shape index: {}]   ;;  %s6214_s4 = inlined_call_operand.hbm [shape: bf16[1,4,32,16], index: 4, kind: input, shape index: {}]   ;;  %s6215_s5 = inlined_call_operand.hbm [shape: bf16[1,4,32,16], index: 5, kind: input, shape index: {}]   ;;  %s6216_s6 = inlined_call_operand.hbm [shape: bf16[1,4,16,32], index: 6, kind: input, shape index: {}]   ;;  %s6217_s7 = inlined_call_operand.hbm [shape: f32[1,1,32], index: 7, kind: input, shape index: {}]   ;;  %s6218_s8 = inlined_call_operand.hbm [shape: f32[1,1,32], index: 8, kind: input, shape index: {}]   ;;  %s6219_s9 = inlined_call_operand.hbm [shape: f32[1,1,32], index: 9, kind: input, shape index: {}]   ;;  %s6220_s10 = inlined_call_operand.hbm [shape: bf16[1,32,128], index: 10, kind: input, shape index: {}]   ;;  %s6221_s11 = inlined_call_operand.hbm [shape: f32[1,1,128], index: 11, kind: input, shape index: {}]   ;;  %s6222_s12 = inlined_call_operand.hbm [shape: bf16[1,128,32], index: 12, kind: input, shape index: {}]   ;;  %s6223_s13 = inlined_call_operand.hbm [shape: f32[1,1,32], index: 13, kind: input, shape index: {}]   ;;  %s6224_s14 = inlined_call_operand.hbm [shape: f32[1,32], index: 14, kind: input, shape index: {}]   ;;  %s6225_s15 = inlined_call_operand.hbm [shape: f32[1,32], index: 15, kind: input, shape index: {}]   ;;  %s6226_s16 = inlined_call_operand.hbm [shape: f32[64,32], index: 16, kind: output, shape index: {}]  }
   0x1   :  { %6228 = sst [smem:[#allocation39_spill]] %s6210_s0 }
   0x2   :  { %21 = vsyncpa [#allocation3], 0 }
   0x3   :  { %22 = vsyncpa [#allocation6], 0 }
   0x4   :  { %23 = vsyncpa [#allocation9], 0 }
   0x5   :  { %24 = vsyncpa [#allocation12], 0 }
   0x6   :  { %25 = vsyncpa [#allocation15], 0 }
   0x7   :  { %26 = vsyncpa [#allocation18], 0 }
   0x8   :  { %27 = vsyncpa [#allocation21], 0 }
   0x9   :  { %28 = vsyncpa [#allocation24], 0 }
   0xa   :  { %29 = vsyncpa [#allocation27], 0 }
   0xb   :  { %30 = vsyncpa [#allocation4], 0  ;;  %s5201_s21 = smov [#allocation5]   ;;  %s5202_s23 = smov [#allocation8]  }
   0xc   :  { %s49_s22 = sshll.u32 %s5201_s21, 4  ;;  %s68_s24 = sshll.u32 %s5202_s23, 4  ;;  %s50_s22 = int_to_ptr.vmem [resolvable:$true] %s49_s22  ;;  %s5307_s24 = int_to_ptr.vmem [resolvable:$true] %s68_s24 }
   0xd   :  { %s4807_s27 = scalar_lea.hbm %s6211_s1, 16 }
   0xe   :  { %p4808_p0 = scmp.ne.s32.totalorder %s6211_s1, %s4807_s27  ;;  %p4811_p1 = scmp.lt.u32.totalorder %s4807_s27, %s6211_s1 }
  0x10   :  { %p4813_p2 = pnand %p4811_p1, %p4808_p0 }
  0x12   :  { %4816 = shalt.err (!%p4813_p2)
}
  0x13   :  { %s4817_s17 = scalar_lea.vmem %s50_s22, 16  ;;  %s4821_s18 = scalar_lea.vmem %s50_s22, 32 }
  0x14   :  { %p4818_p3 = scmp.ne.s32.totalorder %s50_s22, %s4817_s17  ;;  %p4822_p4 = scmp.lt.s32.totalorder %s50_s22, %s50_s22 }
  0x15   :  { %p4823_p5 = scmp.lt.s32.totalorder %s4821_s18, %s4817_s17 }
  0x17   :  { %p4824_p6 = por %p4823_p5, %p4822_p4 }
  0x19   :  { %p4825_p7 = pnand %p4824_p6, %p4818_p3 }
  0x1b   :  { %4828 = shalt.err (!%p4825_p7)
}
  0x1c   :  { %52 = dma.hbm_to_vmem [thread:$0]  %s6211_s1, 16, %s50_s22, [#allocation6]  }
  0x1d   :  { %s4829_s25 = scalar_lea.hbm %s6213_s3, 1024 }
  0x1e   :  { %p4830_p8 = scmp.ne.s32.totalorder %s6213_s3, %s4829_s25  ;;  %p4833_p9 = scmp.lt.u32.totalorder %s4829_s25, %s6213_s3 }
  0x20   :  { %p4835_p10 = pnand %p4833_p9, %p4830_p8 }
  0x22   :  { %4838 = shalt.err (!%p4835_p10)
}
  0x23   :  { %s4839_s30 = scalar_lea.vmem %s5307_s24, 1024  ;;  %p4844_p12 = scmp.lt.s32.totalorder %s5307_s24, %s5307_s24 }
  0x24   :  { %p4840_p11 = scmp.ne.s32.totalorder %s5307_s24, %s4839_s30  ;;  %p4845_p13 = scmp.lt.s32.totalorder %s4839_s30, %s4839_s30 }
  0x26   :  { %p4846_p0 = por %p4845_p13, %p4844_p12 }
  0x28   :  { %p4847_p1 = pnand %p4846_p0, %p4840_p11 }
  0x2a   :  { %4850 = shalt.err (!%p4847_p1)
}
  0x2b   :  { %s5203_s1 = smov 64   ;;  %s5204_s22 = smov 4  }
  0x2c   :  { %74 = dma.hbm_to_vmem [thread:$0]  %s6213_s3, 1024, %s5307_s24, [#allocation9], %s5203_s1, %s5203_s1, %s5204_s22  }
  0x2d   :  { %s5205_s18 = smov [#allocation11]   ;;  %s5206_s20 = smov [#allocation14]  }
  0x2e   :  { %s92_s19 = sshll.u32 %s5205_s18, 4  ;;  %s117_s21 = sshll.u32 %s5206_s20, 4  ;;  %s93_s19 = int_to_ptr.vmem [resolvable:$true] %s92_s19  ;;  %s118_s21 = int_to_ptr.vmem [resolvable:$true] %s117_s21 }
  0x2f   :  { %s4851_s26 = scalar_lea.hbm %s6215_s5, 1024 }
  0x30   :  { %p4852_p2 = scmp.ne.s32.totalorder %s6215_s5, %s4851_s26  ;;  %p4855_p3 = scmp.lt.u32.totalorder %s4851_s26, %s6215_s5 }
  0x32   :  { %p4857_p4 = pnand %p4855_p3, %p4852_p2 }
  0x34   :  { %4860 = shalt.err (!%p4857_p4)
}
  0x35   :  { %s4861_s3 = scalar_lea.vmem %s93_s19, 1024  ;;  %p4866_p6 = scmp.lt.s32.totalorder %s93_s19, %s93_s19 }
  0x36   :  { %p4862_p5 = scmp.ne.s32.totalorder %s93_s19, %s4861_s3  ;;  %p4867_p7 = scmp.lt.s32.totalorder %s4861_s3, %s4861_s3 }
  0x38   :  { %p4868_p8 = por %p4867_p7, %p4866_p6 }
  0x3a   :  { %p4869_p9 = pnand %p4868_p8, %p4862_p5 }
  0x3c   :  { %4872 = shalt.err (!%p4869_p9)
}
  0x3d   :  { %98 = dma.hbm_to_vmem [thread:$0]  %s6215_s5, 1024, %s93_s19, [#allocation12], %s5203_s1, %s5203_s1, %s5204_s22  }
  0x3e   :  { %s4873_s20 = scalar_lea.hbm %s6217_s7, 16 }
  0x3f   :  { %p4874_p10 = scmp.ne.s32.totalorder %s6217_s7, %s4873_s20  ;;  %p4877_p11 = scmp.lt.u32.totalorder %s4873_s20, %s6217_s7 }
  0x41   :  { %p4879_p12 = pnand %p4877_p11, %p4874_p10 }
  0x43   :  { %4882 = shalt.err (!%p4879_p12)
}
  0x44   :  { %s4883_s28 = scalar_lea.vmem %s118_s21, 16  ;;  %s4887_s29 = scalar_lea.vmem %s118_s21, 32 }
  0x45   :  { %p4884_p13 = scmp.ne.s32.totalorder %s118_s21, %s4883_s28  ;;  %p4888_p0 = scmp.lt.s32.totalorder %s118_s21, %s118_s21 }
  0x46   :  { %p4889_p1 = scmp.lt.s32.totalorder %s4887_s29, %s4883_s28 }
  0x48   :  { %p4890_p2 = por %p4889_p1, %p4888_p0 }
  0x4a   :  { %p4891_p3 = pnand %p4890_p2, %p4884_p13 }
  0x4c   :  { %4894 = shalt.err (!%p4891_p3)
}
  0x4d   :  { %120 = dma.hbm_to_vmem [thread:$0]  %s6217_s7, 16, %s118_s21, [#allocation15]  }
  0x4e   :  { %s5207_s30 = smov [#allocation17]   ;;  %s5208_s24 = smov [#allocation20]  }
  0x4f   :  { %s137_s3 = sshll.u32 %s5207_s30, 4  ;;  %s159_s0 = sshll.u32 %s5208_s24, 4  ;;  %s138_s3 = int_to_ptr.vmem [resolvable:$true] %s137_s3  ;;  %s160_s0 = int_to_ptr.vmem [resolvable:$true] %s159_s0 }
  0x50   :  { %s4895_s20 = scalar_lea.hbm %s6219_s9, 16 }
  0x51   :  { %p4896_p4 = scmp.ne.s32.totalorder %s6219_s9, %s4895_s20  ;;  %p4899_p5 = scmp.lt.u32.totalorder %s4895_s20, %s6219_s9 }
  0x53   :  { %p4901_p6 = pnand %p4899_p5, %p4896_p4 }
  0x55   :  { %4904 = shalt.err (!%p4901_p6)
}
  0x56   :  { %s4905_s7 = scalar_lea.vmem %s138_s3, 16  ;;  %s4909_s21 = scalar_lea.vmem %s138_s3, 32 }
  0x57   :  { %p4906_p7 = scmp.ne.s32.totalorder %s138_s3, %s4905_s7  ;;  %p4910_p8 = scmp.lt.s32.totalorder %s138_s3, %s138_s3 }
  0x58   :  { %p4911_p9 = scmp.lt.s32.totalorder %s4909_s21, %s4905_s7 }
  0x5a   :  { %p4912_p10 = por %p4911_p9, %p4910_p8 }
  0x5c   :  { %p4913_p11 = pnand %p4912_p10, %p4906_p7 }
  0x5e   :  { %4916 = shalt.err (!%p4913_p11)
}
  0x5f   :  { %140 = dma.hbm_to_vmem [thread:$0]  %s6219_s9, 16, %s138_s3, [#allocation18]  }
  0x60   :  { %s4917_s30 = scalar_lea.hbm %s6221_s11, 16 }
  0x61   :  { %p4918_p12 = scmp.ne.s32.totalorder %s6221_s11, %s4917_s30  ;;  %p4921_p13 = scmp.lt.u32.totalorder %s4917_s30, %s6221_s11 }
  0x63   :  { %p4923_p0 = pnand %p4921_p13, %p4918_p12 }
  0x65   :  { %4926 = shalt.err (!%p4923_p0)
}
  0x66   :  { %s4927_s23 = scalar_lea.vmem %s160_s0, 16  ;;  %s4931_s25 = scalar_lea.vmem %s160_s0, 32 }
  0x67   :  { %p4928_p1 = scmp.ne.s32.totalorder %s160_s0, %s4927_s23  ;;  %p4932_p2 = scmp.lt.s32.totalorder %s160_s0, %s160_s0 }
  0x68   :  { %p4933_p3 = scmp.lt.s32.totalorder %s4931_s25, %s4927_s23 }
  0x6a   :  { %p4934_p4 = por %p4933_p3, %p4932_p2 }
  0x6c   :  { %p4935_p5 = pnand %p4934_p4, %p4928_p1 }
  0x6e   :  { %4938 = shalt.err (!%p4935_p5)
}
  0x6f   :  { %162 = dma.hbm_to_vmem [thread:$0]  %s6221_s11, 16, %s160_s0, [#allocation21]  }
  0x70   :  { %s5209_s26 = smov [#allocation23]   ;;  %s5210_s7 = smov [#allocation2]  }
  0x71   :  { %s181_s27 = sshll.u32 %s5209_s26, 4  ;;  %s36_s21 = sshll.u32 %s5210_s7, 4  ;;  %s182_s27 = int_to_ptr.vmem [resolvable:$true] %s181_s27  ;;  %s5392_s21 = int_to_ptr.vmem [resolvable:$true] %s36_s21 }
  0x72   :  { %s4939_s5 = scalar_lea.hbm %s6223_s13, 16 }
  0x73   :  { %p4940_p6 = scmp.ne.s32.totalorder %s6223_s13, %s4939_s5  ;;  %p4943_p7 = scmp.lt.u32.totalorder %s4939_s5, %s6223_s13 }
  0x75   :  { %p4945_p8 = pnand %p4943_p7, %p4940_p6 }
  0x77   :  { %4948 = shalt.err (!%p4945_p8)
}
  0x78   :  { %s4949_s11 = scalar_lea.vmem %s182_s27, 16  ;;  %s4953_s0 = scalar_lea.vmem %s182_s27, 32 }
  0x79   :  { %p4950_p9 = scmp.ne.s32.totalorder %s182_s27, %s4949_s11  ;;  %p4954_p10 = scmp.lt.s32.totalorder %s182_s27, %s182_s27 }
  0x7a   :  { %p4955_p11 = scmp.lt.s32.totalorder %s4953_s0, %s4949_s11 }
  0x7c   :  { %p4956_p12 = por %p4955_p11, %p4954_p10 }
  0x7e   :  { %p4957_p13 = pnand %p4956_p12, %p4950_p9 }
  0x80   :  { %4960 = shalt.err (!%p4957_p13)
}
  0x81   :  { %184 = dma.hbm_to_vmem [thread:$0]  %s6223_s13, 16, %s182_s27, [#allocation24]  }
  0x82   :  { %s6229_s9 = sld [smem:[#allocation39_spill]] }
  0x88   :  { %s4961_s3 = scalar_lea.hbm %s6229_s9, 1024 }
  0x89   :  { %p4962_p0 = scmp.ne.s32.totalorder %s6229_s9, %s4961_s3  ;;  %p4965_p1 = scmp.lt.u32.totalorder %s4961_s3, %s6229_s9 }
  0x8b   :  { %p4967_p2 = pnand %p4965_p1, %p4962_p0 }
  0x8d   :  { %4970 = shalt.err (!%p4967_p2)
}
  0x8e   :  { %s4971_s5 = scalar_lea.vmem %s5392_s21, 1024  ;;  %p4976_p4 = scmp.lt.s32.totalorder %s5392_s21, %s5392_s21 }
  0x8f   :  { %p4972_p3 = scmp.ne.s32.totalorder %s5392_s21, %s4971_s5  ;;  %p4977_p5 = scmp.lt.s32.totalorder %s4971_s5, %s4971_s5 }
  0x91   :  { %p4978_p6 = por %p4977_p5, %p4976_p4 }
  0x93   :  { %p4979_p7 = pnand %p4978_p6, %p4972_p3 }
  0x95   :  { %4982 = shalt.err (!%p4979_p7)
}
  0x96   :  { %s5211_s13 = smov 128   ;;  %s5212_s27 = smov 8  }
  0x97   :  { %42 = dma.hbm_to_vmem [thread:$0]  %s6229_s9, 1024, %s5392_s21, [#allocation3], %s5211_s13, %s5211_s13, %s5212_s27  }
  0x98   :  { %s5213_s24 = smov [#allocation7]   ;;  %s5214_s11 = smov [#allocation10]  }
  0x99   :  { %s59_s17 = sshll.u32 %s5213_s24, 4  ;;  %s80_s0 = sshll.u32 %s5214_s11, 4  ;;  %s60_s17 = int_to_ptr.vmem [resolvable:$true] %s59_s17  ;;  %s5426_s0 = int_to_ptr.vmem [resolvable:$true] %s80_s0 }
  0x9a   :  { %s4983_s23 = scalar_lea.hbm %s6212_s2, 16 }
  0x9b   :  { %p4984_p8 = scmp.ne.s32.totalorder %s6212_s2, %s4983_s23  ;;  %p4987_p9 = scmp.lt.u32.totalorder %s4983_s23, %s6212_s2 }
  0x9d   :  { %p4989_p10 = pnand %p4987_p9, %p4984_p8 }
  0x9f   :  { %4992 = shalt.err (!%p4989_p10)
}
  0xa0   :  { %s4993_s21 = scalar_lea.vmem %s60_s17, 16  ;;  %s4997_s9 = scalar_lea.vmem %s60_s17, 32 }
  0xa1   :  { %p4994_p11 = scmp.ne.s32.totalorder %s60_s17, %s4993_s21  ;;  %p4998_p12 = scmp.lt.s32.totalorder %s60_s17, %s60_s17 }
  0xa2   :  { %p4999_p13 = scmp.lt.s32.totalorder %s4997_s9, %s4993_s21 }
  0xa4   :  { %p5000_p0 = por %p4999_p13, %p4998_p12 }
  0xa6   :  { %p5001_p1 = pnand %p5000_p0, %p4994_p11 }
  0xa8   :  { %5004 = shalt.err (!%p5001_p1)
}
  0xa9   :  { %62 = dma.hbm_to_vmem [thread:$0]  %s6212_s2, 16, %s60_s17, [#allocation6]  }
  0xaa   :  { %s5005_s30 = scalar_lea.hbm %s6214_s4, 1024 }
  0xab   :  { %p5006_p2 = scmp.ne.s32.totalorder %s6214_s4, %s5005_s30  ;;  %p5009_p3 = scmp.lt.u32.totalorder %s5005_s30, %s6214_s4 }
  0xad   :  { %p5011_p4 = pnand %p5009_p3, %p5006_p2 }
  0xaf   :  { %5014 = shalt.err (!%p5011_p4)
}
  0xb0   :  { %s5015_s23 = scalar_lea.vmem %s5426_s0, 1024  ;;  %p5020_p6 = scmp.lt.s32.totalorder %s5426_s0, %s5426_s0 }
  0xb1   :  { %p5016_p5 = scmp.ne.s32.totalorder %s5426_s0, %s5015_s23  ;;  %p5021_p7 = scmp.lt.s32.totalorder %s5015_s23, %s5015_s23 }
  0xb3   :  { %p5022_p8 = por %p5021_p7, %p5020_p6 }
  0xb5   :  { %p5023_p9 = pnand %p5022_p8, %p5016_p5 }
  0xb7   :  { %5026 = shalt.err (!%p5023_p9)
}
  0xb8   :  { %86 = dma.hbm_to_vmem [thread:$0]  %s6214_s4, 1024, %s5426_s0, [#allocation9], %s5203_s1, %s5203_s1, %s5204_s22  }
  0xb9   :  { %s5215_s25 = smov [#allocation13]   ;;  %s5216_s26 = smov [#allocation16]  }
  0xba   :  { %s104_s3 = sshll.u32 %s5215_s25, 4  ;;  %s127_s7 = sshll.u32 %s5216_s26, 4  ;;  %s105_s3 = int_to_ptr.vmem [resolvable:$true] %s104_s3  ;;  %s128_s7 = int_to_ptr.vmem [resolvable:$true] %s127_s7 }
  0xbb   :  { %s5027_s28 = scalar_lea.hbm %s6216_s6, 512 }
  0xbc   :  { %p5028_p10 = scmp.ne.s32.totalorder %s6216_s6, %s5027_s28  ;;  %p5031_p11 = scmp.lt.u32.totalorder %s5027_s28, %s6216_s6 }
  0xbe   :  { %p5033_p12 = pnand %p5031_p11, %p5028_p10 }
  0xc0   :  { %5036 = shalt.err (!%p5033_p12)
}
  0xc1   :  { %s5037_s4 = scalar_lea.vmem %s105_s3, 512  ;;  %p5042_p0 = scmp.lt.s32.totalorder %s105_s3, %s105_s3 }
  0xc2   :  { %p5038_p13 = scmp.ne.s32.totalorder %s105_s3, %s5037_s4  ;;  %p5043_p1 = scmp.lt.s32.totalorder %s5037_s4, %s5037_s4 }
  0xc4   :  { %p5044_p2 = por %p5043_p1, %p5042_p0 }
  0xc6   :  { %p5045_p3 = pnand %p5044_p2, %p5038_p13 }
  0xc8   :  { %5048 = shalt.err (!%p5045_p3)
}
  0xc9   :  { %110 = dma.hbm_to_vmem [thread:$0]  %s6216_s6, 512, %s105_s3, [#allocation12], %s5203_s1, %s5203_s1, %s5204_s22  }
  0xca   :  { %s5049_s20 = scalar_lea.hbm %s6218_s8, 16 }
  0xcb   :  { %p5050_p4 = scmp.ne.s32.totalorder %s6218_s8, %s5049_s20  ;;  %p5053_p5 = scmp.lt.u32.totalorder %s5049_s20, %s6218_s8 }
  0xcd   :  { %p5055_p6 = pnand %p5053_p5, %p5050_p4 }
  0xcf   :  { %5058 = shalt.err (!%p5055_p6)
}
  0xd0   :  { %s5059_s26 = scalar_lea.vmem %s128_s7, 16  ;;  %s5063_s21 = scalar_lea.vmem %s128_s7, 32 }
  0xd1   :  { %p5060_p7 = scmp.ne.s32.totalorder %s128_s7, %s5059_s26  ;;  %p5064_p8 = scmp.lt.s32.totalorder %s128_s7, %s128_s7 }
  0xd2   :  { %p5065_p9 = scmp.lt.s32.totalorder %s5063_s21, %s5059_s26 }
  0xd4   :  { %p5066_p10 = por %p5065_p9, %p5064_p8 }
  0xd6   :  { %p5067_p11 = pnand %p5066_p10, %p5060_p7 }
  0xd8   :  { %5070 = shalt.err (!%p5067_p11)
}
  0xd9   :  { %130 = dma.hbm_to_vmem [thread:$0]  %s6218_s8, 16, %s128_s7, [#allocation15]  }
  0xda   :  { %s5217_s9 = smov [#allocation19]   ;;  %s5218_s29 = smov [#allocation22]  }
  0xdb   :  { %s146_s28 = sshll.u32 %s5217_s9, 4  ;;  %s168_s5 = sshll.u32 %s5218_s29, 4  ;;  %s147_s28 = int_to_ptr.vmem [resolvable:$true] %s146_s28  ;;  %s5487_s5 = int_to_ptr.vmem [resolvable:$true] %s168_s5 }
  0xdc   :  { %s5071_s4 = scalar_lea.hbm %s6220_s10, 256 }
  0xdd   :  { %p5072_p12 = scmp.ne.s32.totalorder %s6220_s10, %s5071_s4  ;;  %p5075_p13 = scmp.lt.u32.totalorder %s5071_s4, %s6220_s10 }
  0xdf   :  { %p5077_p0 = pnand %p5075_p13, %p5072_p12 }
  0xe1   :  { %5080 = shalt.err (!%p5077_p0)
}
  0xe2   :  { %s5081_s8 = scalar_lea.vmem %s147_s28, 256  ;;  %p5086_p2 = scmp.lt.s32.totalorder %s147_s28, %s147_s28 }
  0xe3   :  { %p5082_p1 = scmp.ne.s32.totalorder %s147_s28, %s5081_s8  ;;  %p5087_p3 = scmp.lt.s32.totalorder %s5081_s8, %s5081_s8 }
  0xe5   :  { %p5088_p4 = por %p5087_p3, %p5086_p2 }
  0xe7   :  { %p5089_p5 = pnand %p5088_p4, %p5082_p1 }
  0xe9   :  { %5092 = shalt.err (!%p5089_p5)
}
  0xea   :  { %152 = dma.hbm_to_vmem [thread:$0]  %s6220_s10, 256, %s147_s28, [#allocation18], %s5203_s1, %s5203_s1, %s5204_s22  }
  0xeb   :  { %s5093_s17 = scalar_lea.hbm %s6222_s12, 1024 }
  0xec   :  { %p5094_p6 = scmp.ne.s32.totalorder %s6222_s12, %s5093_s17  ;;  %p5097_p7 = scmp.lt.u32.totalorder %s5093_s17, %s6222_s12 }
  0xee   :  { %p5099_p8 = pnand %p5097_p7, %p5094_p6 }
  0xf0   :  { %5102 = shalt.err (!%p5099_p8)
}
  0xf1   :  { %s5103_s3 = scalar_lea.vmem %s5487_s5, 1024  ;;  %p5108_p10 = scmp.lt.s32.totalorder %s5487_s5, %s5487_s5 }
  0xf2   :  { %p5104_p9 = scmp.ne.s32.totalorder %s5487_s5, %s5103_s3  ;;  %p5109_p11 = scmp.lt.s32.totalorder %s5103_s3, %s5103_s3 }
  0xf4   :  { %p5110_p12 = por %p5109_p11, %p5108_p10 }
  0xf6   :  { %p5111_p13 = pnand %p5110_p12, %p5104_p9 }
  0xf8   :  { %5114 = shalt.err (!%p5111_p13)
}
  0xf9   :  { %174 = dma.hbm_to_vmem [thread:$0]  %s6222_s12, 1024, %s5487_s5, [#allocation21], %s5203_s1, %s5203_s1, %s5204_s22  }
  0xfa   :  { %s5219_s28 = smov [#allocation25]   ;;  %s5220_s19 = smov [#allocation26]  }
  0xfb   :  { %s191_s29 = sshll.u32 %s5219_s28, 4  ;;  %s201_s30 = sshll.u32 %s5220_s19, 4  ;;  %s192_s29 = int_to_ptr.vmem [resolvable:$true] %s191_s29  ;;  %s202_s30 = int_to_ptr.vmem [resolvable:$true] %s201_s30 }
  0xfc   :  { %s5115_s24 = scalar_lea.hbm %s6224_s14, 16 }
  0xfd   :  { %p5116_p0 = scmp.ne.s32.totalorder %s6224_s14, %s5115_s24  ;;  %p5119_p1 = scmp.lt.u32.totalorder %s5115_s24, %s6224_s14 }
  0xff   :  { %p5121_p2 = pnand %p5119_p1, %p5116_p0 }
 0x101   :  { %5124 = shalt.err (!%p5121_p2)
}
 0x102   :  { %s5125_s12 = scalar_lea.vmem %s192_s29, 16  ;;  %s5129_s1 = scalar_lea.vmem %s192_s29, 32 }
 0x103   :  { %p5126_p3 = scmp.ne.s32.totalorder %s192_s29, %s5125_s12  ;;  %p5130_p4 = scmp.lt.s32.totalorder %s192_s29, %s192_s29 }
 0x104   :  { %p5131_p5 = scmp.lt.s32.totalorder %s5129_s1, %s5125_s12 }
 0x106   :  { %p5132_p6 = por %p5131_p5, %p5130_p4 }
 0x108   :  { %p5133_p7 = pnand %p5132_p6, %p5126_p3 }
 0x10a   :  { %5136 = shalt.err (!%p5133_p7)
}
 0x10b   :  { %194 = dma.hbm_to_vmem [thread:$0]  %s6224_s14, 16, %s192_s29, [#allocation24]  }
 0x10c   :  { %s5137_s2 = scalar_lea.hbm %s6225_s15, 16 }
 0x10d   :  { %p5138_p8 = scmp.ne.s32.totalorder %s6225_s15, %s5137_s2  ;;  %p5141_p9 = scmp.lt.u32.totalorder %s5137_s2, %s6225_s15 }
 0x10f   :  { %p5143_p10 = pnand %p5141_p9, %p5138_p8 }
 0x111   :  { %5146 = shalt.err (!%p5143_p10)
}
 0x112   :  { %s5147_s6 = scalar_lea.vmem %s202_s30, 16  ;;  %s5151_s3 = scalar_lea.vmem %s202_s30, 32 }
 0x113   :  { %p5148_p11 = scmp.ne.s32.totalorder %s202_s30, %s5147_s6  ;;  %p5152_p12 = scmp.lt.s32.totalorder %s202_s30, %s202_s30 }
 0x114   :  { %p5153_p13 = scmp.lt.s32.totalorder %s5151_s3, %s5147_s6 }
 0x116   :  { %p5154_p0 = por %p5153_p13, %p5152_p12 }
 0x118   :  { %p5155_p1 = pnand %p5154_p0, %p5148_p11 }
 0x11a   :  { %5158 = shalt.err (!%p5155_p1)
}
 0x11b   :  { %204 = dma.hbm_to_vmem [thread:$0]  %s6225_s15, 16, %s202_s30, [#allocation27]  }
 0x11c   :  { %5181 = dma.done.wait [#allocation3], 1024  }
 0x11d   :  { %5182 = vsyncadd [#allocation3], 4294966272 }
 0x11e   :  { %5183 = dma.done.wait [#allocation6], 32  }
 0x11f   :  { %5184 = vsyncadd [#allocation6], 4294967264 }
 0x120   :  { %5185 = dma.done.wait [#allocation9], 2048  }
 0x121   :  { %5186 = vsyncadd [#allocation9], 4294965248 }
 0x122   :  { %5187 = dma.done.wait [#allocation12], 1536  }
 0x123   :  { %5188 = vsyncadd [#allocation12], 4294965760 }
 0x124   :  { %5189 = dma.done.wait [#allocation15], 32  }
 0x125   :  { %5190 = vsyncadd [#allocation15], 4294967264 }
 0x126   :  { %5191 = dma.done.wait [#allocation18], 272  }
 0x127   :  { %5192 = vsyncadd [#allocation18], 4294967024 }
 0x128   :  { %5193 = dma.done.wait [#allocation21], 1040  }
 0x129   :  { %5194 = vsyncadd [#allocation21], 4294966256 }
 0x12a   :  { %5195 = dma.done.wait [#allocation24], 32  }
 0x12b   :  { %5196 = vsyncadd [#allocation24], 4294967264 }
 0x12c   :  { %5197 = dma.done.wait [#allocation27], 16  }
 0x12d   :  { %5198 = vsyncadd [#allocation27], 4294967280  ;;  %vm266_vm0 = vcmask 261120   ;;  %v258_v0 = vld [vmem:[#allocation2] sm:$0xff]  ;;  %v260_v1 = vld [vmem:[#allocation2 + $0x10] sm:$0xff]  ;;  %vm690_vm1 = vcmask 130048  }
 0x12e   :  { %v259_v2 = vld [vmem:[#allocation2 + $0x8] sm:$0xff]  ;;  %267 = vst.msk [vmem:[#allocation28] sm:$0xff] %vm266_vm0, %v258_v0  ;;  %269 = vst.msk [vmem:[#allocation28 + $0x10] sm:$0xff] %vm266_vm0, %v260_v1  ;;  %v261_v3 = vld [vmem:[#allocation2 + $0x18] sm:$0xff]  ;;  %s5221_s15 = smov [#allocation28]  }
 0x12f   :  { %268 = vst.msk [vmem:[#allocation28 + $0x8] sm:$0xff] %vm266_vm0, %v259_v2  ;;  %v262_v4 = vld [vmem:[#allocation2 + $0x20] sm:$0xff]  ;;  %v263_v5 = vld [vmem:[#allocation2 + $0x28] sm:$0xff]  ;;  %270 = vst.msk [vmem:[#allocation28 + $0x18] sm:$0xff] %vm266_vm0, %v261_v3  ;;  %s3819_s9 = sshll.u32 %s5221_s15, 4  ;;  %s3820_s9 = int_to_ptr.vmem [resolvable:$true] %s3819_s9 }
 0x130   :  { %271 = vst.msk [vmem:[#allocation28 + $0x20] sm:$0xff] %vm266_vm0, %v262_v4  ;;  %272 = vst.msk [vmem:[#allocation28 + $0x28] sm:$0xff] %vm266_vm0, %v263_v5  ;;  %v264_v6 = vld [vmem:[#allocation2 + $0x30] sm:$0xff]  ;;  %v265_v7 = vld [vmem:[#allocation2 + $0x38] sm:$0xff]  ;;  %s5159_s28 = scalar_lea.vmem %s3820_s9, 1024  ;;  %p5164_p3 = scmp.lt.s32.totalorder %s3820_s9, %s3820_s9 }
 0x131   :  { %273 = vst.msk [vmem:[#allocation28 + $0x30] sm:$0xff] %vm266_vm0, %v264_v6  ;;  %274 = vst.msk [vmem:[#allocation28 + $0x38] sm:$0xff] %vm266_vm0, %v265_v7  ;;  %v4569_v0 = vld [vmem:[#allocation8] sm:$0xff]   ;;  %v4571_v2 = vld [vmem:[#allocation8 + $0x8] sm:$0xff]   ;;  %p5160_p2 = scmp.ne.s32.totalorder %s3820_s9, %s5159_s28  ;;  %p5165_p4 = scmp.lt.s32.totalorder %s5159_s28, %s5159_s28 }
 0x132   :  { %v4570_v1 = vld [vmem:[#allocation11] sm:$0xff]   ;;  %4160 = vmatprep.subr.bf16.mxu1 %v4569_v0  ;;  %v4572_v3 = vld [vmem:[#allocation11 + $0x8] sm:$0xff]  }
 0x133   :  { %4184 = vmatprep.subr.bf16.mxu0 %v4570_v1  ;;  %4161 = vmatpush3.bf16.msra.mxu1 %v4569_v0  ;;  %v5604_v4 = vld [vmem:[#allocation10] sm:$0xff]   ;;  %p5166_p5 = por %p5165_p4, %p5164_p3 }
 0x134   :  { %4185 = vmatpush3.bf16.msra.mxu0 %v4570_v1  ;;  %4162 = vmatprep.subr.bf16.mxu1 %v4571_v2 }
 0x135   :  { %v275_v8 = vld [vmem:[#allocation28] sm:$0xff]  ;;  %v277_v9 = vld [vmem:[#allocation28 + $0x10] sm:$0xff]  ;;  %4186 = vmatprep.subr.bf16.mxu0 %v4572_v3  ;;  %p5167_p6 = pnand %p5166_p5, %p5160_p2 }
 0x136   :  { %v276_v10 = vld [vmem:[#allocation28 + $0x8] sm:$0xff]  ;;  %v286_v11 = vsel %vm266_vm0, %v275_v8, 0.0  ;;  %v292_v12 = vsel %vm266_vm0, %v277_v9, 0.0  ;;  %v278_v13 = vld [vmem:[#allocation28 + $0x18] sm:$0xff] }
 0x137   :  { %v279_v14 = vld [vmem:[#allocation28 + $0x20] sm:$0xff]  ;;  %v280_v15 = vld [vmem:[#allocation28 + $0x28] sm:$0xff]  ;;  %287 = vadd.xlane.f32.xlu0 %v286_v11  ;;  %293 = vadd.xlane.f32.xlu1 %v292_v12  ;;  %v289_v16 = vsel %vm266_vm0, %v276_v10, 0.0  ;;  %v295_v17 = vsel %vm266_vm0, %v278_v13, 0.0 }
 0x138   :  { %v298_v18 = vsel %vm266_vm0, %v279_v14, 0.0  ;;  %v301_v19 = vsel %vm266_vm0, %v280_v15, 0.0  ;;  %v281_v20 = vld [vmem:[#allocation28 + $0x30] sm:$0xff]  ;;  %v282_v21 = vld [vmem:[#allocation28 + $0x38] sm:$0xff]  ;;  %4163 = vmatpush3.bf16.msra.mxu1 %v4571_v2  ;;  %4187 = vmatpush3.bf16.msra.mxu0 %v4572_v3 }
 0x139   :  { %v304_v22 = vsel %vm266_vm0, %v281_v20, 0.0  ;;  %v307_v23 = vsel %vm266_vm0, %v282_v21, 0.0  ;;  %4172 = vmatprep.subr.bf16.mxu1 %v5604_v4 }
 0x13b   :  { %290 = vadd.xlane.f32.xlu0 %v289_v16  ;;  %296 = vadd.xlane.f32.xlu1 %v295_v17 }
 0x13f   :  { %299 = vadd.xlane.f32.xlu0 %v298_v18  ;;  %302 = vadd.xlane.f32.xlu1 %v301_v19 }
 0x143   :  { %305 = vadd.xlane.f32.xlu0 %v304_v22  ;;  %308 = vadd.xlane.f32.xlu1 %v307_v23 }
 0x1c4   :  { %v288_v24 = vpop.xlane.xlu0 %287  ;;  %v294_v25 = vpop.xlane.xlu1 %293 }
 0x1c5   :  { %v311_v26 = vmul.f32 0.03125, %v288_v24  ;;  %v313_v27 = vmul.f32 0.03125, %v294_v25 }
 0x1c7   :  { %v5564_v28 = vsub.f32 %v275_v8, %v311_v26  ;;  %v5566_v29 = vsub.f32 %v277_v9, %v313_v27 }
 0x1c8   :  { %v291_v30 = vpop.xlane.xlu0 %290  ;;  %v297_v31 = vpop.xlane.xlu1 %296 }
 0x1c9   :  { %v312_v32 = vmul.f32 0.03125, %v291_v30  ;;  %v314_v33 = vmul.f32 0.03125, %v297_v31  ;;  %v327_v34 = vmul.f32 %v5564_v28, %v5564_v28  ;;  %v329_v35 = vmul.f32 %v5566_v29, %v5566_v29  ;;  %v3839_v31 = vld [vmem:[#allocation5] ss:$0 sm:$0xff] }
 0x1cb   :  { %v5572_v36 = vsub.f32 %v276_v10, %v312_v32  ;;  %v5574_v37 = vsub.f32 %v278_v13, %v314_v33  ;;  %v335_v38 = vsel %vm266_vm0, %v327_v34, 0.0  ;;  %v341_v41 = vsel %vm266_vm0, %v329_v35, 0.0 }
 0x1cc   :  { %336 = vadd.xlane.f32.xlu0 %v335_v38  ;;  %v300_v39 = vpop.xlane.xlu0 %299  ;;  %v303_v40 = vpop.xlane.xlu1 %302 }
 0x1cd   :  { %v315_v42 = vmul.f32 0.03125, %v300_v39  ;;  %v316_v43 = vmul.f32 0.03125, %v303_v40  ;;  %v328_v44 = vmul.f32 %v5572_v36, %v5572_v36  ;;  %v330_v45 = vmul.f32 %v5574_v37, %v5574_v37  ;;  %v3840_v40 = vld [vmem:[#allocation7] ss:$0 sm:$0xff] }
 0x1cf   :  { %v5582_v46 = vsub.f32 %v279_v14, %v315_v42  ;;  %v5584_v47 = vsub.f32 %v280_v15, %v316_v43  ;;  %v338_v48 = vsel %vm266_vm0, %v328_v44, 0.0  ;;  %v344_v51 = vsel %vm266_vm0, %v330_v45, 0.0 }
 0x1d0   :  { %342 = vadd.xlane.f32.xlu0 %v341_v41  ;;  %339 = vadd.xlane.f32.xlu1 %v338_v48  ;;  %v306_v49 = vpop.xlane.xlu0 %305  ;;  %v309_v50 = vpop.xlane.xlu1 %308 }
 0x1d1   :  { %v317_v52 = vmul.f32 0.03125, %v306_v49  ;;  %v318_v53 = vmul.f32 0.03125, %v309_v50  ;;  %v331_v54 = vmul.f32 %v5582_v46, %v5582_v46  ;;  %v332_v55 = vmul.f32 %v5584_v47, %v5584_v47 }
 0x1d3   :  { %v5592_v56 = vsub.f32 %v281_v20, %v317_v52  ;;  %v5594_v57 = vsub.f32 %v282_v21, %v318_v53  ;;  %v347_v58 = vsel %vm266_vm0, %v331_v54, 0.0  ;;  %v350_v59 = vsel %vm266_vm0, %v332_v55, 0.0 }
 0x1d4   :  { %345 = vadd.xlane.f32.xlu1 %v344_v51  ;;  %348 = vadd.xlane.f32.xlu0 %v347_v58 }
 0x1d5   :  { %v333_v60 = vmul.f32 %v5592_v56, %v5592_v56  ;;  %v334_v61 = vmul.f32 %v5594_v57, %v5594_v57 }
 0x1d7   :  { %v353_v62 = vsel %vm266_vm0, %v333_v60, 0.0  ;;  %v356_v63 = vsel %vm266_vm0, %v334_v61, 0.0  ;;  %v4574_v60 = vld [vmem:[#allocation10 + $0x8] sm:$0xff]  }
 0x1d8   :  { %351 = vadd.xlane.f32.xlu1 %v350_v59  ;;  %354 = vadd.xlane.f32.xlu0 %v353_v62 }
 0x1dc   :  { %357 = vadd.xlane.f32.xlu1 %v356_v63 }
 0x259   :  { %v337_v5 = vpop.xlane.xlu0 %336 }
 0x25a   :  { %v359_v6 = vmul.f32 0.03125, %v337_v5 }
 0x25c   :  { %v367_v7 = vadd.f32 1e-05, %v359_v6 }
 0x25d   :  { %v340_v8 = vpop.xlane.xlu1 %339  ;;  %v343_v9 = vpop.xlane.xlu0 %342 }
 0x25e   :  { %4607 = vrsqrt.f32 %v367_v7  ;;  %v360_v10 = vmul.f32 0.03125, %v340_v8  ;;  %v361_v11 = vmul.f32 0.03125, %v343_v9 }
 0x260   :  { %v368_v12 = vadd.f32 1e-05, %v360_v10  ;;  %v369_v13 = vadd.f32 1e-05, %v361_v11 }
 0x261   :  { %v346_v14 = vpop.xlane.xlu1 %345  ;;  %v349_v15 = vpop.xlane.xlu0 %348 }
 0x262   :  { %4609 = vrsqrt.f32 %v368_v12  ;;  %v362_v16 = vmul.f32 0.03125, %v346_v14  ;;  %v363_v17 = vmul.f32 0.03125, %v349_v15 }
 0x263   :  { %4611 = vrsqrt.f32 %v369_v13 }
 0x264   :  { %v370_v18 = vadd.f32 1e-05, %v362_v16  ;;  %v371_v19 = vadd.f32 1e-05, %v363_v17 }
 0x265   :  { %v352_v20 = vpop.xlane.xlu1 %351  ;;  %v355_v21 = vpop.xlane.xlu0 %354 }
 0x266   :  { %4613 = vrsqrt.f32 %v370_v18  ;;  %v364_v22 = vmul.f32 0.03125, %v352_v20  ;;  %v365_v23 = vmul.f32 0.03125, %v355_v21 }
 0x267   :  { %4615 = vrsqrt.f32 %v371_v19 }
 0x268   :  { %v4608_v24 = vpop.eup %4607  ;;  %v372_v25 = vadd.f32 1e-05, %v364_v22  ;;  %v373_v26 = vadd.f32 1e-05, %v365_v23 }
 0x269   :  { %v383_v27 = vmul.f32 %v4608_v24, %v5564_v28  ;;  %v358_v30 = vpop.xlane.xlu1 %357 }
 0x26a   :  { %4617 = vrsqrt.f32 %v372_v25  ;;  %v366_v32 = vmul.f32 0.03125, %v358_v30 }
 0x26b   :  { %4619 = vrsqrt.f32 %v373_v26  ;;  %v397_v38 = vmul.f32 %v3839_v31, %v383_v27 }
 0x26c   :  { %v4610_v33 = vpop.eup %4609  ;;  %v374_v34 = vadd.f32 1e-05, %v366_v32 }
 0x26d   :  { %v4612_v35 = vpop.eup %4611  ;;  %v384_v39 = vmul.f32 %v4610_v33, %v5572_v36  ;;  %v411_v45 = vadd.f32 %v3840_v40, %v397_v38 }
 0x26e   :  { %v385_v41 = vmul.f32 %v4612_v35, %v5566_v29  ;;  %4621 = vrsqrt.f32 %v374_v34 }
 0x26f   :  { %v398_v42 = vmul.f32 %v3839_v31, %v384_v39 }
 0x270   :  { %v4614_v43 = vpop.eup %4613  ;;  %v399_v48 = vmul.f32 %v3839_v31, %v385_v41 }
 0x271   :  { %v4616_v44 = vpop.eup %4615  ;;  %v412_v28 = vadd.f32 %v3840_v40, %v398_v42  ;;  %v386_v49 = vmul.f32 %v4614_v43, %v5574_v37 }
 0x272   :  { %v387_v50 = vmul.f32 %v4616_v44, %v5582_v46  ;;  %v413_v55 = vadd.f32 %v3840_v40, %v399_v48  ;;  %v4575_v48 = vld [vmem:[#allocation8 + $0x10] sm:$0xff]  }
 0x273   :  { %v5612_v51 = vpack.c.bf16 %v412_v28, %v411_v45  ;;  %v400_v52 = vmul.f32 %v3839_v31, %v386_v49 }
 0x274   :  { %v4618_v53 = vpop.eup %4617  ;;  %v401_v54 = vmul.f32 %v3839_v31, %v387_v50  ;;  %v4576_v50 = vld [vmem:[#allocation8 + $0x18] sm:$0xff]  }
 0x275   :  { %v4620_v36 = vpop.eup %4619  ;;  %v414_v58 = vadd.f32 %v3840_v40, %v400_v52  ;;  %v388_v29 = vmul.f32 %v4618_v53, %v5584_v47  ;;  %4164 = vmatprep.mubr.msk.bf16.mxu1 %vm266_vm0, %v5612_v51  ;;  %4188 = vmatprep.mubr.msk.bf16.mxu0 %vm266_vm0, %v5612_v51  ;;  %v4577_v52 = vld [vmem:[#allocation11 + $0x10] sm:$0xff]   ;;  %v4578_v53 = vld [vmem:[#allocation11 + $0x18] sm:$0xff]  }
 0x276   :  { %v389_v37 = vmul.f32 %v4620_v36, %v5592_v56  ;;  %v415_v62 = vadd.f32 %v3840_v40, %v401_v54 }
 0x277   :  { %v5620_v59 = vpack.c.bf16 %v414_v58, %v413_v55  ;;  %v402_v46 = vmul.f32 %v3839_v31, %v388_v29 }
 0x278   :  { %v4622_v61 = vpop.eup %4621  ;;  %v403_v0 = vmul.f32 %v3839_v31, %v389_v37 }
 0x279   :  { %v416_v63 = vadd.f32 %v3840_v40, %v402_v46  ;;  %v390_v1 = vmul.f32 %v4622_v61, %v5594_v57  ;;  %4165 = vmatmul.mubr.msk.bf16.vlgmr.msra.gmra.mrb[0].mxu1 %vm266_vm0, %v5620_v59  ;;  %4189 = vmatmul.mubr.msk.bf16.vlgmr.msra.gmra.mrb[0].mxu0 %vm266_vm0, %v5620_v59 }
 0x27a   :  { %4173 = vmatpush3.bf16.msra.mxu1 %v5604_v4  ;;  %v417_v2 = vadd.f32 %v3840_v40, %v403_v0 }
 0x27b   :  { %v5628_v47 = vpack.c.bf16 %v416_v63, %v415_v62  ;;  %v404_v56 = vmul.f32 %v3839_v31, %v390_v1  ;;  %4174 = vmatprep.subr.bf16.mxu1 %v4574_v60 }
 0x27d   :  { %v418_v3 = vadd.f32 %v3840_v40, %v404_v56  ;;  %4168 = vmatprep.mubr.msk.bf16.mxu1 %vm266_vm0, %v5628_v47  ;;  %4192 = vmatprep.mubr.msk.bf16.mxu0 %vm266_vm0, %v5628_v47 }
 0x27e   :  { %4175 = vmatpush3.bf16.msra.mxu1 %v4574_v60 }
 0x27f   :  { %v5634_v57 = vpack.c.bf16 %v418_v3, %v417_v2 }
 0x281   :  { %4169 = vmatmul.mubr.msk.bf16.gmra.mrb[4].mxu1 %vm266_vm0, %v5634_v57  ;;  %4193 = vmatmul.mubr.msk.bf16.gmra.mrb[4].mxu0 %vm266_vm0, %v5634_v57 }
 0x282   :  { %4176 = vmatprep.mubr.msk.bf16.mxu1 %vm266_vm0, %v5612_v51 }
 0x289   :  { %4177 = vmatmul.mubr.msk.bf16.vlgmr.msra.gmra.mrb[8].mxu1 %vm266_vm0, %v5620_v59 }
 0x28a   :  { %4180 = vmatprep.mubr.msk.bf16.mxu1 %vm266_vm0, %v5628_v47 }
 0x291   :  { %4181 = vmatmul.mubr.msk.bf16.gmra.mrb[12].mxu1 %vm266_vm0, %v5634_v57 }
 0x34c   :  { %v4166_v4 = vpop.f32.mrb[0].mxu1  ;;  %v4190_v5 = vpop.f32.mrb[0].mxu0 }
 0x34d   :  { %v485_v6 = vpop.f32.mrb[1].mxu1  ;;  %v647_v7 = vpop.f32.mrb[1].mxu0 }
 0x34e   :  { %v4167_v8 = vpop.f32.mrb[2].mxu1  ;;  %v4191_v9 = vpop.f32.mrb[2].mxu0 }
 0x34f   :  { %v679_v10 = vpack.c.bf16 %v4167_v8, %v4166_v4  ;;  %v687_v11 = vpack.c.bf16 %v4191_v9, %v4190_v5  ;;  %v488_v12 = vpop.f32.mrb[3].mxu1  ;;  %v650_v13 = vpop.f32.mrb[3].mxu0 }
 0x350   :  { %v678_v14 = vpack.c.bf16 %v488_v12, %v485_v6  ;;  %v686_v15 = vpack.c.bf16 %v650_v13, %v647_v7 }
 0x352   :  { %4200 = vmatprep.mubr.msk.bf16.mxu1 %vm690_vm1, %v678_v14 }
 0x354   :  { %v4170_v16 = vpop.f32.mrb[4].mxu1  ;;  %v4194_v17 = vpop.f32.mrb[4].mxu0 }
 0x355   :  { %v501_v18 = vpop.f32.mrb[5].mxu1  ;;  %v663_v19 = vpop.f32.mrb[5].mxu0 }
 0x356   :  { %v4171_v20 = vpop.f32.mrb[6].mxu1  ;;  %v4195_v21 = vpop.f32.mrb[6].mxu0 }
 0x357   :  { %v681_v22 = vpack.c.bf16 %v4171_v20, %v4170_v16  ;;  %v5649_v23 = vpack.c.bf16 %v4195_v21, %v4194_v17  ;;  %v504_v24 = vpop.f32.mrb[7].mxu1  ;;  %v666_v25 = vpop.f32.mrb[7].mxu0 }
 0x358   :  { %v680_v26 = vpack.c.bf16 %v504_v24, %v501_v18  ;;  %v5651_v27 = vpack.c.bf16 %v666_v25, %v663_v19 }
 0x35a   :  { %4208 = vmatprep.mubr.msk.bf16.mxu0 %vm690_vm1, %v680_v26 }
 0x35c   :  { %v4178_v30 = vpop.f32.mrb[8].mxu1 }
 0x35d   :  { %v566_v31 = vpop.f32.mrb[9].mxu1 }
 0x35e   :  { %v4179_v32 = vpop.f32.mrb[10].mxu1 }
 0x35f   :  { %v683_v33 = vpack.c.bf16 %v4179_v32, %v4178_v30  ;;  %v569_v34 = vpop.f32.mrb[11].mxu1 }
 0x360   :  { %v682_v35 = vpack.c.bf16 %v569_v34, %v566_v31 }
 0x361   :  { %v701_v45 = vsel %vm690_vm1, %v683_v33, 0 }
 0x362   :  { %v698_v38 = vsel %vm690_vm1, %v682_v35, 0  ;;  %4532 = vmatprep.subr.msk.bf16.mxu1 %vm690_vm1, %v682_v35 }
 0x363   :  { %4197 = vmatpush3.bf16.xpose.msra.mxu1 %v698_v38 }
 0x364   :  { %v4182_v39 = vpop.f32.mrb[12].mxu1  ;;  %4533 = vmatprep.subr.msk.bf16.mxu1 %vm690_vm1, %v683_v33 }
 0x365   :  { %v582_v40 = vpop.f32.mrb[13].mxu1 }
 0x366   :  { %v4183_v41 = vpop.f32.mrb[14].mxu1 }
 0x367   :  { %v685_v42 = vpack.c.bf16 %v4183_v41, %v4182_v39  ;;  %v585_v43 = vpop.f32.mrb[15].mxu1 }
 0x368   :  { %v684_v44 = vpack.c.bf16 %v585_v43, %v582_v40 }
 0x369   :  { %v762_v49 = vsel %vm690_vm1, %v685_v42, 0 }
 0x36a   :  { %v759_v28 = vsel %vm690_vm1, %v684_v44, 0  ;;  %4534 = vmatprep.subr.msk.bf16.mxu0 %vm690_vm1, %v684_v44 }
 0x36b   :  { %4199 = vmatpush3.bf16.xpose.msra.mxu1 %v701_v45  ;;  %4205 = vmatpush3.bf16.xpose.msra.mxu0 %v759_v28 }
 0x36c   :  { %4535 = vmatprep.subr.msk.bf16.mxu0 %vm690_vm1, %v685_v42  ;;  %4212 = vmatprep.subr.bf16.mxu1 %v686_v15 }
 0x372   :  { %4201 = vmatmul.mubr.msk.bf16.vlgmr.msra.gmra.mrb[16].mxu1 %vm690_vm1, %v679_v10 }
 0x373   :  { %4207 = vmatpush3.bf16.xpose.msra.mxu0 %v762_v49  ;;  %4213 = vmatpush3.bf16.msra.mxu1 %v686_v15 }
 0x374   :  { %4214 = vmatprep.subr.bf16.mxu1 %v687_v11  ;;  %4228 = vmatprep.subr.bf16.mxu0 %v4575_v48 }
 0x377   :  { %4215 = vmatpush3.bf16.msra.mxu1 %v687_v11 }
 0x378   :  { %4220 = vmatprep.subr.bf16.mxu1 %v5651_v27 }
 0x37a   :  { %4209 = vmatmul.mubr.msk.bf16.vlgmr.msra.gmra.mrb[8].mxu0 %vm690_vm1, %v681_v22 }
 0x37b   :  { %4229 = vmatpush3.bf16.msra.mxu0 %v4575_v48  ;;  %4232 = vmatprep.mubr.msk.bf16.mxu0 %vm266_vm0, %v5612_v51 }
 0x37c   :  { %4230 = vmatprep.subr.bf16.mxu0 %v4576_v50 }
 0x37f   :  { %4231 = vmatpush3.bf16.msra.mxu0 %v4576_v50 }
 0x380   :  { %4252 = vmatprep.subr.bf16.mxu0 %v4577_v52 }
 0x382   :  { %4233 = vmatmul.mubr.msk.bf16.vlgmr.msra.gmra.mrb[12].mxu0 %vm266_vm0, %v5620_v59 }
 0x383   :  { %4236 = vmatprep.mubr.msk.bf16.mxu0 %vm266_vm0, %v5628_v47  ;;  %4253 = vmatpush3.bf16.msra.mxu0 %v4577_v52 }
 0x384   :  { %4254 = vmatprep.subr.bf16.mxu0 %v4578_v53 }
 0x387   :  { %4255 = vmatpush3.bf16.msra.mxu0 %v4578_v53 }
 0x38a   :  { %4237 = vmatmul.mubr.msk.bf16.gmra.mrb[16].mxu0 %vm266_vm0, %v5634_v57 }
 0x38b   :  { %4256 = vmatprep.mubr.msk.bf16.mxu0 %vm266_vm0, %v5612_v51 }
 0x392   :  { %4257 = vmatmul.mubr.msk.bf16.vlgmr.msra.gmra.mrb[20].mxu0 %vm266_vm0, %v5620_v59 }
 0x393   :  { %4260 = vmatprep.mubr.msk.bf16.mxu0 %vm266_vm0, %v5628_v47 }
 0x39a   :  { %4261 = vmatmul.mubr.msk.bf16.gmra.mrb[24].mxu0 %vm266_vm0, %v5634_v57 }
 0x445   :  { %v4202_v54 = vpop.f32.mrb[16].mxu1 }
 0x446   :  { %v737_v36 = vpop.f32.mrb[17].mxu1  ;;  %v5681_v37 = vmul.f32 0.25, %v4202_v54 }
 0x447   :  { %v813_v55 = vmul.f32 0.25, %v737_v36  ;;  %v4203_v58 = vpop.f32.mrb[18].mxu1 }
 0x448   :  { %v740_v29 = vpop.f32.mrb[19].mxu1  ;;  %v5684_v61 = vmul.f32 0.25, %v4203_v58  ;;  %v827_v0 = vsel %vm266_vm0, %v5681_v37, -inf }
 0x449   :  { %v814_v46 = vmul.f32 0.25, %v740_v29  ;;  %v821_v60 = vsel %vm266_vm0, %v813_v55, -inf }
 0x44a   :  { %822 = vmax.xlane.f32.xlu0 %v821_v60  ;;  %v830_v3 = vsel %vm266_vm0, %v5684_v61, -inf }
 0x44b   :  { %v824_v62 = vsel %vm266_vm0, %v814_v46, -inf }
 0x44c   :  { %825 = vmax.xlane.f32.xlu1 %v824_v62 }
 0x44d   :  { %v4210_v63 = vpop.f32.mrb[8].mxu0 }
 0x44e   :  { %828 = vmax.xlane.f32.xlu0 %v827_v0  ;;  %v798_v1 = vpop.f32.mrb[9].mxu0  ;;  %v5691_v5 = vmul.f32 0.25, %v4210_v63 }
 0x44f   :  { %v817_v56 = vmul.f32 0.25, %v798_v1  ;;  %v4211_v2 = vpop.f32.mrb[10].mxu0 }
 0x450   :  { %831 = vmax.xlane.f32.xlu1 %v830_v3  ;;  %v801_v4 = vpop.f32.mrb[11].mxu0  ;;  %v5694_v8 = vmul.f32 0.25, %v4211_v2  ;;  %v839_v11 = vsel %vm266_vm0, %v5691_v5, -inf }
 0x451   :  { %v818_v6 = vmul.f32 0.25, %v801_v4  ;;  %v833_v7 = vsel %vm266_vm0, %v817_v56, -inf }
 0x452   :  { %834 = vmax.xlane.f32.xlu0 %v833_v7  ;;  %v842_v14 = vsel %vm266_vm0, %v5694_v8, -inf }
 0x453   :  { %v836_v9 = vsel %vm266_vm0, %v818_v6, -inf }
 0x454   :  { %837 = vmax.xlane.f32.xlu1 %v836_v9 }
 0x455   :  { %v5697_v10 = vpop.f32.mrb[12].mxu0 }
 0x456   :  { %840 = vmax.xlane.f32.xlu0 %v839_v11  ;;  %v5701_v12 = vpop.f32.mrb[13].mxu0 }
 0x457   :  { %v5703_v13 = vpop.f32.mrb[14].mxu0 }
 0x458   :  { %v1276_v15 = vpack.c.bf16 %v5703_v13, %v5697_v10  ;;  %v5709_v16 = vpop.f32.mrb[15].mxu0  ;;  %843 = vmax.xlane.f32.xlu1 %v842_v14 }
 0x459   :  { %v1275_v17 = vpack.c.bf16 %v5709_v16, %v5701_v12 }
 0x45d   :  { %v5713_v18 = vpop.f32.mrb[16].mxu0 }
 0x45e   :  { %v1096_v19 = vpop.f32.mrb[17].mxu0 }
 0x45f   :  { %v5715_v20 = vpop.f32.mrb[18].mxu0 }
 0x460   :  { %v1278_v21 = vpack.c.bf16 %v5715_v20, %v5713_v18  ;;  %v1099_v22 = vpop.f32.mrb[19].mxu0 }
 0x461   :  { %v1277_v24 = vpack.c.bf16 %v1099_v22, %v1096_v19 }
 0x463   :  { %4276 = vmatprep.mubr.msk.bf16.mxu0 %vm690_vm1, %v1277_v24 }
 0x465   :  { %v4258_v25 = vpop.f32.mrb[20].mxu0 }
 0x466   :  { %v1244_v26 = vpop.f32.mrb[21].mxu0 }
 0x467   :  { %v4259_v30 = vpop.f32.mrb[22].mxu0 }
 0x468   :  { %v5720_v31 = vpack.c.bf16 %v4259_v30, %v4258_v25  ;;  %v1247_v32 = vpop.f32.mrb[23].mxu0 }
 0x469   :  { %v5722_v33 = vpack.c.bf16 %v1247_v32, %v1244_v26 }
 0x46d   :  { %v4262_v34 = vpop.f32.mrb[24].mxu0 }
 0x46e   :  { %v1260_v35 = vpop.f32.mrb[25].mxu0 }
 0x46f   :  { %v4263_v38 = vpop.f32.mrb[26].mxu0 }
 0x470   :  { %v5724_v39 = vpack.c.bf16 %v4263_v38, %v4262_v34  ;;  %v1263_v40 = vpop.f32.mrb[27].mxu0 }
 0x471   :  { %v5726_v41 = vpack.c.bf16 %v1263_v40, %v1260_v35 }
 0x4d7   :  { %v823_v42 = vpop.xlane.xlu0 %822 }
 0x4d8   :  { %v845_v43 = vsub.f32 %v813_v55, %v823_v42 }
 0x4d9   :  { %v826_v44 = vpop.xlane.xlu1 %825 }
 0x4da   :  { %v853_v45 = vmul.f32 1.442695, %v845_v43  ;;  %v846_v28 = vsub.f32 %v814_v46, %v826_v44 }
 0x4db   :  { %v829_v48 = vpop.xlane.xlu0 %828 }
 0x4dc   :  { %4623 = vpow2.f32 %v853_v45  ;;  %v855_v49 = vmul.f32 1.442695, %v846_v28  ;;  %v847_v50 = vsub.f32 %v5681_v37, %v829_v48 }
 0x4dd   :  { %v832_v52 = vpop.xlane.xlu1 %831 }
 0x4de   :  { %4625 = vpow2.f32 %v855_v49  ;;  %v857_v53 = vmul.f32 1.442695, %v847_v50  ;;  %v848_v54 = vsub.f32 %v5684_v61, %v832_v52 }
 0x4df   :  { %v835_v36 = vpop.xlane.xlu0 %834 }
 0x4e0   :  { %4627 = vpow2.f32 %v857_v53  ;;  %v859_v58 = vmul.f32 1.442695, %v848_v54  ;;  %v849_v29 = vsub.f32 %v817_v56, %v835_v36 }
 0x4e1   :  { %v838_v60 = vpop.xlane.xlu1 %837 }
 0x4e2   :  { %4629 = vpow2.f32 %v859_v58  ;;  %v861_v55 = vmul.f32 1.442695, %v849_v29  ;;  %v850_v62 = vsub.f32 %v818_v6, %v838_v60 }
 0x4e3   :  { %v841_v63 = vpop.xlane.xlu0 %840 }
 0x4e4   :  { %4631 = vpow2.f32 %v861_v55  ;;  %v863_v46 = vmul.f32 1.442695, %v850_v62  ;;  %v851_v0 = vsub.f32 %v5691_v5, %v841_v63 }
 0x4e5   :  { %v844_v1 = vpop.xlane.xlu1 %843 }
 0x4e6   :  { %v4624_v37 = vpop.eup %4623  ;;  %4633 = vpow2.f32 %v863_v46  ;;  %v865_v2 = vmul.f32 1.442695, %v851_v0  ;;  %v852_v3 = vsub.f32 %v5694_v8, %v844_v1  ;;  %v4579_v0 = vld [vmem:[#allocation10 + $0x10] sm:$0xff]  }
 0x4e7   :  { %v869_v61 = vsel %vm266_vm0, %v4624_v37, 0.0 }
 0x4e8   :  { %v4626_v4 = vpop.eup %4625  ;;  %4635 = vpow2.f32 %v865_v2  ;;  %v867_v56 = vmul.f32 1.442695, %v852_v3  ;;  %870 = vadd.xlane.f32.xlu0 %v869_v61  ;;  %v4580_v61 = vld [vmem:[#allocation10 + $0x18] sm:$0xff]  }
 0x4e9   :  { %v872_v7 = vsel %vm266_vm0, %v4626_v4, 0.0 }
 0x4ea   :  { %v4628_v6 = vpop.eup %4627  ;;  %4637 = vpow2.f32 %v867_v56  ;;  %873 = vadd.xlane.f32.xlu1 %v872_v7 }
 0x4eb   :  { %v875_v9 = vsel %vm266_vm0, %v4628_v6, 0.0 }
 0x4ec   :  { %v4630_v5 = vpop.eup %4629  ;;  %876 = vadd.xlane.f32.xlu0 %v875_v9 }
 0x4ed   :  { %v878_v11 = vsel %vm266_vm0, %v4630_v5, 0.0 }
 0x4ee   :  { %v4632_v14 = vpop.eup %4631  ;;  %879 = vadd.xlane.f32.xlu1 %v878_v11 }
 0x4ef   :  { %v881_v8 = vsel %vm266_vm0, %v4632_v14, 0.0 }
 0x4f0   :  { %v4634_v19 = vpop.eup %4633  ;;  %882 = vadd.xlane.f32.xlu0 %v881_v8 }
 0x4f1   :  { %v884_v22 = vsel %vm266_vm0, %v4634_v19, 0.0 }
 0x4f2   :  { %v4636_v24 = vpop.eup %4635  ;;  %885 = vadd.xlane.f32.xlu1 %v884_v22 }
 0x4f3   :  { %v887_v25 = vsel %vm266_vm0, %v4636_v24, 0.0 }
 0x4f4   :  { %v4638_v26 = vpop.eup %4637  ;;  %888 = vadd.xlane.f32.xlu0 %v887_v25 }
 0x4f5   :  { %v890_v30 = vsel %vm266_vm0, %v4638_v26, 0.0 }
 0x4f6   :  { %891 = vadd.xlane.f32.xlu1 %v890_v30 }
 0x575   :  { %v871_v32 = vpop.xlane.xlu0 %870 }
 0x576   :  { %4639 = vrcp.f32 %v871_v32 }
 0x577   :  { %v874_v34 = vpop.xlane.xlu1 %873 }
 0x578   :  { %4641 = vrcp.f32 %v874_v34 }
 0x579   :  { %v877_v35 = vpop.xlane.xlu0 %876 }
 0x57a   :  { %4643 = vrcp.f32 %v877_v35 }
 0x57b   :  { %v880_v38 = vpop.xlane.xlu1 %879 }
 0x57c   :  { %4645 = vrcp.f32 %v880_v38 }
 0x57d   :  { %v883_v40 = vpop.xlane.xlu0 %882 }
 0x57e   :  { %4647 = vrcp.f32 %v883_v40 }
 0x57f   :  { %v886_v42 = vpop.xlane.xlu1 %885 }
 0x580   :  { %v4640_v43 = vpop.eup %4639  ;;  %4649 = vrcp.f32 %v886_v42 }
 0x581   :  { %v889_v44 = vpop.xlane.xlu0 %888  ;;  %v901_v48 = vmul.f32 %v4640_v43, %v4624_v37 }
 0x582   :  { %v4642_v45 = vpop.eup %4641  ;;  %4651 = vrcp.f32 %v889_v44 }
 0x583   :  { %v892_v28 = vpop.xlane.xlu1 %891  ;;  %v902_v49 = vmul.f32 %v4642_v45, %v4626_v4 }
 0x584   :  { %v4644_v50 = vpop.eup %4643  ;;  %4653 = vrcp.f32 %v892_v28 }
 0x585   :  { %v909_v52 = vpack.c.bf16 %v902_v49, %v901_v48  ;;  %v903_v54 = vmul.f32 %v4644_v50, %v4628_v6 }
 0x586   :  { %v4646_v53 = vpop.eup %4645 }
 0x587   :  { %v904_v36 = vmul.f32 %v4646_v53, %v4630_v5  ;;  %4216 = vmatprep.mubr.msk.bf16.mxu1 %vm266_vm0, %v909_v52 }
 0x588   :  { %v4648_v58 = vpop.eup %4647 }
 0x589   :  { %v910_v29 = vpack.c.bf16 %v904_v36, %v903_v54  ;;  %v905_v55 = vmul.f32 %v4648_v58, %v4632_v14 }
 0x58a   :  { %v4650_v60 = vpop.eup %4649 }
 0x58b   :  { %4217 = vmatmul.mubr.msk.bf16.vlgmr.msra.gmra.mrb[20].mxu1 %vm266_vm0, %v910_v29  ;;  %v906_v62 = vmul.f32 %v4650_v60, %v4634_v19 }
 0x58c   :  { %v4652_v63 = vpop.eup %4651  ;;  %4221 = vmatpush3.bf16.msra.mxu1 %v5651_v27 }
 0x58d   :  { %4222 = vmatprep.subr.bf16.mxu1 %v5649_v23  ;;  %v911_v46 = vpack.c.bf16 %v906_v62, %v905_v55  ;;  %v907_v37 = vmul.f32 %v4652_v63, %v4636_v24 }
 0x58e   :  { %v4654_v1 = vpop.eup %4653 }
 0x58f   :  { %v908_v2 = vmul.f32 %v4654_v1, %v4638_v26  ;;  %4224 = vmatprep.mubr.msk.bf16.mxu1 %vm266_vm0, %v911_v46 }
 0x590   :  { %4223 = vmatpush3.bf16.msra.mxu1 %v5649_v23 }
 0x591   :  { %v912_v3 = vpack.c.bf16 %v908_v2, %v907_v37  ;;  %4240 = vmatprep.subr.bf16.mxu1 %v4579_v0 }
 0x593   :  { %4225 = vmatmul.mubr.msk.bf16.vlgmr.msra.gmra.mrb[24].mxu1 %vm266_vm0, %v912_v3 }
 0x594   :  { %4241 = vmatpush3.bf16.msra.mxu1 %v4579_v0  ;;  %4244 = vmatprep.mubr.msk.bf16.mxu1 %vm266_vm0, %v5612_v51 }
 0x595   :  { %4242 = vmatprep.subr.bf16.mxu1 %v4580_v61 }
 0x598   :  { %4243 = vmatpush3.bf16.msra.mxu1 %v4580_v61 }
 0x59b   :  { %4245 = vmatmul.mubr.msk.bf16.vlgmr.msra.gmra.mrb[28].mxu1 %vm266_vm0, %v5620_v59 }
 0x59c   :  { %4248 = vmatprep.mubr.msk.bf16.mxu1 %vm266_vm0, %v5628_v47 }
 0x5a3   :  { %4249 = vmatmul.mubr.msk.bf16.gmra.mrb[32].mxu1 %vm266_vm0, %v5634_v57 }
 0x5a4   :  { %4268 = vmatprep.mubr.msk.bf16.mxu1 %vm690_vm1, %v1275_v17 }
 0x65e   :  { %v5759_v23 = vpop.f32.mrb[20].mxu1 }
 0x65f   :  { %v5761_v27 = vpop.f32.mrb[21].mxu1 }
 0x660   :  { %v5763_v4 = vpop.f32.mrb[22].mxu1 }
 0x661   :  { %v1024_v56 = vpack.c.bf16 %v5763_v4, %v5759_v23  ;;  %v5767_v7 = vpop.f32.mrb[23].mxu1 }
 0x662   :  { %v1023_v6 = vpack.c.bf16 %v5767_v7, %v5761_v27 }
 0x666   :  { %v5771_v9 = vpop.f32.mrb[24].mxu1 }
 0x667   :  { %v5773_v5 = vpop.f32.mrb[25].mxu1 }
 0x668   :  { %v5775_v12 = vpop.f32.mrb[26].mxu1 }
 0x669   :  { %v1026_v16 = vpack.c.bf16 %v5775_v12, %v5771_v9  ;;  %v5779_v17 = vpop.f32.mrb[27].mxu1 }
 0x66a   :  { %v1025_v11 = vpack.c.bf16 %v5779_v17, %v5773_v5 }
 0x66e   :  { %v4246_v14 = vpop.f32.mrb[28].mxu1 }
 0x66f   :  { %v1162_v8 = vpop.f32.mrb[29].mxu1 }
 0x670   :  { %v4247_v19 = vpop.f32.mrb[30].mxu1 }
 0x671   :  { %v1280_v22 = vpack.c.bf16 %v4247_v19, %v4246_v14  ;;  %v1165_v24 = vpop.f32.mrb[31].mxu1 }
 0x672   :  { %v1279_v25 = vpack.c.bf16 %v1165_v24, %v1162_v8 }
 0x673   :  { %v1297_v42 = vsel %vm690_vm1, %v1280_v22, 0 }
 0x674   :  { %v1294_v26 = vsel %vm690_vm1, %v1279_v25, 0  ;;  %4536 = vmatprep.subr.msk.bf16.mxu1 %vm690_vm1, %v1279_v25 }
 0x675   :  { %4265 = vmatpush3.bf16.xpose.msra.mxu1 %v1294_v26 }
 0x676   :  { %v4250_v30 = vpop.f32.mrb[32].mxu1  ;;  %4537 = vmatprep.subr.msk.bf16.mxu1 %vm690_vm1, %v1280_v22 }
 0x677   :  { %v1178_v32 = vpop.f32.mrb[33].mxu1 }
 0x678   :  { %v4251_v34 = vpop.f32.mrb[34].mxu1 }
 0x679   :  { %v1282_v35 = vpack.c.bf16 %v4251_v34, %v4250_v30  ;;  %v1181_v38 = vpop.f32.mrb[35].mxu1 }
 0x67a   :  { %v1281_v40 = vpack.c.bf16 %v1181_v38, %v1178_v32 }
 0x67b   :  { %v1358_v44 = vsel %vm690_vm1, %v1282_v35, 0 }
 0x67c   :  { %v1355_v43 = vsel %vm690_vm1, %v1281_v40, 0  ;;  %4538 = vmatprep.subr.msk.bf16.mxu0 %vm690_vm1, %v1281_v40 }
 0x67d   :  { %4267 = vmatpush3.bf16.xpose.msra.mxu1 %v1297_v42  ;;  %4273 = vmatpush3.bf16.xpose.msra.mxu0 %v1355_v43 }
 0x67e   :  { %4539 = vmatprep.subr.msk.bf16.mxu0 %vm690_vm1, %v1282_v35  ;;  %4280 = vmatprep.subr.bf16.mxu1 %v5722_v33 }
 0x684   :  { %4269 = vmatmul.mubr.msk.bf16.vlgmr.msra.gmra.mrb[36].mxu1 %vm690_vm1, %v1276_v15 }
 0x685   :  { %4275 = vmatpush3.bf16.xpose.msra.mxu0 %v1358_v44  ;;  %4281 = vmatpush3.bf16.msra.mxu1 %v5722_v33 }
 0x686   :  { %4282 = vmatprep.subr.bf16.mxu1 %v5720_v31 }
 0x689   :  { %4283 = vmatpush3.bf16.msra.mxu1 %v5720_v31 }
 0x68a   :  { %4288 = vmatprep.subr.bf16.mxu1 %v5726_v41 }
 0x68c   :  { %4277 = vmatmul.mubr.msk.bf16.vlgmr.msra.gmra.mrb[28].mxu0 %vm690_vm1, %v1278_v21 }
 0x757   :  { %v4270_v45 = vpop.f32.mrb[36].mxu1 }
 0x758   :  { %v1333_v28 = vpop.f32.mrb[37].mxu1  ;;  %v1411_v15 = vmul.f32 0.25, %v4270_v45 }
 0x759   :  { %v1409_v48 = vmul.f32 0.25, %v1333_v28  ;;  %v4271_v10 = vpop.f32.mrb[38].mxu1 }
 0x75a   :  { %v1336_v13 = vpop.f32.mrb[39].mxu1  ;;  %v1412_v50 = vmul.f32 0.25, %v4271_v10  ;;  %v1423_v53 = vsel %vm266_vm0, %v1411_v15, -inf }
 0x75b   :  { %v1410_v49 = vmul.f32 0.25, %v1336_v13  ;;  %v1417_v33 = vsel %vm266_vm0, %v1409_v48, -inf }
 0x75c   :  { %1418 = vmax.xlane.f32.xlu0 %v1417_v33  ;;  %v1426_v54 = vsel %vm266_vm0, %v1412_v50, -inf }
 0x75d   :  { %v1420_v31 = vsel %vm266_vm0, %v1410_v49, -inf }
 0x75e   :  { %1421 = vmax.xlane.f32.xlu1 %v1420_v31 }
 0x75f   :  { %v4278_v52 = vpop.f32.mrb[28].mxu0 }
 0x760   :  { %1424 = vmax.xlane.f32.xlu0 %v1423_v53  ;;  %v1394_v18 = vpop.f32.mrb[29].mxu0  ;;  %v1415_v58 = vmul.f32 0.25, %v4278_v52 }
 0x761   :  { %v1413_v20 = vmul.f32 0.25, %v1394_v18  ;;  %v4279_v21 = vpop.f32.mrb[30].mxu0 }
 0x762   :  { %1427 = vmax.xlane.f32.xlu1 %v1426_v54  ;;  %v1397_v36 = vpop.f32.mrb[31].mxu0  ;;  %v1416_v55 = vmul.f32 0.25, %v4279_v21  ;;  %v1435_v63 = vsel %vm266_vm0, %v1415_v58, -inf }
 0x763   :  { %v1414_v29 = vmul.f32 0.25, %v1397_v36  ;;  %v1429_v60 = vsel %vm266_vm0, %v1413_v20, -inf }
 0x764   :  { %1430 = vmax.xlane.f32.xlu0 %v1429_v60  ;;  %v1438_v46 = vsel %vm266_vm0, %v1416_v55, -inf }
 0x765   :  { %v1432_v62 = vsel %vm266_vm0, %v1414_v29, -inf }
 0x766   :  { %1433 = vmax.xlane.f32.xlu1 %v1432_v62 }
 0x768   :  { %1436 = vmax.xlane.f32.xlu0 %v1435_v63 }
 0x76a   :  { %1439 = vmax.xlane.f32.xlu1 %v1438_v46 }
 0x7e9   :  { %v1419_v0 = vpop.xlane.xlu0 %1418 }
 0x7ea   :  { %v1441_v1 = vsub.f32 %v1409_v48, %v1419_v0 }
 0x7eb   :  { %v1422_v37 = vpop.xlane.xlu1 %1421 }
 0x7ec   :  { %v1449_v2 = vmul.f32 1.442695, %v1441_v1  ;;  %v1442_v3 = vsub.f32 %v1410_v49, %v1422_v37 }
 0x7ed   :  { %v1425_v61 = vpop.xlane.xlu0 %1424 }
 0x7ee   :  { %4655 = vpow2.f32 %v1449_v2  ;;  %v1451_v14 = vmul.f32 1.442695, %v1442_v3  ;;  %v1443_v8 = vsub.f32 %v1411_v15, %v1425_v61 }
 0x7ef   :  { %v1428_v19 = vpop.xlane.xlu1 %1427 }
 0x7f0   :  { %4657 = vpow2.f32 %v1451_v14  ;;  %v1453_v22 = vmul.f32 1.442695, %v1443_v8  ;;  %v1444_v24 = vsub.f32 %v1412_v50, %v1428_v19 }
 0x7f1   :  { %v1431_v25 = vpop.xlane.xlu0 %1430 }
 0x7f2   :  { %4659 = vpow2.f32 %v1453_v22  ;;  %v1455_v26 = vmul.f32 1.442695, %v1444_v24  ;;  %v1445_v30 = vsub.f32 %v1413_v20, %v1431_v25 }
 0x7f3   :  { %v1434_v32 = vpop.xlane.xlu1 %1433 }
 0x7f4   :  { %4661 = vpow2.f32 %v1455_v26  ;;  %v1457_v34 = vmul.f32 1.442695, %v1445_v30  ;;  %v1446_v35 = vsub.f32 %v1414_v29, %v1434_v32 }
 0x7f5   :  { %v1437_v38 = vpop.xlane.xlu0 %1436 }
 0x7f6   :  { %4663 = vpow2.f32 %v1457_v34  ;;  %v1459_v40 = vmul.f32 1.442695, %v1446_v35  ;;  %v1447_v42 = vsub.f32 %v1415_v58, %v1437_v38 }
 0x7f7   :  { %v1440_v43 = vpop.xlane.xlu1 %1439 }
 0x7f8   :  { %v4656_v44 = vpop.eup %4655  ;;  %4665 = vpow2.f32 %v1459_v40  ;;  %v1461_v45 = vmul.f32 1.442695, %v1447_v42  ;;  %v1448_v28 = vsub.f32 %v1416_v55, %v1440_v43  ;;  %v4581_v40 = vld [vmem:[#allocation8 + $0x20] sm:$0xff]  }
 0x7f9   :  { %v1465_v48 = vsel %vm266_vm0, %v4656_v44, 0.0 }
 0x7fa   :  { %v4658_v10 = vpop.eup %4657  ;;  %4667 = vpow2.f32 %v1461_v45  ;;  %v1463_v13 = vmul.f32 1.442695, %v1448_v28  ;;  %1466 = vadd.xlane.f32.xlu0 %v1465_v48  ;;  %v4582_v28 = vld [vmem:[#allocation8 + $0x28] sm:$0xff]  }
 0x7fb   :  { %v1468_v15 = vsel %vm266_vm0, %v4658_v10, 0.0  ;;  %v4584_v48 = vld [vmem:[#allocation10 + $0x28] sm:$0xff]  }
 0x7fc   :  { %v4660_v49 = vpop.eup %4659  ;;  %4669 = vpow2.f32 %v1463_v13  ;;  %1469 = vadd.xlane.f32.xlu1 %v1468_v15 }
 0x7fd   :  { %v1471_v33 = vsel %vm266_vm0, %v4660_v49, 0.0 }
 0x7fe   :  { %v4662_v50 = vpop.eup %4661  ;;  %1472 = vadd.xlane.f32.xlu0 %v1471_v33 }
 0x7ff   :  { %v1474_v31 = vsel %vm266_vm0, %v4662_v50, 0.0 }
 0x800   :  { %v4664_v52 = vpop.eup %4663  ;;  %1475 = vadd.xlane.f32.xlu1 %v1474_v31 }
 0x801   :  { %v1477_v53 = vsel %vm266_vm0, %v4664_v52, 0.0 }
 0x802   :  { %v4666_v18 = vpop.eup %4665  ;;  %1478 = vadd.xlane.f32.xlu0 %v1477_v53 }
 0x803   :  { %v1480_v20 = vsel %vm266_vm0, %v4666_v18, 0.0 }
 0x804   :  { %v4668_v21 = vpop.eup %4667  ;;  %1481 = vadd.xlane.f32.xlu1 %v1480_v20 }
 0x805   :  { %v1483_v54 = vsel %vm266_vm0, %v4668_v21, 0.0 }
 0x806   :  { %v4670_v36 = vpop.eup %4669  ;;  %1484 = vadd.xlane.f32.xlu0 %v1483_v54 }
 0x807   :  { %v1486_v58 = vsel %vm266_vm0, %v4670_v36, 0.0 }
 0x808   :  { %1487 = vadd.xlane.f32.xlu1 %v1486_v58 }
 0x887   :  { %v1467_v29 = vpop.xlane.xlu0 %1466 }
 0x888   :  { %4671 = vrcp.f32 %v1467_v29 }
 0x889   :  { %v1470_v60 = vpop.xlane.xlu1 %1469 }
 0x88a   :  { %4673 = vrcp.f32 %v1470_v60 }
 0x88b   :  { %v1473_v55 = vpop.xlane.xlu0 %1472 }
 0x88c   :  { %4675 = vrcp.f32 %v1473_v55 }
 0x88d   :  { %v1476_v62 = vpop.xlane.xlu1 %1475 }
 0x88e   :  { %4677 = vrcp.f32 %v1476_v62 }
 0x88f   :  { %v1479_v63 = vpop.xlane.xlu0 %1478 }
 0x890   :  { %4679 = vrcp.f32 %v1479_v63 }
 0x891   :  { %v1482_v46 = vpop.xlane.xlu1 %1481 }
 0x892   :  { %v4672_v0 = vpop.eup %4671  ;;  %4681 = vrcp.f32 %v1482_v46  ;;  %v4588_v46 = vld [vmem:[#allocation11 + $0x28] sm:$0xff]  }
 0x893   :  { %v1485_v1 = vpop.xlane.xlu0 %1484  ;;  %v1497_v3 = vmul.f32 %v4672_v0, %v4656_v44 }
 0x894   :  { %v4674_v37 = vpop.eup %4673  ;;  %4683 = vrcp.f32 %v1485_v1 }
 0x895   :  { %v1488_v2 = vpop.xlane.xlu1 %1487  ;;  %v1498_v61 = vmul.f32 %v4674_v37, %v4658_v10  ;;  %v4586_v10 = vld [vmem:[#allocation13] sm:$0xff]  }
 0x896   :  { %v4676_v14 = vpop.eup %4675  ;;  %4685 = vrcp.f32 %v1488_v2 }
 0x897   :  { %v1505_v8 = vpack.c.bf16 %v1498_v61, %v1497_v3  ;;  %v1499_v22 = vmul.f32 %v4676_v14, %v4660_v49 }
 0x898   :  { %v4678_v19 = vpop.eup %4677 }
 0x899   :  { %v1500_v24 = vmul.f32 %v4678_v19, %v4662_v50  ;;  %4284 = vmatprep.mubr.msk.bf16.mxu1 %vm266_vm0, %v1505_v8 }
 0x89a   :  { %v4680_v25 = vpop.eup %4679 }
 0x89b   :  { %v1506_v26 = vpack.c.bf16 %v1500_v24, %v1499_v22  ;;  %v1501_v32 = vmul.f32 %v4680_v25, %v4664_v52  ;;  %v4587_v52 = vld [vmem:[#allocation11 + $0x20] sm:$0xff]  }
 0x89c   :  { %v4682_v30 = vpop.eup %4681 }
 0x89d   :  { %4285 = vmatmul.mubr.msk.bf16.vlgmr.msra.gmra.mrb[40].mxu1 %vm266_vm0, %v1506_v26  ;;  %v1502_v34 = vmul.f32 %v4682_v30, %v4666_v18 }
 0x89e   :  { %v4684_v35 = vpop.eup %4683  ;;  %4289 = vmatpush3.bf16.msra.mxu1 %v5726_v41  ;;  %v4583_v41 = vld [vmem:[#allocation10 + $0x20] sm:$0xff]  }
 0x89f   :  { %4290 = vmatprep.subr.bf16.mxu1 %v5724_v39  ;;  %v1507_v38 = vpack.c.bf16 %v1502_v34, %v1501_v32  ;;  %v1503_v43 = vmul.f32 %v4684_v35, %v4668_v21 }
 0x8a0   :  { %v4686_v42 = vpop.eup %4685 }
 0x8a1   :  { %v1504_v44 = vmul.f32 %v4686_v42, %v4670_v36  ;;  %4292 = vmatprep.mubr.msk.bf16.mxu1 %vm266_vm0, %v1507_v38 }
 0x8a2   :  { %4291 = vmatpush3.bf16.msra.mxu1 %v5724_v39  ;;  %v4585_v39 = vld [vmem:[#allocation13 + $0x8] sm:$0xff]  }
 0x8a3   :  { %v1508_v45 = vpack.c.bf16 %v1504_v44, %v1503_v43  ;;  %4316 = vmatprep.subr.bf16.mxu1 %v4581_v40  ;;  %4296 = vmatprep.subr.bf16.mxu0 %v4585_v39 }
 0x8a4   :  { %4297 = vmatpush3.bf16.msra.mxu0 %v4585_v39 }
 0x8a5   :  { %4293 = vmatmul.mubr.msk.bf16.vlgmr.msra.gmra.mrb[44].mxu1 %vm266_vm0, %v1508_v45  ;;  %4306 = vmatprep.subr.bf16.mxu0 %v4586_v10 }
 0x8a6   :  { %4317 = vmatpush3.bf16.msra.mxu1 %v4581_v40  ;;  %4320 = vmatprep.mubr.msk.bf16.mxu1 %vm266_vm0, %v5612_v51 }
 0x8a7   :  { %4318 = vmatprep.subr.bf16.mxu1 %v4582_v28 }
 0x8aa   :  { %4319 = vmatpush3.bf16.msra.mxu1 %v4582_v28 }
 0x8ab   :  { %4328 = vmatprep.subr.bf16.mxu1 %v4583_v41 }
 0x8ad   :  { %4321 = vmatmul.mubr.msk.bf16.vlgmr.msra.gmra.mrb[48].mxu1 %vm266_vm0, %v5620_v59 }
 0x8ae   :  { %4324 = vmatprep.mubr.msk.bf16.mxu1 %vm266_vm0, %v5628_v47  ;;  %4329 = vmatpush3.bf16.msra.mxu1 %v4583_v41 }
 0x8af   :  { %4330 = vmatprep.subr.bf16.mxu1 %v4584_v48 }
 0x8b2   :  { %4331 = vmatpush3.bf16.msra.mxu1 %v4584_v48 }
 0x8b5   :  { %4325 = vmatmul.mubr.msk.bf16.gmra.mrb[52].mxu1 %vm266_vm0, %v5634_v57 }
 0x8b6   :  { %4332 = vmatprep.mubr.msk.bf16.mxu1 %vm266_vm0, %v5612_v51 }
 0x8bd   :  { %4333 = vmatmul.mubr.msk.bf16.vlgmr.msra.gmra.mrb[56].mxu1 %vm266_vm0, %v5620_v59 }
 0x8be   :  { %4336 = vmatprep.mubr.msk.bf16.mxu1 %vm266_vm0, %v5628_v47 }
 0x8c5   :  { %4337 = vmatmul.mubr.msk.bf16.gmra.mrb[60].mxu1 %vm266_vm0, %v5634_v57 }
 0x970   :  { %v4286_v13 = vpop.f32.mrb[40].mxu1 }
 0x971   :  { %v1549_v15 = vpop.f32.mrb[41].mxu1 }
 0x972   :  { %v4287_v49 = vpop.f32.mrb[42].mxu1 }
 0x973   :  { %v1620_v33 = vpack.c.bf16 %v4287_v49, %v4286_v13  ;;  %v1552_v50 = vpop.f32.mrb[43].mxu1 }
 0x974   :  { %v1619_v31 = vpack.c.bf16 %v1552_v50, %v1549_v15 }
 0x976   :  { %4298 = vmatprep.mubr.msk.bf16.mxu0 %vm690_vm1, %v1619_v31 }
 0x977   :  { %4299 = vmatmul.mubr.msk.bf16.vlgmr.msra.gmra.mrb[32].mxu0 %vm690_vm1, %v1620_v33 }
 0x978   :  { %v4294_v53 = vpop.f32.mrb[44].mxu1  ;;  %4307 = vmatpush3.bf16.msra.mxu0 %v4586_v10 }
 0x979   :  { %v1604_v18 = vpop.f32.mrb[45].mxu1  ;;  %4340 = vmatprep.subr.bf16.mxu0 %v4587_v52 }
 0x97a   :  { %v4295_v20 = vpop.f32.mrb[46].mxu1 }
 0x97b   :  { %v1622_v21 = vpack.c.bf16 %v4295_v20, %v4294_v53  ;;  %v1607_v54 = vpop.f32.mrb[47].mxu1 }
 0x97c   :  { %v1621_v36 = vpack.c.bf16 %v1607_v54, %v1604_v18 }
 0x97e   :  { %4302 = vmatprep.mubr.msk.bf16.mxu0 %vm690_vm1, %v1621_v36 }
 0x97f   :  { %4303 = vmatmul.mubr.msk.bf16.gmra.mrb[36].mxu0 %vm690_vm1, %v1622_v21 }
 0x980   :  { %4308 = vmatprep.mubr.msk.bf16.mxu0 %vm690_vm1, %v1023_v6  ;;  %v4322_v58 = vpop.f32.mrb[48].mxu1 }
 0x981   :  { %v1843_v29 = vpop.f32.mrb[49].mxu1 }
 0x982   :  { %v4323_v60 = vpop.f32.mrb[50].mxu1 }
 0x983   :  { %v2039_v55 = vpack.c.bf16 %v4323_v60, %v4322_v58  ;;  %v1846_v62 = vpop.f32.mrb[51].mxu1 }
 0x984   :  { %v2038_v63 = vpack.c.bf16 %v1846_v62, %v1843_v29 }
 0x986   :  { %4356 = vmatprep.mubr.msk.bf16.mxu1 %vm690_vm1, %v2038_v63 }
 0x987   :  { %4309 = vmatmul.mubr.msk.bf16.vlgmr.msra.gmra.mrb[32].mxu0 %vm690_vm1, %v1024_v56 }
 0x988   :  { %4312 = vmatprep.mubr.msk.bf16.mxu0 %vm690_vm1, %v1025_v11  ;;  %v4326_v27 = vpop.f32.mrb[52].mxu1  ;;  %4341 = vmatpush3.bf16.msra.mxu0 %v4587_v52 }
 0x989   :  { %v1859_v7 = vpop.f32.mrb[53].mxu1  ;;  %4342 = vmatprep.subr.bf16.mxu0 %v4588_v46 }
 0x98a   :  { %v4327_v6 = vpop.f32.mrb[54].mxu1 }
 0x98b   :  { %v2041_v0 = vpack.c.bf16 %v4327_v6, %v4326_v27  ;;  %v1862_v1 = vpop.f32.mrb[55].mxu1 }
 0x98c   :  { %v2040_v37 = vpack.c.bf16 %v1862_v1, %v1859_v7  ;;  %4343 = vmatpush3.bf16.msra.mxu0 %v4588_v46 }
 0x98f   :  { %4313 = vmatmul.mubr.msk.bf16.gmra.mrb[36].mxu0 %vm690_vm1, %v1026_v16 }
 0x990   :  { %v4334_v23 = vpop.f32.mrb[56].mxu1  ;;  %4344 = vmatprep.mubr.msk.bf16.mxu0 %vm266_vm0, %v5612_v51 }
 0x991   :  { %v1925_v4 = vpop.f32.mrb[57].mxu1 }
 0x992   :  { %v4335_v56 = vpop.f32.mrb[58].mxu1 }
 0x993   :  { %v2043_v5 = vpack.c.bf16 %v4335_v56, %v4334_v23  ;;  %v1928_v17 = vpop.f32.mrb[59].mxu1 }
 0x994   :  { %v2042_v11 = vpack.c.bf16 %v1928_v17, %v1925_v4 }
 0x995   :  { %v2060_v8 = vsel %vm690_vm1, %v2043_v5, 0 }
 0x996   :  { %v2057_v2 = vsel %vm690_vm1, %v2042_v11, 0  ;;  %4540 = vmatprep.subr.msk.bf16.mxu1 %vm690_vm1, %v2042_v11 }
 0x997   :  { %4345 = vmatmul.mubr.msk.bf16.vlgmr.msra.gmra.mrb[40].mxu0 %vm266_vm0, %v5620_v59  ;;  %4353 = vmatpush3.bf16.xpose.msra.mxu1 %v2057_v2 }
 0x998   :  { %v4338_v9 = vpop.f32.mrb[60].mxu1  ;;  %4348 = vmatprep.mubr.msk.bf16.mxu0 %vm266_vm0, %v5628_v47  ;;  %4541 = vmatprep.subr.msk.bf16.mxu1 %vm690_vm1, %v2043_v5 }
 0x999   :  { %v1941_v12 = vpop.f32.mrb[61].mxu1 }
 0x99a   :  { %v4339_v16 = vpop.f32.mrb[62].mxu1 }
 0x99b   :  { %v2045_v3 = vpack.c.bf16 %v4339_v16, %v4338_v9  ;;  %v1944_v61 = vpop.f32.mrb[63].mxu1 }
 0x99c   :  { %v2044_v14 = vpack.c.bf16 %v1944_v61, %v1941_v12 }
 0x99d   :  { %v2121_v22 = vsel %vm690_vm1, %v2045_v3, 0 }
 0x99e   :  { %v2118_v19 = vsel %vm690_vm1, %v2044_v14, 0  ;;  %4542 = vmatprep.subr.msk.bf16.mxu0 %vm690_vm1, %v2044_v14 }
 0x99f   :  { %4349 = vmatmul.mubr.msk.bf16.gmra.mrb[44].mxu0 %vm266_vm0, %v5634_v57  ;;  %4355 = vmatpush3.bf16.xpose.msra.mxu1 %v2060_v8 }
 0x9a0   :  { %4361 = vmatpush3.bf16.xpose.msra.mxu0 %v2118_v19  ;;  %4364 = vmatprep.mubr.msk.bf16.mxu0 %vm690_vm1, %v2040_v37 }
 0x9a1   :  { %4543 = vmatprep.subr.msk.bf16.mxu0 %vm690_vm1, %v2045_v3 }
 0x9a6   :  { %4357 = vmatmul.mubr.msk.bf16.vlgmr.msra.gmra.mrb[64].mxu1 %vm690_vm1, %v2039_v55 }
 0x9a8   :  { %4363 = vmatpush3.bf16.xpose.msra.mxu0 %v2121_v22 }
 0x9af   :  { %4365 = vmatmul.mubr.msk.bf16.vlgmr.msra.gmra.mrb[48].mxu0 %vm690_vm1, %v2041_v0 }
 0xa6a   :  { %v4346_v24 = vpop.f32.mrb[40].mxu0 }
 0xa6b   :  { %v2007_v25 = vpop.f32.mrb[41].mxu0 }
 0xa6c   :  { %v4347_v26 = vpop.f32.mrb[42].mxu0 }
 0xa6d   :  { %v2047_v30 = vpack.c.bf16 %v4347_v26, %v4346_v24  ;;  %v2010_v32 = vpop.f32.mrb[43].mxu0 }
 0xa6e   :  { %v2046_v34 = vpack.c.bf16 %v2010_v32, %v2007_v25 }
 0xa70   :  { %4368 = vmatprep.subr.bf16.mxu1 %v2046_v34 }
 0xa71   :  { %4369 = vmatpush3.bf16.msra.mxu1 %v2046_v34 }
 0xa72   :  { %v4350_v35 = vpop.f32.mrb[44].mxu0  ;;  %4370 = vmatprep.subr.bf16.mxu1 %v2047_v30 }
 0xa73   :  { %v2023_v38 = vpop.f32.mrb[45].mxu0 }
 0xa74   :  { %v4351_v40 = vpop.f32.mrb[46].mxu0 }
 0xa75   :  { %v5883_v42 = vpack.c.bf16 %v4351_v40, %v4350_v35  ;;  %v2026_v43 = vpop.f32.mrb[47].mxu0  ;;  %4371 = vmatpush3.bf16.msra.mxu1 %v2047_v30 }
 0xa76   :  { %v5885_v44 = vpack.c.bf16 %v2026_v43, %v2023_v38 }
 0xa78   :  { %4376 = vmatprep.subr.bf16.mxu1 %v5885_v44 }
 0xa79   :  { %v4358_v45 = vpop.f32.mrb[64].mxu1 }
 0xa7a   :  { %v2096_v28 = vpop.f32.mrb[65].mxu1  ;;  %v2174_v10 = vmul.f32 0.25, %v4358_v45 }
 0xa7b   :  { %v2172_v41 = vmul.f32 0.25, %v2096_v28  ;;  %v4359_v48 = vpop.f32.mrb[66].mxu1 }
 0xa7c   :  { %v2099_v39 = vpop.f32.mrb[67].mxu1  ;;  %v2175_v49 = vmul.f32 0.25, %v4359_v48  ;;  %v2186_v50 = vsel %vm266_vm0, %v2174_v10, -inf }
 0xa7d   :  { %v2173_v13 = vmul.f32 0.25, %v2099_v39  ;;  %v2180_v15 = vsel %vm266_vm0, %v2172_v41, -inf }
 0xa7e   :  { %2181 = vmax.xlane.f32.xlu0 %v2180_v15  ;;  %v2189_v53 = vsel %vm266_vm0, %v2175_v49, -inf }
 0xa7f   :  { %v2183_v33 = vsel %vm266_vm0, %v2173_v13, -inf }
 0xa80   :  { %2184 = vmax.xlane.f32.xlu1 %v2183_v33 }
 0xa82   :  { %v4366_v31 = vpop.f32.mrb[48].mxu0  ;;  %2187 = vmax.xlane.f32.xlu0 %v2186_v50 }
 0xa83   :  { %v2157_v52 = vpop.f32.mrb[49].mxu0  ;;  %v2178_v54 = vmul.f32 0.25, %v4366_v31 }
 0xa84   :  { %v2176_v18 = vmul.f32 0.25, %v2157_v52  ;;  %v4367_v20 = vpop.f32.mrb[50].mxu0  ;;  %2190 = vmax.xlane.f32.xlu1 %v2189_v53 }
 0xa85   :  { %v2160_v21 = vpop.f32.mrb[51].mxu0  ;;  %v2179_v29 = vmul.f32 0.25, %v4367_v20  ;;  %v2198_v55 = vsel %vm266_vm0, %v2178_v54, -inf }
 0xa86   :  { %v2177_v36 = vmul.f32 0.25, %v2160_v21  ;;  %v2192_v58 = vsel %vm266_vm0, %v2176_v18, -inf }
 0xa87   :  { %2193 = vmax.xlane.f32.xlu0 %v2192_v58  ;;  %v2201_v62 = vsel %vm266_vm0, %v2179_v29, -inf }
 0xa88   :  { %v2195_v60 = vsel %vm266_vm0, %v2177_v36, -inf }
 0xa89   :  { %2196 = vmax.xlane.f32.xlu1 %v2195_v60 }
 0xa8b   :  { %2199 = vmax.xlane.f32.xlu0 %v2198_v55 }
 0xa8d   :  { %2202 = vmax.xlane.f32.xlu1 %v2201_v62 }
 0xb0b   :  { %v2182_v63 = vpop.xlane.xlu0 %2181 }
 0xb0c   :  { %v2204_v46 = vsub.f32 %v2172_v41, %v2182_v63 }
 0xb0d   :  { %v2185_v27 = vpop.xlane.xlu1 %2184 }
 0xb0e   :  { %v2212_v7 = vmul.f32 1.442695, %v2204_v46  ;;  %v2205_v6 = vsub.f32 %v2173_v13, %v2185_v27  ;;  %v4593_v13 = vld [vmem:[#allocation13 + $0x10] sm:$0xff]  }
 0xb0f   :  { %v2188_v0 = vpop.xlane.xlu0 %2187  ;;  %4384 = vmatprep.subr.bf16.mxu0 %v4593_v13 }
 0xb10   :  { %4687 = vpow2.f32 %v2212_v7  ;;  %v2214_v1 = vmul.f32 1.442695, %v2205_v6  ;;  %v2206_v37 = vsub.f32 %v2174_v10, %v2188_v0  ;;  %4385 = vmatpush3.bf16.msra.mxu0 %v4593_v13 }
 0xb11   :  { %v2191_v23 = vpop.xlane.xlu1 %2190 }
 0xb12   :  { %4689 = vpow2.f32 %v2214_v1  ;;  %v2216_v4 = vmul.f32 1.442695, %v2206_v37  ;;  %v2207_v56 = vsub.f32 %v2175_v49, %v2191_v23  ;;  %v4589_v1 = vld [vmem:[#allocation8 + $0x30] sm:$0xff]  }
 0xb14   :  { %4691 = vpow2.f32 %v2216_v4  ;;  %v2218_v5 = vmul.f32 1.442695, %v2207_v56  ;;  %v2194_v17 = vpop.xlane.xlu0 %2193 }
 0xb15   :  { %v2208_v11 = vsub.f32 %v2176_v18, %v2194_v17  ;;  %v4590_v17 = vld [vmem:[#allocation8 + $0x38] sm:$0xff]  }
 0xb16   :  { %4693 = vpow2.f32 %v2218_v5  ;;  %v2197_v2 = vpop.xlane.xlu1 %2196 }
 0xb17   :  { %v2220_v9 = vmul.f32 1.442695, %v2208_v11  ;;  %v2209_v12 = vsub.f32 %v2177_v36, %v2197_v2  ;;  %v4592_v11 = vld [vmem:[#allocation11 + $0x38] sm:$0xff]  }
 0xb18   :  { %v2200_v16 = vpop.xlane.xlu0 %2199 }
 0xb19   :  { %4695 = vpow2.f32 %v2220_v9  ;;  %v2222_v3 = vmul.f32 1.442695, %v2209_v12  ;;  %v2210_v61 = vsub.f32 %v2178_v54, %v2200_v16 }
 0xb1a   :  { %v4688_v14 = vpop.eup %4687  ;;  %v2203_v8 = vpop.xlane.xlu1 %2202 }
 0xb1b   :  { %4697 = vpow2.f32 %v2222_v3  ;;  %v2224_v19 = vmul.f32 1.442695, %v2210_v61  ;;  %v2211_v22 = vsub.f32 %v2179_v29, %v2203_v8  ;;  %v2228_v24 = vsel %vm266_vm0, %v4688_v14, 0.0 }
 0xb1c   :  { %v4690_v25 = vpop.eup %4689  ;;  %2229 = vadd.xlane.f32.xlu0 %v2228_v24 }
 0xb1d   :  { %4699 = vpow2.f32 %v2224_v19  ;;  %v2226_v26 = vmul.f32 1.442695, %v2211_v22  ;;  %v2231_v30 = vsel %vm266_vm0, %v4690_v25, 0.0 }
 0xb1e   :  { %v4692_v32 = vpop.eup %4691  ;;  %2232 = vadd.xlane.f32.xlu1 %v2231_v30 }
 0xb1f   :  { %4701 = vpow2.f32 %v2226_v26  ;;  %v2234_v34 = vsel %vm266_vm0, %v4692_v32, 0.0 }
 0xb20   :  { %v4694_v35 = vpop.eup %4693  ;;  %2235 = vadd.xlane.f32.xlu0 %v2234_v34 }
 0xb21   :  { %v2237_v38 = vsel %vm266_vm0, %v4694_v35, 0.0 }
 0xb22   :  { %2238 = vadd.xlane.f32.xlu1 %v2237_v38 }
 0xb23   :  { %v4696_v40 = vpop.eup %4695 }
 0xb24   :  { %v2240_v43 = vsel %vm266_vm0, %v4696_v40, 0.0 }
 0xb25   :  { %v4698_v45 = vpop.eup %4697  ;;  %2241 = vadd.xlane.f32.xlu0 %v2240_v43 }
 0xb26   :  { %v2243_v28 = vsel %vm266_vm0, %v4698_v45, 0.0 }
 0xb27   :  { %v4700_v41 = vpop.eup %4699  ;;  %2244 = vadd.xlane.f32.xlu1 %v2243_v28 }
 0xb28   :  { %v2246_v48 = vsel %vm266_vm0, %v4700_v41, 0.0 }
 0xb29   :  { %v4702_v39 = vpop.eup %4701  ;;  %2247 = vadd.xlane.f32.xlu0 %v2246_v48 }
 0xb2a   :  { %v2249_v10 = vsel %vm266_vm0, %v4702_v39, 0.0 }
 0xb2b   :  { %2250 = vadd.xlane.f32.xlu1 %v2249_v10 }
 0xba9   :  { %v2230_v15 = vpop.xlane.xlu0 %2229 }
 0xbaa   :  { %4703 = vrcp.f32 %v2230_v15 }
 0xbab   :  { %v2233_v49 = vpop.xlane.xlu1 %2232 }
 0xbac   :  { %4705 = vrcp.f32 %v2233_v49 }
 0xbad   :  { %v2236_v33 = vpop.xlane.xlu0 %2235 }
 0xbae   :  { %4707 = vrcp.f32 %v2236_v33 }
 0xbaf   :  { %v2239_v50 = vpop.xlane.xlu1 %2238 }
 0xbb0   :  { %4709 = vrcp.f32 %v2239_v50 }
 0xbb2   :  { %v2242_v31 = vpop.xlane.xlu0 %2241 }
 0xbb3   :  { %4711 = vrcp.f32 %v2242_v31 }
 0xbb4   :  { %v4704_v52 = vpop.eup %4703  ;;  %v2245_v53 = vpop.xlane.xlu1 %2244 }
 0xbb5   :  { %4713 = vrcp.f32 %v2245_v53  ;;  %v2260_v21 = vmul.f32 %v4704_v52, %v4688_v14  ;;  %v4595_v14 = vld [vmem:[#allocation10 + $0x38] sm:$0xff]  }
 0xbb6   :  { %v4706_v18 = vpop.eup %4705  ;;  %v2248_v20 = vpop.xlane.xlu0 %2247 }
 0xbb7   :  { %4715 = vrcp.f32 %v2248_v20  ;;  %v2261_v54 = vmul.f32 %v4706_v18, %v4690_v25 }
 0xbb8   :  { %v4708_v36 = vpop.eup %4707  ;;  %v2251_v58 = vpop.xlane.xlu1 %2250 }
 0xbb9   :  { %4717 = vrcp.f32 %v2251_v58  ;;  %v2268_v29 = vpack.c.bf16 %v2261_v54, %v2260_v21  ;;  %v2262_v55 = vmul.f32 %v4708_v36, %v4692_v32 }
 0xbba   :  { %v4710_v60 = vpop.eup %4709 }
 0xbbb   :  { %v2263_v62 = vmul.f32 %v4710_v60, %v4694_v35  ;;  %4372 = vmatprep.mubr.msk.bf16.mxu1 %vm266_vm0, %v2268_v29 }
 0xbbd   :  { %v4712_v63 = vpop.eup %4711  ;;  %v2269_v46 = vpack.c.bf16 %v2263_v62, %v2262_v55 }
 0xbbe   :  { %v2264_v7 = vmul.f32 %v4712_v63, %v4696_v40 }
 0xbbf   :  { %v4714_v27 = vpop.eup %4713  ;;  %4373 = vmatmul.mubr.msk.bf16.vlgmr.msra.gmra.mrb[68].mxu1 %vm266_vm0, %v2269_v46 }
 0xbc0   :  { %4377 = vmatpush3.bf16.msra.mxu1 %v5885_v44  ;;  %v2265_v6 = vmul.f32 %v4714_v27, %v4698_v45  ;;  %v4591_v44 = vld [vmem:[#allocation11 + $0x30] sm:$0xff]  }
 0xbc1   :  { %v4716_v0 = vpop.eup %4715  ;;  %4378 = vmatprep.subr.bf16.mxu1 %v5883_v42 }
 0xbc2   :  { %v2270_v37 = vpack.c.bf16 %v2265_v6, %v2264_v7  ;;  %v2266_v4 = vmul.f32 %v4716_v0, %v4700_v41 }
 0xbc3   :  { %v4718_v23 = vpop.eup %4717 }
 0xbc4   :  { %v2267_v56 = vmul.f32 %v4718_v23, %v4702_v39  ;;  %4379 = vmatpush3.bf16.msra.mxu1 %v5883_v42  ;;  %4380 = vmatprep.mubr.msk.bf16.mxu1 %vm266_vm0, %v2270_v37  ;;  %v4594_v42 = vld [vmem:[#allocation10 + $0x30] sm:$0xff]  }
 0xbc5   :  { %4394 = vmatprep.subr.bf16.mxu1 %v4589_v1  ;;  %4406 = vmatprep.subr.bf16.mxu0 %v4594_v42 }
 0xbc6   :  { %v2271_v5 = vpack.c.bf16 %v2267_v56, %v2266_v4 }
 0xbc8   :  { %4381 = vmatmul.mubr.msk.bf16.vlgmr.msra.gmra.mrb[72].mxu1 %vm266_vm0, %v2271_v5 }
 0xbc9   :  { %4395 = vmatpush3.bf16.msra.mxu1 %v4589_v1  ;;  %4398 = vmatprep.mubr.msk.bf16.mxu1 %vm266_vm0, %v5612_v51 }
 0xbca   :  { %4396 = vmatprep.subr.bf16.mxu1 %v4590_v17 }
 0xbcd   :  { %4397 = vmatpush3.bf16.msra.mxu1 %v4590_v17 }
 0xbce   :  { %4418 = vmatprep.subr.bf16.mxu1 %v4591_v44 }
 0xbd0   :  { %4399 = vmatmul.mubr.msk.bf16.vlgmr.msra.gmra.mrb[76].mxu1 %vm266_vm0, %v5620_v59 }
 0xbd1   :  { %4402 = vmatprep.mubr.msk.bf16.mxu1 %vm266_vm0, %v5628_v47  ;;  %4419 = vmatpush3.bf16.msra.mxu1 %v4591_v44 }
 0xbd2   :  { %4420 = vmatprep.subr.bf16.mxu1 %v4592_v11 }
 0xbd5   :  { %4421 = vmatpush3.bf16.msra.mxu1 %v4592_v11 }
 0xbd8   :  { %4403 = vmatmul.mubr.msk.bf16.gmra.mrb[80].mxu1 %vm266_vm0, %v5634_v57 }
 0xbd9   :  { %4422 = vmatprep.mubr.msk.bf16.mxu1 %vm266_vm0, %v5612_v51 }
 0xbe0   :  { %4423 = vmatmul.mubr.msk.bf16.vlgmr.msra.gmra.mrb[84].mxu1 %vm266_vm0, %v5620_v59 }
 0xbe1   :  { %4426 = vmatprep.mubr.msk.bf16.mxu1 %vm266_vm0, %v5628_v47 }
 0xbe8   :  { %4427 = vmatmul.mubr.msk.bf16.gmra.mrb[88].mxu1 %vm266_vm0, %v5634_v57 }
 0xc92   :  { %v4374_v2 = vpop.f32.mrb[68].mxu1 }
 0xc93   :  { %v2312_v9 = vpop.f32.mrb[69].mxu1 }
 0xc94   :  { %v4375_v12 = vpop.f32.mrb[70].mxu1 }
 0xc95   :  { %v2383_v16 = vpack.c.bf16 %v4375_v12, %v4374_v2  ;;  %v2315_v3 = vpop.f32.mrb[71].mxu1 }
 0xc96   :  { %v2382_v61 = vpack.c.bf16 %v2315_v3, %v2312_v9 }
 0xc98   :  { %4386 = vmatprep.mubr.msk.bf16.mxu0 %vm690_vm1, %v2382_v61 }
 0xc99   :  { %4387 = vmatmul.mubr.msk.bf16.vlgmr.msra.gmra.mrb[32].mxu0 %vm690_vm1, %v2383_v16 }
 0xc9a   :  { %4407 = vmatpush3.bf16.msra.mxu0 %v4594_v42 }
 0xc9b   :  { %v4382_v8 = vpop.f32.mrb[72].mxu1  ;;  %4408 = vmatprep.subr.bf16.mxu0 %v4595_v14 }
 0xc9c   :  { %v2367_v19 = vpop.f32.mrb[73].mxu1 }
 0xc9d   :  { %v4383_v22 = vpop.f32.mrb[74].mxu1 }
 0xc9e   :  { %v2385_v24 = vpack.c.bf16 %v4383_v22, %v4382_v8  ;;  %v2370_v25 = vpop.f32.mrb[75].mxu1  ;;  %4409 = vmatpush3.bf16.msra.mxu0 %v4595_v14 }
 0xc9f   :  { %v2384_v26 = vpack.c.bf16 %v2370_v25, %v2367_v19 }
 0xca1   :  { %4390 = vmatprep.mubr.msk.bf16.mxu0 %vm690_vm1, %v2384_v26 }
 0xca2   :  { %4391 = vmatmul.mubr.msk.bf16.gmra.mrb[36].mxu0 %vm690_vm1, %v2385_v24 }
 0xca3   :  { %v4400_v30 = vpop.f32.mrb[76].mxu1  ;;  %4410 = vmatprep.mubr.msk.bf16.mxu0 %vm266_vm0, %v5612_v51 }
 0xca4   :  { %v2531_v32 = vpop.f32.mrb[77].mxu1 }
 0xca5   :  { %v4401_v34 = vpop.f32.mrb[78].mxu1 }
 0xca6   :  { %v2727_v35 = vpack.c.bf16 %v4401_v34, %v4400_v30  ;;  %v2534_v38 = vpop.f32.mrb[79].mxu1 }
 0xca7   :  { %v2726_v40 = vpack.c.bf16 %v2534_v38, %v2531_v32 }
 0xcaa   :  { %4411 = vmatmul.mubr.msk.bf16.vlgmr.msra.gmra.mrb[52].mxu0 %vm266_vm0, %v5620_v59 }
 0xcab   :  { %v4404_v43 = vpop.f32.mrb[80].mxu1  ;;  %4414 = vmatprep.mubr.msk.bf16.mxu0 %vm266_vm0, %v5628_v47 }
 0xcac   :  { %v2547_v45 = vpop.f32.mrb[81].mxu1 }
 0xcad   :  { %v4405_v28 = vpop.f32.mrb[82].mxu1 }
 0xcae   :  { %v2729_v41 = vpack.c.bf16 %v4405_v28, %v4404_v43  ;;  %v2550_v48 = vpop.f32.mrb[83].mxu1 }
 0xcaf   :  { %v2728_v39 = vpack.c.bf16 %v2550_v48, %v2547_v45 }
 0xcb1   :  { %4442 = vmatprep.mubr.msk.bf16.mxu1 %vm690_vm1, %v2728_v39 }
 0xcb2   :  { %4415 = vmatmul.mubr.msk.bf16.gmra.mrb[56].mxu0 %vm266_vm0, %v5634_v57 }
 0xcb3   :  { %v4424_v51 = vpop.f32.mrb[84].mxu1  ;;  %4434 = vmatprep.mubr.msk.bf16.mxu0 %vm690_vm1, %v2726_v40 }
 0xcb4   :  { %v2695_v10 = vpop.f32.mrb[85].mxu1 }
 0xcb5   :  { %v4425_v13 = vpop.f32.mrb[86].mxu1 }
 0xcb6   :  { %v2735_v59 = vpack.c.bf16 %v4425_v13, %v4424_v51  ;;  %v2698_v15 = vpop.f32.mrb[87].mxu1 }
 0xcb7   :  { %v2734_v49 = vpack.c.bf16 %v2698_v15, %v2695_v10 }
 0xcbb   :  { %v4428_v33 = vpop.f32.mrb[88].mxu1 }
 0xcbc   :  { %v2711_v47 = vpop.f32.mrb[89].mxu1 }
 0xcbd   :  { %v4429_v50 = vpop.f32.mrb[90].mxu1 }
 0xcbe   :  { %v2737_v31 = vpack.c.bf16 %v4429_v50, %v4428_v33  ;;  %v2714_v52 = vpop.f32.mrb[91].mxu1 }
 0xcbf   :  { %v2736_v53 = vpack.c.bf16 %v2714_v52, %v2711_v47 }
 0xd7d   :  { %v4412_v18 = vpop.f32.mrb[52].mxu0 }
 0xd7e   :  { %v2613_v20 = vpop.f32.mrb[53].mxu0 }
 0xd7f   :  { %v4413_v21 = vpop.f32.mrb[54].mxu0 }
 0xd80   :  { %v2731_v54 = vpack.c.bf16 %v4413_v21, %v4412_v18  ;;  %v2616_v36 = vpop.f32.mrb[55].mxu0 }
 0xd81   :  { %v2730_v57 = vpack.c.bf16 %v2616_v36, %v2613_v20 }
 0xd82   :  { %v2748_v27 = vsel %vm690_vm1, %v2731_v54, 0 }
 0xd83   :  { %v2745_v58 = vsel %vm690_vm1, %v2730_v57, 0  ;;  %4544 = vmatprep.subr.msk.bf16.mxu0 %vm690_vm1, %v2730_v57 }
 0xd84   :  { %4431 = vmatpush3.bf16.xpose.msra.mxu0 %v2745_v58 }
 0xd85   :  { %v4416_v29 = vpop.f32.mrb[56].mxu0  ;;  %4545 = vmatprep.subr.msk.bf16.mxu0 %vm690_vm1, %v2731_v54 }
 0xd86   :  { %v2629_v60 = vpop.f32.mrb[57].mxu0 }
 0xd87   :  { %v4417_v55 = vpop.f32.mrb[58].mxu0 }
 0xd88   :  { %v2733_v62 = vpack.c.bf16 %v4417_v55, %v4416_v29  ;;  %v2632_v63 = vpop.f32.mrb[59].mxu0 }
 0xd89   :  { %v2732_v46 = vpack.c.bf16 %v2632_v63, %v2629_v60 }
 0xd8a   :  { %v2809_v6 = vsel %vm690_vm1, %v2733_v62, 0 }
 0xd8b   :  { %v2806_v7 = vsel %vm690_vm1, %v2732_v46, 0  ;;  %4546 = vmatprep.subr.msk.bf16.mxu1 %vm690_vm1, %v2732_v46 }
 0xd8c   :  { %4433 = vmatpush3.bf16.xpose.msra.mxu0 %v2748_v27  ;;  %4439 = vmatpush3.bf16.xpose.msra.mxu1 %v2806_v7 }
 0xd8d   :  { %4547 = vmatprep.subr.msk.bf16.mxu1 %vm690_vm1, %v2733_v62  ;;  %4446 = vmatprep.subr.bf16.mxu0 %v2734_v49 }
 0xd93   :  { %4435 = vmatmul.mubr.msk.bf16.vlgmr.msra.gmra.mrb[60].mxu0 %vm690_vm1, %v2727_v35 }
 0xd94   :  { %4441 = vmatpush3.bf16.xpose.msra.mxu1 %v2809_v6  ;;  %4447 = vmatpush3.bf16.msra.mxu0 %v2734_v49 }
 0xd95   :  { %4448 = vmatprep.subr.bf16.mxu0 %v2735_v59  ;;  %4454 = vmatprep.subr.bf16.mxu1 %v2736_v53 }
 0xd98   :  { %4449 = vmatpush3.bf16.msra.mxu0 %v2735_v59 }
 0xd9b   :  { %4443 = vmatmul.mubr.msk.bf16.vlgmr.msra.gmra.mrb[92].mxu1 %vm690_vm1, %v2729_v41 }
 0xd9c   :  { %4455 = vmatpush3.bf16.msra.mxu1 %v2736_v53 }
 0xd9d   :  { %4456 = vmatprep.subr.bf16.mxu1 %v2737_v31 }
 0xda0   :  { %4457 = vmatpush3.bf16.msra.mxu1 %v2737_v31 }
 0xe66   :  { %v4436_v0 = vpop.f32.mrb[60].mxu0 }
 0xe67   :  { %v2784_v1 = vpop.f32.mrb[61].mxu0  ;;  %v2862_v56 = vmul.f32 0.25, %v4436_v0  ;;  %v4596_v0 = vld [vmem:[#allocation13 + $0x18] sm:$0xff]  }
 0xe68   :  { %v2860_v37 = vmul.f32 0.25, %v2784_v1  ;;  %v4437_v23 = vpop.f32.mrb[62].mxu0  ;;  %4462 = vmatprep.subr.bf16.mxu0 %v4596_v0 }
 0xe69   :  { %v2787_v4 = vpop.f32.mrb[63].mxu0  ;;  %v2863_v44 = vmul.f32 0.25, %v4437_v23  ;;  %v2874_v2 = vsel %vm266_vm0, %v2862_v56, -inf }
 0xe6a   :  { %v2861_v5 = vmul.f32 0.25, %v2787_v4  ;;  %v2868_v17 = vsel %vm266_vm0, %v2860_v37, -inf }
 0xe6b   :  { %2869 = vmax.xlane.f32.xlu0 %v2868_v17  ;;  %v2877_v3 = vsel %vm266_vm0, %v2863_v44, -inf }
 0xe6c   :  { %v2871_v11 = vsel %vm266_vm0, %v2861_v5, -inf }
 0xe6d   :  { %2872 = vmax.xlane.f32.xlu1 %v2871_v11 }
 0xe6e   :  { %v4444_v42 = vpop.f32.mrb[92].mxu1 }
 0xe6f   :  { %2875 = vmax.xlane.f32.xlu0 %v2874_v2  ;;  %v2845_v9 = vpop.f32.mrb[93].mxu1  ;;  %v2866_v14 = vmul.f32 0.25, %v4444_v42 }
 0xe70   :  { %v2864_v12 = vmul.f32 0.25, %v2845_v9  ;;  %v4445_v16 = vpop.f32.mrb[94].mxu1 }
 0xe71   :  { %2878 = vmax.xlane.f32.xlu1 %v2877_v3  ;;  %v2848_v61 = vpop.f32.mrb[95].mxu1  ;;  %v2867_v22 = vmul.f32 0.25, %v4445_v16  ;;  %v2886_v25 = vsel %vm266_vm0, %v2866_v14, -inf }
 0xe72   :  { %v2865_v8 = vmul.f32 0.25, %v2848_v61  ;;  %v2880_v19 = vsel %vm266_vm0, %v2864_v12, -inf }
 0xe73   :  { %2881 = vmax.xlane.f32.xlu0 %v2880_v19  ;;  %v2889_v26 = vsel %vm266_vm0, %v2867_v22, -inf }
 0xe74   :  { %v2883_v24 = vsel %vm266_vm0, %v2865_v8, -inf }
 0xe75   :  { %2884 = vmax.xlane.f32.xlu1 %v2883_v24 }
 0xe77   :  { %2887 = vmax.xlane.f32.xlu0 %v2886_v25 }
 0xe79   :  { %2890 = vmax.xlane.f32.xlu1 %v2889_v26 }
 0xef8   :  { %v2870_v30 = vpop.xlane.xlu0 %2869 }
 0xef9   :  { %v2892_v32 = vsub.f32 %v2860_v37, %v2870_v30 }
 0xefa   :  { %v2873_v34 = vpop.xlane.xlu1 %2872 }
 0xefb   :  { %v2900_v35 = vmul.f32 1.442695, %v2892_v32  ;;  %v2893_v38 = vsub.f32 %v2861_v5, %v2873_v34 }
 0xefc   :  { %v2876_v40 = vpop.xlane.xlu0 %2875 }
 0xefd   :  { %4719 = vpow2.f32 %v2900_v35  ;;  %v2902_v43 = vmul.f32 1.442695, %v2893_v38  ;;  %v2894_v45 = vsub.f32 %v2862_v56, %v2876_v40 }
 0xefe   :  { %v2879_v28 = vpop.xlane.xlu1 %2878 }
 0xeff   :  { %4721 = vpow2.f32 %v2902_v43  ;;  %v2904_v41 = vmul.f32 1.442695, %v2894_v45  ;;  %v2895_v48 = vsub.f32 %v2863_v44, %v2879_v28 }
 0xf00   :  { %v2882_v39 = vpop.xlane.xlu0 %2881 }
 0xf01   :  { %4723 = vpow2.f32 %v2904_v41  ;;  %v2906_v51 = vmul.f32 1.442695, %v2895_v48  ;;  %v2896_v10 = vsub.f32 %v2864_v12, %v2882_v39 }
 0xf02   :  { %v2885_v13 = vpop.xlane.xlu1 %2884 }
 0xf03   :  { %4725 = vpow2.f32 %v2906_v51  ;;  %v2908_v59 = vmul.f32 1.442695, %v2896_v10  ;;  %v2897_v15 = vsub.f32 %v2865_v8, %v2885_v13 }
 0xf04   :  { %v2888_v49 = vpop.xlane.xlu0 %2887 }
 0xf05   :  { %4727 = vpow2.f32 %v2908_v59  ;;  %v2910_v33 = vmul.f32 1.442695, %v2897_v15  ;;  %v2898_v47 = vsub.f32 %v2866_v14, %v2888_v49 }
 0xf06   :  { %v2891_v50 = vpop.xlane.xlu1 %2890 }
 0xf07   :  { %v4720_v31 = vpop.eup %4719  ;;  %4729 = vpow2.f32 %v2910_v33  ;;  %v2912_v52 = vmul.f32 1.442695, %v2898_v47  ;;  %v2899_v53 = vsub.f32 %v2867_v22, %v2891_v50  ;;  %v3965_v33 = vld [vmem:[#allocation14] ss:$0 sm:$0xff]  ;;  %v4799_v50 = vld [vmem:[#allocation28 + $0x10] sm:$0xff] }
 0xf08   :  { %v2916_v18 = vsel %vm266_vm0, %v4720_v31, 0.0 }
 0xf09   :  { %v4722_v20 = vpop.eup %4721  ;;  %4731 = vpow2.f32 %v2912_v52  ;;  %v2914_v21 = vmul.f32 1.442695, %v2899_v53  ;;  %2917 = vadd.xlane.f32.xlu0 %v2916_v18  ;;  %v4800_v52 = vld [vmem:[#allocation28] sm:$0xff] }
 0xf0a   :  { %v2919_v54 = vsel %vm266_vm0, %v4722_v20, 0.0 }
 0xf0b   :  { %v4724_v36 = vpop.eup %4723  ;;  %4733 = vpow2.f32 %v2914_v21  ;;  %2920 = vadd.xlane.f32.xlu1 %v2919_v54  ;;  %v4801_v54 = vld [vmem:[#allocation28 + $0x18] sm:$0xff] }
 0xf0c   :  { %v2922_v57 = vsel %vm266_vm0, %v4724_v36, 0.0 }
 0xf0d   :  { %v4726_v58 = vpop.eup %4725  ;;  %2923 = vadd.xlane.f32.xlu0 %v2922_v57  ;;  %v4802_v57 = vld [vmem:[#allocation28 + $0x8] sm:$0xff] }
 0xf0e   :  { %v2925_v29 = vsel %vm266_vm0, %v4726_v58, 0.0 }
 0xf0f   :  { %v4728_v60 = vpop.eup %4727  ;;  %2926 = vadd.xlane.f32.xlu1 %v2925_v29 }
 0xf10   :  { %v2928_v55 = vsel %vm266_vm0, %v4728_v60, 0.0 }
 0xf11   :  { %v4730_v62 = vpop.eup %4729  ;;  %2929 = vadd.xlane.f32.xlu0 %v2928_v55 }
 0xf12   :  { %v2931_v63 = vsel %vm266_vm0, %v4730_v62, 0.0 }
 0xf13   :  { %v4732_v46 = vpop.eup %4731  ;;  %2932 = vadd.xlane.f32.xlu1 %v2931_v63 }
 0xf14   :  { %v2934_v27 = vsel %vm266_vm0, %v4732_v46, 0.0 }
 0xf15   :  { %v4734_v7 = vpop.eup %4733  ;;  %2935 = vadd.xlane.f32.xlu0 %v2934_v27 }
 0xf16   :  { %v2937_v6 = vsel %vm266_vm0, %v4734_v7, 0.0 }
 0xf17   :  { %2938 = vadd.xlane.f32.xlu1 %v2937_v6 }
 0xf96   :  { %v2918_v1 = vpop.xlane.xlu0 %2917 }
 0xf97   :  { %4735 = vrcp.f32 %v2918_v1 }
 0xf98   :  { %v2921_v37 = vpop.xlane.xlu1 %2920 }
 0xf99   :  { %4737 = vrcp.f32 %v2921_v37 }
 0xf9a   :  { %v2924_v23 = vpop.xlane.xlu0 %2923 }
 0xf9b   :  { %4739 = vrcp.f32 %v2924_v23 }
 0xf9c   :  { %v2927_v4 = vpop.xlane.xlu1 %2926 }
 0xf9d   :  { %4741 = vrcp.f32 %v2927_v4 }
 0xf9e   :  { %v2930_v56 = vpop.xlane.xlu0 %2929 }
 0xf9f   :  { %4743 = vrcp.f32 %v2930_v56 }
 0xfa0   :  { %v2933_v5 = vpop.xlane.xlu1 %2932 }
 0xfa1   :  { %v4736_v17 = vpop.eup %4735  ;;  %4745 = vrcp.f32 %v2933_v5  ;;  %v4805_v5 = vld [vmem:[#allocation28 + $0x38] sm:$0xff] }
 0xfa2   :  { %v2936_v44 = vpop.xlane.xlu0 %2935  ;;  %v2948_v2 = vmul.f32 %v4736_v17, %v4720_v31 }
 0xfa3   :  { %v4738_v11 = vpop.eup %4737  ;;  %4747 = vrcp.f32 %v2936_v44  ;;  %v4806_v44 = vld [vmem:[#allocation28 + $0x28] sm:$0xff] }
 0xfa4   :  { %v2939_v42 = vpop.xlane.xlu1 %2938  ;;  %v2949_v9 = vmul.f32 %v4738_v11, %v4722_v20 }
 0xfa5   :  { %v4740_v12 = vpop.eup %4739  ;;  %4749 = vrcp.f32 %v2939_v42 }
 0xfa6   :  { %v2956_v16 = vpack.c.bf16 %v2949_v9, %v2948_v2  ;;  %v2950_v61 = vmul.f32 %v4740_v12, %v4724_v36 }
 0xfa7   :  { %v4742_v3 = vpop.eup %4741 }
 0xfa8   :  { %v2951_v14 = vmul.f32 %v4742_v3, %v4726_v58  ;;  %4450 = vmatprep.mubr.msk.bf16.mxu0 %vm266_vm0, %v2956_v16 }
 0xfa9   :  { %v4744_v8 = vpop.eup %4743 }
 0xfaa   :  { %v2957_v19 = vpack.c.bf16 %v2951_v14, %v2950_v61  ;;  %v2952_v24 = vmul.f32 %v4744_v8, %v4728_v60 }
 0xfab   :  { %v4746_v22 = vpop.eup %4745 }
 0xfac   :  { %4451 = vmatmul.mubr.msk.bf16.vlgmr.msra.gmra.mrb[64].mxu0 %vm266_vm0, %v2957_v19  ;;  %v2953_v25 = vmul.f32 %v4746_v22, %v4730_v62 }
 0xfad   :  { %v4748_v26 = vpop.eup %4747  ;;  %4463 = vmatpush3.bf16.msra.mxu0 %v4596_v0  ;;  %v4804_v0 = vld [vmem:[#allocation28 + $0x20] sm:$0xff] }
 0xfae   :  { %v2958_v30 = vpack.c.bf16 %v2953_v25, %v2952_v24  ;;  %v2954_v34 = vmul.f32 %v4748_v26, %v4732_v46 }
 0xfaf   :  { %v4750_v32 = vpop.eup %4749 }
 0xfb0   :  { %v2955_v35 = vmul.f32 %v4750_v32, %v4734_v7  ;;  %4458 = vmatprep.mubr.msk.bf16.mxu1 %vm266_vm0, %v2958_v30  ;;  %v4803_v7 = vld [vmem:[#allocation28 + $0x30] sm:$0xff] }
 0xfb2   :  { %v2959_v38 = vpack.c.bf16 %v2955_v35, %v2954_v34 }
 0xfb4   :  { %4459 = vmatmul.mubr.msk.bf16.vlgmr.msra.gmra.mrb[96].mxu1 %vm266_vm0, %v2959_v38 }
0x107f   :  { %v4452_v40 = vpop.f32.mrb[64].mxu0 }
0x1080   :  { %v3000_v43 = vpop.f32.mrb[65].mxu0 }
0x1081   :  { %v4453_v45 = vpop.f32.mrb[66].mxu0 }
0x1082   :  { %v3071_v28 = vpack.c.bf16 %v4453_v45, %v4452_v40  ;;  %v3003_v41 = vpop.f32.mrb[67].mxu0 }
0x1083   :  { %v3070_v48 = vpack.c.bf16 %v3003_v41, %v3000_v43 }
0x1085   :  { %4464 = vmatprep.mubr.msk.bf16.mxu0 %vm690_vm1, %v3070_v48 }
0x1086   :  { %4465 = vmatmul.mubr.msk.bf16.vlgmr.msra.gmra.mrb[32].mxu0 %vm690_vm1, %v3071_v28 }
0x1087   :  { %v4460_v39 = vpop.f32.mrb[96].mxu1 }
0x1088   :  { %v3055_v51 = vpop.f32.mrb[97].mxu1 }
0x1089   :  { %v4461_v10 = vpop.f32.mrb[98].mxu1 }
0x108a   :  { %v3073_v13 = vpack.c.bf16 %v4461_v10, %v4460_v39  ;;  %v3058_v59 = vpop.f32.mrb[99].mxu1 }
0x108b   :  { %v3072_v15 = vpack.c.bf16 %v3058_v59, %v3055_v51 }
0x108d   :  { %4468 = vmatprep.mubr.msk.bf16.mxu0 %vm690_vm1, %v3072_v15 }
0x108e   :  { %4469 = vmatmul.mubr.msk.bf16.gmra.mrb[36].mxu0 %vm690_vm1, %v3073_v13 }
0x1159   :  { %v4466_v49 = vpop.f32.mrb[32].mxu0 }
0x115a   :  { %v3129_v47 = vpop.f32.mrb[33].mxu0  ;;  %v3170_v31 = vadd.f32 %v4799_v50, %v4466_v49 }
0x115b   :  { %v3168_v53 = vadd.f32 %v4800_v52, %v3129_v47  ;;  %v4467_v18 = vpop.f32.mrb[34].mxu0 }
0x115c   :  { %v3132_v20 = vpop.f32.mrb[35].mxu0  ;;  %v3171_v36 = vadd.f32 %v4801_v54, %v4467_v18  ;;  %v5977_v29 = vadd.f32 %v3965_v33, %v3170_v31 }
0x115d   :  { %v5975_v21 = vadd.f32 %v3965_v33, %v3168_v53  ;;  %v3169_v58 = vadd.f32 %v4802_v57, %v3132_v20 }
0x115e   :  { %v5983_v62 = vadd.f32 %v3965_v33, %v3171_v36  ;;  %v3199_v23 = vsel %vm266_vm0, %v5977_v29, 0.0 }
0x115f   :  { %v5979_v60 = vadd.f32 %v3965_v33, %v3169_v58  ;;  %v3193_v55 = vsel %vm266_vm0, %v5975_v21, 0.0 }
0x1160   :  { %3194 = vadd.xlane.f32.xlu0 %v3193_v55  ;;  %v3202_v42 = vsel %vm266_vm0, %v5983_v62, 0.0 }
0x1161   :  { %v4470_v63 = vpop.f32.mrb[36].mxu0  ;;  %v3196_v46 = vsel %vm266_vm0, %v5979_v60, 0.0 }
0x1162   :  { %3197 = vadd.xlane.f32.xlu1 %v3196_v46  ;;  %v3145_v27 = vpop.f32.mrb[37].mxu0  ;;  %v3174_v6 = vadd.f32 %v4803_v7, %v4470_v63  ;;  %v4597_v7 = vld [vmem:[#allocation19] sm:$0xff]  }
0x1163   :  { %v3172_v1 = vadd.f32 %v4804_v0, %v3145_v27  ;;  %v4471_v37 = vpop.f32.mrb[38].mxu0  ;;  %4472 = vmatprep.subr.bf16.mxu1 %v4597_v7 }
0x1164   :  { %3200 = vadd.xlane.f32.xlu0 %v3199_v23  ;;  %v3148_v4 = vpop.f32.mrb[39].mxu0  ;;  %v3175_v17 = vadd.f32 %v4805_v5, %v4471_v37  ;;  %v5993_v2 = vadd.f32 %v3965_v33, %v3174_v6  ;;  %4473 = vmatpush3.bf16.msra.mxu1 %v4597_v7  ;;  %v4598_v6 = vld [vmem:[#allocation19 + $0x8] sm:$0xff]  }
0x1165   :  { %v5989_v56 = vadd.f32 %v3965_v33, %v3172_v1  ;;  %v3173_v11 = vadd.f32 %v4806_v44, %v3148_v4  ;;  %4474 = vmatprep.subr.bf16.mxu1 %v4598_v6 }
0x1166   :  { %3203 = vadd.xlane.f32.xlu1 %v3202_v42  ;;  %v5999_v16 = vadd.f32 %v3965_v33, %v3175_v17  ;;  %v3211_v61 = vsel %vm266_vm0, %v5993_v2, 0.0 }
0x1167   :  { %v5995_v9 = vadd.f32 %v3965_v33, %v3173_v11  ;;  %v3205_v12 = vsel %vm266_vm0, %v5989_v56, 0.0 }
0x1168   :  { %3206 = vadd.xlane.f32.xlu0 %v3205_v12  ;;  %v3214_v14 = vsel %vm266_vm0, %v5999_v16, 0.0  ;;  %4475 = vmatpush3.bf16.msra.mxu1 %v4598_v6 }
0x1169   :  { %v3208_v3 = vsel %vm266_vm0, %v5995_v9, 0.0 }
0x116a   :  { %3209 = vadd.xlane.f32.xlu1 %v3208_v3 }
0x116c   :  { %3212 = vadd.xlane.f32.xlu0 %v3211_v61 }
0x116e   :  { %3215 = vadd.xlane.f32.xlu1 %v3214_v14 }
0x11ed   :  { %v3195_v8 = vpop.xlane.xlu0 %3194 }
0x11ee   :  { %v3217_v19 = vmul.f32 0.03125, %v3195_v8 }
0x11ef   :  { %v3198_v22 = vpop.xlane.xlu1 %3197 }
0x11f0   :  { %v6008_v24 = vsub.f32 %v5975_v21, %v3217_v19  ;;  %v3218_v25 = vmul.f32 0.03125, %v3198_v22 }
0x11f1   :  { %v3201_v26 = vpop.xlane.xlu0 %3200 }
0x11f2   :  { %v6011_v30 = vsub.f32 %v5979_v60, %v3218_v25  ;;  %v3219_v32 = vmul.f32 0.03125, %v3201_v26  ;;  %v3233_v34 = vmul.f32 %v6008_v24, %v6008_v24 }
0x11f3   :  { %v3204_v35 = vpop.xlane.xlu1 %3203 }
0x11f4   :  { %v6016_v38 = vsub.f32 %v5977_v29, %v3219_v32  ;;  %v3220_v40 = vmul.f32 0.03125, %v3204_v35  ;;  %v3241_v43 = vsel %vm266_vm0, %v3233_v34, 0.0  ;;  %v3234_v45 = vmul.f32 %v6011_v30, %v6011_v30 }
0x11f5   :  { %3242 = vadd.xlane.f32.xlu0 %v3241_v43  ;;  %v3207_v28 = vpop.xlane.xlu0 %3206 }
0x11f6   :  { %v6022_v41 = vsub.f32 %v5983_v62, %v3220_v40  ;;  %v3221_v48 = vmul.f32 0.03125, %v3207_v28  ;;  %v3244_v39 = vsel %vm266_vm0, %v3234_v45, 0.0  ;;  %v3235_v51 = vmul.f32 %v6016_v38, %v6016_v38  ;;  %v3966_v40 = vld [vmem:[#allocation16] ss:$0 sm:$0xff] }
0x11f7   :  { %3245 = vadd.xlane.f32.xlu1 %v3244_v39  ;;  %v3210_v10 = vpop.xlane.xlu1 %3209 }
0x11f8   :  { %v6028_v13 = vsub.f32 %v5989_v56, %v3221_v48  ;;  %v3222_v59 = vmul.f32 0.03125, %v3210_v10  ;;  %v3247_v15 = vsel %vm266_vm0, %v3235_v51, 0.0  ;;  %v3236_v49 = vmul.f32 %v6022_v41, %v6022_v41 }
0x11f9   :  { %3248 = vadd.xlane.f32.xlu0 %v3247_v15  ;;  %v3213_v33 = vpop.xlane.xlu0 %3212  ;;  %v3967_v15 = vld [vmem:[#allocation17] ss:$0 sm:$0xff] }
0x11fa   :  { %v6034_v47 = vsub.f32 %v5995_v9, %v3222_v59  ;;  %v3223_v50 = vmul.f32 0.03125, %v3213_v33  ;;  %v3250_v31 = vsel %vm266_vm0, %v3236_v49, 0.0  ;;  %v3237_v52 = vmul.f32 %v6028_v13, %v6028_v13 }
0x11fb   :  { %3251 = vadd.xlane.f32.xlu1 %v3250_v31  ;;  %v3216_v53 = vpop.xlane.xlu1 %3215 }
0x11fc   :  { %v6040_v18 = vsub.f32 %v5993_v2, %v3223_v50  ;;  %v3224_v20 = vmul.f32 0.03125, %v3216_v53  ;;  %v3253_v54 = vsel %vm266_vm0, %v3237_v52, 0.0  ;;  %v3238_v36 = vmul.f32 %v6034_v47, %v6034_v47 }
0x11fd   :  { %3254 = vadd.xlane.f32.xlu0 %v3253_v54 }
0x11fe   :  { %v6046_v57 = vsub.f32 %v5999_v16, %v3224_v20  ;;  %v3256_v58 = vsel %vm266_vm0, %v3238_v36, 0.0  ;;  %v3239_v55 = vmul.f32 %v6040_v18, %v6040_v18 }
0x11ff   :  { %3257 = vadd.xlane.f32.xlu1 %v3256_v58 }
0x1200   :  { %v3259_v63 = vsel %vm266_vm0, %v3239_v55, 0.0  ;;  %v3240_v46 = vmul.f32 %v6046_v57, %v6046_v57 }
0x1201   :  { %3260 = vadd.xlane.f32.xlu0 %v3259_v63 }
0x1202   :  { %v3262_v27 = vsel %vm266_vm0, %v3240_v46, 0.0 }
0x1203   :  { %3263 = vadd.xlane.f32.xlu1 %v3262_v27 }
0x1282   :  { %v3243_v0 = vpop.xlane.xlu0 %3242 }
0x1283   :  { %v3265_v1 = vmul.f32 0.03125, %v3243_v0 }
0x1284   :  { %v3246_v37 = vpop.xlane.xlu1 %3245 }
0x1285   :  { %v3273_v23 = vadd.f32 1e-05, %v3265_v1  ;;  %v3266_v4 = vmul.f32 0.03125, %v3246_v37 }
0x1286   :  { %v3249_v5 = vpop.xlane.xlu0 %3248 }
0x1287   :  { %4751 = vrsqrt.f32 %v3273_v23  ;;  %v3274_v17 = vadd.f32 1e-05, %v3266_v4  ;;  %v3267_v44 = vmul.f32 0.03125, %v3249_v5 }
0x1288   :  { %v3252_v11 = vpop.xlane.xlu1 %3251 }
0x1289   :  { %4753 = vrsqrt.f32 %v3274_v17  ;;  %v3275_v42 = vadd.f32 1e-05, %v3267_v44  ;;  %v3268_v12 = vmul.f32 0.03125, %v3252_v11  ;;  %v4600_v11 = vld [vmem:[#allocation22 + $0x8] sm:$0xff]  }
0x128a   :  { %v3255_v3 = vpop.xlane.xlu0 %3254 }
0x128b   :  { %4755 = vrsqrt.f32 %v3275_v42  ;;  %v3276_v61 = vadd.f32 1e-05, %v3268_v12  ;;  %v3269_v14 = vmul.f32 0.03125, %v3255_v3  ;;  %v4602_v42 = vld [vmem:[#allocation22 + $0x18] sm:$0xff]   ;;  %v4603_v12 = vld [vmem:[#allocation22 + $0x20] sm:$0xff]   ;;  %v4604_v3 = vld [vmem:[#allocation22 + $0x28] sm:$0xff]  }
0x128c   :  { %v3258_v8 = vpop.xlane.xlu1 %3257 }
0x128d   :  { %4757 = vrsqrt.f32 %v3276_v61  ;;  %v3277_v19 = vadd.f32 1e-05, %v3269_v14  ;;  %v3270_v22 = vmul.f32 0.03125, %v3258_v8  ;;  %v4605_v61 = vld [vmem:[#allocation22 + $0x30] sm:$0xff]   ;;  %v4606_v14 = vld [vmem:[#allocation22 + $0x38] sm:$0xff]  }
0x128e   :  { %v3261_v25 = vpop.xlane.xlu0 %3260  ;;  %v3968_v8 = vld [vmem:[#allocation20] ss:$0 sm:$0xff] }
0x128f   :  { %4759 = vrsqrt.f32 %v3277_v19  ;;  %v3278_v26 = vadd.f32 1e-05, %v3270_v22  ;;  %v3271_v32 = vmul.f32 0.03125, %v3261_v25 }
0x1290   :  { %v3264_v34 = vpop.xlane.xlu1 %3263 }
0x1291   :  { %v4752_v35 = vpop.eup %4751  ;;  %4761 = vrsqrt.f32 %v3278_v26  ;;  %v3279_v43 = vadd.f32 1e-05, %v3271_v32  ;;  %v3272_v45 = vmul.f32 0.03125, %v3264_v34 }
0x1292   :  { %v3289_v28 = vmul.f32 %v4752_v35, %v6008_v24 }
0x1293   :  { %v4754_v48 = vpop.eup %4753  ;;  %4763 = vrsqrt.f32 %v3279_v43  ;;  %v3280_v39 = vadd.f32 1e-05, %v3272_v45 }
0x1294   :  { %v3290_v51 = vmul.f32 %v4754_v48, %v6011_v30  ;;  %v3303_v10 = vmul.f32 %v3966_v40, %v3289_v28 }
0x1295   :  { %v4756_v59 = vpop.eup %4755  ;;  %4765 = vrsqrt.f32 %v3280_v39 }
0x1296   :  { %v3291_v49 = vmul.f32 %v4756_v59, %v6016_v38  ;;  %v3304_v33 = vmul.f32 %v3966_v40, %v3290_v51  ;;  %v3317_v53 = vadd.f32 %v3967_v15, %v3303_v10 }
0x1297   :  { %v4758_v50 = vpop.eup %4757 }
0x1298   :  { %v3305_v31 = vmul.f32 %v3966_v40, %v3291_v49  ;;  %v3292_v52 = vmul.f32 %v4758_v50, %v6022_v41  ;;  %v3318_v20 = vadd.f32 %v3967_v15, %v3304_v33 }
0x1299   :  { %v4760_v54 = vpop.eup %4759 }
0x129a   :  { %v3306_v24 = vmul.f32 %v3966_v40, %v3292_v52  ;;  %v3293_v36 = vmul.f32 %v4760_v54, %v6028_v13  ;;  %v3325_v58 = vpack.c.bf16 %v3318_v20, %v3317_v53  ;;  %v3319_v63 = vadd.f32 %v3967_v15, %v3305_v31 }
0x129b   :  { %v4762_v55 = vpop.eup %4761 }
0x129c   :  { %v3294_v30 = vmul.f32 %v4762_v55, %v6034_v47  ;;  %4476 = vmatprep.mubr.msk.bf16.mxu1 %vm266_vm0, %v3325_v58  ;;  %v3320_v46 = vadd.f32 %v3967_v15, %v3306_v24  ;;  %v3307_v38 = vmul.f32 %v3966_v40, %v3293_v36 }
0x129d   :  { %v4764_v27 = vpop.eup %4763 }
0x129e   :  { %v3295_v7 = vmul.f32 %v4764_v27, %v6040_v18  ;;  %v3326_v6 = vpack.c.bf16 %v3320_v46, %v3319_v63  ;;  %v3308_v41 = vmul.f32 %v3966_v40, %v3294_v30  ;;  %v3321_v13 = vadd.f32 %v3967_v15, %v3307_v38  ;;  %v4599_v18 = vld [vmem:[#allocation22] sm:$0xff]  }
0x129f   :  { %v4766_v0 = vpop.eup %4765  ;;  %4484 = vmatprep.subr.bf16.mxu0 %v4599_v18 }
0x12a0   :  { %v3296_v1 = vmul.f32 %v4766_v0, %v6046_v57  ;;  %4477 = vmatmul.mubr.msk.bf16.vlgmr.msra.gmra.mrb[100].mxu1 %vm266_vm0, %v3326_v6  ;;  %v3322_v37 = vadd.f32 %v3967_v15, %v3308_v41  ;;  %v3309_v23 = vmul.f32 %v3966_v40, %v3295_v7  ;;  %4485 = vmatpush3.bf16.msra.mxu0 %v4599_v18  ;;  %v4601_v57 = vld [vmem:[#allocation22 + $0x10] sm:$0xff]  }
0x12a1   :  { %4486 = vmatprep.subr.bf16.mxu0 %v4600_v11 }
0x12a2   :  { %v3327_v4 = vpack.c.bf16 %v3322_v37, %v3321_v13  ;;  %v3310_v47 = vmul.f32 %v3966_v40, %v3296_v1  ;;  %v3323_v5 = vadd.f32 %v3967_v15, %v3309_v23 }
0x12a4   :  { %4480 = vmatprep.mubr.msk.bf16.mxu1 %vm266_vm0, %v3327_v4  ;;  %v3324_v17 = vadd.f32 %v3967_v15, %v3310_v47  ;;  %4487 = vmatpush3.bf16.msra.mxu0 %v4600_v11 }
0x12a5   :  { %4488 = vmatprep.subr.bf16.mxu0 %v4601_v57 }
0x12a6   :  { %v3328_v44 = vpack.c.bf16 %v3324_v17, %v3323_v5 }
0x12a8   :  { %4481 = vmatmul.mubr.msk.bf16.gmra.mrb[104].mxu1 %vm266_vm0, %v3328_v44  ;;  %4489 = vmatpush3.bf16.msra.mxu0 %v4601_v57 }
0x12a9   :  { %4490 = vmatprep.subr.bf16.mxu0 %v4602_v42 }
0x12ac   :  { %4491 = vmatpush3.bf16.msra.mxu0 %v4602_v42 }
0x12ad   :  { %4492 = vmatprep.subr.bf16.mxu0 %v4603_v12 }
0x12b0   :  { %4493 = vmatpush3.bf16.msra.mxu0 %v4603_v12 }
0x12b1   :  { %4494 = vmatprep.subr.bf16.mxu0 %v4604_v3 }
0x12b4   :  { %4495 = vmatpush3.bf16.msra.mxu0 %v4604_v3 }
0x12b5   :  { %4496 = vmatprep.subr.bf16.mxu0 %v4605_v61 }
0x12b8   :  { %4497 = vmatpush3.bf16.msra.mxu0 %v4605_v61 }
0x12b9   :  { %4498 = vmatprep.subr.bf16.mxu0 %v4606_v14 }
0x12bc   :  { %4499 = vmatpush3.bf16.msra.mxu0 %v4606_v14 }
0x1373   :  { %v4478_v19 = vpop.f32.mrb[100].mxu1 }
0x1374   :  { %v6067_v22 = vadd.f32 %v4478_v19, %v3968_v8  ;;  %v3398_v25 = vpop.f32.mrb[101].mxu1 }
0x1375   :  { %v6069_v26 = vadd.f32 %v3968_v8, %v3398_v25  ;;  %v4479_v32 = vpop.f32.mrb[102].mxu1 }
0x1376   :  { %v3431_v34 = vmul.f32 %v6067_v22, %v6067_v22  ;;  %v6073_v35 = vadd.f32 %v4479_v32, %v3968_v8  ;;  %v3401_v40 = vpop.f32.mrb[103].mxu1 }
0x1377   :  { %v3429_v43 = vmul.f32 %v6069_v26, %v6069_v26  ;;  %v6077_v45 = vadd.f32 %v3968_v8, %v3401_v40 }
0x1378   :  { %v3439_v28 = vmul.f32 %v3431_v34, %v6067_v22  ;;  %v3432_v48 = vmul.f32 %v6073_v35, %v6073_v35 }
0x1379   :  { %v3437_v39 = vmul.f32 %v3429_v43, %v6069_v26  ;;  %v3430_v51 = vmul.f32 %v6077_v45, %v6077_v45 }
0x137a   :  { %v3447_v10 = vmul.f32 0.044715, %v3439_v28  ;;  %v3440_v59 = vmul.f32 %v3432_v48, %v6073_v35 }
0x137b   :  { %v3445_v15 = vmul.f32 0.044715, %v3437_v39  ;;  %v3438_v49 = vmul.f32 %v3430_v51, %v6077_v45  ;;  %v4482_v33 = vpop.f32.mrb[104].mxu1 }
0x137c   :  { %v3455_v50 = vadd.f32 %v3447_v10, %v6067_v22  ;;  %v3448_v31 = vmul.f32 0.044715, %v3440_v59  ;;  %v6088_v52 = vadd.f32 %v4482_v33, %v3968_v8  ;;  %v3414_v53 = vpop.f32.mrb[105].mxu1 }
0x137d   :  { %v3453_v20 = vadd.f32 %v3445_v15, %v6069_v26  ;;  %v3446_v54 = vmul.f32 0.044715, %v3438_v49  ;;  %v6091_v24 = vadd.f32 %v3968_v8, %v3414_v53  ;;  %v4483_v36 = vpop.f32.mrb[106].mxu1 }
0x137e   :  { %v3463_v58 = vmul.f32 0.7978846, %v3455_v50  ;;  %v3456_v55 = vadd.f32 %v3448_v31, %v6073_v35  ;;  %v3435_v30 = vmul.f32 %v6088_v52, %v6088_v52  ;;  %v6096_v63 = vadd.f32 %v4483_v36, %v3968_v8  ;;  %v3417_v46 = vpop.f32.mrb[107].mxu1 }
0x137f   :  { %v3461_v38 = vmul.f32 0.7978846, %v3453_v20  ;;  %v3454_v27 = vadd.f32 %v3446_v54, %v6077_v45  ;;  %v3433_v7 = vmul.f32 %v6091_v24, %v6091_v24  ;;  %v6101_v6 = vadd.f32 %v3968_v8, %v3417_v46 }
0x1380   :  { %4767 = vtanh.f32 %v3463_v58  ;;  %v3464_v41 = vmul.f32 0.7978846, %v3456_v55  ;;  %v3443_v0 = vmul.f32 %v3435_v30, %v6088_v52  ;;  %v3436_v1 = vmul.f32 %v6096_v63, %v6096_v63 }
0x1381   :  { %4769 = vtanh.f32 %v3461_v38  ;;  %v3462_v13 = vmul.f32 0.7978846, %v3454_v27  ;;  %v3441_v37 = vmul.f32 %v3433_v7, %v6091_v24  ;;  %v3434_v23 = vmul.f32 %v6101_v6, %v6101_v6 }
0x1382   :  { %4771 = vtanh.f32 %v3464_v41  ;;  %v3451_v4 = vmul.f32 0.044715, %v3443_v0  ;;  %v3444_v47 = vmul.f32 %v3436_v1, %v6096_v63 }
0x1383   :  { %4773 = vtanh.f32 %v3462_v13  ;;  %v3449_v5 = vmul.f32 0.044715, %v3441_v37  ;;  %v3442_v17 = vmul.f32 %v3434_v23, %v6101_v6  ;;  %v3983_v23 = vld [vmem:[#allocation23] ss:$0 sm:$0xff] }
0x1384   :  { %v3459_v44 = vadd.f32 %v3451_v4, %v6088_v52  ;;  %v3452_v18 = vmul.f32 0.044715, %v3444_v47 }
0x1385   :  { %v3457_v11 = vadd.f32 %v3449_v5, %v6091_v24  ;;  %v3450_v57 = vmul.f32 0.044715, %v3442_v17 }
0x1386   :  { %v3467_v42 = vmul.f32 0.7978846, %v3459_v44  ;;  %v3460_v12 = vadd.f32 %v3452_v18, %v6096_v63 }
0x1387   :  { %v3465_v3 = vmul.f32 0.7978846, %v3457_v11  ;;  %v3458_v61 = vadd.f32 %v3450_v57, %v6101_v6 }
0x1388   :  { %4775 = vtanh.f32 %v3467_v42  ;;  %v3468_v14 = vmul.f32 0.7978846, %v3460_v12 }
0x1389   :  { %4777 = vtanh.f32 %v3465_v3  ;;  %v3466_v8 = vmul.f32 0.7978846, %v3458_v61 }
0x138a   :  { %v4768_v19 = vpop.eup %4767  ;;  %4779 = vtanh.f32 %v3468_v14 }
0x138b   :  { %v4770_v25 = vpop.eup %4769  ;;  %v3479_v32 = vadd.f32 1.0, %v4768_v19  ;;  %4781 = vtanh.f32 %v3466_v8 }
0x138c   :  { %v4772_v34 = vpop.eup %4771  ;;  %v3477_v40 = vadd.f32 1.0, %v4770_v25 }
0x138d   :  { %v4774_v43 = vpop.eup %4773  ;;  %v3487_v28 = vmul.f32 0.5, %v3479_v32  ;;  %v3480_v48 = vadd.f32 1.0, %v4772_v34 }
0x138e   :  { %v3478_v39 = vadd.f32 1.0, %v4774_v43  ;;  %v3485_v51 = vmul.f32 0.5, %v3477_v40 }
0x138f   :  { %v3488_v10 = vmul.f32 0.5, %v3480_v48  ;;  %v3495_v15 = vmul.f32 %v3487_v28, %v6067_v22 }
0x1390   :  { %v3486_v59 = vmul.f32 0.5, %v3478_v39  ;;  %v3493_v50 = vmul.f32 %v3485_v51, %v6069_v26 }
0x1391   :  { %v3496_v49 = vmul.f32 %v3488_v10, %v6073_v35 }
0x1392   :  { %v4776_v33 = vpop.eup %4775  ;;  %v3494_v31 = vmul.f32 %v3486_v59, %v6077_v45 }
0x1393   :  { %v4778_v53 = vpop.eup %4777  ;;  %v3502_v20 = vpack.c.bf16 %v3496_v49, %v3495_v15  ;;  %v3483_v54 = vadd.f32 1.0, %v4776_v33 }
0x1394   :  { %v4780_v36 = vpop.eup %4779  ;;  %v3501_v58 = vpack.c.bf16 %v3494_v31, %v3493_v50  ;;  %v3481_v55 = vadd.f32 1.0, %v4778_v53 }
0x1395   :  { %v4782_v30 = vpop.eup %4781  ;;  %v3484_v46 = vadd.f32 1.0, %v4780_v36  ;;  %v3491_v38 = vmul.f32 0.5, %v3483_v54 }
0x1396   :  { %4500 = vmatprep.mubr.bf16.mxu0 %v3501_v58  ;;  %v3482_v27 = vadd.f32 1.0, %v4782_v30  ;;  %v3489_v7 = vmul.f32 0.5, %v3481_v55 }
0x1397   :  { %4501 = vmatmul.mubr.bf16.vlgmr.msra.gmra.mrb[68].mxu0 %v3502_v20  ;;  %v3492_v22 = vmul.f32 0.5, %v3484_v46  ;;  %v3499_v41 = vmul.f32 %v3491_v38, %v6088_v52 }
0x1398   :  { %v3490_v35 = vmul.f32 0.5, %v3482_v27  ;;  %v3497_v45 = vmul.f32 %v3489_v7, %v6091_v24 }
0x1399   :  { %v3500_v26 = vmul.f32 %v3492_v22, %v6096_v63 }
0x139a   :  { %v3498_v0 = vmul.f32 %v3490_v35, %v6101_v6 }
0x139b   :  { %v3504_v1 = vpack.c.bf16 %v3500_v26, %v3499_v41 }
0x139c   :  { %v3503_v13 = vpack.c.bf16 %v3498_v0, %v3497_v45 }
0x139e   :  { %4504 = vmatprep.mubr.bf16.mxu0 %v3503_v13 }
0x139f   :  { %4505 = vmatmul.mubr.bf16.gmra.mrb[72].mxu0 %v3504_v1 }
0x146a   :  { %v4502_v37 = vpop.f32.mrb[68].mxu0 }
0x146b   :  { %v3636_v4 = vadd.f32 %v4502_v37, %v5977_v29  ;;  %v3603_v47 = vpop.f32.mrb[69].mxu0 }
0x146c   :  { %v3634_v5 = vadd.f32 %v3603_v47, %v5975_v21  ;;  %v4503_v17 = vpop.f32.mrb[70].mxu0 }
0x146d   :  { %v3637_v52 = vadd.f32 %v4503_v17, %v5983_v62  ;;  %v3606_v44 = vpop.f32.mrb[71].mxu0  ;;  %v3651_v63 = vadd.f32 %v3983_v23, %v3636_v4 }
0x146e   :  { %v3635_v24 = vadd.f32 %v3606_v44, %v5979_v60  ;;  %v3649_v18 = vadd.f32 %v3983_v23, %v3634_v5 }
0x146f   :  { %v3680_v6 = vsel %vm266_vm0, %v3651_v63, 0.0  ;;  %v3652_v11 = vadd.f32 %v3983_v23, %v3637_v52 }
0x1470   :  { %3681 = vadd.xlane.f32.xlu0 %v3680_v6  ;;  %v3650_v57 = vadd.f32 %v3983_v23, %v3635_v24  ;;  %v3674_v21 = vsel %vm266_vm0, %v3649_v18, 0.0 }
0x1471   :  { %v3683_v42 = vsel %vm266_vm0, %v3652_v11, 0.0 }
0x1472   :  { %3684 = vadd.xlane.f32.xlu1 %v3683_v42  ;;  %v4506_v29 = vpop.f32.mrb[72].mxu0  ;;  %v3677_v14 = vsel %vm266_vm0, %v3650_v57, 0.0 }
0x1473   :  { %v3619_v12 = vpop.f32.mrb[73].mxu0  ;;  %v3640_v3 = vadd.f32 %v4506_v29, %v5993_v2 }
0x1474   :  { %v3638_v62 = vadd.f32 %v3619_v12, %v5989_v56  ;;  %3675 = vadd.xlane.f32.xlu0 %v3674_v21  ;;  %v4507_v61 = vpop.f32.mrb[74].mxu0 }
0x1475   :  { %v3622_v60 = vpop.f32.mrb[75].mxu0  ;;  %v3641_v19 = vadd.f32 %v4507_v61, %v5999_v16  ;;  %v3655_v32 = vadd.f32 %v3983_v23, %v3640_v3 }
0x1476   :  { %v3653_v8 = vadd.f32 %v3983_v23, %v3638_v62  ;;  %v3639_v25 = vadd.f32 %v3622_v60, %v5995_v9  ;;  %3678 = vadd.xlane.f32.xlu1 %v3677_v14 }
0x1477   :  { %v3656_v43 = vadd.f32 %v3983_v23, %v3641_v19  ;;  %v3692_v56 = vsel %vm266_vm0, %v3655_v32, 0.0 }
0x1478   :  { %v3654_v34 = vadd.f32 %v3983_v23, %v3639_v25  ;;  %v3686_v40 = vsel %vm266_vm0, %v3653_v8, 0.0 }
0x1479   :  { %3687 = vadd.xlane.f32.xlu0 %v3686_v40  ;;  %v3695_v28 = vsel %vm266_vm0, %v3656_v43, 0.0 }
0x147a   :  { %v3689_v2 = vsel %vm266_vm0, %v3654_v34, 0.0 }
0x147b   :  { %3690 = vadd.xlane.f32.xlu1 %v3689_v2  ;;  %v3984_v2 = vld [vmem:[#allocation25] ss:$0 sm:$0xff] }
0x147d   :  { %3693 = vadd.xlane.f32.xlu0 %v3692_v56 }
0x147f   :  { %3696 = vadd.xlane.f32.xlu1 %v3695_v28 }
0x14fd   :  { %v3682_v48 = vpop.xlane.xlu0 %3681 }
0x14fe   :  { %v3700_v16 = vmul.f32 0.03125, %v3682_v48 }
0x14ff   :  { %v3685_v39 = vpop.xlane.xlu1 %3684 }
0x1500   :  { %v6139_v9 = vsub.f32 %v3651_v63, %v3700_v16  ;;  %v3701_v51 = vmul.f32 0.03125, %v3685_v39 }
0x1501   :  { %v3676_v10 = vpop.xlane.xlu0 %3675 }
0x1502   :  { %v6141_v59 = vsub.f32 %v3652_v11, %v3701_v51  ;;  %v3698_v15 = vmul.f32 0.03125, %v3676_v10  ;;  %v3716_v49 = vmul.f32 %v6139_v9, %v6139_v9  ;;  %v3985_v51 = vld [vmem:[#allocation26] ss:$0 sm:$0xff] }
0x1503   :  { %v3679_v33 = vpop.xlane.xlu1 %3678 }
0x1504   :  { %v6145_v50 = vsub.f32 %v3649_v18, %v3698_v15  ;;  %v3699_v31 = vmul.f32 0.03125, %v3679_v33  ;;  %v3728_v53 = vsel %vm266_vm0, %v3716_v49, 0.0  ;;  %v3717_v20 = vmul.f32 %v6141_v59, %v6141_v59 }
0x1505   :  { %3729 = vadd.xlane.f32.xlu0 %v3728_v53 }
0x1506   :  { %v6150_v54 = vsub.f32 %v3650_v57, %v3699_v31  ;;  %v3688_v36 = vpop.xlane.xlu0 %3687  ;;  %v3731_v58 = vsel %vm266_vm0, %v3717_v20, 0.0  ;;  %v3714_v55 = vmul.f32 %v6145_v50, %v6145_v50 }
0x1507   :  { %v3702_v30 = vmul.f32 0.03125, %v3688_v36  ;;  %3732 = vadd.xlane.f32.xlu1 %v3731_v58 }
0x1508   :  { %v3691_v46 = vpop.xlane.xlu1 %3690  ;;  %v3722_v38 = vsel %vm266_vm0, %v3714_v55, 0.0  ;;  %v3715_v27 = vmul.f32 %v6150_v54, %v6150_v54 }
0x1509   :  { %v6158_v7 = vsub.f32 %v3653_v8, %v3702_v30  ;;  %v3703_v22 = vmul.f32 0.03125, %v3691_v46  ;;  %3723 = vadd.xlane.f32.xlu0 %v3722_v38 }
0x150a   :  { %v3694_v35 = vpop.xlane.xlu0 %3693  ;;  %v3725_v41 = vsel %vm266_vm0, %v3715_v27, 0.0 }
0x150b   :  { %v6161_v26 = vsub.f32 %v3654_v34, %v3703_v22  ;;  %v3704_v45 = vmul.f32 0.03125, %v3694_v35  ;;  %3726 = vadd.xlane.f32.xlu1 %v3725_v41  ;;  %v3718_v0 = vmul.f32 %v6158_v7, %v6158_v7 }
0x150c   :  { %v3697_v1 = vpop.xlane.xlu1 %3696 }
0x150d   :  { %v6165_v13 = vsub.f32 %v3655_v32, %v3704_v45  ;;  %v3705_v37 = vmul.f32 0.03125, %v3697_v1  ;;  %v3734_v23 = vsel %vm266_vm0, %v3718_v0, 0.0  ;;  %v3719_v4 = vmul.f32 %v6161_v26, %v6161_v26 }
0x150e   :  { %3735 = vadd.xlane.f32.xlu0 %v3734_v23 }
0x150f   :  { %v6170_v47 = vsub.f32 %v3656_v43, %v3705_v37  ;;  %v3737_v5 = vsel %vm266_vm0, %v3719_v4, 0.0  ;;  %v3720_v17 = vmul.f32 %v6165_v13, %v6165_v13 }
0x1510   :  { %3738 = vadd.xlane.f32.xlu1 %v3737_v5 }
0x1511   :  { %v3740_v52 = vsel %vm266_vm0, %v3720_v17, 0.0  ;;  %v3721_v44 = vmul.f32 %v6170_v47, %v6170_v47 }
0x1512   :  { %3741 = vadd.xlane.f32.xlu0 %v3740_v52 }
0x1513   :  { %v3743_v63 = vsel %vm266_vm0, %v3721_v44, 0.0 }
0x1514   :  { %3744 = vadd.xlane.f32.xlu1 %v3743_v63 }
0x1592   :  { %v3730_v24 = vpop.xlane.xlu0 %3729 }
0x1593   :  { %v3748_v18 = vmul.f32 0.03125, %v3730_v24 }
0x1594   :  { %v3733_v6 = vpop.xlane.xlu1 %3732 }
0x1595   :  { %v3756_v11 = vadd.f32 1e-05, %v3748_v18  ;;  %v3749_v57 = vmul.f32 0.03125, %v3733_v6 }
0x1596   :  { %v3724_v42 = vpop.xlane.xlu0 %3723 }
0x1597   :  { %4783 = vrsqrt.f32 %v3756_v11  ;;  %v3757_v29 = vadd.f32 1e-05, %v3749_v57  ;;  %v3746_v12 = vmul.f32 0.03125, %v3724_v42 }
0x1598   :  { %v3727_v21 = vpop.xlane.xlu1 %3726 }
0x1599   :  { %4785 = vrsqrt.f32 %v3757_v29  ;;  %v3754_v3 = vadd.f32 1e-05, %v3746_v12  ;;  %v3747_v62 = vmul.f32 0.03125, %v3727_v21 }
0x159b   :  { %4787 = vrsqrt.f32 %v3754_v3  ;;  %v3755_v61 = vadd.f32 1e-05, %v3747_v62  ;;  %v3736_v60 = vpop.xlane.xlu0 %3735 }
0x159c   :  { %v3750_v14 = vmul.f32 0.03125, %v3736_v60 }
0x159d   :  { %4789 = vrsqrt.f32 %v3755_v61  ;;  %v3739_v8 = vpop.xlane.xlu1 %3738 }
0x159e   :  { %v3758_v19 = vadd.f32 1e-05, %v3750_v14  ;;  %v3751_v25 = vmul.f32 0.03125, %v3739_v8 }
0x159f   :  { %v3742_v32 = vpop.xlane.xlu0 %3741 }
0x15a0   :  { %4791 = vrsqrt.f32 %v3758_v19  ;;  %v3759_v34 = vadd.f32 1e-05, %v3751_v25  ;;  %v3752_v40 = vmul.f32 0.03125, %v3742_v32 }
0x15a1   :  { %v4784_v43 = vpop.eup %4783  ;;  %v3745_v56 = vpop.xlane.xlu1 %3744 }
0x15a2   :  { %v3772_v28 = vmul.f32 %v4784_v43, %v6139_v9  ;;  %4793 = vrsqrt.f32 %v3759_v34  ;;  %v3760_v48 = vadd.f32 1e-05, %v3752_v40  ;;  %v3753_v16 = vmul.f32 0.03125, %v3745_v56 }
0x15a3   :  { %v4786_v39 = vpop.eup %4785 }
0x15a4   :  { %v3786_v10 = vmul.f32 %v3984_v2, %v3772_v28  ;;  %v3773_v15 = vmul.f32 %v4786_v39, %v6141_v59  ;;  %4795 = vrsqrt.f32 %v3760_v48  ;;  %v3761_v49 = vadd.f32 1e-05, %v3753_v16 }
0x15a5   :  { %v4788_v33 = vpop.eup %4787 }
0x15a6   :  { %v3800_v31 = vadd.f32 %v3985_v51, %v3786_v10  ;;  %v3787_v53 = vmul.f32 %v3984_v2, %v3773_v15  ;;  %v3770_v20 = vmul.f32 %v4788_v33, %v6145_v50  ;;  %4797 = vrsqrt.f32 %v3761_v49 }
0x15a7   :  { %v4790_v36 = vpop.eup %4789 }
0x15a8   :  { %3808 = vst.msk [vmem:[#allocation28 + $0x10] sm:$0xff] %vm266_vm0, %v3800_v31  ;;  %v3801_v9 = vadd.f32 %v3985_v51, %v3787_v53  ;;  %v3784_v58 = vmul.f32 %v3984_v2, %v3770_v20  ;;  %v3771_v55 = vmul.f32 %v4790_v36, %v6150_v54 }
0x15aa   :  { %v4792_v30 = vpop.eup %4791  ;;  %3809 = vst.msk [vmem:[#allocation28 + $0x18] sm:$0xff] %vm266_vm0, %v3801_v9  ;;  %v3798_v46 = vadd.f32 %v3985_v51, %v3784_v58  ;;  %v3785_v59 = vmul.f32 %v3984_v2, %v3771_v55 }
0x15ab   :  { %v3774_v38 = vmul.f32 %v4792_v30, %v6158_v7 }
0x15ac   :  { %v4794_v27 = vpop.eup %4793  ;;  %3806 = vst.msk [vmem:[#allocation28] sm:$0xff] %vm266_vm0, %v3798_v46  ;;  %v3799_v22 = vadd.f32 %v3985_v51, %v3785_v59 }
0x15ad   :  { %v3788_v50 = vmul.f32 %v3984_v2, %v3774_v38  ;;  %v3775_v35 = vmul.f32 %v4794_v27, %v6161_v26 }
0x15ae   :  { %v4796_v41 = vpop.eup %4795  ;;  %3807 = vst.msk [vmem:[#allocation28 + $0x8] sm:$0xff] %vm266_vm0, %v3799_v22 }
0x15af   :  { %v3802_v45 = vadd.f32 %v3985_v51, %v3788_v50  ;;  %v3789_v0 = vmul.f32 %v3984_v2, %v3775_v35  ;;  %v3776_v54 = vmul.f32 %v4796_v41, %v6165_v13 }
0x15b0   :  { %v4798_v1 = vpop.eup %4797 }
0x15b1   :  { %3810 = vst.msk [vmem:[#allocation28 + $0x20] sm:$0xff] %vm266_vm0, %v3802_v45  ;;  %v3803_v37 = vadd.f32 %v3985_v51, %v3789_v0  ;;  %v3790_v23 = vmul.f32 %v3984_v2, %v3776_v54  ;;  %v3777_v7 = vmul.f32 %v4798_v1, %v6170_v47 }
0x15b3   :  { %3811 = vst.msk [vmem:[#allocation28 + $0x28] sm:$0xff] %vm266_vm0, %v3803_v37  ;;  %v3804_v4 = vadd.f32 %v3985_v51, %v3790_v23  ;;  %v3791_v26 = vmul.f32 %v3984_v2, %v3777_v7 }
0x15b5   :  { %3812 = vst.msk [vmem:[#allocation28 + $0x30] sm:$0xff] %vm266_vm0, %v3804_v4  ;;  %v3805_v5 = vadd.f32 %v3985_v51, %v3791_v26 }
0x15b7   :  { %3813 = vst.msk [vmem:[#allocation28 + $0x38] sm:$0xff] %vm266_vm0, %v3805_v5 }
0x15b8   :  { %5170 = shalt.err (!%p5167_p6)
}
0x15b9   :  { %s5171_s30 = scalar_lea.hbm %s6226_s16, 1024 }
0x15ba   :  { %p5172_p7 = scmp.ne.s32.totalorder %s6226_s16, %s5171_s30  ;;  %p5175_p8 = scmp.lt.u32.totalorder %s5171_s30, %s6226_s16 }
0x15bc   :  { %p5177_p9 = pnand %p5175_p8, %p5172_p7 }
0x15be   :  { %5180 = shalt.err (!%p5177_p9)
}
0x15bf   :  { %3825 = dma.vmem_to_hbm [thread:$0]  %s3820_s9, 1024, %s6226_s16, [#allocation4], %s5211_s13, %s5211_s13, %s5212_s27  }
0x15c0   :  { %5199 = dma.done.wait [#allocation4], 1024  }
0x15c1   :  { %5200 = vsyncadd [#allocation4], 4294966272 }
0x15c2   :  { %3829 = vsyncpa [#allocation3], 1 }
0x15c3   :  { %3830 = vsyncpa [#allocation6], 1 }
0x15c4   :  { %3831 = vsyncpa [#allocation9], 1 }
0x15c5   :  { %3832 = vsyncpa [#allocation12], 1 }
0x15c6   :  { %3833 = vsyncpa [#allocation15], 1 }
0x15c7   :  { %3834 = vsyncpa [#allocation18], 1 }
0x15c8   :  { %3835 = vsyncpa [#allocation21], 1 }
0x15c9   :  { %3836 = vsyncpa [#allocation24], 1 }
0x15ca   :  { %3837 = vsyncpa [#allocation27], 1 }
0x15cb   :  { %3838 = vsyncpa [#allocation4], 1 }

</bundles_post_ra>
